<compile_context>
chip_gen: v7x
topology: tpu7x:2x2x1
jax: 0.10.0
libtpu: 0.0.40
codegen_flags: <defaults>
</compile_context>

<pallas_src>
import jax
import jax.numpy as jnp
from jax.experimental import pallas as pl
from jax.experimental.pallas import tpu as pltpu


# ----------------------------- Pallas kernels -----------------------------

def _conv_stage_kernel(x_ref, w1_ref, b1_ref, w2_ref, b2_ref, o_ref,
                       a1_scr, p2_scr, a2_scr):
    """Fused conv1(1->32,3x3,p1)+ReLU+pool2 and conv2(32->64,3x3,p1)+ReLU+pool2.

    x_ref : (G, 992, 32) f32  image, spatially padded to (31,32), flattened with row
                              stride 32 and pre-broadcast across 32 channel lanes.
    w1_ref: (9, 1, 32)  f32   conv1 tap rows (t = kh*3+kw).
    b1_ref: (1, 32)     f32
    w2_ref: (9, 32, 64) bf16  conv2 tap matrices (IC, OC).
    b2_ref: (1, 64)     f32
    o_ref : (G, 49, 64) bf16  NHWC-flattened pooled conv2 output (row = h*7+w).
    a1_scr: (G, 896, 32) f32  conv1 activations (flat, stride 32).
    p2_scr: (G, 272, 32) f32  conv2 input: pooled conv1 re-embedded in zero-padded
                              flat layout (row stride 16, + slack row).
    a2_scr: (G, 224, 64) f32  conv2 activations (flat, stride 16).
    """
    G = x_ref.shape[0]

    # ---- conv1: 9 shifted VPU multiply-adds (IC=1, so no MXU needed) ----
    acc1 = jnp.zeros((G, 896, 32), jnp.float32)
    for kw in range(3):                       # one horizontal (misaligned) shift per kw
        xs = x_ref[:, kw:kw + 960, :]
        for kh in range(3):                   # vertical shifts are 32-row -> aligned
            acc1 = acc1 + xs[:, 32 * kh:32 * kh + 896, :] * w1_ref[3 * kh + kw]
    acc1 = jnp.maximum(acc1 + b1_ref[...], 0.0)
    a1_scr[...] = acc1

    # ---- maxpool 2x2/2 + scatter into conv2's zero-padded flat layout ----
    p2_scr[...] = jnp.zeros_like(p2_scr)      # borders must be zero every step
    for rp in range(14):
        base = 64 * rp
        p00 = a1_scr[:, pl.ds(base, 14, stride=2), :]
        p01 = a1_scr[:, pl.ds(base + 1, 14, stride=2), :]
        p10 = a1_scr[:, pl.ds(base + 32, 14, stride=2), :]
        p11 = a1_scr[:, pl.ds(base + 33, 14, stride=2), :]
        p2_scr[:, 16 * rp + 17:16 * rp + 31, :] = jnp.maximum(
            jnp.maximum(p00, p01), jnp.maximum(p10, p11))

    # ---- conv2: 9 accumulating bf16 MXU matmuls (K=32, N=64) ----
    x2 = p2_scr[...]                          # (G, 272, 32) f32
    acc2 = jnp.zeros((G, 224, 64), jnp.float32)
    for kw in range(3):
        x2s = x2[:, kw:kw + 256, :].astype(jnp.bfloat16)   # shift in f32, cast once
        for kh in range(3):
            w2t = jnp.broadcast_to(w2_ref[3 * kh + kw], (G, 32, 64))
            acc2 = acc2 + jnp.einsum(
                'gmk,gkn->gmn', x2s[:, 16 * kh:16 * kh + 224, :], w2t,
                preferred_element_type=jnp.float32)
    acc2 = jnp.maximum(acc2 + b2_ref[...], 0.0)
    a2_scr[...] = acc2

    # ---- maxpool 2x2/2 -> NHWC (49, 64) rows, bf16 output ----
    for rp in range(7):
        base = 32 * rp
        q00 = a2_scr[:, pl.ds(base, 7, stride=2), :]
        q01 = a2_scr[:, pl.ds(base + 1, 7, stride=2), :]
        q10 = a2_scr[:, pl.ds(base + 16, 7, stride=2), :]
        q11 = a2_scr[:, pl.ds(base + 17, 7, stride=2), :]
        o_ref[:, 7 * rp:7 * rp + 7, :] = jnp.maximum(
            jnp.maximum(q00, q01), jnp.maximum(q10, q11)).astype(o_ref.dtype)


def _fc_kernel(x_ref, w1_ref, b1_ref, w2_ref, b2_ref, o_ref):
    """Fused fc1 + ReLU + fc2 (bf16 MXU inputs, f32 accumulation, lane-dense N=128)."""
    h = jnp.dot(x_ref[...], w1_ref[...], preferred_element_type=jnp.float32)
    h = jnp.maximum(h + b1_ref[...], 0.0).astype(jnp.bfloat16)
    o_ref[...] = jnp.dot(h, w2_ref[...],
                         preferred_element_type=jnp.float32) + b2_ref[...]


# ----------------------------- pallas_call wrappers -----------------------------

_PAR = pltpu.CompilerParams(dimension_semantics=("parallel",))


def _pick_group(batch):
    """Images per grid step: amortize per-step overhead but keep >=2 steps (v7x 2 TCs)."""
    for g in (16, 8, 4, 2):
        if batch % g == 0 and batch // g >= 2:
            return g
    return 1


def conv_stage(xb, w1, b1, w2, b2):
    B = xb.shape[0]
    G = _pick_group(B)
    flops = B * (2 * 9 * 896 * 32 + 2 * 9 * 224 * 32 * 64)
    bytes_acc = (B * 992 * 32 * 4 + B * 49 * 64 * 2
                 + 9 * 32 * 4 + 32 * 4 + 9 * 32 * 64 * 2 + 64 * 4)
    return pl.pallas_call(
        _conv_stage_kernel,
        out_shape=jax.ShapeDtypeStruct((B, 49, 64), jnp.bfloat16),
        grid=(B // G,),
        in_specs=[
            pl.BlockSpec((G, 992, 32), lambda i: (i, 0, 0)),
            pl.BlockSpec((9, 1, 32), lambda i: (0, 0, 0)),     # resident weights
            pl.BlockSpec((1, 32), lambda i: (0, 0)),
            pl.BlockSpec((9, 32, 64), lambda i: (0, 0, 0)),
            pl.BlockSpec((1, 64), lambda i: (0, 0)),
        ],
        out_specs=pl.BlockSpec((G, 49, 64), lambda i: (i, 0, 0)),
        scratch_shapes=[
            pltpu.VMEM((G, 896, 32), jnp.float32),
            pltpu.VMEM((G, 272, 32), jnp.float32),
            pltpu.VMEM((G, 224, 64), jnp.float32),
        ],
        compiler_params=_PAR,
        cost_estimate=pl.CostEstimate(flops=flops, transcendentals=0,
                                      bytes_accessed=bytes_acc),
    )(xb, w1, b1, w2, b2)


def fc_fused(x, w1, b1, w2, b2):
    B, K = x.shape
    bm = B if B <= 256 else 256
    Bp = ((B + bm - 1) // bm) * bm
    if Bp != B:
        x = jnp.pad(x, ((0, Bp - B), (0, 0)))
    flops = 2 * Bp * (K * 128 + 128 * 128)
    bytes_acc = Bp * K * 2 + K * 128 * 2 + 128 * 128 * 2 + 2 * 128 * 4 + Bp * 128 * 4
    return pl.pallas_call(
        _fc_kernel,
        out_shape=jax.ShapeDtypeStruct((Bp, 128), jnp.float32),
        grid=(Bp // bm,),
        in_specs=[
            pl.BlockSpec((bm, K), lambda i: (i, 0)),
            pl.BlockSpec((K, 128), lambda i: (0, 0)),          # resident weights
            pl.BlockSpec((1, 128), lambda i: (0, 0)),
            pl.BlockSpec((128, 128), lambda i: (0, 0)),
            pl.BlockSpec((1, 128), lambda i: (0, 0)),
        ],
        out_specs=pl.BlockSpec((bm, 128), lambda i: (i, 0)),
        compiler_params=_PAR,
        cost_estimate=pl.CostEstimate(flops=flops, transcendentals=0,
                                      bytes_accessed=bytes_acc),
    )(x, w1, b1, w2, b2)


# ----------------------------- params / one-time prep -----------------------------

def init_params(key):
    k = jax.random.split(key, 8)
    s = jnp.float32(0.05)
    return {
        "conv1_w": jax.random.normal(k[0], (32, 1, 3, 3), jnp.float32) * s,
        "conv1_b": jax.random.normal(k[1], (32,), jnp.float32) * s,
        "conv2_w": jax.random.normal(k[2], (64, 32, 3, 3), jnp.float32) * s,
        "conv2_b": jax.random.normal(k[3], (64,), jnp.float32) * s,
        "fc1_w": jax.random.normal(k[4], (128, 64 * 7 * 7), jnp.float32) * s,
        "fc1_b": jax.random.normal(k[5], (128,), jnp.float32) * s,
        "fc2_w": jax.random.normal(k[6], (25, 128), jnp.float32) * s,
        "fc2_b": jax.random.normal(k[7], (25,), jnp.float32) * s,
    }


def prepare_params(params):
    """One-time weight re-layout / dtype cast (hoisted out of the forward pass)."""
    # conv taps: (OC, IC, KH, KW) -> (KH*KW, IC, OC)
    w1 = jnp.transpose(params["conv1_w"], (2, 3, 1, 0)).reshape(9, 1, 32)
    w2 = jnp.transpose(params["conv2_w"], (2, 3, 1, 0)).reshape(9, 32, 64)
    b1 = params["conv1_b"].reshape(1, 32)
    b2 = params["conv2_b"].reshape(1, 64)
    # fc1: absorb the NCHW->NHWC flatten permutation into its columns, pre-transpose.
    fc1 = params["fc1_w"].reshape(128, 64, 7, 7).transpose(0, 2, 3, 1).reshape(128, 3136)
    fc1_w = fc1.T                                              # (3136, 128)
    fc1_b = params["fc1_b"].reshape(1, 128)
    # fc2: pre-transpose and pad N 25 -> 128 so the kernel output store is lane-dense.
    fc2_w = jnp.zeros((128, 128), jnp.float32).at[:, :25].set(params["fc2_w"].T)
    fc2_b = jnp.zeros((1, 128), jnp.float32).at[:, :25].set(params["fc2_b"].reshape(1, 25))
    return {
        "conv1_w": w1.astype(jnp.float32), "conv1_b": b1.astype(jnp.float32),
        "conv2_w": w2.astype(jnp.bfloat16), "conv2_b": b2.astype(jnp.float32),
        "fc1_w": fc1_w.astype(jnp.bfloat16), "fc1_b": fc1_b.astype(jnp.float32),
        "fc2_w": fc2_w.astype(jnp.bfloat16), "fc2_b": fc2_b.astype(jnp.float32),
    }


# ----------------------------- forward pass -----------------------------

def cnn_forward(prep, x_nchw):
    """x_nchw: (B, 1, 28, 28) -> logits (B, 25). Matches the PyTorch CNN forward."""
    B = x_nchw.shape[0]
    # conv1 input: spatial pad to (31,32) (row stride 32 => sublane-aligned vertical tap
    # shifts), flatten, and pre-broadcast across the 32 output-channel lanes.  This is one
    # fused XLA op and gives the kernel dense, lane-aligned blocks (~127 KB/image).
    xs = x_nchw.reshape(B, 28, 28).astype(jnp.float32)
    xpad = jnp.pad(xs, ((0, 0), (1, 2), (1, 3)))                       # (B, 31, 32)
    xb = jnp.broadcast_to(xpad.reshape(B, 992, 1), (B, 992, 32))       # (B, 992, 32)
    h = conv_stage(xb, prep["conv1_w"], prep["conv1_b"],
                   prep["conv2_w"], prep["conv2_b"])                   # (B, 49, 64) bf16
    flat = h.reshape(B, 49 * 64)     # contiguous NHWC flatten; fc1 columns pre-permuted
    out = fc_fused(flat, prep["fc1_w"], prep["fc1_b"], prep["fc2_w"], prep["fc2_b"])
    return out[:B, :25]
    # TODO(synk): the module's host-side `print('Shape before view:', ...)` is omitted.


# ----------------------------- pure-JAX reference (for self-check) -----------------------------

def cnn_reference(params, x):
    P = jax.lax.Precision.HIGHEST
    y = jax.lax.conv_general_dilated(
        x, params["conv1_w"], (1, 1), ((1, 1), (1, 1)),
        dimension_numbers=("NCHW", "OIHW", "NCHW"), precision=P)
    y = jax.nn.relu(y + params["conv1_b"][None, :, None, None])
    y = jax.lax.reduce_window(y, -jnp.inf, jax.lax.max,
                              (1, 1, 2, 2), (1, 1, 2, 2), "VALID")
    y = jax.lax.conv_general_dilated(
        y, params["conv2_w"], (1, 1), ((1, 1), (1, 1)),
        dimension_numbers=("NCHW", "OIHW", "NCHW"), precision=P)
    y = jax.nn.relu(y + params["conv2_b"][None, :, None, None])
    y = jax.lax.reduce_window(y, -jnp.inf, jax.lax.max,
                              (1, 1, 2, 2), (1, 1, 2, 2), "VALID")
    y = y.reshape(y.shape[0], -1)                       # torch x.view(B, -1) (NCHW)
    y = jax.nn.relu(jnp.dot(y, params["fc1_w"].T, precision=P) + params["fc1_b"])
    return jnp.dot(y, params["fc2_w"].T, precision=P) + params["fc2_b"]


if __name__ == "__main__":
    key = jax.random.PRNGKey(0)
    pkey, xkey = jax.random.split(key)
    params = init_params(pkey)
    prep = prepare_params(params)
    # Spatial size must be 28x28 so the flatten matches fc1's 64*7*7 input.
    x = jax.random.normal(xkey, (2, 1, 28, 28), jnp.float32)

    fwd = jax.jit(cnn_forward)
    out = jax.block_until_ready(fwd(prep, x))

    assert out.shape == (2, 25), out.shape
    assert bool(jnp.all(jnp.isfinite(out)))

    ref = jax.block_until_ready(jax.jit(cnn_reference)(params, x))
    err = float(jnp.max(jnp.abs(out - ref)))
    assert err < 1e-2, f"mismatch vs. reference: {err}"

    print("KERNEL_OK")
</pallas_src>

<mosaic_0001>
module attributes {stable_mosaic.version = 11 : i64} {
  func.func @_fc_kernel(%arg0: i32, %arg1: memref<2x3136xbf16, #tpu.memory_space<vmem>>, %arg2: memref<3136x128xbf16, #tpu.memory_space<vmem>>, %arg3: memref<1x128xf32, #tpu.memory_space<vmem>>, %arg4: memref<128x128xbf16, #tpu.memory_space<vmem>>, %arg5: memref<1x128xf32, #tpu.memory_space<vmem>>, %arg6: memref<2x128xf32, #tpu.memory_space<vmem>>) attributes {dimension_semantics = [#tpu.dimension_semantics<parallel>], iteration_bounds = array<i64: 1>, scalar_prefetch = 0 : i64, scratch_operands = 0 : i64, tpu.core_type = #tpu.core_type<tc>, window_params = [{transform_indices = @transform_0, window_bounds = array<i64: 2, 3136>}, {pipeline_mode = #tpu.pipeline_mode<synchronous>, transform_indices = @transform_1, window_bounds = array<i64: 3136, 128>}, {pipeline_mode = #tpu.pipeline_mode<synchronous>, transform_indices = @transform_2, window_bounds = array<i64: 1, 128>}, {pipeline_mode = #tpu.pipeline_mode<synchronous>, transform_indices = @transform_3, window_bounds = array<i64: 128, 128>}, {pipeline_mode = #tpu.pipeline_mode<synchronous>, transform_indices = @transform_4, window_bounds = array<i64: 1, 128>}, {transform_indices = @transform_5, window_bounds = array<i64: 2, 128>}]} {
    %c0 = arith.constant 0 : index
    %c0_0 = arith.constant 0 : index
    %0 = vector.load %arg1[%c0, %c0_0] : memref<2x3136xbf16, #tpu.memory_space<vmem>>, vector<2x3136xbf16>
    %c0_1 = arith.constant 0 : index
    %c0_2 = arith.constant 0 : index
    %1 = vector.load %arg2[%c0_1, %c0_2] : memref<3136x128xbf16, #tpu.memory_space<vmem>>, vector<3136x128xbf16>
    %cst = arith.constant dense<0.000000e+00> : vector<2x128xf32>
    %2 = tpu.matmul %0, %1, %cst {dimension_numbers = #tpu.dot_dimension_numbers<[1], [0], [0], [1], [0, 0, 1, 1], [], []>} : vector<2x3136xbf16>, vector<3136x128xbf16>, vector<2x128xf32> -> vector<2x128xf32>
    %c0_3 = arith.constant 0 : index
    %c0_4 = arith.constant 0 : index
    %3 = vector.load %arg3[%c0_3, %c0_4] : memref<1x128xf32, #tpu.memory_space<vmem>>, vector<1x128xf32>
    %4 = vector.broadcast %3 : vector<1x128xf32> to vector<2x128xf32>
    %5 = arith.addf %2, %4 : vector<2x128xf32>
    %cst_5 = arith.constant 0.000000e+00 : f32
    %6 = vector.broadcast %cst_5 : f32 to vector<2x128xf32>
    %7 = arith.maximumf %5, %6 : vector<2x128xf32>
    %8 = arith.truncf %7 : vector<2x128xf32> to vector<2x128xbf16>
    %c0_6 = arith.constant 0 : index
    %c0_7 = arith.constant 0 : index
    %9 = vector.load %arg4[%c0_6, %c0_7] : memref<128x128xbf16, #tpu.memory_space<vmem>>, vector<128x128xbf16>
    %cst_8 = arith.constant dense<0.000000e+00> : vector<2x128xf32>
    %10 = tpu.matmul %8, %9, %cst_8 {dimension_numbers = #tpu.dot_dimension_numbers<[1], [0], [0], [1], [0, 0, 1, 1], [], []>} : vector<2x128xbf16>, vector<128x128xbf16>, vector<2x128xf32> -> vector<2x128xf32>
    %c0_9 = arith.constant 0 : index
    %c0_10 = arith.constant 0 : index
    %11 = vector.load %arg5[%c0_9, %c0_10] : memref<1x128xf32, #tpu.memory_space<vmem>>, vector<1x128xf32>
    %12 = vector.broadcast %11 : vector<1x128xf32> to vector<2x128xf32>
    %13 = arith.addf %10, %12 : vector<2x128xf32>
    %c0_11 = arith.constant 0 : index
    %c0_12 = arith.constant 0 : index
    %14 = vector.load %arg6[%c0_11, %c0_12] : memref<2x128xf32, #tpu.memory_space<vmem>>, vector<2x128xf32>
    tpu.vector_store %arg6[%c0_11, %c0_12], %13 {strides = array<i32>} : memref<2x128xf32, #tpu.memory_space<vmem>>, vector<2x128xf32>,
    return
  }
  func.func @transform_0(%arg0: i32) -> (i32, i32) {
    %c0_i32 = arith.constant 0 : i32
    %c0_i32_0 = arith.constant 0 : i32
    return %arg0, %c0_i32 : i32, i32
  }
  func.func @transform_1(%arg0: i32) -> (i32, i32) {
    %c0_i32 = arith.constant 0 : i32
    %c0_i32_0 = arith.constant 0 : i32
    %c0_i32_1 = arith.constant 0 : i32
    return %c0_i32, %c0_i32_0 : i32, i32
  }
  func.func @transform_2(%arg0: i32) -> (i32, i32) {
    %c0_i32 = arith.constant 0 : i32
    %c0_i32_0 = arith.constant 0 : i32
    %c0_i32_1 = arith.constant 0 : i32
    return %c0_i32, %c0_i32_0 : i32, i32
  }
  func.func @transform_3(%arg0: i32) -> (i32, i32) {
    %c0_i32 = arith.constant 0 : i32
    %c0_i32_0 = arith.constant 0 : i32
    %c0_i32_1 = arith.constant 0 : i32
    return %c0_i32, %c0_i32_0 : i32, i32
  }
  func.func @transform_4(%arg0: i32) -> (i32, i32) {
    %c0_i32 = arith.constant 0 : i32
    %c0_i32_0 = arith.constant 0 : i32
    %c0_i32_1 = arith.constant 0 : i32
    return %c0_i32, %c0_i32_0 : i32, i32
  }
  func.func @transform_5(%arg0: i32) -> (i32, i32) {
    %c0_i32 = arith.constant 0 : i32
    %c0_i32_0 = arith.constant 0 : i32
    return %arg0, %c0_i32 : i32, i32
  }
}

module attributes {stable_mosaic.version = 11 : i64} {
  func.func @_conv_stage_kernel(%arg0: i32, %arg1: memref<1x992x32xf32, #tpu.memory_space<vmem>>, %arg2: memref<9x1x32xf32, #tpu.memory_space<vmem>>, %arg3: memref<1x32xf32, #tpu.memory_space<vmem>>, %arg4: memref<9x32x64xbf16, #tpu.memory_space<vmem>>, %arg5: memref<1x64xf32, #tpu.memory_space<vmem>>, %arg6: memref<1x49x64xbf16, #tpu.memory_space<vmem>>, %arg7: memref<1x896x32xf32, #tpu.memory_space<vmem>>, %arg8: memref<1x272x32xf32, #tpu.memory_space<vmem>>, %arg9: memref<1x224x64xf32, #tpu.memory_space<vmem>>) attributes {dimension_semantics = [#tpu.dimension_semantics<parallel>], iteration_bounds = array<i64: 2>, scalar_prefetch = 0 : i64, scratch_operands = 3 : i64, tpu.core_type = #tpu.core_type<tc>, window_params = [{transform_indices = @transform_0, window_bounds = array<i64: 1, 992, 32>}, {pipeline_mode = #tpu.pipeline_mode<synchronous>, transform_indices = @transform_1, window_bounds = array<i64: 9, 1, 32>}, {pipeline_mode = #tpu.pipeline_mode<synchronous>, transform_indices = @transform_2, window_bounds = array<i64: 1, 32>}, {pipeline_mode = #tpu.pipeline_mode<synchronous>, transform_indices = @transform_3, window_bounds = array<i64: 9, 32, 64>}, {pipeline_mode = #tpu.pipeline_mode<synchronous>, transform_indices = @transform_4, window_bounds = array<i64: 1, 64>}, {transform_indices = @transform_5, window_bounds = array<i64: 1, 49, 64>}]} {
    %cst = arith.constant 0.000000e+00 : f32
    %0 = vector.broadcast %cst : f32 to vector<1x896x32xf32>
    %c0 = arith.constant 0 : index
    %c0_0 = arith.constant 0 : index
    %c0_1 = arith.constant 0 : index
    %1 = vector.load %arg1[%c0, %c0_0, %c0_1] : memref<1x992x32xf32, #tpu.memory_space<vmem>>, vector<1x960x32xf32>
    %2 = vector.extract_strided_slice %1 {offsets = [0, 0, 0], sizes = [1, 896, 32], strides = [1, 1, 1]} : vector<1x960x32xf32> to vector<1x896x32xf32>
    %c0_2 = arith.constant 0 : index
    %c0_3 = arith.constant 0 : index
    %c0_4 = arith.constant 0 : index
    %3 = vector.load %arg2[%c0_2, %c0_3, %c0_4] : memref<9x1x32xf32, #tpu.memory_space<vmem>>, vector<1x1x32xf32>
    %4 = vector.shape_cast %3 : vector<1x1x32xf32> to vector<1x32xf32>
    %5 = vector.shape_cast %4 : vector<1x32xf32> to vector<1x1x32xf32>
    %6 = vector.broadcast %5 : vector<1x1x32xf32> to vector<1x896x32xf32>
    %7 = arith.mulf %2, %6 : vector<1x896x32xf32>
    %8 = arith.addf %0, %7 : vector<1x896x32xf32>
    %9 = vector.extract_strided_slice %1 {offsets = [0, 32, 0], sizes = [1, 896, 32], strides = [1, 1, 1]} : vector<1x960x32xf32> to vector<1x896x32xf32>
    %c3 = arith.constant 3 : index
    %c0_5 = arith.constant 0 : index
    %c0_6 = arith.constant 0 : index
    %10 = vector.load %arg2[%c3, %c0_5, %c0_6] : memref<9x1x32xf32, #tpu.memory_space<vmem>>, vector<1x1x32xf32>
    %11 = vector.shape_cast %10 : vector<1x1x32xf32> to vector<1x32xf32>
    %12 = vector.shape_cast %11 : vector<1x32xf32> to vector<1x1x32xf32>
    %13 = vector.broadcast %12 : vector<1x1x32xf32> to vector<1x896x32xf32>
    %14 = arith.mulf %9, %13 : vector<1x896x32xf32>
    %15 = arith.addf %8, %14 : vector<1x896x32xf32>
    %16 = vector.extract_strided_slice %1 {offsets = [0, 64, 0], sizes = [1, 896, 32], strides = [1, 1, 1]} : vector<1x960x32xf32> to vector<1x896x32xf32>
    %c6 = arith.constant 6 : index
    %c0_7 = arith.constant 0 : index
    %c0_8 = arith.constant 0 : index
    %17 = vector.load %arg2[%c6, %c0_7, %c0_8] : memref<9x1x32xf32, #tpu.memory_space<vmem>>, vector<1x1x32xf32>
    %18 = vector.shape_cast %17 : vector<1x1x32xf32> to vector<1x32xf32>
    %19 = vector.shape_cast %18 : vector<1x32xf32> to vector<1x1x32xf32>
    %20 = vector.broadcast %19 : vector<1x1x32xf32> to vector<1x896x32xf32>
    %21 = arith.mulf %16, %20 : vector<1x896x32xf32>
    %22 = arith.addf %15, %21 : vector<1x896x32xf32>
    %c0_9 = arith.constant 0 : index
    %c1 = arith.constant 1 : index
    %c0_10 = arith.constant 0 : index
    %23 = vector.load %arg1[%c0_9, %c1, %c0_10] : memref<1x992x32xf32, #tpu.memory_space<vmem>>, vector<1x960x32xf32>
    %24 = vector.extract_strided_slice %23 {offsets = [0, 0, 0], sizes = [1, 896, 32], strides = [1, 1, 1]} : vector<1x960x32xf32> to vector<1x896x32xf32>
    %c1_11 = arith.constant 1 : index
    %c0_12 = arith.constant 0 : index
    %c0_13 = arith.constant 0 : index
    %25 = vector.load %arg2[%c1_11, %c0_12, %c0_13] : memref<9x1x32xf32, #tpu.memory_space<vmem>>, vector<1x1x32xf32>
    %26 = vector.shape_cast %25 : vector<1x1x32xf32> to vector<1x32xf32>
    %27 = vector.shape_cast %26 : vector<1x32xf32> to vector<1x1x32xf32>
    %28 = vector.broadcast %27 : vector<1x1x32xf32> to vector<1x896x32xf32>
    %29 = arith.mulf %24, %28 : vector<1x896x32xf32>
    %30 = arith.addf %22, %29 : vector<1x896x32xf32>
    %31 = vector.extract_strided_slice %23 {offsets = [0, 32, 0], sizes = [1, 896, 32], strides = [1, 1, 1]} : vector<1x960x32xf32> to vector<1x896x32xf32>
    %c4 = arith.constant 4 : index
    %c0_14 = arith.constant 0 : index
    %c0_15 = arith.constant 0 : index
    %32 = vector.load %arg2[%c4, %c0_14, %c0_15] : memref<9x1x32xf32, #tpu.memory_space<vmem>>, vector<1x1x32xf32>
    %33 = vector.shape_cast %32 : vector<1x1x32xf32> to vector<1x32xf32>
    %34 = vector.shape_cast %33 : vector<1x32xf32> to vector<1x1x32xf32>
    %35 = vector.broadcast %34 : vector<1x1x32xf32> to vector<1x896x32xf32>
    %36 = arith.mulf %31, %35 : vector<1x896x32xf32>
    %37 = arith.addf %30, %36 : vector<1x896x32xf32>
    %38 = vector.extract_strided_slice %23 {offsets = [0, 64, 0], sizes = [1, 896, 32], strides = [1, 1, 1]} : vector<1x960x32xf32> to vector<1x896x32xf32>
    %c7 = arith.constant 7 : index
    %c0_16 = arith.constant 0 : index
    %c0_17 = arith.constant 0 : index
    %39 = vector.load %arg2[%c7, %c0_16, %c0_17] : memref<9x1x32xf32, #tpu.memory_space<vmem>>, vector<1x1x32xf32>
    %40 = vector.shape_cast %39 : vector<1x1x32xf32> to vector<1x32xf32>
    %41 = vector.shape_cast %40 : vector<1x32xf32> to vector<1x1x32xf32>
    %42 = vector.broadcast %41 : vector<1x1x32xf32> to vector<1x896x32xf32>
    %43 = arith.mulf %38, %42 : vector<1x896x32xf32>
    %44 = arith.addf %37, %43 : vector<1x896x32xf32>
    %c0_18 = arith.constant 0 : index
    %c2 = arith.constant 2 : index
    %c0_19 = arith.constant 0 : index
    %45 = vector.load %arg1[%c0_18, %c2, %c0_19] : memref<1x992x32xf32, #tpu.memory_space<vmem>>, vector<1x960x32xf32>
    %46 = vector.extract_strided_slice %45 {offsets = [0, 0, 0], sizes = [1, 896, 32], strides = [1, 1, 1]} : vector<1x960x32xf32> to vector<1x896x32xf32>
    %c2_20 = arith.constant 2 : index
    %c0_21 = arith.constant 0 : index
    %c0_22 = arith.constant 0 : index
    %47 = vector.load %arg2[%c2_20, %c0_21, %c0_22] : memref<9x1x32xf32, #tpu.memory_space<vmem>>, vector<1x1x32xf32>
    %48 = vector.shape_cast %47 : vector<1x1x32xf32> to vector<1x32xf32>
    %49 = vector.shape_cast %48 : vector<1x32xf32> to vector<1x1x32xf32>
    %50 = vector.broadcast %49 : vector<1x1x32xf32> to vector<1x896x32xf32>
    %51 = arith.mulf %46, %50 : vector<1x896x32xf32>
    %52 = arith.addf %44, %51 : vector<1x896x32xf32>
    %53 = vector.extract_strided_slice %45 {offsets = [0, 32, 0], sizes = [1, 896, 32], strides = [1, 1, 1]} : vector<1x960x32xf32> to vector<1x896x32xf32>
    %c5 = arith.constant 5 : index
    %c0_23 = arith.constant 0 : index
    %c0_24 = arith.constant 0 : index
    %54 = vector.load %arg2[%c5, %c0_23, %c0_24] : memref<9x1x32xf32, #tpu.memory_space<vmem>>, vector<1x1x32xf32>
    %55 = vector.shape_cast %54 : vector<1x1x32xf32> to vector<1x32xf32>
    %56 = vector.shape_cast %55 : vector<1x32xf32> to vector<1x1x32xf32>
    %57 = vector.broadcast %56 : vector<1x1x32xf32> to vector<1x896x32xf32>
    %58 = arith.mulf %53, %57 : vector<1x896x32xf32>
    %59 = arith.addf %52, %58 : vector<1x896x32xf32>
    %60 = vector.extract_strided_slice %45 {offsets = [0, 64, 0], sizes = [1, 896, 32], strides = [1, 1, 1]} : vector<1x960x32xf32> to vector<1x896x32xf32>
    %c8 = arith.constant 8 : index
    %c0_25 = arith.constant 0 : index
    %c0_26 = arith.constant 0 : index
    %61 = vector.load %arg2[%c8, %c0_25, %c0_26] : memref<9x1x32xf32, #tpu.memory_space<vmem>>, vector<1x1x32xf32>
    %62 = vector.shape_cast %61 : vector<1x1x32xf32> to vector<1x32xf32>
    %63 = vector.shape_cast %62 : vector<1x32xf32> to vector<1x1x32xf32>
    %64 = vector.broadcast %63 : vector<1x1x32xf32> to vector<1x896x32xf32>
    %65 = arith.mulf %60, %64 : vector<1x896x32xf32>
    %66 = arith.addf %59, %65 : vector<1x896x32xf32>
    %c0_27 = arith.constant 0 : index
    %c0_28 = arith.constant 0 : index
    %67 = vector.load %arg3[%c0_27, %c0_28] : memref<1x32xf32, #tpu.memory_space<vmem>>, vector<1x32xf32>
    %68 = vector.shape_cast %67 : vector<1x32xf32> to vector<1x1x32xf32>
    %69 = vector.broadcast %68 : vector<1x1x32xf32> to vector<1x896x32xf32>
    %70 = arith.addf %66, %69 : vector<1x896x32xf32>
    %cst_29 = arith.constant 0.000000e+00 : f32
    %71 = vector.broadcast %cst_29 : f32 to vector<1x896x32xf32>
    %72 = arith.maximumf %70, %71 : vector<1x896x32xf32>
    %c0_30 = arith.constant 0 : index
    %c0_31 = arith.constant 0 : index
    %c0_32 = arith.constant 0 : index
    %73 = vector.load %arg7[%c0_30, %c0_31, %c0_32] : memref<1x896x32xf32, #tpu.memory_space<vmem>>, vector<1x896x32xf32>
    tpu.vector_store %arg7[%c0_30, %c0_31, %c0_32], %72 {strides = array<i32>} : memref<1x896x32xf32, #tpu.memory_space<vmem>>, vector<1x896x32xf32>,
    %cst_33 = arith.constant 0.000000e+00 : f32
    %74 = vector.broadcast %cst_33 : f32 to vector<1x272x32xf32>
    %c0_34 = arith.constant 0 : index
    %c0_35 = arith.constant 0 : index
    %c0_36 = arith.constant 0 : index
    %75 = vector.load %arg8[%c0_34, %c0_35, %c0_36] : memref<1x272x32xf32, #tpu.memory_space<vmem>>, vector<1x272x32xf32>
    tpu.vector_store %arg8[%c0_34, %c0_35, %c0_36], %74 {strides = array<i32>} : memref<1x272x32xf32, #tpu.memory_space<vmem>>, vector<1x272x32xf32>,
    %c0_37 = arith.constant 0 : index
    %c0_38 = arith.constant 0 : index
    %c0_39 = arith.constant 0 : index
    %76 = tpu.strided_load %arg7[%c0_37, %c0_38, %c0_39] {strides = array<i32: 1, 2, 1>} : memref<1x896x32xf32, #tpu.memory_space<vmem>>, vector<1x14x32xf32>
    %c0_40 = arith.constant 0 : index
    %c1_41 = arith.constant 1 : index
    %c0_42 = arith.constant 0 : index
    %77 = tpu.strided_load %arg7[%c0_40, %c1_41, %c0_42] {strides = array<i32: 1, 2, 1>} : memref<1x896x32xf32, #tpu.memory_space<vmem>>, vector<1x14x32xf32>
    %c0_43 = arith.constant 0 : index
    %c32 = arith.constant 32 : index
    %c0_44 = arith.constant 0 : index
    %78 = tpu.strided_load %arg7[%c0_43, %c32, %c0_44] {strides = array<i32: 1, 2, 1>} : memref<1x896x32xf32, #tpu.memory_space<vmem>>, vector<1x14x32xf32>
    %c0_45 = arith.constant 0 : index
    %c33 = arith.constant 33 : index
    %c0_46 = arith.constant 0 : index
    %79 = tpu.strided_load %arg7[%c0_45, %c33, %c0_46] {strides = array<i32: 1, 2, 1>} : memref<1x896x32xf32, #tpu.memory_space<vmem>>, vector<1x14x32xf32>
    %80 = arith.maximumf %76, %77 : vector<1x14x32xf32>
    %81 = arith.maximumf %78, %79 : vector<1x14x32xf32>
    %82 = arith.maximumf %80, %81 : vector<1x14x32xf32>
    %c0_47 = arith.constant 0 : index
    %c17 = arith.constant 17 : index
    %c0_48 = arith.constant 0 : index
    %83 = vector.load %arg8[%c0_47, %c17, %c0_48] : memref<1x272x32xf32, #tpu.memory_space<vmem>>, vector<1x14x32xf32>
    tpu.vector_store %arg8[%c0_47, %c17, %c0_48], %82 {strides = array<i32>} : memref<1x272x32xf32, #tpu.memory_space<vmem>>, vector<1x14x32xf32>,
    %c0_49 = arith.constant 0 : index
    %c64 = arith.constant 64 : index
    %c0_50 = arith.constant 0 : index
    %84 = tpu.strided_load %arg7[%c0_49, %c64, %c0_50] {strides = array<i32: 1, 2, 1>} : memref<1x896x32xf32, #tpu.memory_space<vmem>>, vector<1x14x32xf32>
    %c0_51 = arith.constant 0 : index
    %c65 = arith.constant 65 : index
    %c0_52 = arith.constant 0 : index
    %85 = tpu.strided_load %arg7[%c0_51, %c65, %c0_52] {strides = array<i32: 1, 2, 1>} : memref<1x896x32xf32, #tpu.memory_space<vmem>>, vector<1x14x32xf32>
    %c0_53 = arith.constant 0 : index
    %c96 = arith.constant 96 : index
    %c0_54 = arith.constant 0 : index
    %86 = tpu.strided_load %arg7[%c0_53, %c96, %c0_54] {strides = array<i32: 1, 2, 1>} : memref<1x896x32xf32, #tpu.memory_space<vmem>>, vector<1x14x32xf32>
    %c0_55 = arith.constant 0 : index
    %c97 = arith.constant 97 : index
    %c0_56 = arith.constant 0 : index
    %87 = tpu.strided_load %arg7[%c0_55, %c97, %c0_56] {strides = array<i32: 1, 2, 1>} : memref<1x896x32xf32, #tpu.memory_space<vmem>>, vector<1x14x32xf32>
    %88 = arith.maximumf %84, %85 : vector<1x14x32xf32>
    %89 = arith.maximumf %86, %87 : vector<1x14x32xf32>
    %90 = arith.maximumf %88, %89 : vector<1x14x32xf32>
    %c0_57 = arith.constant 0 : index
    %c33_58 = arith.constant 33 : index
    %c0_59 = arith.constant 0 : index
    %91 = vector.load %arg8[%c0_57, %c33_58, %c0_59] : memref<1x272x32xf32, #tpu.memory_space<vmem>>, vector<1x14x32xf32>
    tpu.vector_store %arg8[%c0_57, %c33_58, %c0_59], %90 {strides = array<i32>} : memref<1x272x32xf32, #tpu.memory_space<vmem>>, vector<1x14x32xf32>,
    %c0_60 = arith.constant 0 : index
    %c128 = arith.constant 128 : index
    %c0_61 = arith.constant 0 : index
    %92 = tpu.strided_load %arg7[%c0_60, %c128, %c0_61] {strides = array<i32: 1, 2, 1>} : memref<1x896x32xf32, #tpu.memory_space<vmem>>, vector<1x14x32xf32>
    %c0_62 = arith.constant 0 : index
    %c129 = arith.constant 129 : index
    %c0_63 = arith.constant 0 : index
    %93 = tpu.strided_load %arg7[%c0_62, %c129, %c0_63] {strides = array<i32: 1, 2, 1>} : memref<1x896x32xf32, #tpu.memory_space<vmem>>, vector<1x14x32xf32>
    %c0_64 = arith.constant 0 : index
    %c160 = arith.constant 160 : index
    %c0_65 = arith.constant 0 : index
    %94 = tpu.strided_load %arg7[%c0_64, %c160, %c0_65] {strides = array<i32: 1, 2, 1>} : memref<1x896x32xf32, #tpu.memory_space<vmem>>, vector<1x14x32xf32>
    %c0_66 = arith.constant 0 : index
    %c161 = arith.constant 161 : index
    %c0_67 = arith.constant 0 : index
    %95 = tpu.strided_load %arg7[%c0_66, %c161, %c0_67] {strides = array<i32: 1, 2, 1>} : memref<1x896x32xf32, #tpu.memory_space<vmem>>, vector<1x14x32xf32>
    %96 = arith.maximumf %92, %93 : vector<1x14x32xf32>
    %97 = arith.maximumf %94, %95 : vector<1x14x32xf32>
    %98 = arith.maximumf %96, %97 : vector<1x14x32xf32>
    %c0_68 = arith.constant 0 : index
    %c49 = arith.constant 49 : index
    %c0_69 = arith.constant 0 : index
    %99 = vector.load %arg8[%c0_68, %c49, %c0_69] : memref<1x272x32xf32, #tpu.memory_space<vmem>>, vector<1x14x32xf32>
    tpu.vector_store %arg8[%c0_68, %c49, %c0_69], %98 {strides = array<i32>} : memref<1x272x32xf32, #tpu.memory_space<vmem>>, vector<1x14x32xf32>,
    %c0_70 = arith.constant 0 : index
    %c192 = arith.constant 192 : index
    %c0_71 = arith.constant 0 : index
    %100 = tpu.strided_load %arg7[%c0_70, %c192, %c0_71] {strides = array<i32: 1, 2, 1>} : memref<1x896x32xf32, #tpu.memory_space<vmem>>, vector<1x14x32xf32>
    %c0_72 = arith.constant 0 : index
    %c193 = arith.constant 193 : index
    %c0_73 = arith.constant 0 : index
    %101 = tpu.strided_load %arg7[%c0_72, %c193, %c0_73] {strides = array<i32: 1, 2, 1>} : memref<1x896x32xf32, #tpu.memory_space<vmem>>, vector<1x14x32xf32>
    %c0_74 = arith.constant 0 : index
    %c224 = arith.constant 224 : index
    %c0_75 = arith.constant 0 : index
    %102 = tpu.strided_load %arg7[%c0_74, %c224, %c0_75] {strides = array<i32: 1, 2, 1>} : memref<1x896x32xf32, #tpu.memory_space<vmem>>, vector<1x14x32xf32>
    %c0_76 = arith.constant 0 : index
    %c225 = arith.constant 225 : index
    %c0_77 = arith.constant 0 : index
    %103 = tpu.strided_load %arg7[%c0_76, %c225, %c0_77] {strides = array<i32: 1, 2, 1>} : memref<1x896x32xf32, #tpu.memory_space<vmem>>, vector<1x14x32xf32>
    %104 = arith.maximumf %100, %101 : vector<1x14x32xf32>
    %105 = arith.maximumf %102, %103 : vector<1x14x32xf32>
    %106 = arith.maximumf %104, %105 : vector<1x14x32xf32>
    %c0_78 = arith.constant 0 : index
    %c65_79 = arith.constant 65 : index
    %c0_80 = arith.constant 0 : index
    %107 = vector.load %arg8[%c0_78, %c65_79, %c0_80] : memref<1x272x32xf32, #tpu.memory_space<vmem>>, vector<1x14x32xf32>
    tpu.vector_store %arg8[%c0_78, %c65_79, %c0_80], %106 {strides = array<i32>} : memref<1x272x32xf32, #tpu.memory_space<vmem>>, vector<1x14x32xf32>,
    %c0_81 = arith.constant 0 : index
    %c256 = arith.constant 256 : index
    %c0_82 = arith.constant 0 : index
    %108 = tpu.strided_load %arg7[%c0_81, %c256, %c0_82] {strides = array<i32: 1, 2, 1>} : memref<1x896x32xf32, #tpu.memory_space<vmem>>, vector<1x14x32xf32>
    %c0_83 = arith.constant 0 : index
    %c257 = arith.constant 257 : index
    %c0_84 = arith.constant 0 : index
    %109 = tpu.strided_load %arg7[%c0_83, %c257, %c0_84] {strides = array<i32: 1, 2, 1>} : memref<1x896x32xf32, #tpu.memory_space<vmem>>, vector<1x14x32xf32>
    %c0_85 = arith.constant 0 : index
    %c288 = arith.constant 288 : index
    %c0_86 = arith.constant 0 : index
    %110 = tpu.strided_load %arg7[%c0_85, %c288, %c0_86] {strides = array<i32: 1, 2, 1>} : memref<1x896x32xf32, #tpu.memory_space<vmem>>, vector<1x14x32xf32>
    %c0_87 = arith.constant 0 : index
    %c289 = arith.constant 289 : index
    %c0_88 = arith.constant 0 : index
    %111 = tpu.strided_load %arg7[%c0_87, %c289, %c0_88] {strides = array<i32: 1, 2, 1>} : memref<1x896x32xf32, #tpu.memory_space<vmem>>, vector<1x14x32xf32>
    %112 = arith.maximumf %108, %109 : vector<1x14x32xf32>
    %113 = arith.maximumf %110, %111 : vector<1x14x32xf32>
    %114 = arith.maximumf %112, %113 : vector<1x14x32xf32>
    %c0_89 = arith.constant 0 : index
    %c81 = arith.constant 81 : index
    %c0_90 = arith.constant 0 : index
    %115 = vector.load %arg8[%c0_89, %c81, %c0_90] : memref<1x272x32xf32, #tpu.memory_space<vmem>>, vector<1x14x32xf32>
    tpu.vector_store %arg8[%c0_89, %c81, %c0_90], %114 {strides = array<i32>} : memref<1x272x32xf32, #tpu.memory_space<vmem>>, vector<1x14x32xf32>,
    %c0_91 = arith.constant 0 : index
    %c320 = arith.constant 320 : index
    %c0_92 = arith.constant 0 : index
    %116 = tpu.strided_load %arg7[%c0_91, %c320, %c0_92] {strides = array<i32: 1, 2, 1>} : memref<1x896x32xf32, #tpu.memory_space<vmem>>, vector<1x14x32xf32>
    %c0_93 = arith.constant 0 : index
    %c321 = arith.constant 321 : index
    %c0_94 = arith.constant 0 : index
    %117 = tpu.strided_load %arg7[%c0_93, %c321, %c0_94] {strides = array<i32: 1, 2, 1>} : memref<1x896x32xf32, #tpu.memory_space<vmem>>, vector<1x14x32xf32>
    %c0_95 = arith.constant 0 : index
    %c352 = arith.constant 352 : index
    %c0_96 = arith.constant 0 : index
    %118 = tpu.strided_load %arg7[%c0_95, %c352, %c0_96] {strides = array<i32: 1, 2, 1>} : memref<1x896x32xf32, #tpu.memory_space<vmem>>, vector<1x14x32xf32>
    %c0_97 = arith.constant 0 : index
    %c353 = arith.constant 353 : index
    %c0_98 = arith.constant 0 : index
    %119 = tpu.strided_load %arg7[%c0_97, %c353, %c0_98] {strides = array<i32: 1, 2, 1>} : memref<1x896x32xf32, #tpu.memory_space<vmem>>, vector<1x14x32xf32>
    %120 = arith.maximumf %116, %117 : vector<1x14x32xf32>
    %121 = arith.maximumf %118, %119 : vector<1x14x32xf32>
    %122 = arith.maximumf %120, %121 : vector<1x14x32xf32>
    %c0_99 = arith.constant 0 : index
    %c97_100 = arith.constant 97 : index
    %c0_101 = arith.constant 0 : index
    %123 = vector.load %arg8[%c0_99, %c97_100, %c0_101] : memref<1x272x32xf32, #tpu.memory_space<vmem>>, vector<1x14x32xf32>
    tpu.vector_store %arg8[%c0_99, %c97_100, %c0_101], %122 {strides = array<i32>} : memref<1x272x32xf32, #tpu.memory_space<vmem>>, vector<1x14x32xf32>,
    %c0_102 = arith.constant 0 : index
    %c384 = arith.constant 384 : index
    %c0_103 = arith.constant 0 : index
    %124 = tpu.strided_load %arg7[%c0_102, %c384, %c0_103] {strides = array<i32: 1, 2, 1>} : memref<1x896x32xf32, #tpu.memory_space<vmem>>, vector<1x14x32xf32>
    %c0_104 = arith.constant 0 : index
    %c385 = arith.constant 385 : index
    %c0_105 = arith.constant 0 : index
    %125 = tpu.strided_load %arg7[%c0_104, %c385, %c0_105] {strides = array<i32: 1, 2, 1>} : memref<1x896x32xf32, #tpu.memory_space<vmem>>, vector<1x14x32xf32>
    %c0_106 = arith.constant 0 : index
    %c416 = arith.constant 416 : index
    %c0_107 = arith.constant 0 : index
    %126 = tpu.strided_load %arg7[%c0_106, %c416, %c0_107] {strides = array<i32: 1, 2, 1>} : memref<1x896x32xf32, #tpu.memory_space<vmem>>, vector<1x14x32xf32>
    %c0_108 = arith.constant 0 : index
    %c417 = arith.constant 417 : index
    %c0_109 = arith.constant 0 : index
    %127 = tpu.strided_load %arg7[%c0_108, %c417, %c0_109] {strides = array<i32: 1, 2, 1>} : memref<1x896x32xf32, #tpu.memory_space<vmem>>, vector<1x14x32xf32>
    %128 = arith.maximumf %124, %125 : vector<1x14x32xf32>
    %129 = arith.maximumf %126, %127 : vector<1x14x32xf32>
    %130 = arith.maximumf %128, %129 : vector<1x14x32xf32>
    %c0_110 = arith.constant 0 : index
    %c113 = arith.constant 113 : index
    %c0_111 = arith.constant 0 : index
    %131 = vector.load %arg8[%c0_110, %c113, %c0_111] : memref<1x272x32xf32, #tpu.memory_space<vmem>>, vector<1x14x32xf32>
    tpu.vector_store %arg8[%c0_110, %c113, %c0_111], %130 {strides = array<i32>} : memref<1x272x32xf32, #tpu.memory_space<vmem>>, vector<1x14x32xf32>,
    %c0_112 = arith.constant 0 : index
    %c448 = arith.constant 448 : index
    %c0_113 = arith.constant 0 : index
    %132 = tpu.strided_load %arg7[%c0_112, %c448, %c0_113] {strides = array<i32: 1, 2, 1>} : memref<1x896x32xf32, #tpu.memory_space<vmem>>, vector<1x14x32xf32>
    %c0_114 = arith.constant 0 : index
    %c449 = arith.constant 449 : index
    %c0_115 = arith.constant 0 : index
    %133 = tpu.strided_load %arg7[%c0_114, %c449, %c0_115] {strides = array<i32: 1, 2, 1>} : memref<1x896x32xf32, #tpu.memory_space<vmem>>, vector<1x14x32xf32>
    %c0_116 = arith.constant 0 : index
    %c480 = arith.constant 480 : index
    %c0_117 = arith.constant 0 : index
    %134 = tpu.strided_load %arg7[%c0_116, %c480, %c0_117] {strides = array<i32: 1, 2, 1>} : memref<1x896x32xf32, #tpu.memory_space<vmem>>, vector<1x14x32xf32>
    %c0_118 = arith.constant 0 : index
    %c481 = arith.constant 481 : index
    %c0_119 = arith.constant 0 : index
    %135 = tpu.strided_load %arg7[%c0_118, %c481, %c0_119] {strides = array<i32: 1, 2, 1>} : memref<1x896x32xf32, #tpu.memory_space<vmem>>, vector<1x14x32xf32>
    %136 = arith.maximumf %132, %133 : vector<1x14x32xf32>
    %137 = arith.maximumf %134, %135 : vector<1x14x32xf32>
    %138 = arith.maximumf %136, %137 : vector<1x14x32xf32>
    %c0_120 = arith.constant 0 : index
    %c129_121 = arith.constant 129 : index
    %c0_122 = arith.constant 0 : index
    %139 = vector.load %arg8[%c0_120, %c129_121, %c0_122] : memref<1x272x32xf32, #tpu.memory_space<vmem>>, vector<1x14x32xf32>
    tpu.vector_store %arg8[%c0_120, %c129_121, %c0_122], %138 {strides = array<i32>} : memref<1x272x32xf32, #tpu.memory_space<vmem>>, vector<1x14x32xf32>,
    %c0_123 = arith.constant 0 : index
    %c512 = arith.constant 512 : index
    %c0_124 = arith.constant 0 : index
    %140 = tpu.strided_load %arg7[%c0_123, %c512, %c0_124] {strides = array<i32: 1, 2, 1>} : memref<1x896x32xf32, #tpu.memory_space<vmem>>, vector<1x14x32xf32>
    %c0_125 = arith.constant 0 : index
    %c513 = arith.constant 513 : index
    %c0_126 = arith.constant 0 : index
    %141 = tpu.strided_load %arg7[%c0_125, %c513, %c0_126] {strides = array<i32: 1, 2, 1>} : memref<1x896x32xf32, #tpu.memory_space<vmem>>, vector<1x14x32xf32>
    %c0_127 = arith.constant 0 : index
    %c544 = arith.constant 544 : index
    %c0_128 = arith.constant 0 : index
    %142 = tpu.strided_load %arg7[%c0_127, %c544, %c0_128] {strides = array<i32: 1, 2, 1>} : memref<1x896x32xf32, #tpu.memory_space<vmem>>, vector<1x14x32xf32>
    %c0_129 = arith.constant 0 : index
    %c545 = arith.constant 545 : index
    %c0_130 = arith.constant 0 : index
    %143 = tpu.strided_load %arg7[%c0_129, %c545, %c0_130] {strides = array<i32: 1, 2, 1>} : memref<1x896x32xf32, #tpu.memory_space<vmem>>, vector<1x14x32xf32>
    %144 = arith.maximumf %140, %141 : vector<1x14x32xf32>
    %145 = arith.maximumf %142, %143 : vector<1x14x32xf32>
    %146 = arith.maximumf %144, %145 : vector<1x14x32xf32>
    %c0_131 = arith.constant 0 : index
    %c145 = arith.constant 145 : index
    %c0_132 = arith.constant 0 : index
    %147 = vector.load %arg8[%c0_131, %c145, %c0_132] : memref<1x272x32xf32, #tpu.memory_space<vmem>>, vector<1x14x32xf32>
    tpu.vector_store %arg8[%c0_131, %c145, %c0_132], %146 {strides = array<i32>} : memref<1x272x32xf32, #tpu.memory_space<vmem>>, vector<1x14x32xf32>,
    %c0_133 = arith.constant 0 : index
    %c576 = arith.constant 576 : index
    %c0_134 = arith.constant 0 : index
    %148 = tpu.strided_load %arg7[%c0_133, %c576, %c0_134] {strides = array<i32: 1, 2, 1>} : memref<1x896x32xf32, #tpu.memory_space<vmem>>, vector<1x14x32xf32>
    %c0_135 = arith.constant 0 : index
    %c577 = arith.constant 577 : index
    %c0_136 = arith.constant 0 : index
    %149 = tpu.strided_load %arg7[%c0_135, %c577, %c0_136] {strides = array<i32: 1, 2, 1>} : memref<1x896x32xf32, #tpu.memory_space<vmem>>, vector<1x14x32xf32>
    %c0_137 = arith.constant 0 : index
    %c608 = arith.constant 608 : index
    %c0_138 = arith.constant 0 : index
    %150 = tpu.strided_load %arg7[%c0_137, %c608, %c0_138] {strides = array<i32: 1, 2, 1>} : memref<1x896x32xf32, #tpu.memory_space<vmem>>, vector<1x14x32xf32>
    %c0_139 = arith.constant 0 : index
    %c609 = arith.constant 609 : index
    %c0_140 = arith.constant 0 : index
    %151 = tpu.strided_load %arg7[%c0_139, %c609, %c0_140] {strides = array<i32: 1, 2, 1>} : memref<1x896x32xf32, #tpu.memory_space<vmem>>, vector<1x14x32xf32>
    %152 = arith.maximumf %148, %149 : vector<1x14x32xf32>
    %153 = arith.maximumf %150, %151 : vector<1x14x32xf32>
    %154 = arith.maximumf %152, %153 : vector<1x14x32xf32>
    %c0_141 = arith.constant 0 : index
    %c161_142 = arith.constant 161 : index
    %c0_143 = arith.constant 0 : index
    %155 = vector.load %arg8[%c0_141, %c161_142, %c0_143] : memref<1x272x32xf32, #tpu.memory_space<vmem>>, vector<1x14x32xf32>
    tpu.vector_store %arg8[%c0_141, %c161_142, %c0_143], %154 {strides = array<i32>} : memref<1x272x32xf32, #tpu.memory_space<vmem>>, vector<1x14x32xf32>,
    %c0_144 = arith.constant 0 : index
    %c640 = arith.constant 640 : index
    %c0_145 = arith.constant 0 : index
    %156 = tpu.strided_load %arg7[%c0_144, %c640, %c0_145] {strides = array<i32: 1, 2, 1>} : memref<1x896x32xf32, #tpu.memory_space<vmem>>, vector<1x14x32xf32>
    %c0_146 = arith.constant 0 : index
    %c641 = arith.constant 641 : index
    %c0_147 = arith.constant 0 : index
    %157 = tpu.strided_load %arg7[%c0_146, %c641, %c0_147] {strides = array<i32: 1, 2, 1>} : memref<1x896x32xf32, #tpu.memory_space<vmem>>, vector<1x14x32xf32>
    %c0_148 = arith.constant 0 : index
    %c672 = arith.constant 672 : index
    %c0_149 = arith.constant 0 : index
    %158 = tpu.strided_load %arg7[%c0_148, %c672, %c0_149] {strides = array<i32: 1, 2, 1>} : memref<1x896x32xf32, #tpu.memory_space<vmem>>, vector<1x14x32xf32>
    %c0_150 = arith.constant 0 : index
    %c673 = arith.constant 673 : index
    %c0_151 = arith.constant 0 : index
    %159 = tpu.strided_load %arg7[%c0_150, %c673, %c0_151] {strides = array<i32: 1, 2, 1>} : memref<1x896x32xf32, #tpu.memory_space<vmem>>, vector<1x14x32xf32>
    %160 = arith.maximumf %156, %157 : vector<1x14x32xf32>
    %161 = arith.maximumf %158, %159 : vector<1x14x32xf32>
    %162 = arith.maximumf %160, %161 : vector<1x14x32xf32>
    %c0_152 = arith.constant 0 : index
    %c177 = arith.constant 177 : index
    %c0_153 = arith.constant 0 : index
    %163 = vector.load %arg8[%c0_152, %c177, %c0_153] : memref<1x272x32xf32, #tpu.memory_space<vmem>>, vector<1x14x32xf32>
    tpu.vector_store %arg8[%c0_152, %c177, %c0_153], %162 {strides = array<i32>} : memref<1x272x32xf32, #tpu.memory_space<vmem>>, vector<1x14x32xf32>,
    %c0_154 = arith.constant 0 : index
    %c704 = arith.constant 704 : index
    %c0_155 = arith.constant 0 : index
    %164 = tpu.strided_load %arg7[%c0_154, %c704, %c0_155] {strides = array<i32: 1, 2, 1>} : memref<1x896x32xf32, #tpu.memory_space<vmem>>, vector<1x14x32xf32>
    %c0_156 = arith.constant 0 : index
    %c705 = arith.constant 705 : index
    %c0_157 = arith.constant 0 : index
    %165 = tpu.strided_load %arg7[%c0_156, %c705, %c0_157] {strides = array<i32: 1, 2, 1>} : memref<1x896x32xf32, #tpu.memory_space<vmem>>, vector<1x14x32xf32>
    %c0_158 = arith.constant 0 : index
    %c736 = arith.constant 736 : index
    %c0_159 = arith.constant 0 : index
    %166 = tpu.strided_load %arg7[%c0_158, %c736, %c0_159] {strides = array<i32: 1, 2, 1>} : memref<1x896x32xf32, #tpu.memory_space<vmem>>, vector<1x14x32xf32>
    %c0_160 = arith.constant 0 : index
    %c737 = arith.constant 737 : index
    %c0_161 = arith.constant 0 : index
    %167 = tpu.strided_load %arg7[%c0_160, %c737, %c0_161] {strides = array<i32: 1, 2, 1>} : memref<1x896x32xf32, #tpu.memory_space<vmem>>, vector<1x14x32xf32>
    %168 = arith.maximumf %164, %165 : vector<1x14x32xf32>
    %169 = arith.maximumf %166, %167 : vector<1x14x32xf32>
    %170 = arith.maximumf %168, %169 : vector<1x14x32xf32>
    %c0_162 = arith.constant 0 : index
    %c193_163 = arith.constant 193 : index
    %c0_164 = arith.constant 0 : index
    %171 = vector.load %arg8[%c0_162, %c193_163, %c0_164] : memref<1x272x32xf32, #tpu.memory_space<vmem>>, vector<1x14x32xf32>
    tpu.vector_store %arg8[%c0_162, %c193_163, %c0_164], %170 {strides = array<i32>} : memref<1x272x32xf32, #tpu.memory_space<vmem>>, vector<1x14x32xf32>,
    %c0_165 = arith.constant 0 : index
    %c768 = arith.constant 768 : index
    %c0_166 = arith.constant 0 : index
    %172 = tpu.strided_load %arg7[%c0_165, %c768, %c0_166] {strides = array<i32: 1, 2, 1>} : memref<1x896x32xf32, #tpu.memory_space<vmem>>, vector<1x14x32xf32>
    %c0_167 = arith.constant 0 : index
    %c769 = arith.constant 769 : index
    %c0_168 = arith.constant 0 : index
    %173 = tpu.strided_load %arg7[%c0_167, %c769, %c0_168] {strides = array<i32: 1, 2, 1>} : memref<1x896x32xf32, #tpu.memory_space<vmem>>, vector<1x14x32xf32>
    %c0_169 = arith.constant 0 : index
    %c800 = arith.constant 800 : index
    %c0_170 = arith.constant 0 : index
    %174 = tpu.strided_load %arg7[%c0_169, %c800, %c0_170] {strides = array<i32: 1, 2, 1>} : memref<1x896x32xf32, #tpu.memory_space<vmem>>, vector<1x14x32xf32>
    %c0_171 = arith.constant 0 : index
    %c801 = arith.constant 801 : index
    %c0_172 = arith.constant 0 : index
    %175 = tpu.strided_load %arg7[%c0_171, %c801, %c0_172] {strides = array<i32: 1, 2, 1>} : memref<1x896x32xf32, #tpu.memory_space<vmem>>, vector<1x14x32xf32>
    %176 = arith.maximumf %172, %173 : vector<1x14x32xf32>
    %177 = arith.maximumf %174, %175 : vector<1x14x32xf32>
    %178 = arith.maximumf %176, %177 : vector<1x14x32xf32>
    %c0_173 = arith.constant 0 : index
    %c209 = arith.constant 209 : index
    %c0_174 = arith.constant 0 : index
    %179 = vector.load %arg8[%c0_173, %c209, %c0_174] : memref<1x272x32xf32, #tpu.memory_space<vmem>>, vector<1x14x32xf32>
    tpu.vector_store %arg8[%c0_173, %c209, %c0_174], %178 {strides = array<i32>} : memref<1x272x32xf32, #tpu.memory_space<vmem>>, vector<1x14x32xf32>,
    %c0_175 = arith.constant 0 : index
    %c832 = arith.constant 832 : index
    %c0_176 = arith.constant 0 : index
    %180 = tpu.strided_load %arg7[%c0_175, %c832, %c0_176] {strides = array<i32: 1, 2, 1>} : memref<1x896x32xf32, #tpu.memory_space<vmem>>, vector<1x14x32xf32>
    %c0_177 = arith.constant 0 : index
    %c833 = arith.constant 833 : index
    %c0_178 = arith.constant 0 : index
    %181 = tpu.strided_load %arg7[%c0_177, %c833, %c0_178] {strides = array<i32: 1, 2, 1>} : memref<1x896x32xf32, #tpu.memory_space<vmem>>, vector<1x14x32xf32>
    %c0_179 = arith.constant 0 : index
    %c864 = arith.constant 864 : index
    %c0_180 = arith.constant 0 : index
    %182 = tpu.strided_load %arg7[%c0_179, %c864, %c0_180] {strides = array<i32: 1, 2, 1>} : memref<1x896x32xf32, #tpu.memory_space<vmem>>, vector<1x14x32xf32>
    %c0_181 = arith.constant 0 : index
    %c865 = arith.constant 865 : index
    %c0_182 = arith.constant 0 : index
    %183 = tpu.strided_load %arg7[%c0_181, %c865, %c0_182] {strides = array<i32: 1, 2, 1>} : memref<1x896x32xf32, #tpu.memory_space<vmem>>, vector<1x14x32xf32>
    %184 = arith.maximumf %180, %181 : vector<1x14x32xf32>
    %185 = arith.maximumf %182, %183 : vector<1x14x32xf32>
    %186 = arith.maximumf %184, %185 : vector<1x14x32xf32>
    %c0_183 = arith.constant 0 : index
    %c225_184 = arith.constant 225 : index
    %c0_185 = arith.constant 0 : index
    %187 = vector.load %arg8[%c0_183, %c225_184, %c0_185] : memref<1x272x32xf32, #tpu.memory_space<vmem>>, vector<1x14x32xf32>
    tpu.vector_store %arg8[%c0_183, %c225_184, %c0_185], %186 {strides = array<i32>} : memref<1x272x32xf32, #tpu.memory_space<vmem>>, vector<1x14x32xf32>,
    %c0_186 = arith.constant 0 : index
    %c0_187 = arith.constant 0 : index
    %c0_188 = arith.constant 0 : index
    %188 = vector.load %arg8[%c0_186, %c0_187, %c0_188] : memref<1x272x32xf32, #tpu.memory_space<vmem>>, vector<1x272x32xf32>
    %cst_189 = arith.constant 0.000000e+00 : f32
    %189 = vector.broadcast %cst_189 : f32 to vector<1x224x64xf32>
    %190 = vector.extract_strided_slice %188 {offsets = [0, 0, 0], sizes = [1, 256, 32], strides = [1, 1, 1]} : vector<1x272x32xf32> to vector<1x256x32xf32>
    %191 = arith.truncf %190 : vector<1x256x32xf32> to vector<1x256x32xbf16>
    %c0_190 = arith.constant 0 : index
    %c0_191 = arith.constant 0 : index
    %c0_192 = arith.constant 0 : index
    %192 = vector.load %arg4[%c0_190, %c0_191, %c0_192] : memref<9x32x64xbf16, #tpu.memory_space<vmem>>, vector<1x32x64xbf16>
    %193 = vector.shape_cast %192 : vector<1x32x64xbf16> to vector<32x64xbf16>
    %194 = vector.shape_cast %193 : vector<32x64xbf16> to vector<1x32x64xbf16>
    %195 = vector.extract_strided_slice %191 {offsets = [0, 0, 0], sizes = [1, 224, 32], strides = [1, 1, 1]} : vector<1x256x32xbf16> to vector<1x224x32xbf16>
    "tpu.trace_start"() <{level = 10 : i32, message = "gmk,gkn->gmn"}> : () -> ()
    %cst_193 = arith.constant dense<0.000000e+00> : vector<1x224x64xf32>
    %196 = tpu.matmul %195, %194, %cst_193 {dimension_numbers = #tpu.dot_dimension_numbers<[2], [1], [1], [2], [0, 0, 0, 1, 1, 2], [0], [0]>} : vector<1x224x32xbf16>, vector<1x32x64xbf16>, vector<1x224x64xf32> -> vector<1x224x64xf32>
    "tpu.trace_stop"() : () -> ()
    %197 = arith.addf %189, %196 : vector<1x224x64xf32>
    %c3_194 = arith.constant 3 : index
    %c0_195 = arith.constant 0 : index
    %c0_196 = arith.constant 0 : index
    %198 = vector.load %arg4[%c3_194, %c0_195, %c0_196] : memref<9x32x64xbf16, #tpu.memory_space<vmem>>, vector<1x32x64xbf16>
    %199 = vector.shape_cast %198 : vector<1x32x64xbf16> to vector<32x64xbf16>
    %200 = vector.shape_cast %199 : vector<32x64xbf16> to vector<1x32x64xbf16>
    %201 = vector.extract_strided_slice %191 {offsets = [0, 16, 0], sizes = [1, 224, 32], strides = [1, 1, 1]} : vector<1x256x32xbf16> to vector<1x224x32xbf16>
    "tpu.trace_start"() <{level = 10 : i32, message = "gmk,gkn->gmn"}> : () -> ()
    %cst_197 = arith.constant dense<0.000000e+00> : vector<1x224x64xf32>
    %202 = tpu.matmul %201, %200, %cst_197 {dimension_numbers = #tpu.dot_dimension_numbers<[2], [1], [1], [2], [0, 0, 0, 1, 1, 2], [0], [0]>} : vector<1x224x32xbf16>, vector<1x32x64xbf16>, vector<1x224x64xf32> -> vector<1x224x64xf32>
    "tpu.trace_stop"() : () -> ()
    %203 = arith.addf %197, %202 : vector<1x224x64xf32>
    %c6_198 = arith.constant 6 : index
    %c0_199 = arith.constant 0 : index
    %c0_200 = arith.constant 0 : index
    %204 = vector.load %arg4[%c6_198, %c0_199, %c0_200] : memref<9x32x64xbf16, #tpu.memory_space<vmem>>, vector<1x32x64xbf16>
    %205 = vector.shape_cast %204 : vector<1x32x64xbf16> to vector<32x64xbf16>
    %206 = vector.shape_cast %205 : vector<32x64xbf16> to vector<1x32x64xbf16>
    %207 = vector.extract_strided_slice %191 {offsets = [0, 32, 0], sizes = [1, 224, 32], strides = [1, 1, 1]} : vector<1x256x32xbf16> to vector<1x224x32xbf16>
    "tpu.trace_start"() <{level = 10 : i32, message = "gmk,gkn->gmn"}> : () -> ()
    %cst_201 = arith.constant dense<0.000000e+00> : vector<1x224x64xf32>
    %208 = tpu.matmul %207, %206, %cst_201 {dimension_numbers = #tpu.dot_dimension_numbers<[2], [1], [1], [2], [0, 0, 0, 1, 1, 2], [0], [0]>} : vector<1x224x32xbf16>, vector<1x32x64xbf16>, vector<1x224x64xf32> -> vector<1x224x64xf32>
    "tpu.trace_stop"() : () -> ()
    %209 = arith.addf %203, %208 : vector<1x224x64xf32>
    %210 = vector.extract_strided_slice %188 {offsets = [0, 1, 0], sizes = [1, 256, 32], strides = [1, 1, 1]} : vector<1x272x32xf32> to vector<1x256x32xf32>
    %211 = arith.truncf %210 : vector<1x256x32xf32> to vector<1x256x32xbf16>
    %c1_202 = arith.constant 1 : index
    %c0_203 = arith.constant 0 : index
    %c0_204 = arith.constant 0 : index
    %212 = vector.load %arg4[%c1_202, %c0_203, %c0_204] : memref<9x32x64xbf16, #tpu.memory_space<vmem>>, vector<1x32x64xbf16>
    %213 = vector.shape_cast %212 : vector<1x32x64xbf16> to vector<32x64xbf16>
    %214 = vector.shape_cast %213 : vector<32x64xbf16> to vector<1x32x64xbf16>
    %215 = vector.extract_strided_slice %211 {offsets = [0, 0, 0], sizes = [1, 224, 32], strides = [1, 1, 1]} : vector<1x256x32xbf16> to vector<1x224x32xbf16>
    "tpu.trace_start"() <{level = 10 : i32, message = "gmk,gkn->gmn"}> : () -> ()
    %cst_205 = arith.constant dense<0.000000e+00> : vector<1x224x64xf32>
    %216 = tpu.matmul %215, %214, %cst_205 {dimension_numbers = #tpu.dot_dimension_numbers<[2], [1], [1], [2], [0, 0, 0, 1, 1, 2], [0], [0]>} : vector<1x224x32xbf16>, vector<1x32x64xbf16>, vector<1x224x64xf32> -> vector<1x224x64xf32>
    "tpu.trace_stop"() : () -> ()
    %217 = arith.addf %209, %216 : vector<1x224x64xf32>
    %c4_206 = arith.constant 4 : index
    %c0_207 = arith.constant 0 : index
    %c0_208 = arith.constant 0 : index
    %218 = vector.load %arg4[%c4_206, %c0_207, %c0_208] : memref<9x32x64xbf16, #tpu.memory_space<vmem>>, vector<1x32x64xbf16>
    %219 = vector.shape_cast %218 : vector<1x32x64xbf16> to vector<32x64xbf16>
    %220 = vector.shape_cast %219 : vector<32x64xbf16> to vector<1x32x64xbf16>
    %221 = vector.extract_strided_slice %211 {offsets = [0, 16, 0], sizes = [1, 224, 32], strides = [1, 1, 1]} : vector<1x256x32xbf16> to vector<1x224x32xbf16>
    "tpu.trace_start"() <{level = 10 : i32, message = "gmk,gkn->gmn"}> : () -> ()
    %cst_209 = arith.constant dense<0.000000e+00> : vector<1x224x64xf32>
    %222 = tpu.matmul %221, %220, %cst_209 {dimension_numbers = #tpu.dot_dimension_numbers<[2], [1], [1], [2], [0, 0, 0, 1, 1, 2], [0], [0]>} : vector<1x224x32xbf16>, vector<1x32x64xbf16>, vector<1x224x64xf32> -> vector<1x224x64xf32>
    "tpu.trace_stop"() : () -> ()
    %223 = arith.addf %217, %222 : vector<1x224x64xf32>
    %c7_210 = arith.constant 7 : index
    %c0_211 = arith.constant 0 : index
    %c0_212 = arith.constant 0 : index
    %224 = vector.load %arg4[%c7_210, %c0_211, %c0_212] : memref<9x32x64xbf16, #tpu.memory_space<vmem>>, vector<1x32x64xbf16>
    %225 = vector.shape_cast %224 : vector<1x32x64xbf16> to vector<32x64xbf16>
    %226 = vector.shape_cast %225 : vector<32x64xbf16> to vector<1x32x64xbf16>
    %227 = vector.extract_strided_slice %211 {offsets = [0, 32, 0], sizes = [1, 224, 32], strides = [1, 1, 1]} : vector<1x256x32xbf16> to vector<1x224x32xbf16>
    "tpu.trace_start"() <{level = 10 : i32, message = "gmk,gkn->gmn"}> : () -> ()
    %cst_213 = arith.constant dense<0.000000e+00> : vector<1x224x64xf32>
    %228 = tpu.matmul %227, %226, %cst_213 {dimension_numbers = #tpu.dot_dimension_numbers<[2], [1], [1], [2], [0, 0, 0, 1, 1, 2], [0], [0]>} : vector<1x224x32xbf16>, vector<1x32x64xbf16>, vector<1x224x64xf32> -> vector<1x224x64xf32>
    "tpu.trace_stop"() : () -> ()
    %229 = arith.addf %223, %228 : vector<1x224x64xf32>
    %230 = vector.extract_strided_slice %188 {offsets = [0, 2, 0], sizes = [1, 256, 32], strides = [1, 1, 1]} : vector<1x272x32xf32> to vector<1x256x32xf32>
    %231 = arith.truncf %230 : vector<1x256x32xf32> to vector<1x256x32xbf16>
    %c2_214 = arith.constant 2 : index
    %c0_215 = arith.constant 0 : index
    %c0_216 = arith.constant 0 : index
    %232 = vector.load %arg4[%c2_214, %c0_215, %c0_216] : memref<9x32x64xbf16, #tpu.memory_space<vmem>>, vector<1x32x64xbf16>
    %233 = vector.shape_cast %232 : vector<1x32x64xbf16> to vector<32x64xbf16>
    %234 = vector.shape_cast %233 : vector<32x64xbf16> to vector<1x32x64xbf16>
    %235 = vector.extract_strided_slice %231 {offsets = [0, 0, 0], sizes = [1, 224, 32], strides = [1, 1, 1]} : vector<1x256x32xbf16> to vector<1x224x32xbf16>
    "tpu.trace_start"() <{level = 10 : i32, message = "gmk,gkn->gmn"}> : () -> ()
    %cst_217 = arith.constant dense<0.000000e+00> : vector<1x224x64xf32>
    %236 = tpu.matmul %235, %234, %cst_217 {dimension_numbers = #tpu.dot_dimension_numbers<[2], [1], [1], [2], [0, 0, 0, 1, 1, 2], [0], [0]>} : vector<1x224x32xbf16>, vector<1x32x64xbf16>, vector<1x224x64xf32> -> vector<1x224x64xf32>
    "tpu.trace_stop"() : () -> ()
    %237 = arith.addf %229, %236 : vector<1x224x64xf32>
    %c5_218 = arith.constant 5 : index
    %c0_219 = arith.constant 0 : index
    %c0_220 = arith.constant 0 : index
    %238 = vector.load %arg4[%c5_218, %c0_219, %c0_220] : memref<9x32x64xbf16, #tpu.memory_space<vmem>>, vector<1x32x64xbf16>
    %239 = vector.shape_cast %238 : vector<1x32x64xbf16> to vector<32x64xbf16>
    %240 = vector.shape_cast %239 : vector<32x64xbf16> to vector<1x32x64xbf16>
    %241 = vector.extract_strided_slice %231 {offsets = [0, 16, 0], sizes = [1, 224, 32], strides = [1, 1, 1]} : vector<1x256x32xbf16> to vector<1x224x32xbf16>
    "tpu.trace_start"() <{level = 10 : i32, message = "gmk,gkn->gmn"}> : () -> ()
    %cst_221 = arith.constant dense<0.000000e+00> : vector<1x224x64xf32>
    %242 = tpu.matmul %241, %240, %cst_221 {dimension_numbers = #tpu.dot_dimension_numbers<[2], [1], [1], [2], [0, 0, 0, 1, 1, 2], [0], [0]>} : vector<1x224x32xbf16>, vector<1x32x64xbf16>, vector<1x224x64xf32> -> vector<1x224x64xf32>
    "tpu.trace_stop"() : () -> ()
    %243 = arith.addf %237, %242 : vector<1x224x64xf32>
    %c8_222 = arith.constant 8 : index
    %c0_223 = arith.constant 0 : index
    %c0_224 = arith.constant 0 : index
    %244 = vector.load %arg4[%c8_222, %c0_223, %c0_224] : memref<9x32x64xbf16, #tpu.memory_space<vmem>>, vector<1x32x64xbf16>
    %245 = vector.shape_cast %244 : vector<1x32x64xbf16> to vector<32x64xbf16>
    %246 = vector.shape_cast %245 : vector<32x64xbf16> to vector<1x32x64xbf16>
    %247 = vector.extract_strided_slice %231 {offsets = [0, 32, 0], sizes = [1, 224, 32], strides = [1, 1, 1]} : vector<1x256x32xbf16> to vector<1x224x32xbf16>
    "tpu.trace_start"() <{level = 10 : i32, message = "gmk,gkn->gmn"}> : () -> ()
    %cst_225 = arith.constant dense<0.000000e+00> : vector<1x224x64xf32>
    %248 = tpu.matmul %247, %246, %cst_225 {dimension_numbers = #tpu.dot_dimension_numbers<[2], [1], [1], [2], [0, 0, 0, 1, 1, 2], [0], [0]>} : vector<1x224x32xbf16>, vector<1x32x64xbf16>, vector<1x224x64xf32> -> vector<1x224x64xf32>
    "tpu.trace_stop"() : () -> ()
    %249 = arith.addf %243, %248 : vector<1x224x64xf32>
    %c0_226 = arith.constant 0 : index
    %c0_227 = arith.constant 0 : index
    %250 = vector.load %arg5[%c0_226, %c0_227] : memref<1x64xf32, #tpu.memory_space<vmem>>, vector<1x64xf32>
    %251 = vector.shape_cast %250 : vector<1x64xf32> to vector<1x1x64xf32>
    %252 = vector.broadcast %251 : vector<1x1x64xf32> to vector<1x224x64xf32>
    %253 = arith.addf %249, %252 : vector<1x224x64xf32>
    %cst_228 = arith.constant 0.000000e+00 : f32
    %254 = vector.broadcast %cst_228 : f32 to vector<1x224x64xf32>
    %255 = arith.maximumf %253, %254 : vector<1x224x64xf32>
    %c0_229 = arith.constant 0 : index
    %c0_230 = arith.constant 0 : index
    %c0_231 = arith.constant 0 : index
    %256 = vector.load %arg9[%c0_229, %c0_230, %c0_231] : memref<1x224x64xf32, #tpu.memory_space<vmem>>, vector<1x224x64xf32>
    tpu.vector_store %arg9[%c0_229, %c0_230, %c0_231], %255 {strides = array<i32>} : memref<1x224x64xf32, #tpu.memory_space<vmem>>, vector<1x224x64xf32>,
    %c0_232 = arith.constant 0 : index
    %c0_233 = arith.constant 0 : index
    %c0_234 = arith.constant 0 : index
    %257 = tpu.strided_load %arg9[%c0_232, %c0_233, %c0_234] {strides = array<i32: 1, 2, 1>} : memref<1x224x64xf32, #tpu.memory_space<vmem>>, vector<1x7x64xf32>
    %c0_235 = arith.constant 0 : index
    %c1_236 = arith.constant 1 : index
    %c0_237 = arith.constant 0 : index
    %258 = tpu.strided_load %arg9[%c0_235, %c1_236, %c0_237] {strides = array<i32: 1, 2, 1>} : memref<1x224x64xf32, #tpu.memory_space<vmem>>, vector<1x7x64xf32>
    %c0_238 = arith.constant 0 : index
    %c16 = arith.constant 16 : index
    %c0_239 = arith.constant 0 : index
    %259 = tpu.strided_load %arg9[%c0_238, %c16, %c0_239] {strides = array<i32: 1, 2, 1>} : memref<1x224x64xf32, #tpu.memory_space<vmem>>, vector<1x7x64xf32>
    %c0_240 = arith.constant 0 : index
    %c17_241 = arith.constant 17 : index
    %c0_242 = arith.constant 0 : index
    %260 = tpu.strided_load %arg9[%c0_240, %c17_241, %c0_242] {strides = array<i32: 1, 2, 1>} : memref<1x224x64xf32, #tpu.memory_space<vmem>>, vector<1x7x64xf32>
    %261 = arith.maximumf %257, %258 : vector<1x7x64xf32>
    %262 = arith.maximumf %259, %260 : vector<1x7x64xf32>
    %263 = arith.maximumf %261, %262 : vector<1x7x64xf32>
    %264 = arith.truncf %263 : vector<1x7x64xf32> to vector<1x7x64xbf16>
    %c0_243 = arith.constant 0 : index
    %c0_244 = arith.constant 0 : index
    %c0_245 = arith.constant 0 : index
    %265 = vector.load %arg6[%c0_243, %c0_244, %c0_245] : memref<1x49x64xbf16, #tpu.memory_space<vmem>>, vector<1x7x64xbf16>
    tpu.vector_store %arg6[%c0_243, %c0_244, %c0_245], %264 {strides = array<i32>} : memref<1x49x64xbf16, #tpu.memory_space<vmem>>, vector<1x7x64xbf16>,
    %c0_246 = arith.constant 0 : index
    %c32_247 = arith.constant 32 : index
    %c0_248 = arith.constant 0 : index
    %266 = tpu.strided_load %arg9[%c0_246, %c32_247, %c0_248] {strides = array<i32: 1, 2, 1>} : memref<1x224x64xf32, #tpu.memory_space<vmem>>, vector<1x7x64xf32>
    %c0_249 = arith.constant 0 : index
    %c33_250 = arith.constant 33 : index
    %c0_251 = arith.constant 0 : index
    %267 = tpu.strided_load %arg9[%c0_249, %c33_250, %c0_251] {strides = array<i32: 1, 2, 1>} : memref<1x224x64xf32, #tpu.memory_space<vmem>>, vector<1x7x64xf32>
    %c0_252 = arith.constant 0 : index
    %c48 = arith.constant 48 : index
    %c0_253 = arith.constant 0 : index
    %268 = tpu.strided_load %arg9[%c0_252, %c48, %c0_253] {strides = array<i32: 1, 2, 1>} : memref<1x224x64xf32, #tpu.memory_space<vmem>>, vector<1x7x64xf32>
    %c0_254 = arith.constant 0 : index
    %c49_255 = arith.constant 49 : index
    %c0_256 = arith.constant 0 : index
    %269 = tpu.strided_load %arg9[%c0_254, %c49_255, %c0_256] {strides = array<i32: 1, 2, 1>} : memref<1x224x64xf32, #tpu.memory_space<vmem>>, vector<1x7x64xf32>
    %270 = arith.maximumf %266, %267 : vector<1x7x64xf32>
    %271 = arith.maximumf %268, %269 : vector<1x7x64xf32>
    %272 = arith.maximumf %270, %271 : vector<1x7x64xf32>
    %273 = arith.truncf %272 : vector<1x7x64xf32> to vector<1x7x64xbf16>
    %c0_257 = arith.constant 0 : index
    %c7_258 = arith.constant 7 : index
    %c0_259 = arith.constant 0 : index
    %274 = vector.load %arg6[%c0_257, %c7_258, %c0_259] : memref<1x49x64xbf16, #tpu.memory_space<vmem>>, vector<1x7x64xbf16>
    tpu.vector_store %arg6[%c0_257, %c7_258, %c0_259], %273 {strides = array<i32>} : memref<1x49x64xbf16, #tpu.memory_space<vmem>>, vector<1x7x64xbf16>,
    %c0_260 = arith.constant 0 : index
    %c64_261 = arith.constant 64 : index
    %c0_262 = arith.constant 0 : index
    %275 = tpu.strided_load %arg9[%c0_260, %c64_261, %c0_262] {strides = array<i32: 1, 2, 1>} : memref<1x224x64xf32, #tpu.memory_space<vmem>>, vector<1x7x64xf32>
    %c0_263 = arith.constant 0 : index
    %c65_264 = arith.constant 65 : index
    %c0_265 = arith.constant 0 : index
    %276 = tpu.strided_load %arg9[%c0_263, %c65_264, %c0_265] {strides = array<i32: 1, 2, 1>} : memref<1x224x64xf32, #tpu.memory_space<vmem>>, vector<1x7x64xf32>
    %c0_266 = arith.constant 0 : index
    %c80 = arith.constant 80 : index
    %c0_267 = arith.constant 0 : index
    %277 = tpu.strided_load %arg9[%c0_266, %c80, %c0_267] {strides = array<i32: 1, 2, 1>} : memref<1x224x64xf32, #tpu.memory_space<vmem>>, vector<1x7x64xf32>
    %c0_268 = arith.constant 0 : index
    %c81_269 = arith.constant 81 : index
    %c0_270 = arith.constant 0 : index
    %278 = tpu.strided_load %arg9[%c0_268, %c81_269, %c0_270] {strides = array<i32: 1, 2, 1>} : memref<1x224x64xf32, #tpu.memory_space<vmem>>, vector<1x7x64xf32>
    %279 = arith.maximumf %275, %276 : vector<1x7x64xf32>
    %280 = arith.maximumf %277, %278 : vector<1x7x64xf32>
    %281 = arith.maximumf %279, %280 : vector<1x7x64xf32>
    %282 = arith.truncf %281 : vector<1x7x64xf32> to vector<1x7x64xbf16>
    %c0_271 = arith.constant 0 : index
    %c14 = arith.constant 14 : index
    %c0_272 = arith.constant 0 : index
    %283 = vector.load %arg6[%c0_271, %c14, %c0_272] : memref<1x49x64xbf16, #tpu.memory_space<vmem>>, vector<1x7x64xbf16>
    tpu.vector_store %arg6[%c0_271, %c14, %c0_272], %282 {strides = array<i32>} : memref<1x49x64xbf16, #tpu.memory_space<vmem>>, vector<1x7x64xbf16>,
    %c0_273 = arith.constant 0 : index
    %c96_274 = arith.constant 96 : index
    %c0_275 = arith.constant 0 : index
    %284 = tpu.strided_load %arg9[%c0_273, %c96_274, %c0_275] {strides = array<i32: 1, 2, 1>} : memref<1x224x64xf32, #tpu.memory_space<vmem>>, vector<1x7x64xf32>
    %c0_276 = arith.constant 0 : index
    %c97_277 = arith.constant 97 : index
    %c0_278 = arith.constant 0 : index
    %285 = tpu.strided_load %arg9[%c0_276, %c97_277, %c0_278] {strides = array<i32: 1, 2, 1>} : memref<1x224x64xf32, #tpu.memory_space<vmem>>, vector<1x7x64xf32>
    %c0_279 = arith.constant 0 : index
    %c112 = arith.constant 112 : index
    %c0_280 = arith.constant 0 : index
    %286 = tpu.strided_load %arg9[%c0_279, %c112, %c0_280] {strides = array<i32: 1, 2, 1>} : memref<1x224x64xf32, #tpu.memory_space<vmem>>, vector<1x7x64xf32>
    %c0_281 = arith.constant 0 : index
    %c113_282 = arith.constant 113 : index
    %c0_283 = arith.constant 0 : index
    %287 = tpu.strided_load %arg9[%c0_281, %c113_282, %c0_283] {strides = array<i32: 1, 2, 1>} : memref<1x224x64xf32, #tpu.memory_space<vmem>>, vector<1x7x64xf32>
    %288 = arith.maximumf %284, %285 : vector<1x7x64xf32>
    %289 = arith.maximumf %286, %287 : vector<1x7x64xf32>
    %290 = arith.maximumf %288, %289 : vector<1x7x64xf32>
    %291 = arith.truncf %290 : vector<1x7x64xf32> to vector<1x7x64xbf16>
    %c0_284 = arith.constant 0 : index
    %c21 = arith.constant 21 : index
    %c0_285 = arith.constant 0 : index
    %292 = vector.load %arg6[%c0_284, %c21, %c0_285] : memref<1x49x64xbf16, #tpu.memory_space<vmem>>, vector<1x7x64xbf16>
    tpu.vector_store %arg6[%c0_284, %c21, %c0_285], %291 {strides = array<i32>} : memref<1x49x64xbf16, #tpu.memory_space<vmem>>, vector<1x7x64xbf16>,
    %c0_286 = arith.constant 0 : index
    %c128_287 = arith.constant 128 : index
    %c0_288 = arith.constant 0 : index
    %293 = tpu.strided_load %arg9[%c0_286, %c128_287, %c0_288] {strides = array<i32: 1, 2, 1>} : memref<1x224x64xf32, #tpu.memory_space<vmem>>, vector<1x7x64xf32>
    %c0_289 = arith.constant 0 : index
    %c129_290 = arith.constant 129 : index
    %c0_291 = arith.constant 0 : index
    %294 = tpu.strided_load %arg9[%c0_289, %c129_290, %c0_291] {strides = array<i32: 1, 2, 1>} : memref<1x224x64xf32, #tpu.memory_space<vmem>>, vector<1x7x64xf32>
    %c0_292 = arith.constant 0 : index
    %c144 = arith.constant 144 : index
    %c0_293 = arith.constant 0 : index
    %295 = tpu.strided_load %arg9[%c0_292, %c144, %c0_293] {strides = array<i32: 1, 2, 1>} : memref<1x224x64xf32, #tpu.memory_space<vmem>>, vector<1x7x64xf32>
    %c0_294 = arith.constant 0 : index
    %c145_295 = arith.constant 145 : index
    %c0_296 = arith.constant 0 : index
    %296 = tpu.strided_load %arg9[%c0_294, %c145_295, %c0_296] {strides = array<i32: 1, 2, 1>} : memref<1x224x64xf32, #tpu.memory_space<vmem>>, vector<1x7x64xf32>
    %297 = arith.maximumf %293, %294 : vector<1x7x64xf32>
    %298 = arith.maximumf %295, %296 : vector<1x7x64xf32>
    %299 = arith.maximumf %297, %298 : vector<1x7x64xf32>
    %300 = arith.truncf %299 : vector<1x7x64xf32> to vector<1x7x64xbf16>
    %c0_297 = arith.constant 0 : index
    %c28 = arith.constant 28 : index
    %c0_298 = arith.constant 0 : index
    %301 = vector.load %arg6[%c0_297, %c28, %c0_298] : memref<1x49x64xbf16, #tpu.memory_space<vmem>>, vector<1x7x64xbf16>
    tpu.vector_store %arg6[%c0_297, %c28, %c0_298], %300 {strides = array<i32>} : memref<1x49x64xbf16, #tpu.memory_space<vmem>>, vector<1x7x64xbf16>,
    %c0_299 = arith.constant 0 : index
    %c160_300 = arith.constant 160 : index
    %c0_301 = arith.constant 0 : index
    %302 = tpu.strided_load %arg9[%c0_299, %c160_300, %c0_301] {strides = array<i32: 1, 2, 1>} : memref<1x224x64xf32, #tpu.memory_space<vmem>>, vector<1x7x64xf32>
    %c0_302 = arith.constant 0 : index
    %c161_303 = arith.constant 161 : index
    %c0_304 = arith.constant 0 : index
    %303 = tpu.strided_load %arg9[%c0_302, %c161_303, %c0_304] {strides = array<i32: 1, 2, 1>} : memref<1x224x64xf32, #tpu.memory_space<vmem>>, vector<1x7x64xf32>
    %c0_305 = arith.constant 0 : index
    %c176 = arith.constant 176 : index
    %c0_306 = arith.constant 0 : index
    %304 = tpu.strided_load %arg9[%c0_305, %c176, %c0_306] {strides = array<i32: 1, 2, 1>} : memref<1x224x64xf32, #tpu.memory_space<vmem>>, vector<1x7x64xf32>
    %c0_307 = arith.constant 0 : index
    %c177_308 = arith.constant 177 : index
    %c0_309 = arith.constant 0 : index
    %305 = tpu.strided_load %arg9[%c0_307, %c177_308, %c0_309] {strides = array<i32: 1, 2, 1>} : memref<1x224x64xf32, #tpu.memory_space<vmem>>, vector<1x7x64xf32>
    %306 = arith.maximumf %302, %303 : vector<1x7x64xf32>
    %307 = arith.maximumf %304, %305 : vector<1x7x64xf32>
    %308 = arith.maximumf %306, %307 : vector<1x7x64xf32>
    %309 = arith.truncf %308 : vector<1x7x64xf32> to vector<1x7x64xbf16>
    %c0_310 = arith.constant 0 : index
    %c35 = arith.constant 35 : index
    %c0_311 = arith.constant 0 : index
    %310 = vector.load %arg6[%c0_310, %c35, %c0_311] : memref<1x49x64xbf16, #tpu.memory_space<vmem>>, vector<1x7x64xbf16>
    tpu.vector_store %arg6[%c0_310, %c35, %c0_311], %309 {strides = array<i32>} : memref<1x49x64xbf16, #tpu.memory_space<vmem>>, vector<1x7x64xbf16>,
    %c0_312 = arith.constant 0 : index
    %c192_313 = arith.constant 192 : index
    %c0_314 = arith.constant 0 : index
    %311 = tpu.strided_load %arg9[%c0_312, %c192_313, %c0_314] {strides = array<i32: 1, 2, 1>} : memref<1x224x64xf32, #tpu.memory_space<vmem>>, vector<1x7x64xf32>
    %c0_315 = arith.constant 0 : index
    %c193_316 = arith.constant 193 : index
    %c0_317 = arith.constant 0 : index
    %312 = tpu.strided_load %arg9[%c0_315, %c193_316, %c0_317] {strides = array<i32: 1, 2, 1>} : memref<1x224x64xf32, #tpu.memory_space<vmem>>, vector<1x7x64xf32>
    %c0_318 = arith.constant 0 : index
    %c208 = arith.constant 208 : index
    %c0_319 = arith.constant 0 : index
    %313 = tpu.strided_load %arg9[%c0_318, %c208, %c0_319] {strides = array<i32: 1, 2, 1>} : memref<1x224x64xf32, #tpu.memory_space<vmem>>, vector<1x7x64xf32>
    %c0_320 = arith.constant 0 : index
    %c209_321 = arith.constant 209 : index
    %c0_322 = arith.constant 0 : index
    %314 = tpu.strided_load %arg9[%c0_320, %c209_321, %c0_322] {strides = array<i32: 1, 2, 1>} : memref<1x224x64xf32, #tpu.memory_space<vmem>>, vector<1x7x64xf32>
    %315 = arith.maximumf %311, %312 : vector<1x7x64xf32>
    %316 = arith.maximumf %313, %314 : vector<1x7x64xf32>
    %317 = arith.maximumf %315, %316 : vector<1x7x64xf32>
    %318 = arith.truncf %317 : vector<1x7x64xf32> to vector<1x7x64xbf16>
    %c0_323 = arith.constant 0 : index
    %c42 = arith.constant 42 : index
    %c0_324 = arith.constant 0 : index
    %319 = vector.load %arg6[%c0_323, %c42, %c0_324] : memref<1x49x64xbf16, #tpu.memory_space<vmem>>, vector<1x7x64xbf16>
    tpu.vector_store %arg6[%c0_323, %c42, %c0_324], %318 {strides = array<i32>} : memref<1x49x64xbf16, #tpu.memory_space<vmem>>, vector<1x7x64xbf16>,
    return
  }
  func.func @transform_0(%arg0: i32) -> (i32, i32, i32) {
    %c0_i32 = arith.constant 0 : i32
    %c0_i32_0 = arith.constant 0 : i32
    %c0_i32_1 = arith.constant 0 : i32
    return %arg0, %c0_i32, %c0_i32_0 : i32, i32, i32
  }
  func.func @transform_1(%arg0: i32) -> (i32, i32, i32) {
    %c0_i32 = arith.constant 0 : i32
    %c0_i32_0 = arith.constant 0 : i32
    %c0_i32_1 = arith.constant 0 : i32
    %c0_i32_2 = arith.constant 0 : i32
    return %c0_i32, %c0_i32_0, %c0_i32_1 : i32, i32, i32
  }
  func.func @transform_2(%arg0: i32) -> (i32, i32) {
    %c0_i32 = arith.constant 0 : i32
    %c0_i32_0 = arith.constant 0 : i32
    %c0_i32_1 = arith.constant 0 : i32
    return %c0_i32, %c0_i32_0 : i32, i32
  }
  func.func @transform_3(%arg0: i32) -> (i32, i32, i32) {
    %c0_i32 = arith.constant 0 : i32
    %c0_i32_0 = arith.constant 0 : i32
    %c0_i32_1 = arith.constant 0 : i32
    %c0_i32_2 = arith.constant 0 : i32
    return %c0_i32, %c0_i32_0, %c0_i32_1 : i32, i32, i32
  }
  func.func @transform_4(%arg0: i32) -> (i32, i32) {
    %c0_i32 = arith.constant 0 : i32
    %c0_i32_0 = arith.constant 0 : i32
    %c0_i32_1 = arith.constant 0 : i32
    return %c0_i32, %c0_i32_0 : i32, i32
  }
  func.func @transform_5(%arg0: i32) -> (i32, i32, i32) {
    %c0_i32 = arith.constant 0 : i32
    %c0_i32_0 = arith.constant 0 : i32
    %c0_i32_1 = arith.constant 0 : i32
    return %arg0, %c0_i32, %c0_i32_0 : i32, i32, i32
  }
}

</mosaic_0001>

<bundles_post_ra>
// kernel: cnn_forward.3
= control target key start
LH: loop header
LB: loop body
LE: loop exit
PB: predicated region body
PF: predicated region fallthrough
CT: control target
= control target key end

     0   :  { %v433_v27 = vlaneseq  ;;  %v3195_v35 = vmov 1966171168   ;;  %s3921_s0 = inlined_call_operand.vmem [shape: bf16[2,3136], index: 0, kind: input, shape index: {}]   ;;  %s3922_s1 = inlined_call_operand.vmem [shape: bf16[3136,128], index: 1, kind: input, shape index: {}]   ;;  %s3923_s2 = inlined_call_operand.vmem [shape: f32[1,128], index: 2, kind: input, shape index: {}]   ;;  %s3924_s3 = inlined_call_operand.vmem [shape: bf16[128,128], index: 3, kind: input, shape index: {}]   ;;  %s3925_s4 = inlined_call_operand.vmem [shape: f32[1,128], index: 4, kind: input, shape index: {}]   ;;  %s3926_s5 = inlined_call_operand.hbm [shape: f32[2,128], index: 5, kind: output, shape index: {}]  }
   0x1   :  { %v2964_v0 = vld [vmem:[%s3922_s1 + $0x40] sm:$0xff]   ;;  %v2968_v4 = vld [vmem:[%s3922_s1 + $0x48] sm:$0xff]   ;;  %v2972_v8 = vld [vmem:[%s3922_s1 + $0x50] sm:$0xff]   ;;  %v431_v36 = vunpack.c.l.s4 %v3195_v35 }
   0x2   :  { %v2965_v1 = vld [vmem:[%s3922_s1] sm:$0xff]   ;;  %2650 = vmatprep.subr.bf16.mxu0 %v2964_v0  ;;  %v2969_v5 = vld [vmem:[%s3922_s1 + $0x8] sm:$0xff]   ;;  %v2973_v9 = vld [vmem:[%s3922_s1 + $0x10] sm:$0xff]   ;;  %v434_v32 = vshrl.u32 %v433_v27, 7 }
   0x3   :  { %v2966_v2 = vld [vmem:[%s3922_s1 + $0xc0] sm:$0xff]   ;;  %2651 = vmatpush3.bf16.msra.mxu0 %v2965_v1  ;;  %v2970_v6 = vld [vmem:[%s3922_s1 + $0xc8] sm:$0xff]   ;;  %v2974_v10 = vld [vmem:[%s3922_s1 + $0xd0] sm:$0xff]   ;;  %v432_v39 = vunpack.c.0.s8 %v431_v36 }
   0x4   :  { %v2967_v3 = vld [vmem:[%s3922_s1 + $0x80] sm:$0xff]   ;;  %2672 = vmatprep.subr.bf16.mxu1 %v2966_v2  ;;  %2652 = vmatprep.subr.bf16.mxu0 %v2968_v4  ;;  %v2971_v7 = vld [vmem:[%s3922_s1 + $0x88] sm:$0xff]   ;;  %v2975_v11 = vld [vmem:[%s3922_s1 + $0x90] sm:$0xff]  }
   0x5   :  { %2673 = vmatpush3.bf16.msra.mxu1 %v2967_v3  ;;  %v2976_v12 = vld [vmem:[%s3922_s1 + $0x58] sm:$0xff]   ;;  %v2980_v16 = vld [vmem:[%s3922_s1 + $0x60] sm:$0xff]   ;;  %v2984_v20 = vld [vmem:[%s3922_s1 + $0x68] sm:$0xff]   ;;  %v3334_v41 = vsub.s32 %v432_v39, %v434_v32 }
   0x6   :  { %2674 = vmatprep.subr.bf16.mxu1 %v2970_v6  ;;  %v2977_v13 = vld [vmem:[%s3922_s1 + $0x18] sm:$0xff]   ;;  %v2981_v17 = vld [vmem:[%s3922_s1 + $0x20] sm:$0xff]   ;;  %v2985_v21 = vld [vmem:[%s3922_s1 + $0x28] sm:$0xff]  }
   0x7   :  { %2653 = vmatpush3.bf16.msra.mxu0 %v2969_v5  ;;  %v2978_v14 = vld [vmem:[%s3922_s1 + $0xd8] sm:$0xff]   ;;  %v2982_v18 = vld [vmem:[%s3922_s1 + $0xe0] sm:$0xff]   ;;  %v2986_v22 = vld [vmem:[%s3922_s1 + $0xe8] sm:$0xff]  }
   0x8   :  { %2654 = vmatprep.subr.bf16.mxu0 %v2972_v8  ;;  %v2979_v15 = vld [vmem:[%s3922_s1 + $0x98] sm:$0xff]   ;;  %v2983_v19 = vld [vmem:[%s3922_s1 + $0xa0] sm:$0xff]   ;;  %v2987_v23 = vld [vmem:[%s3922_s1 + $0xa8] sm:$0xff]  }
   0x9   :  { %2675 = vmatpush3.bf16.msra.mxu1 %v2971_v7  ;;  %v2988_v24 = vld [vmem:[%s3922_s1 + $0x70] sm:$0xff]   ;;  %v2992_v29 = vld [vmem:[%s3922_s1 + $0x78] sm:$0xff]   ;;  %v22_v33 = vld [vmem:[%s3921_s0] sm:$0xff] }
   0xa   :  { %2676 = vmatprep.subr.bf16.mxu1 %v2974_v10  ;;  %v2989_v25 = vld [vmem:[%s3922_s1 + $0x30] sm:$0xff]   ;;  %v2993_v30 = vld [vmem:[%s3922_s1 + $0x38] sm:$0xff]   ;;  %v2997_v37 = vld [vmem:[%s3922_s1 + $0x140] sm:$0xff]   ;;  %v429_v38 = vcombine.high %v22_v33, %v22_v33  ;;  %v436_v42 = vrot.slane %v22_v33, %v3334_v41 }
   0xb   :  { %2655 = vmatpush3.bf16.msra.mxu0 %v2973_v9  ;;  %v2990_v26 = vld [vmem:[%s3922_s1 + $0xf0] sm:$0xff]   ;;  %v2994_v31 = vld [vmem:[%s3922_s1 + $0xf8] sm:$0xff]   ;;  %v2999_v40 = vld [vmem:[%s3922_s1 + $0x1c0] sm:$0xff]  }
   0xc   :  { %2656 = vmatprep.subr.bf16.mxu0 %v2976_v12  ;;  %v2991_v28 = vld [vmem:[%s3922_s1 + $0xb0] sm:$0xff]   ;;  %v2996_v34 = vld [vmem:[%s3922_s1 + $0xb8] sm:$0xff]   ;;  %v3338_v43 = vrot.slane %v429_v38, %v3334_v41  ;;  %v444_v44 = vcombine.high %v436_v42, %v436_v42  ;;  %v452_v45 = vrot.slane %v436_v42, %v3334_v41  ;;  %v2998_v48 = vld [vmem:[%s3922_s1 + $0x100] sm:$0xff]  }
   0xd   :  { %2677 = vmatpush3.bf16.msra.mxu1 %v2975_v11  ;;  %v3001_v51 = vld [vmem:[%s3922_s1 + $0x148] sm:$0xff]   ;;  %v3000_v53 = vld [vmem:[%s3922_s1 + $0x180] sm:$0xff]   ;;  %v3005_v57 = vld [vmem:[%s3922_s1 + $0x150] sm:$0xff]  }
   0xe   :  { %2678 = vmatprep.subr.bf16.mxu1 %v2978_v14  ;;  %v445_v46 = vcombine.high %v3338_v43, %v3338_v43  ;;  %v466_v47 = vrot.slane %v444_v44, %v3334_v41  ;;  %v474_v50 = vcombine.high %v452_v45, %v452_v45  ;;  %v3003_v54 = vld [vmem:[%s3922_s1 + $0x1c8] sm:$0xff]   ;;  %v3007_v59 = vld [vmem:[%s3922_s1 + $0x1d0] sm:$0xff]   ;;  %v3009_v61 = vld [vmem:[%s3922_s1 + $0x158] sm:$0xff]  }
   0xf   :  { %2657 = vmatpush3.bf16.msra.mxu0 %v2977_v13  ;;  %v3002_v56 = vld [vmem:[%s3922_s1 + $0x108] sm:$0xff]   ;;  %v3006_v60 = vld [vmem:[%s3922_s1 + $0x110] sm:$0xff]   ;;  %v3011_v63 = vld [vmem:[%s3922_s1 + $0x1d8] sm:$0xff]  }
  0x10   :  { %2658 = vmatprep.subr.bf16.mxu0 %v2980_v16  ;;  %v473_v49 = vrot.slane %v445_v46, %v3334_v41  ;;  %1826 = vmatprep.mubr.bf16.mxu0 %v466_v47  ;;  %v476_v52 = vcombine.high %v466_v47, %v466_v47  ;;  %v3004_v58 = vld [vmem:[%s3922_s1 + $0x188] sm:$0xff]   ;;  %v3008_v62 = vld [vmem:[%s3922_s1 + $0x190] sm:$0xff]   ;;  %v3010_v0 = vld [vmem:[%s3922_s1 + $0x118] sm:$0xff]  }
  0x11   :  { %2679 = vmatpush3.bf16.msra.mxu1 %v2979_v15  ;;  %v3013_v1 = vld [vmem:[%s3922_s1 + $0x160] sm:$0xff]   ;;  %v3012_v2 = vld [vmem:[%s3922_s1 + $0x198] sm:$0xff]   ;;  %v3017_v5 = vld [vmem:[%s3922_s1 + $0x168] sm:$0xff]  }
  0x12   :  { %2680 = vmatprep.subr.bf16.mxu1 %v2982_v18  ;;  %v477_v55 = vcombine.high %v473_v49, %v473_v49  ;;  %1866 = vmatprep.mubr.bf16.mxu1 %v476_v52  ;;  %v3015_v3 = vld [vmem:[%s3922_s1 + $0x1e0] sm:$0xff]   ;;  %v3019_v7 = vld [vmem:[%s3922_s1 + $0x1e8] sm:$0xff]   ;;  %v3021_v9 = vld [vmem:[%s3922_s1 + $0x170] sm:$0xff]  }
  0x13   :  { %2659 = vmatpush3.bf16.msra.mxu0 %v2981_v17  ;;  %v3014_v4 = vld [vmem:[%s3922_s1 + $0x120] sm:$0xff]   ;;  %v3018_v8 = vld [vmem:[%s3922_s1 + $0x128] sm:$0xff]   ;;  %v3023_v11 = vld [vmem:[%s3922_s1 + $0x1f0] sm:$0xff]   ;;  %v459_v17 = vrot.slane %v3338_v43, %v3334_v41 }
  0x14   :  { %2660 = vmatprep.subr.bf16.mxu0 %v2984_v20  ;;  %v3016_v6 = vld [vmem:[%s3922_s1 + $0x1a0] sm:$0xff]   ;;  %v3020_v10 = vld [vmem:[%s3922_s1 + $0x1a8] sm:$0xff]   ;;  %v3022_v12 = vld [vmem:[%s3922_s1 + $0x130] sm:$0xff]  }
  0x15   :  { %2681 = vmatpush3.bf16.msra.mxu1 %v2983_v19  ;;  %v3025_v13 = vld [vmem:[%s3922_s1 + $0x178] sm:$0xff]   ;;  %v3024_v14 = vld [vmem:[%s3922_s1 + $0x1b0] sm:$0xff]   ;;  %v3029_v18 = vld [vmem:[%s3922_s1 + $0x240] sm:$0xff]  }
  0x16   :  { %2682 = vmatprep.subr.bf16.mxu1 %v2986_v22  ;;  %v3027_v15 = vld [vmem:[%s3922_s1 + $0x1f8] sm:$0xff]   ;;  %v3031_v20 = vld [vmem:[%s3922_s1 + $0x2c0] sm:$0xff]   ;;  %v475_v22 = vcombine.high %v459_v17, %v459_v17  ;;  %v3037_v27 = vld [vmem:[%s3922_s1 + $0x250] sm:$0xff]  }
  0x17   :  { %2661 = vmatpush3.bf16.msra.mxu0 %v2985_v21  ;;  %v3026_v16 = vld [vmem:[%s3922_s1 + $0x138] sm:$0xff]   ;;  %v3030_v21 = vld [vmem:[%s3922_s1 + $0x200] sm:$0xff]   ;;  %v3040_v32 = vld [vmem:[%s3922_s1 + $0x290] sm:$0xff]  }
  0x18   :  { %2662 = vmatprep.subr.bf16.mxu0 %v2988_v24  ;;  %v3028_v19 = vld [vmem:[%s3922_s1 + $0x1b8] sm:$0xff]   ;;  %v3032_v24 = vld [vmem:[%s3922_s1 + $0x280] sm:$0xff]   ;;  %v3049_v39 = vld [vmem:[%s3922_s1 + $0x268] sm:$0xff]  }
  0x19   :  { %2683 = vmatpush3.bf16.msra.mxu1 %v2987_v23  ;;  %v3033_v23 = vld [vmem:[%s3922_s1 + $0x248] sm:$0xff]   ;;  %v3043_v33 = vld [vmem:[%s3922_s1 + $0x2d8] sm:$0xff]   ;;  %v3045_v35 = vld [vmem:[%s3922_s1 + $0x260] sm:$0xff]  }
  0x1a   :  { %2684 = vmatprep.subr.bf16.mxu1 %v2990_v26  ;;  %v3034_v26 = vld [vmem:[%s3922_s1 + $0x208] sm:$0xff]   ;;  %v3044_v36 = vld [vmem:[%s3922_s1 + $0x298] sm:$0xff]   ;;  %v3046_v38 = vld [vmem:[%s3922_s1 + $0x220] sm:$0xff]  }
  0x1b   :  { %2663 = vmatpush3.bf16.msra.mxu0 %v2989_v25  ;;  %v3035_v25 = vld [vmem:[%s3922_s1 + $0x2c8] sm:$0xff]   ;;  %v3053_v44 = vld [vmem:[%s3922_s1 + $0x270] sm:$0xff]  }
  0x1c   :  { %2664 = vmatprep.subr.bf16.mxu0 %v2992_v29  ;;  %v3039_v29 = vld [vmem:[%s3922_s1 + $0x2d0] sm:$0xff]   ;;  %v3051_v42 = vld [vmem:[%s3922_s1 + $0x2e8] sm:$0xff]  }
  0x1d   :  { %2685 = vmatpush3.bf16.msra.mxu1 %v2991_v28  ;;  %v3036_v28 = vld [vmem:[%s3922_s1 + $0x288] sm:$0xff]  }
  0x1e   :  { %2686 = vmatprep.subr.bf16.mxu1 %v2994_v31  ;;  %v3041_v31 = vld [vmem:[%s3922_s1 + $0x258] sm:$0xff]   ;;  %v3050_v43 = vld [vmem:[%s3922_s1 + $0x228] sm:$0xff]  }
  0x1f   :  { %2665 = vmatpush3.bf16.msra.mxu0 %v2993_v30  ;;  %v3038_v30 = vld [vmem:[%s3922_s1 + $0x210] sm:$0xff]   ;;  %v3052_v46 = vld [vmem:[%s3922_s1 + $0x2a8] sm:$0xff]  }
  0x20   :  { %2694 = vmatprep.subr.bf16.mxu0 %v2997_v37  ;;  %v3047_v37 = vld [vmem:[%s3922_s1 + $0x2e0] sm:$0xff]  }
  0x21   :  { %2687 = vmatpush3.bf16.msra.mxu1 %v2996_v34  ;;  %v3042_v34 = vld [vmem:[%s3922_s1 + $0x218] sm:$0xff]  }
  0x22   :  { %2716 = vmatprep.subr.bf16.mxu1 %v2999_v40  ;;  %1827 = vmatmul.mubr.bf16.vlgmr.msra.gmra.mrb[0].mxu0 %v452_v45  ;;  %v3048_v40 = vld [vmem:[%s3922_s1 + $0x2a0] sm:$0xff]   ;;  %v23_v45 = vld [vmem:[%s3921_s0 + $0x8] sm:$0xff] }
  0x23   :  { %2695 = vmatpush3.bf16.msra.mxu0 %v2998_v48  ;;  %1906 = vmatprep.mubr.bf16.mxu0 %v473_v49  ;;  %v485_v47 = vrot.slane %v23_v45, %v3334_v41  ;;  %v478_v48 = vcombine.high %v23_v45, %v23_v45  ;;  %v3055_v49 = vld [vmem:[%s3922_s1 + $0x2f0] sm:$0xff]  }
  0x24   :  { %1867 = vmatmul.mubr.bf16.vlgmr.msra.gmra.mrb[0].mxu1 %v474_v50  ;;  %2696 = vmatprep.subr.bf16.mxu0 %v3001_v51  ;;  %v3054_v50 = vld [vmem:[%s3922_s1 + $0x230] sm:$0xff]  }
  0x25   :  { %2717 = vmatpush3.bf16.msra.mxu1 %v3000_v53  ;;  %1946 = vmatprep.mubr.bf16.mxu1 %v477_v55  ;;  %v493_v51 = vcombine.high %v485_v47, %v485_v47  ;;  %v3523_v52 = vrot.slane %v478_v48, %v3334_v41  ;;  %v3057_v53 = vld [vmem:[%s3922_s1 + $0x278] sm:$0xff]   ;;  %v3104_v45 = vld [vmem:[%s3922_s1 + $0x4d0] sm:$0xff]  }
  0x26   :  { %2718 = vmatprep.subr.bf16.mxu1 %v3003_v54  ;;  %v3056_v54 = vld [vmem:[%s3922_s1 + $0x2b0] sm:$0xff]  }
  0x27   :  { %2697 = vmatpush3.bf16.msra.mxu0 %v3002_v56  ;;  %v515_v55 = vrot.slane %v493_v51, %v3334_v41  ;;  %v494_v56 = vcombine.high %v3523_v52, %v3523_v52  ;;  %v3105_v48 = vld [vmem:[%s3922_s1 + $0x490] sm:$0xff]   ;;  %v3110_v51 = vld [vmem:[%s3922_s1 + $0x460] sm:$0xff]  }
  0x28   :  { %2698 = vmatprep.subr.bf16.mxu0 %v3005_v57  ;;  %v3059_v57 = vld [vmem:[%s3922_s1 + $0x2f8] sm:$0xff]  }
  0x29   :  { %2719 = vmatpush3.bf16.msra.mxu1 %v3004_v58  ;;  %v3058_v58 = vld [vmem:[%s3922_s1 + $0x238] sm:$0xff]  }
  0x2a   :  { %2720 = vmatprep.subr.bf16.mxu1 %v3007_v59  ;;  %v525_v59 = vcombine.high %v515_v55, %v515_v55 }
  0x2b   :  { %2699 = vmatpush3.bf16.msra.mxu0 %v3006_v60  ;;  %v501_v60 = vrot.slane %v485_v47, %v3334_v41  ;;  %v3106_v47 = vld [vmem:[%s3922_s1 + $0x458] sm:$0xff]  }
  0x2c   :  { %2700 = vmatprep.subr.bf16.mxu0 %v3009_v61  ;;  %v3061_v61 = vld [vmem:[%s3922_s1 + $0x340] sm:$0xff]  }
  0x2d   :  { %2721 = vmatpush3.bf16.msra.mxu1 %v3008_v62  ;;  %v3060_v62 = vld [vmem:[%s3922_s1 + $0x2b8] sm:$0xff]  }
  0x2e   :  { %2722 = vmatprep.subr.bf16.mxu1 %v3011_v63  ;;  %v522_v63 = vrot.slane %v494_v56, %v3334_v41  ;;  %v3113_v56 = vld [vmem:[%s3922_s1 + $0x4a0] sm:$0xff]  }
  0x2f   :  { %2701 = vmatpush3.bf16.msra.mxu0 %v3010_v0  ;;  %v3063_v0 = vld [vmem:[%s3922_s1 + $0x3c0] sm:$0xff]  }
  0x30   :  { %2702 = vmatprep.subr.bf16.mxu0 %v3013_v1  ;;  %v3062_v1 = vld [vmem:[%s3922_s1 + $0x300] sm:$0xff]  }
  0x31   :  { %2723 = vmatpush3.bf16.msra.mxu1 %v3012_v2  ;;  %v523_v2 = vcombine.high %v501_v60, %v501_v60 }
  0x32   :  { %2724 = vmatprep.subr.bf16.mxu1 %v3015_v3  ;;  %v3065_v3 = vld [vmem:[%s3922_s1 + $0x348] sm:$0xff]  }
  0x33   :  { %2703 = vmatpush3.bf16.msra.mxu0 %v3014_v4  ;;  %v3064_v4 = vld [vmem:[%s3922_s1 + $0x380] sm:$0xff]  }
  0x34   :  { %2704 = vmatprep.subr.bf16.mxu0 %v3017_v5  ;;  %v526_v5 = vcombine.high %v522_v63, %v522_v63 }
  0x35   :  { %2725 = vmatpush3.bf16.msra.mxu1 %v3016_v6  ;;  %v3067_v6 = vld [vmem:[%s3922_s1 + $0x3c8] sm:$0xff]  }
  0x36   :  { %2726 = vmatprep.subr.bf16.mxu1 %v3019_v7  ;;  %v3066_v7 = vld [vmem:[%s3922_s1 + $0x308] sm:$0xff]  }
  0x37   :  { %2705 = vmatpush3.bf16.msra.mxu0 %v3018_v8  ;;  %v3069_v8 = vld [vmem:[%s3922_s1 + $0x350] sm:$0xff]  }
  0x38   :  { %2706 = vmatprep.subr.bf16.mxu0 %v3021_v9  ;;  %v3068_v9 = vld [vmem:[%s3922_s1 + $0x388] sm:$0xff]  }
  0x39   :  { %2727 = vmatpush3.bf16.msra.mxu1 %v3020_v10  ;;  %v3071_v10 = vld [vmem:[%s3922_s1 + $0x3d0] sm:$0xff]  }
  0x3a   :  { %2728 = vmatprep.subr.bf16.mxu1 %v3023_v11  ;;  %v3070_v11 = vld [vmem:[%s3922_s1 + $0x310] sm:$0xff]  }
  0x3b   :  { %2707 = vmatpush3.bf16.msra.mxu0 %v3022_v12  ;;  %v3073_v12 = vld [vmem:[%s3922_s1 + $0x358] sm:$0xff]  }
  0x3c   :  { %2708 = vmatprep.subr.bf16.mxu0 %v3025_v13  ;;  %v3072_v13 = vld [vmem:[%s3922_s1 + $0x390] sm:$0xff]  }
  0x3d   :  { %2729 = vmatpush3.bf16.msra.mxu1 %v3024_v14  ;;  %v3075_v14 = vld [vmem:[%s3922_s1 + $0x3d8] sm:$0xff]  }
  0x3e   :  { %2730 = vmatprep.subr.bf16.mxu1 %v3027_v15  ;;  %v3074_v15 = vld [vmem:[%s3922_s1 + $0x318] sm:$0xff]  }
  0x3f   :  { %2709 = vmatpush3.bf16.msra.mxu0 %v3026_v16  ;;  %v3077_v16 = vld [vmem:[%s3922_s1 + $0x360] sm:$0xff]  }
  0x40   :  { %2738 = vmatprep.subr.bf16.mxu0 %v3029_v18  ;;  %v3079_v18 = vld [vmem:[%s3922_s1 + $0x3e0] sm:$0xff]  }
  0x41   :  { %2731 = vmatpush3.bf16.msra.mxu1 %v3028_v19  ;;  %v3078_v19 = vld [vmem:[%s3922_s1 + $0x320] sm:$0xff]  }
  0x42   :  { %1907 = vmatmul.mubr.bf16.vlgmr.msra.gmra.mrb[4].mxu0 %v459_v17  ;;  %2760 = vmatprep.subr.bf16.mxu1 %v3031_v20  ;;  %v3076_v17 = vld [vmem:[%s3922_s1 + $0x398] sm:$0xff]   ;;  %v3081_v20 = vld [vmem:[%s3922_s1 + $0x368] sm:$0xff]  }
  0x43   :  { %2739 = vmatpush3.bf16.msra.mxu0 %v3030_v21  ;;  %1986 = vmatprep.mubr.bf16.mxu0 %v515_v55  ;;  %v3080_v21 = vld [vmem:[%s3922_s1 + $0x3a0] sm:$0xff]   ;;  %v3114_v55 = vld [vmem:[%s3922_s1 + $0x468] sm:$0xff]  }
  0x44   :  { %1947 = vmatmul.mubr.bf16.vlgmr.msra.gmra.mrb[4].mxu1 %v475_v22  ;;  %2740 = vmatprep.subr.bf16.mxu0 %v3033_v23  ;;  %v3083_v22 = vld [vmem:[%s3922_s1 + $0x3e8] sm:$0xff]  }
  0x45   :  { %2761 = vmatpush3.bf16.msra.mxu1 %v3032_v24  ;;  %2026 = vmatprep.mubr.bf16.mxu1 %v525_v59  ;;  %v3082_v23 = vld [vmem:[%s3922_s1 + $0x328] sm:$0xff]   ;;  %v3085_v24 = vld [vmem:[%s3922_s1 + $0x370] sm:$0xff]  }
  0x46   :  { %2762 = vmatprep.subr.bf16.mxu1 %v3035_v25  ;;  %v3084_v25 = vld [vmem:[%s3922_s1 + $0x3a8] sm:$0xff]   ;;  %v3118_v59 = vld [vmem:[%s3922_s1 + $0x470] sm:$0xff]  }
  0x47   :  { %2741 = vmatpush3.bf16.msra.mxu0 %v3034_v26  ;;  %v3087_v26 = vld [vmem:[%s3922_s1 + $0x3f0] sm:$0xff]  }
  0x48   :  { %2742 = vmatprep.subr.bf16.mxu0 %v3037_v27  ;;  %v3086_v27 = vld [vmem:[%s3922_s1 + $0x330] sm:$0xff]  }
  0x49   :  { %2763 = vmatpush3.bf16.msra.mxu1 %v3036_v28  ;;  %v3089_v28 = vld [vmem:[%s3922_s1 + $0x378] sm:$0xff]  }
  0x4a   :  { %2764 = vmatprep.subr.bf16.mxu1 %v3039_v29  ;;  %v3088_v29 = vld [vmem:[%s3922_s1 + $0x3b0] sm:$0xff]  }
  0x4b   :  { %2743 = vmatpush3.bf16.msra.mxu0 %v3038_v30  ;;  %v3091_v30 = vld [vmem:[%s3922_s1 + $0x3f8] sm:$0xff]  }
  0x4c   :  { %2744 = vmatprep.subr.bf16.mxu0 %v3041_v31  ;;  %v3090_v31 = vld [vmem:[%s3922_s1 + $0x338] sm:$0xff]  }
  0x4d   :  { %2765 = vmatpush3.bf16.msra.mxu1 %v3040_v32  ;;  %v508_v32 = vrot.slane %v3523_v52, %v3334_v41  ;;  %v3109_v52 = vld [vmem:[%s3922_s1 + $0x498] sm:$0xff]  }
  0x4e   :  { %2766 = vmatprep.subr.bf16.mxu1 %v3043_v33  ;;  %v3094_v33 = vld [vmem:[%s3922_s1 + $0x440] sm:$0xff]  }
  0x4f   :  { %2745 = vmatpush3.bf16.msra.mxu0 %v3042_v34  ;;  %v3093_v34 = vld [vmem:[%s3922_s1 + $0x3b8] sm:$0xff]  }
  0x50   :  { %2746 = vmatprep.subr.bf16.mxu0 %v3045_v35  ;;  %v3096_v35 = vld [vmem:[%s3922_s1 + $0x4c0] sm:$0xff]  }
  0x51   :  { %2767 = vmatpush3.bf16.msra.mxu1 %v3044_v36  ;;  %v3095_v36 = vld [vmem:[%s3922_s1 + $0x400] sm:$0xff]  }
  0x52   :  { %2768 = vmatprep.subr.bf16.mxu1 %v3047_v37  ;;  %v524_v37 = vcombine.high %v508_v32, %v508_v32 }
  0x53   :  { %2747 = vmatpush3.bf16.msra.mxu0 %v3046_v38  ;;  %v3098_v38 = vld [vmem:[%s3922_s1 + $0x448] sm:$0xff]  }
  0x54   :  { %2748 = vmatprep.subr.bf16.mxu0 %v3049_v39  ;;  %v3097_v39 = vld [vmem:[%s3922_s1 + $0x480] sm:$0xff]  }
  0x55   :  { %2769 = vmatpush3.bf16.msra.mxu1 %v3048_v40  ;;  %v3100_v40 = vld [vmem:[%s3922_s1 + $0x4c8] sm:$0xff]  }
  0x56   :  { %2770 = vmatprep.subr.bf16.mxu1 %v3051_v42  ;;  %v3099_v42 = vld [vmem:[%s3922_s1 + $0x408] sm:$0xff]  }
  0x57   :  { %2749 = vmatpush3.bf16.msra.mxu0 %v3050_v43  ;;  %v3102_v43 = vld [vmem:[%s3922_s1 + $0x450] sm:$0xff]  }
  0x58   :  { %2750 = vmatprep.subr.bf16.mxu0 %v3053_v44  ;;  %v3101_v44 = vld [vmem:[%s3922_s1 + $0x488] sm:$0xff]  }
  0x59   :  { %2771 = vmatpush3.bf16.msra.mxu1 %v3052_v46  ;;  %v3103_v46 = vld [vmem:[%s3922_s1 + $0x410] sm:$0xff]  }
  0x5a   :  { %2772 = vmatprep.subr.bf16.mxu1 %v3055_v49  ;;  %v3108_v49 = vld [vmem:[%s3922_s1 + $0x4d8] sm:$0xff]  }
  0x5b   :  { %2751 = vmatpush3.bf16.msra.mxu0 %v3054_v50  ;;  %v3107_v50 = vld [vmem:[%s3922_s1 + $0x418] sm:$0xff]  }
  0x5c   :  { %2752 = vmatprep.subr.bf16.mxu0 %v3057_v53  ;;  %v3112_v53 = vld [vmem:[%s3922_s1 + $0x4e0] sm:$0xff]  }
  0x5d   :  { %2773 = vmatpush3.bf16.msra.mxu1 %v3056_v54  ;;  %v3111_v54 = vld [vmem:[%s3922_s1 + $0x420] sm:$0xff]  }
  0x5e   :  { %2774 = vmatprep.subr.bf16.mxu1 %v3059_v57  ;;  %v3116_v57 = vld [vmem:[%s3922_s1 + $0x4e8] sm:$0xff]  }
  0x5f   :  { %2753 = vmatpush3.bf16.msra.mxu0 %v3058_v58  ;;  %v3115_v58 = vld [vmem:[%s3922_s1 + $0x428] sm:$0xff]  }
  0x60   :  { %2782 = vmatprep.subr.bf16.mxu0 %v3061_v61  ;;  %v3117_v61 = vld [vmem:[%s3922_s1 + $0x4a8] sm:$0xff]  }
  0x61   :  { %2775 = vmatpush3.bf16.msra.mxu1 %v3060_v62 }
  0x62   :  { %1987 = vmatmul.mubr.bf16.vlgmr.msra.gmra.mrb[8].mxu0 %v501_v60  ;;  %2804 = vmatprep.subr.bf16.mxu1 %v3063_v0  ;;  %v24_v60 = vld [vmem:[%s3921_s0 + $0x10] sm:$0xff] }
  0x63   :  { %2783 = vmatpush3.bf16.msra.mxu0 %v3062_v1  ;;  %2066 = vmatprep.mubr.bf16.mxu0 %v522_v63  ;;  %v534_v62 = vrot.slane %v24_v60, %v3334_v41  ;;  %v527_v63 = vcombine.high %v24_v60, %v24_v60  ;;  %v3120_v0 = vld [vmem:[%s3922_s1 + $0x4f0] sm:$0xff]  }
  0x64   :  { %2027 = vmatmul.mubr.bf16.vlgmr.msra.gmra.mrb[8].mxu1 %v523_v2  ;;  %2784 = vmatprep.subr.bf16.mxu0 %v3065_v3  ;;  %v3119_v1 = vld [vmem:[%s3922_s1 + $0x430] sm:$0xff]  }
  0x65   :  { %2805 = vmatpush3.bf16.msra.mxu1 %v3064_v4  ;;  %2106 = vmatprep.mubr.bf16.mxu1 %v526_v5  ;;  %v542_v2 = vcombine.high %v534_v62, %v534_v62  ;;  %v3729_v3 = vrot.slane %v527_v63, %v3334_v41  ;;  %v3122_v4 = vld [vmem:[%s3922_s1 + $0x478] sm:$0xff]   ;;  %v3121_v5 = vld [vmem:[%s3922_s1 + $0x4b0] sm:$0xff]  }
  0x66   :  { %2806 = vmatprep.subr.bf16.mxu1 %v3067_v6 }
  0x67   :  { %2785 = vmatpush3.bf16.msra.mxu0 %v3066_v7  ;;  %v564_v6 = vrot.slane %v542_v2, %v3334_v41  ;;  %v543_v7 = vcombine.high %v3729_v3, %v3729_v3 }
  0x68   :  { %2786 = vmatprep.subr.bf16.mxu0 %v3069_v8  ;;  %v3124_v8 = vld [vmem:[%s3922_s1 + $0x4f8] sm:$0xff]  }
  0x69   :  { %2807 = vmatpush3.bf16.msra.mxu1 %v3068_v9  ;;  %v3123_v9 = vld [vmem:[%s3922_s1 + $0x438] sm:$0xff]  }
  0x6a   :  { %2808 = vmatprep.subr.bf16.mxu1 %v3071_v10  ;;  %v574_v10 = vcombine.high %v564_v6, %v564_v6 }
  0x6b   :  { %2787 = vmatpush3.bf16.msra.mxu0 %v3070_v11  ;;  %v550_v11 = vrot.slane %v534_v62, %v3334_v41 }
  0x6c   :  { %2788 = vmatprep.subr.bf16.mxu0 %v3073_v12  ;;  %v3126_v12 = vld [vmem:[%s3922_s1 + $0x540] sm:$0xff]  }
  0x6d   :  { %2809 = vmatpush3.bf16.msra.mxu1 %v3072_v13  ;;  %v3125_v13 = vld [vmem:[%s3922_s1 + $0x4b8] sm:$0xff]  }
  0x6e   :  { %2810 = vmatprep.subr.bf16.mxu1 %v3075_v14  ;;  %v571_v14 = vrot.slane %v543_v7, %v3334_v41 }
  0x6f   :  { %2789 = vmatpush3.bf16.msra.mxu0 %v3074_v15  ;;  %v3128_v15 = vld [vmem:[%s3922_s1 + $0x5c0] sm:$0xff]  }
  0x70   :  { %2790 = vmatprep.subr.bf16.mxu0 %v3077_v16  ;;  %v3127_v16 = vld [vmem:[%s3922_s1 + $0x500] sm:$0xff]  }
  0x71   :  { %2811 = vmatpush3.bf16.msra.mxu1 %v3076_v17  ;;  %v572_v17 = vcombine.high %v550_v11, %v550_v11 }
  0x72   :  { %2812 = vmatprep.subr.bf16.mxu1 %v3079_v18  ;;  %v3130_v18 = vld [vmem:[%s3922_s1 + $0x548] sm:$0xff]  }
  0x73   :  { %2791 = vmatpush3.bf16.msra.mxu0 %v3078_v19  ;;  %v3129_v19 = vld [vmem:[%s3922_s1 + $0x580] sm:$0xff]  }
  0x74   :  { %2792 = vmatprep.subr.bf16.mxu0 %v3081_v20  ;;  %v575_v20 = vcombine.high %v571_v14, %v571_v14 }
  0x75   :  { %2813 = vmatpush3.bf16.msra.mxu1 %v3080_v21  ;;  %v3132_v21 = vld [vmem:[%s3922_s1 + $0x5c8] sm:$0xff]  }
  0x76   :  { %2814 = vmatprep.subr.bf16.mxu1 %v3083_v22  ;;  %v3131_v22 = vld [vmem:[%s3922_s1 + $0x508] sm:$0xff]  }
  0x77   :  { %2793 = vmatpush3.bf16.msra.mxu0 %v3082_v23  ;;  %v3134_v23 = vld [vmem:[%s3922_s1 + $0x550] sm:$0xff]  }
  0x78   :  { %2794 = vmatprep.subr.bf16.mxu0 %v3085_v24  ;;  %v3133_v24 = vld [vmem:[%s3922_s1 + $0x588] sm:$0xff]  }
  0x79   :  { %2815 = vmatpush3.bf16.msra.mxu1 %v3084_v25  ;;  %v3136_v25 = vld [vmem:[%s3922_s1 + $0x5d0] sm:$0xff]  }
  0x7a   :  { %2816 = vmatprep.subr.bf16.mxu1 %v3087_v26  ;;  %v3135_v26 = vld [vmem:[%s3922_s1 + $0x510] sm:$0xff]  }
  0x7b   :  { %2795 = vmatpush3.bf16.msra.mxu0 %v3086_v27  ;;  %v3138_v27 = vld [vmem:[%s3922_s1 + $0x558] sm:$0xff]  }
  0x7c   :  { %2796 = vmatprep.subr.bf16.mxu0 %v3089_v28  ;;  %v3137_v28 = vld [vmem:[%s3922_s1 + $0x590] sm:$0xff]  }
  0x7d   :  { %2817 = vmatpush3.bf16.msra.mxu1 %v3088_v29  ;;  %v3140_v29 = vld [vmem:[%s3922_s1 + $0x5d8] sm:$0xff]  }
  0x7e   :  { %2818 = vmatprep.subr.bf16.mxu1 %v3091_v30  ;;  %v3139_v30 = vld [vmem:[%s3922_s1 + $0x518] sm:$0xff]  }
  0x7f   :  { %2797 = vmatpush3.bf16.msra.mxu0 %v3090_v31  ;;  %v3142_v31 = vld [vmem:[%s3922_s1 + $0x560] sm:$0xff]  }
  0x80   :  { %2826 = vmatprep.subr.bf16.mxu0 %v3094_v33  ;;  %v3144_v33 = vld [vmem:[%s3922_s1 + $0x5e0] sm:$0xff]  }
  0x81   :  { %2819 = vmatpush3.bf16.msra.mxu1 %v3093_v34  ;;  %v3143_v34 = vld [vmem:[%s3922_s1 + $0x520] sm:$0xff]  }
  0x82   :  { %2067 = vmatmul.mubr.bf16.vlgmr.msra.gmra.mrb[12].mxu0 %v508_v32  ;;  %2848 = vmatprep.subr.bf16.mxu1 %v3096_v35  ;;  %v3141_v32 = vld [vmem:[%s3922_s1 + $0x598] sm:$0xff]   ;;  %v3146_v35 = vld [vmem:[%s3922_s1 + $0x568] sm:$0xff]  }
  0x83   :  { %2827 = vmatpush3.bf16.msra.mxu0 %v3095_v36  ;;  %2146 = vmatprep.mubr.bf16.mxu0 %v564_v6  ;;  %v3145_v36 = vld [vmem:[%s3922_s1 + $0x5a0] sm:$0xff]  }
  0x84   :  { %2107 = vmatmul.mubr.bf16.vlgmr.msra.gmra.mrb[12].mxu1 %v524_v37  ;;  %2828 = vmatprep.subr.bf16.mxu0 %v3098_v38  ;;  %v3148_v37 = vld [vmem:[%s3922_s1 + $0x5e8] sm:$0xff]  }
  0x85   :  { %2849 = vmatpush3.bf16.msra.mxu1 %v3097_v39  ;;  %2186 = vmatprep.mubr.bf16.mxu1 %v574_v10  ;;  %v3147_v38 = vld [vmem:[%s3922_s1 + $0x528] sm:$0xff]   ;;  %v3150_v39 = vld [vmem:[%s3922_s1 + $0x570] sm:$0xff]  }
  0x86   :  { %2850 = vmatprep.subr.bf16.mxu1 %v3100_v40  ;;  %v3149_v40 = vld [vmem:[%s3922_s1 + $0x5a8] sm:$0xff]  }
  0x87   :  { %2829 = vmatpush3.bf16.msra.mxu0 %v3099_v42  ;;  %v3152_v42 = vld [vmem:[%s3922_s1 + $0x5f0] sm:$0xff]  }
  0x88   :  { %2830 = vmatprep.subr.bf16.mxu0 %v3102_v43  ;;  %v3151_v43 = vld [vmem:[%s3922_s1 + $0x530] sm:$0xff]  }
  0x89   :  { %2851 = vmatpush3.bf16.msra.mxu1 %v3101_v44  ;;  %v3154_v44 = vld [vmem:[%s3922_s1 + $0x578] sm:$0xff]  }
  0x8a   :  { %2852 = vmatprep.subr.bf16.mxu1 %v3104_v45  ;;  %v3153_v45 = vld [vmem:[%s3922_s1 + $0x5b0] sm:$0xff]  }
  0x8b   :  { %2831 = vmatpush3.bf16.msra.mxu0 %v3103_v46  ;;  %v3155_v46 = vld [vmem:[%s3922_s1 + $0x538] sm:$0xff]  }
  0x8c   :  { %2832 = vmatprep.subr.bf16.mxu0 %v3106_v47  ;;  %v3156_v47 = vld [vmem:[%s3922_s1 + $0x5f8] sm:$0xff]  }
  0x8d   :  { %2853 = vmatpush3.bf16.msra.mxu1 %v3105_v48  ;;  %v3158_v48 = vld [vmem:[%s3922_s1 + $0x5b8] sm:$0xff]  }
  0x8e   :  { %2854 = vmatprep.subr.bf16.mxu1 %v3108_v49  ;;  %v557_v49 = vrot.slane %v3729_v3, %v3334_v41 }
  0x8f   :  { %2833 = vmatpush3.bf16.msra.mxu0 %v3107_v50  ;;  %v3159_v50 = vld [vmem:[%s3922_s1 + $0x600] sm:$0xff]  }
  0x90   :  { %2834 = vmatprep.subr.bf16.mxu0 %v3110_v51  ;;  %v3196_v51 = vmov 0.0  }
  0x91   :  { %2855 = vmatpush3.bf16.msra.mxu1 %v3109_v52  ;;  %v573_v52 = vcombine.high %v557_v49, %v557_v49 }
  0x92   :  { %2856 = vmatprep.subr.bf16.mxu1 %v3112_v53 }
  0x93   :  { %2835 = vmatpush3.bf16.msra.mxu0 %v3111_v54 }
  0x94   :  { %2836 = vmatprep.subr.bf16.mxu0 %v3114_v55 }
  0x95   :  { %2857 = vmatpush3.bf16.msra.mxu1 %v3113_v56 }
  0x96   :  { %2858 = vmatprep.subr.bf16.mxu1 %v3116_v57 }
  0x97   :  { %2837 = vmatpush3.bf16.msra.mxu0 %v3115_v58 }
  0x98   :  { %2838 = vmatprep.subr.bf16.mxu0 %v3118_v59 }
  0x99   :  { %2859 = vmatpush3.bf16.msra.mxu1 %v3117_v61 }
  0x9a   :  { %2860 = vmatprep.subr.bf16.mxu1 %v3120_v0 }
  0x9b   :  { %2839 = vmatpush3.bf16.msra.mxu0 %v3119_v1 }
  0x9c   :  { %2840 = vmatprep.subr.bf16.mxu0 %v3122_v4 }
  0x9d   :  { %2861 = vmatpush3.bf16.msra.mxu1 %v3121_v5 }
  0x9e   :  { %2862 = vmatprep.subr.bf16.mxu1 %v3124_v8 }
  0x9f   :  { %2841 = vmatpush3.bf16.msra.mxu0 %v3123_v9 }
  0xa0   :  { %2870 = vmatprep.subr.bf16.mxu0 %v3126_v12 }
  0xa1   :  { %2863 = vmatpush3.bf16.msra.mxu1 %v3125_v13 }
  0xa2   :  { %2147 = vmatmul.mubr.bf16.vlgmr.msra.gmra.mrb[16].mxu0 %v550_v11  ;;  %2892 = vmatprep.subr.bf16.mxu1 %v3128_v15 }
  0xa3   :  { %2871 = vmatpush3.bf16.msra.mxu0 %v3127_v16  ;;  %2226 = vmatprep.mubr.bf16.mxu0 %v571_v14 }
  0xa4   :  { %2187 = vmatmul.mubr.bf16.vlgmr.msra.gmra.mrb[16].mxu1 %v572_v17  ;;  %2872 = vmatprep.subr.bf16.mxu0 %v3130_v18 }
  0xa5   :  { %2893 = vmatpush3.bf16.msra.mxu1 %v3129_v19  ;;  %2266 = vmatprep.mubr.bf16.mxu1 %v575_v20 }
  0xa6   :  { %2894 = vmatprep.subr.bf16.mxu1 %v3132_v21 }
  0xa7   :  { %2873 = vmatpush3.bf16.msra.mxu0 %v3131_v22 }
  0xa8   :  { %2874 = vmatprep.subr.bf16.mxu0 %v3134_v23 }
  0xa9   :  { %2895 = vmatpush3.bf16.msra.mxu1 %v3133_v24 }
  0xaa   :  { %2896 = vmatprep.subr.bf16.mxu1 %v3136_v25 }
  0xab   :  { %2875 = vmatpush3.bf16.msra.mxu0 %v3135_v26 }
  0xac   :  { %2876 = vmatprep.subr.bf16.mxu0 %v3138_v27 }
  0xad   :  { %2897 = vmatpush3.bf16.msra.mxu1 %v3137_v28 }
  0xae   :  { %2898 = vmatprep.subr.bf16.mxu1 %v3140_v29 }
  0xaf   :  { %2877 = vmatpush3.bf16.msra.mxu0 %v3139_v30 }
  0xb0   :  { %2878 = vmatprep.subr.bf16.mxu0 %v3142_v31 }
  0xb1   :  { %2899 = vmatpush3.bf16.msra.mxu1 %v3141_v32 }
  0xb2   :  { %2900 = vmatprep.subr.bf16.mxu1 %v3144_v33 }
  0xb3   :  { %2879 = vmatpush3.bf16.msra.mxu0 %v3143_v34 }
  0xb4   :  { %2880 = vmatprep.subr.bf16.mxu0 %v3146_v35 }
  0xb5   :  { %2901 = vmatpush3.bf16.msra.mxu1 %v3145_v36 }
  0xb6   :  { %2902 = vmatprep.subr.bf16.mxu1 %v3148_v37 }
  0xb7   :  { %2881 = vmatpush3.bf16.msra.mxu0 %v3147_v38 }
  0xb8   :  { %2882 = vmatprep.subr.bf16.mxu0 %v3150_v39 }
  0xb9   :  { %2903 = vmatpush3.bf16.msra.mxu1 %v3149_v40 }
  0xba   :  { %2904 = vmatprep.subr.bf16.mxu1 %v3152_v42 }
  0xbb   :  { %2883 = vmatpush3.bf16.msra.mxu0 %v3151_v43 }
  0xbc   :  { %2884 = vmatprep.subr.bf16.mxu0 %v3154_v44 }
  0xbd   :  { %2905 = vmatpush3.bf16.msra.mxu1 %v3153_v45 }
  0xbe   :  { %2906 = vmatprep.subr.bf16.mxu1 %v3156_v47 }
  0xbf   :  { %2885 = vmatpush3.bf16.msra.mxu0 %v3155_v46 }
  0xc0   :  { %2928 = vmatprep.subr.bf16.mxu0 %v3196_v51 }
  0xc1   :  { %10 = vsyncpa [#allocation3], 0  ;;  %2907 = vmatpush3.bf16.msra.mxu1 %v3158_v48  ;;  %v3160_v53 = vld [vmem:[%s3922_s1 + $0x608] sm:$0xff]   ;;  %vm3197_vm0 = vmmov 0   ;;  %v3161_v54 = vld [vmem:[%s3922_s1 + $0x610] sm:$0xff]   ;;  %vm1790_vm1 = vcmask 523264  }
  0xc2   :  { %2227 = vmatmul.mubr.bf16.vlgmr.msra.gmra.mrb[20].mxu0 %v557_v49  ;;  %2940 = vmatprep.subr.bf16.mxu1 %v3196_v51  ;;  %v3162_v55 = vld [vmem:[%s3922_s1 + $0x618] sm:$0xff]   ;;  %v2442_v59 = vld [vmem:[%s3923_s2] ss:$0 sm:$0xff]  ;;  %v3164_v7 = vld [vmem:[%s3924_s3 + $0x8] sm:$0xff]   ;;  %s3198_s9 = smov [#allocation2]  }
  0xc3   :  { %2929 = vmatpush3.bf16.msra.mxu0 %v3159_v50  ;;  %2936 = vmatprep.mubr.msk.bf16.mxu0 %vm3197_vm0, %v3196_v51  ;;  %v2443_v56 = vld.sshfl [vmem:[%s3921_s0 + $0x18] sm:$0x1 pattern:$0x75316420]  ;;  %v3165_v8 = vld [vmem:[%s3924_s3 + $0x10] sm:$0xff]   ;;  %v3167_v20 = vld [vmem:[%s3924_s3 + $0x20] sm:$0xff]  }
  0xc4   :  { %2267 = vmatmul.mubr.bf16.vlgmr.msra.gmra.mrb[20].mxu1 %v573_v52  ;;  %2930 = vmatprep.subr.bf16.mxu0 %v3196_v51  ;;  %v589_v57 = vrot.slane %v2443_v56, %v3334_v41  ;;  %v3163_v41 = vld [vmem:[%s3924_s3] sm:$0xff]   ;;  %v3166_v14 = vld [vmem:[%s3924_s3 + $0x18] sm:$0xff]   ;;  %v3168_v23 = vld [vmem:[%s3924_s3 + $0x28] sm:$0xff]   ;;  %s2434_s10 = sshll.u32 %s3198_s9, 4  ;;  %s2435_s10 = int_to_ptr.vmem [resolvable:$true] %s2434_s10 }
  0xc5   :  { %2956 = vmatprep.mubr.msk.bf16.mxu1 %vm3197_vm0, %v3196_v51  ;;  %2941 = vmatpush3.bf16.msra.mxu1 %v3163_v41  ;;  %v3169_v24 = vld [vmem:[%s3924_s3 + $0x30] sm:$0xff]   ;;  %v3170_v25 = vld [vmem:[%s3924_s3 + $0x38] sm:$0xff]   ;;  %s3171_s11 = scalar_lea.vmem %s2435_s10, 32  ;;  %p3176_p1 = scmp.lt.s32.totalorder %s2435_s10, %s2435_s10 }
  0xc6   :  { %2942 = vmatprep.subr.bf16.mxu1 %v3196_v51  ;;  %p3172_p0 = scmp.ne.s32.totalorder %s2435_s10, %s3171_s11  ;;  %p3177_p2 = scmp.lt.s32.totalorder %s3171_s11, %s3171_s11 }
  0xc7   :  { %2931 = vmatpush3.bf16.msra.mxu0 %v3160_v53 }
  0xc8   :  { %2932 = vmatprep.subr.bf16.mxu0 %v3196_v51  ;;  %p3178_p3 = por %p3177_p2, %p3176_p1 }
  0xc9   :  { %2943 = vmatpush3.bf16.msra.mxu1 %v3164_v7 }
  0xca   :  { %2944 = vmatprep.subr.bf16.mxu1 %v3196_v51  ;;  %p3179_p4 = pnand %p3178_p3, %p3172_p0 }
  0xcb   :  { %2933 = vmatpush3.bf16.msra.mxu0 %v3161_v54 }
  0xcc   :  { %2934 = vmatprep.subr.bf16.mxu0 %v3196_v51 }
  0xcd   :  { %2945 = vmatpush3.bf16.msra.mxu1 %v3165_v8 }
  0xce   :  { %2946 = vmatprep.subr.bf16.mxu1 %v3196_v51 }
  0xcf   :  { %2935 = vmatpush3.bf16.msra.mxu0 %v3162_v55 }
  0xd1   :  { %2947 = vmatpush3.bf16.msra.mxu1 %v3166_v14 }
  0xd2   :  { %2937 = vmatmul.mubr.msk.bf16.vlgmr.msra.gmra.mrb[24].mxu0 %vm1790_vm1, %v589_v57  ;;  %2948 = vmatprep.subr.bf16.mxu1 %v3196_v51 }
  0xd5   :  { %2949 = vmatpush3.bf16.msra.mxu1 %v3167_v20 }
  0xd6   :  { %2950 = vmatprep.subr.bf16.mxu1 %v3196_v51 }
  0xd9   :  { %2951 = vmatpush3.bf16.msra.mxu1 %v3168_v23 }
  0xda   :  { %2952 = vmatprep.subr.bf16.mxu1 %v3196_v51 }
  0xdd   :  { %2953 = vmatpush3.bf16.msra.mxu1 %v3169_v24 }
  0xde   :  { %2954 = vmatprep.subr.bf16.mxu1 %v3196_v51 }
  0xe1   :  { %2955 = vmatpush3.bf16.msra.mxu1 %v3170_v25 }
  0xf5   :  { %v2666_v58 = vpop.f32.mrb[0].mxu0 }
  0xf6   :  { %v2667_v60 = vpop.f32.mrb[1].mxu0 }
  0xf7   :  { %v2668_v61 = vadd.f32 %v2667_v60, %v2666_v58  ;;  %v2669_v62 = vpop.f32.mrb[2].mxu0  ;;  %v2688_v63 = vpop.f32.mrb[0].mxu1 }
  0xf8   :  { %v2670_v0 = vpop.f32.mrb[3].mxu0  ;;  %v2689_v1 = vpop.f32.mrb[1].mxu1 }
  0xf9   :  { %v1829_v2 = vadd.f32 %v2668_v61, %v2442_v59  ;;  %v2690_v3 = vadd.f32 %v2689_v1, %v2688_v63  ;;  %v2691_v4 = vpop.f32.mrb[2].mxu1 }
  0xfa   :  { %v2692_v5 = vpop.f32.mrb[3].mxu1 }
  0xfb   :  { %v1869_v6 = vadd.f32 %v2690_v3, %v1829_v2 }
 0x115   :  { %v2710_v9 = vpop.f32.mrb[4].mxu0 }
 0x116   :  { %v2711_v10 = vpop.f32.mrb[5].mxu0 }
 0x117   :  { %v2712_v11 = vadd.f32 %v2711_v10, %v2710_v9  ;;  %v2713_v12 = vpop.f32.mrb[6].mxu0  ;;  %v2732_v13 = vpop.f32.mrb[4].mxu1 }
 0x118   :  { %v2714_v15 = vpop.f32.mrb[7].mxu0  ;;  %v2733_v16 = vpop.f32.mrb[5].mxu1 }
 0x119   :  { %v1909_v17 = vadd.f32 %v2712_v11, %v1869_v6  ;;  %v2734_v18 = vadd.f32 %v2733_v16, %v2732_v13  ;;  %v2735_v19 = vpop.f32.mrb[6].mxu1 }
 0x11a   :  { %v2736_v21 = vpop.f32.mrb[7].mxu1 }
 0x11b   :  { %v1949_v22 = vadd.f32 %v2734_v18, %v1909_v17  ;;  %v2641_v17 = vld [vmem:[%s3925_s4] ss:$0 sm:$0xff] }
 0x135   :  { %v2754_v26 = vpop.f32.mrb[8].mxu0 }
 0x136   :  { %v2755_v27 = vpop.f32.mrb[9].mxu0 }
 0x137   :  { %v2756_v28 = vadd.f32 %v2755_v27, %v2754_v26  ;;  %v2757_v29 = vpop.f32.mrb[10].mxu0  ;;  %v2776_v30 = vpop.f32.mrb[8].mxu1 }
 0x138   :  { %v2758_v31 = vpop.f32.mrb[11].mxu0  ;;  %v2777_v32 = vpop.f32.mrb[9].mxu1 }
 0x139   :  { %v1989_v33 = vadd.f32 %v2756_v28, %v1949_v22  ;;  %v2778_v34 = vadd.f32 %v2777_v32, %v2776_v30  ;;  %v2779_v35 = vpop.f32.mrb[10].mxu1 }
 0x13a   :  { %v2780_v36 = vpop.f32.mrb[11].mxu1 }
 0x13b   :  { %v2029_v37 = vadd.f32 %v2778_v34, %v1989_v33 }
 0x155   :  { %v2798_v38 = vpop.f32.mrb[12].mxu0 }
 0x156   :  { %v2799_v39 = vpop.f32.mrb[13].mxu0 }
 0x157   :  { %v2800_v40 = vadd.f32 %v2799_v39, %v2798_v38  ;;  %v2801_v42 = vpop.f32.mrb[14].mxu0  ;;  %v2820_v43 = vpop.f32.mrb[12].mxu1 }
 0x158   :  { %v2802_v44 = vpop.f32.mrb[15].mxu0  ;;  %v2821_v45 = vpop.f32.mrb[13].mxu1 }
 0x159   :  { %v2069_v46 = vadd.f32 %v2800_v40, %v2029_v37  ;;  %v2822_v47 = vadd.f32 %v2821_v45, %v2820_v43  ;;  %v2823_v48 = vpop.f32.mrb[14].mxu1 }
 0x15a   :  { %v2824_v49 = vpop.f32.mrb[15].mxu1 }
 0x15b   :  { %v2109_v50 = vadd.f32 %v2822_v47, %v2069_v46 }
 0x175   :  { %v2842_v51 = vpop.f32.mrb[16].mxu0 }
 0x176   :  { %v2843_v52 = vpop.f32.mrb[17].mxu0 }
 0x177   :  { %v2844_v53 = vadd.f32 %v2843_v52, %v2842_v51  ;;  %v2845_v54 = vpop.f32.mrb[18].mxu0  ;;  %v2864_v55 = vpop.f32.mrb[16].mxu1 }
 0x178   :  { %v2846_v56 = vpop.f32.mrb[19].mxu0  ;;  %v2865_v57 = vpop.f32.mrb[17].mxu1 }
 0x179   :  { %v2149_v58 = vadd.f32 %v2844_v53, %v2109_v50  ;;  %v2866_v59 = vadd.f32 %v2865_v57, %v2864_v55  ;;  %v2867_v60 = vpop.f32.mrb[18].mxu1 }
 0x17a   :  { %v2868_v61 = vpop.f32.mrb[19].mxu1 }
 0x17b   :  { %v2189_v62 = vadd.f32 %v2866_v59, %v2149_v58 }
 0x195   :  { %v2886_v63 = vpop.f32.mrb[20].mxu0 }
 0x196   :  { %v2887_v0 = vpop.f32.mrb[21].mxu0 }
 0x197   :  { %v2888_v1 = vadd.f32 %v2887_v0, %v2886_v63  ;;  %v2889_v2 = vpop.f32.mrb[22].mxu0  ;;  %v2908_v3 = vpop.f32.mrb[20].mxu1 }
 0x198   :  { %v2890_v4 = vpop.f32.mrb[23].mxu0  ;;  %v2909_v5 = vpop.f32.mrb[21].mxu1 }
 0x199   :  { %v2229_v6 = vadd.f32 %v2888_v1, %v2189_v62  ;;  %v2910_v41 = vadd.f32 %v2909_v5, %v2908_v3  ;;  %v2911_v7 = vpop.f32.mrb[22].mxu1 }
 0x19a   :  { %v2912_v8 = vpop.f32.mrb[23].mxu1 }
 0x19b   :  { %v2269_v9 = vadd.f32 %v2910_v41, %v2229_v6 }
 0x1a5   :  { %v2308_v10 = vpop.f32.mrb[24].mxu0 }
 0x1a6   :  { %v2309_v11 = vadd.f32 %v2308_v10, %v2269_v9  ;;  %v2938_v12 = vpop.f32.mrb[25].mxu0 }
 0x1a7   :  { %v2311_v13 = vpop.f32.mrb[26].mxu0 }
 0x1a8   :  { %v2314_v14 = vmax.f32 %v2309_v11, 0.0  ;;  %v2939_v15 = vpop.f32.mrb[27].mxu0 }
 0x1aa   :  { %v2315_v16 = vpack.c.bf16 %v2314_v14, %v2314_v14 }
 0x1ac   :  { %2957 = vmatmul.mubr.bf16.vlgmr.msra.gmra.mrb[24].mxu1 %v2315_v16 }
 0x27f   :  { %v2421_v18 = vpop.f32.mrb[24].mxu1 }
 0x280   :  { %v2422_v19 = vadd.f32 %v2641_v17, %v2421_v18  ;;  %v2958_v20 = vpop.f32.mrb[25].mxu1 }
 0x281   :  { %v2424_v21 = vpop.f32.mrb[26].mxu1 }
 0x282   :  { %2427 = vst [vmem:[#allocation2] sm:$0x3] %v2422_v19  ;;  %v2959_v22 = vpop.f32.mrb[27].mxu1 }
 0x283   :  { %3182 = shalt.err (!%p3179_p4)
}
 0x284   :  { %s3183_s4 = scalar_lea.hbm %s3926_s5, 32 }
 0x285   :  { %p3184_p5 = scmp.ne.s32.totalorder %s3926_s5, %s3183_s4  ;;  %p3187_p6 = scmp.lt.u32.totalorder %s3183_s4, %s3926_s5 }
 0x287   :  { %p3189_p7 = pnand %p3187_p6, %p3184_p5 }
 0x289   :  { %3192 = shalt.err (!%p3189_p7)
}
 0x28a   :  { %2437 = dma.vmem_to_hbm [thread:$0]  %s2435_s10, 32, %s3926_s5, [#allocation3]  }
 0x28b   :  { %3193 = dma.done.wait [#allocation3], 32  }
 0x28c   :  { %3194 = vsyncadd [#allocation3], 4294967264 }
 0x28d   :  { %2441 = vsyncpa [#allocation3], 1 }

// kernel: cnn_forward.2
= control target key start
LH: loop header
LB: loop body
LE: loop exit
PB: predicated region body
PF: predicated region fallthrough
CT: control target
= control target key end

     0   :  { %s6738_s18 = smov 0   ;;  %s10900_s0 = inlined_call_operand.vmem [shape: f32[2,992,32], index: 0, kind: input, shape index: {}]   ;;  %s10901_s1 = inlined_call_operand.vmem [shape: f32[9,1,32], index: 1, kind: input, shape index: {}]   ;;  %s10902_s2 = inlined_call_operand.vmem [shape: f32[1,32], index: 2, kind: input, shape index: {}]   ;;  %s10903_s3 = inlined_call_operand.vmem [shape: bf16[9,32,64], index: 3, kind: input, shape index: {}]   ;;  %s10904_s4 = inlined_call_operand.vmem [shape: f32[1,64], index: 4, kind: input, shape index: {}]   ;;  %s10905_s5 = inlined_call_operand.vmem [shape: bf16[2,49,64], index: 5, kind: output, shape index: {}]  }
   0x1 LB: > { %s5749_s19 = sadd.s32 4294967295, %s6705_s18   ;;  %p5753_p0 = scmp.ge.s32.totalorder %s6705_s18, 1  ;;  %s6705_s18 = sphi %s6738_s18, %s15_s18  }
   0x2   : > { %p187_p1 = scmp.lt.s32.totalorder %s6705_s18, 3 }
   0x4   : > { %p188_p2 = pnand %p5753_p0, %p187_p1 }
   0x6   : > { %191 = sbr.rel (%p188_p2) target bundleno = 1065 (0x429), region = 40 }
   0xd   : > { %v6636_v0 = vld [vmem:[%s10903_s3 + $0x30] sm:$0xff]   ;;  %p215_p3 = scmp.lt.s32.totalorder %s5749_s19, 1  ;;  %v6637_v1 = vld [vmem:[%s10903_s3 + $0x38] sm:$0xff]   ;;  %v6638_v2 = vld [vmem:[%s10903_s3 + $0x40] sm:$0xff]   ;;  %vm2904_vm0 = vcmask 261120   ;;  %v6707_v4 = vmov 0.0  }
   0xe   : > { %6109 = vmatprep.subr.bf16.mxu1 %v6636_v0  ;;  %6237 = vmatprep.subr.bf16.mxu0 %v6638_v2  ;;  %v6761_v3 = vld [vmem:[%s10901_s1] ss:$0 sm:$0xff]  ;;  %3019 = vst.msk [vmem:[#allocation3 + $0x10] sm:$0xff] %vm2904_vm0, %v6707_v4  ;;  %3020 = vst.msk [vmem:[#allocation3 + $0x18] sm:$0xff] %vm2904_vm0, %v6707_v4  ;;  %v6806_v5 = vld [vmem:[%s10901_s1 + $0x3] ss:$0 sm:$0xff] }
   0xf   : > { %s11162_s19 = smov (!%p215_p3, %s5749_s19), 1  ;;  %6110 = vmatpush3.bf16.msra.mxu1 %v6636_v0  ;;  %11016 = vst [vmem:[#allocation5_spill] sm:$0xff] %v6761_v3  ;;  %3017 = vst.msk [vmem:[#allocation3] sm:$0xff] %vm2904_vm0, %v6707_v4  ;;  %6238 = vmatpush3.bf16.msra.mxu0 %v6638_v2  ;;  %v6639_v6 = vld [vmem:[%s10903_s3 + $0x48] sm:$0xff]   ;;  %v6878_v2 = vld [vmem:[%s10901_s1 + $0x6] ss:$0 sm:$0xff] }
  0x10   : > { %6111 = vmatprep.subr.bf16.mxu1 %v6637_v1  ;;  %s6625_s26 = smul.u32 992, %s11162_s19  ;;  %3018 = vst.msk [vmem:[#allocation3 + $0x8] sm:$0xff] %vm2904_vm0, %v6707_v4  ;;  %3021 = vst.msk [vmem:[#allocation3 + $0x20] sm:$0xff] %vm2904_vm0, %v6707_v4  ;;  %6239 = vmatprep.subr.bf16.mxu0 %v6639_v6  ;;  %vm3073_vm1 = vcmask 259072   ;;  %vm4003_vm2 = vsmask.f32 7424 }
  0x11   : > { %3022 = vst.msk [vmem:[#allocation3 + $0x28] sm:$0xff] %vm2904_vm0, %v6707_v4  ;;  %3023 = vst.msk [vmem:[#allocation3 + $0x30] sm:$0xff] %vm2904_vm0, %v6707_v4  ;;  %vm4753_vm3 = vcmask 1046528   ;;  %vm5465_vm4 = vcmask 523264   ;;  %s6626_s14 = smul.u32 28, %s11162_s19  ;;  %vm5505_vm5 = vcmask 519168  }
  0x12   : > { %3024 = vst.msk [vmem:[#allocation3 + $0x38] sm:$0xff] %vm2904_vm0, %v6707_v4  ;;  %3025 = vst.msk [vmem:[#allocation3 + $0x40] sm:$0xff] %vm2904_vm0, %v6707_v4  ;;  %s6801_s6 = scalar_lea.vmem %s10900_s0, %s6625_s26  ;;  %vm5506_vm6 = vsmask.f32 3328  ;;  %vm5537_vm8 = vcmask 519171   ;;  %vm5543_vm11 = vcmask 518144  }
  0x13   : > { %3026 = vst.msk [vmem:[#allocation3 + $0x48] sm:$0xff] %vm2904_vm0, %v6707_v4  ;;  %3027 = vst.msk [vmem:[#allocation3 + $0x50] sm:$0xff] %vm2904_vm0, %v6707_v4  ;;  %6112 = vmatpush3.bf16.msra.mxu1 %v6637_v1  ;;  %v226_v7 = vld [vmem:[%s6801_s6] sm:$0xff]  ;;  %v227_v8 = vld [vmem:[%s6801_s6 + $0x8] sm:$0xff]  ;;  %6240 = vmatpush3.bf16.msra.mxu0 %v6639_v6  ;;  %vm5538_vm9 = vsmask.f32 7950 }
  0x14   : > { %3028 = vst.msk [vmem:[#allocation3 + $0x58] sm:$0xff] %vm2904_vm0, %v6707_v4  ;;  %3029 = vst.msk [vmem:[#allocation3 + $0x60] sm:$0xff] %vm2904_vm0, %v6707_v4  ;;  %v228_v9 = vld [vmem:[%s6801_s6 + $0x10] sm:$0xff]  ;;  %v229_v10 = vld [vmem:[%s6801_s6 + $0x18] sm:$0xff]  ;;  %v353_v13 = vmul.f32 %v6761_v3, %v226_v7  ;;  %v354_v14 = vmul.f32 %v6761_v3, %v227_v8  ;;  %vm5567_vm12 = vsmask.f32 2304 }
  0x15   : > { %3030 = vst.msk [vmem:[#allocation3 + $0x68] sm:$0xff] %vm2904_vm0, %v6707_v4  ;;  %3031 = vst.msk [vmem:[#allocation3 + $0x70] sm:$0xff] %vm2904_vm0, %v6707_v4  ;;  %v230_v11 = vld [vmem:[%s6801_s6 + $0x20] sm:$0xff]  ;;  %v231_v12 = vld [vmem:[%s6801_s6 + $0x28] sm:$0xff]  ;;  %v355_v15 = vmul.f32 %v6761_v3, %v228_v9  ;;  %v356_v19 = vmul.f32 %v6761_v3, %v229_v10  ;;  %vm5599_vm14 = vsmask.f32 7946 }
  0x16   : > { %3032 = vst.msk [vmem:[#allocation3 + $0x78] sm:$0xff] %vm2904_vm0, %v6707_v4  ;;  %3033 = vst.msk [vmem:[#allocation3 + $0x80] sm:$0xff] %vm2904_vm0, %v6707_v4  ;;  %v232_v16 = vld [vmem:[%s6801_s6 + $0x30] sm:$0xff]  ;;  %v233_v17 = vld [vmem:[%s6801_s6 + $0x38] sm:$0xff]  ;;  %v357_v20 = vmul.f32 %v6761_v3, %v230_v11  ;;  %v358_v21 = vmul.f32 %v6761_v3, %v231_v12  ;;  %v585_v22 = vmul.f32 %v6806_v5, %v230_v11  ;;  %vm5598_vm15 = vcmask 519170  }
  0x17   : > { %3034 = vst.msk [vmem:[#allocation3 + $0x88] sm:$0xff] %vm2904_vm0, %v6707_v4  ;;  %3035 = vst.msk [vmem:[#allocation3 + $0x90] sm:$0xff] %vm2904_vm0, %v6707_v4  ;;  %v234_v18 = vld [vmem:[%s6801_s6 + $0x40] sm:$0xff]  ;;  %v235_v23 = vld [vmem:[%s6801_s6 + $0x48] sm:$0xff]  ;;  %v359_v26 = vmul.f32 %v6761_v3, %v232_v16  ;;  %v360_v27 = vmul.f32 %v6761_v3, %v233_v17  ;;  %v586_v29 = vmul.f32 %v6806_v5, %v231_v12 }
  0x18   : > { %3036 = vst.msk [vmem:[#allocation3 + $0x98] sm:$0xff] %vm2904_vm0, %v6707_v4  ;;  %3037 = vst.msk [vmem:[#allocation3 + $0xa0] sm:$0xff] %vm2904_vm0, %v6707_v4  ;;  %v236_v24 = vld [vmem:[%s6801_s6 + $0x50] sm:$0xff]  ;;  %v237_v25 = vld [vmem:[%s6801_s6 + $0x58] sm:$0xff]  ;;  %v361_v28 = vmul.f32 %v6761_v3, %v234_v18  ;;  %v362_v33 = vmul.f32 %v6761_v3, %v235_v23  ;;  %v587_v36 = vmul.f32 %v6806_v5, %v232_v16 }
  0x19   : > { %3038 = vst.msk [vmem:[#allocation3 + $0xa8] sm:$0xff] %vm2904_vm0, %v6707_v4  ;;  %3039 = vst.msk [vmem:[#allocation3 + $0xb0] sm:$0xff] %vm2904_vm0, %v6707_v4  ;;  %v238_v30 = vld [vmem:[%s6801_s6 + $0x60] sm:$0xff]  ;;  %v239_v31 = vld [vmem:[%s6801_s6 + $0x68] sm:$0xff]  ;;  %v363_v34 = vmul.f32 %v6761_v3, %v236_v24  ;;  %v364_v35 = vmul.f32 %v6761_v3, %v237_v25  ;;  %v588_v43 = vmul.f32 %v6806_v5, %v233_v17 }
  0x1a   : > { %3040 = vst.msk [vmem:[#allocation3 + $0xb8] sm:$0xff] %vm2904_vm0, %v6707_v4  ;;  %3041 = vst.msk [vmem:[#allocation3 + $0xc0] sm:$0xff] %vm2904_vm0, %v6707_v4  ;;  %v240_v32 = vld [vmem:[%s6801_s6 + $0x70] sm:$0xff]  ;;  %v241_v37 = vld [vmem:[%s6801_s6 + $0x78] sm:$0xff]  ;;  %v365_v40 = vmul.f32 %v6761_v3, %v238_v30  ;;  %v366_v41 = vmul.f32 %v6761_v3, %v239_v31  ;;  %v589_v47 = vmul.f32 %v6806_v5, %v234_v18 }
  0x1b   : > { %3042 = vst.msk [vmem:[#allocation3 + $0xc8] sm:$0xff] %vm2904_vm0, %v6707_v4  ;;  %3043 = vst.msk [vmem:[#allocation3 + $0xd0] sm:$0xff] %vm2904_vm0, %v6707_v4  ;;  %v6843_v38 = vld [vmem:[%s6801_s6 + $0x80] sm:$0xff]  ;;  %v6846_v39 = vld [vmem:[%s6801_s6 + $0x88] sm:$0xff]  ;;  %v367_v42 = vmul.f32 %v6761_v3, %v240_v32  ;;  %v368_v46 = vmul.f32 %v6761_v3, %v241_v37  ;;  %v590_v48 = vmul.f32 %v6806_v5, %v235_v23 }
  0x1c   : > { %3044 = vst.msk [vmem:[#allocation3 + $0xd8] sm:$0xff] %vm2904_vm0, %v6707_v4  ;;  %3045 = vst.msk [vmem:[#allocation3 + $0xe0] sm:$0xff] %vm2904_vm0, %v6707_v4  ;;  %v6853_v44 = vld [vmem:[%s6801_s6 + $0x90] sm:$0xff]  ;;  %v6856_v45 = vld [vmem:[%s6801_s6 + $0x98] sm:$0xff]  ;;  %v591_v49 = vmul.f32 %v6806_v5, %v236_v24  ;;  %v592_v50 = vmul.f32 %v6806_v5, %v237_v25  ;;  %v593_v51 = vmul.f32 %v6806_v5, %v238_v30 }
  0x1d   : > { %3046 = vst.msk [vmem:[#allocation3 + $0xe8] sm:$0xff] %vm2904_vm0, %v6707_v4  ;;  %3047 = vst.msk [vmem:[#allocation3 + $0xf0] sm:$0xff] %vm2904_vm0, %v6707_v4  ;;  %v594_v52 = vmul.f32 %v6806_v5, %v239_v31  ;;  %v595_v53 = vmul.f32 %v6806_v5, %v240_v32  ;;  %v596_v54 = vmul.f32 %v6806_v5, %v241_v37 }
  0x1e   : > { %3048 = vst.msk [vmem:[#allocation3 + $0xf8] sm:$0xff] %vm2904_vm0, %v6707_v4  ;;  %3049 = vst.msk [vmem:[#allocation3 + $0x100] sm:$0xff] %vm2904_vm0, %v6707_v4  ;;  %v597_v55 = vmul.f32 %v6806_v5, %v6843_v38  ;;  %v598_v56 = vmul.f32 %v6806_v5, %v6846_v39  ;;  %v599_v57 = vmul.f32 %v6806_v5, %v6853_v44 }
  0x1f   : > { %11017 = vst [vmem:[#allocation6_spill] sm:$0xff] %v6806_v5  ;;  %11018 = vst [vmem:[#allocation7_spill] sm:$0xff] %v6843_v38  ;;  %v600_v58 = vmul.f32 %v6806_v5, %v6856_v45  ;;  %v697_v59 = vadd.f32 %v585_v22, %v353_v13  ;;  %v698_v60 = vadd.f32 %v586_v29, %v354_v14  ;;  %v6881_v13 = vld [vmem:[%s6801_s6 + $0xa0] sm:$0xff]  ;;  %v6884_v14 = vld [vmem:[%s6801_s6 + $0xa8] sm:$0xff] }
  0x20   : > { %11019 = vst [vmem:[#allocation8_spill] sm:$0xff] %v6846_v39  ;;  %11020 = vst [vmem:[#allocation9_spill] sm:$0xff] %v6853_v44  ;;  %v699_v61 = vadd.f32 %v587_v36, %v355_v15  ;;  %v700_v62 = vadd.f32 %v588_v43, %v356_v19  ;;  %v701_v63 = vadd.f32 %v589_v47, %v357_v20  ;;  %v6887_v15 = vld [vmem:[%s6801_s6 + $0xb0] sm:$0xff]  ;;  %v6920_v36 = vld [vmem:[%s10901_s1 + $0x1] ss:$0 sm:$0xff] }
  0x21   : > { %11021 = vst [vmem:[#allocation10_spill] sm:$0xff] %v6856_v45  ;;  %v702_v0 = vadd.f32 %v590_v48, %v358_v21  ;;  %v703_v1 = vadd.f32 %v591_v49, %v359_v26  ;;  %11022 = vst [vmem:[#allocation11_spill] sm:$0xff] %v6878_v2  ;;  %v704_v4 = vadd.f32 %v592_v50, %v360_v27  ;;  %v6893_v21 = vld [vmem:[%s6801_s6 + $0xb8] sm:$0xff]  ;;  %v6929_v47 = vld [vmem:[%s6801_s6 + $0x29] sm:$0xff] }
  0x22   : > { %v705_v6 = vadd.f32 %v593_v51, %v361_v28  ;;  %v706_v7 = vadd.f32 %v594_v52, %v362_v33  ;;  %v707_v8 = vadd.f32 %v595_v53, %v363_v34  ;;  %v708_v9 = vadd.f32 %v596_v54, %v364_v35  ;;  %11023 = vst [vmem:[#allocation12_spill] sm:$0xff] %v6881_v13  ;;  %v1041_v33 = vld [vmem:[%s6801_s6 + $0x1] sm:$0xff]  ;;  %v1042_v34 = vld [vmem:[%s6801_s6 + $0x9] sm:$0xff]  ;;  %v1043_v35 = vld [vmem:[%s6801_s6 + $0x11] sm:$0xff] }
  0x23   : > { %v709_v10 = vadd.f32 %v597_v55, %v365_v40  ;;  %v710_v11 = vadd.f32 %v598_v56, %v366_v41  ;;  %v711_v12 = vadd.f32 %v599_v57, %v367_v42  ;;  %11024 = vst [vmem:[#allocation13_spill] sm:$0xff] %v6884_v14  ;;  %11025 = vst [vmem:[#allocation14_spill] sm:$0xff] %v6887_v15  ;;  %v1044_v43 = vld [vmem:[%s6801_s6 + $0x19] sm:$0xff]  ;;  %v6932_v52 = vld [vmem:[%s6801_s6 + $0x31] sm:$0xff] }
  0x24   : > { %v712_v16 = vadd.f32 %v600_v58, %v368_v46  ;;  %v817_v17 = vmul.f32 %v6878_v2, %v234_v18  ;;  %v818_v19 = vmul.f32 %v6878_v2, %v235_v23  ;;  %v819_v20 = vmul.f32 %v6878_v2, %v236_v24  ;;  %11026 = vst [vmem:[#allocation15_spill] sm:$0xff] %v6893_v21  ;;  %v6926_v46 = vld [vmem:[%s6801_s6 + $0x21] sm:$0xff]  ;;  %v6935_v53 = vld [vmem:[%s6801_s6 + $0x39] sm:$0xff]  ;;  %vm5507_vm7 = vmand %vm5505_vm5, %vm5506_vm6 }
  0x25   : > { %v820_v22 = vmul.f32 %v6878_v2, %v237_v25  ;;  %v821_v26 = vmul.f32 %v6878_v2, %v238_v30  ;;  %v822_v27 = vmul.f32 %v6878_v2, %v239_v31  ;;  %v823_v28 = vmul.f32 %v6878_v2, %v240_v32  ;;  %v6938_v54 = vld [vmem:[%s6801_s6 + $0x41] sm:$0xff]  ;;  %vm5539_vm10 = vmand %vm5537_vm8, %vm5538_vm9 }
  0x26   : > { %v824_v29 = vmul.f32 %v6878_v2, %v241_v37  ;;  %v825_v18 = vmul.f32 %v6878_v2, %v6843_v38  ;;  %v826_v23 = vmul.f32 %v6878_v2, %v6846_v39  ;;  %v827_v24 = vmul.f32 %v6878_v2, %v6853_v44  ;;  %vm5568_vm13 = vmand %vm5543_vm11, %vm5567_vm12 }
  0x27   : > { %v828_v25 = vmul.f32 %v6878_v2, %v6856_v45  ;;  %v829_v30 = vmul.f32 %v6878_v2, %v6881_v13  ;;  %v830_v31 = vmul.f32 %v6878_v2, %v6884_v14  ;;  %v831_v32 = vmul.f32 %v6878_v2, %v6887_v15  ;;  %v6640_v15 = vld [vmem:[%s10903_s3 + $0x70] sm:$0xff]  }
  0x28   : > { %v832_v37 = vmul.f32 %v6878_v2, %v6893_v21  ;;  %v929_v40 = vadd.f32 %v817_v17, %v697_v59  ;;  %v930_v41 = vadd.f32 %v818_v19, %v698_v60  ;;  %v931_v42 = vadd.f32 %v819_v20, %v699_v61  ;;  %v6941_v59 = vld [vmem:[%s6801_s6 + $0x49] sm:$0xff]  ;;  %v6944_v60 = vld [vmem:[%s6801_s6 + $0x51] sm:$0xff]  ;;  %v6947_v61 = vld [vmem:[%s6801_s6 + $0x59] sm:$0xff]  ;;  %6269 = vmatprep.subr.bf16.mxu0 %v6640_v15 }
  0x29   : > { %v932_v48 = vadd.f32 %v820_v22, %v700_v62  ;;  %v933_v49 = vadd.f32 %v821_v26, %v701_v63  ;;  %v934_v50 = vadd.f32 %v822_v27, %v702_v0  ;;  %v935_v51 = vadd.f32 %v823_v28, %v703_v1  ;;  %v6950_v17 = vld [vmem:[%s6801_s6 + $0x61] sm:$0xff]  ;;  %v6965_v20 = vld [vmem:[%s6801_s6 + $0x89] sm:$0xff]  ;;  %v6974_v22 = vld [vmem:[%s6801_s6 + $0x99] sm:$0xff] }
  0x2a   : > { %v936_v55 = vadd.f32 %v824_v29, %v704_v4  ;;  %v937_v56 = vadd.f32 %v825_v18, %v705_v6  ;;  %v938_v57 = vadd.f32 %v826_v23, %v706_v7  ;;  %v939_v58 = vadd.f32 %v827_v24, %v707_v8  ;;  %v6953_v4 = vld [vmem:[%s6801_s6 + $0x69] sm:$0xff]  ;;  %v6956_v6 = vld [vmem:[%s6801_s6 + $0x71] sm:$0xff]  ;;  %v6959_v8 = vld [vmem:[%s6801_s6 + $0x79] sm:$0xff]  ;;  %11027 = vst [vmem:[#allocation16_spill] sm:$0xff] %v6974_v22 }
  0x2b   : > { %v940_v62 = vadd.f32 %v828_v25, %v708_v9  ;;  %v941_v63 = vadd.f32 %v829_v30, %v709_v10  ;;  %v942_v0 = vadd.f32 %v830_v31, %v710_v11  ;;  %v943_v1 = vadd.f32 %v831_v32, %v711_v12  ;;  %v6962_v19 = vld [vmem:[%s6801_s6 + $0x81] sm:$0xff]  ;;  %v6971_v12 = vld [vmem:[%s6801_s6 + $0x91] sm:$0xff]  ;;  %v6987_v18 = vld [vmem:[%s6801_s6 + $0xa9] sm:$0xff] }
  0x2c   : > { %v944_v7 = vadd.f32 %v832_v37, %v712_v16  ;;  %v1169_v9 = vmul.f32 %v6920_v36, %v1041_v33  ;;  %v1170_v10 = vmul.f32 %v6920_v36, %v1042_v34  ;;  %v1171_v11 = vmul.f32 %v6920_v36, %v1043_v35  ;;  %v6977_v26 = vld [vmem:[%s6801_s6 + $0xa1] sm:$0xff]  ;;  %11029 = vst [vmem:[#allocation18_spill] sm:$0xff] %v6987_v18  ;;  %v6990_v23 = vld [vmem:[%s6801_s6 + $0xb1] sm:$0xff]  ;;  %v6993_v24 = vld [vmem:[%s6801_s6 + $0xb9] sm:$0xff] }
  0x2d   : > { %11028 = vst [vmem:[#allocation17_spill] sm:$0xff] %v6977_v26  ;;  %v1172_v16 = vmul.f32 %v6920_v36, %v1044_v43  ;;  %v1173_v27 = vmul.f32 %v6920_v36, %v6926_v46  ;;  %v1174_v28 = vmul.f32 %v6920_v36, %v6929_v47  ;;  %v1175_v29 = vmul.f32 %v6920_v36, %v6932_v52 }
  0x2e   : > { %11030 = vst [vmem:[#allocation19_spill] sm:$0xff] %v6990_v23  ;;  %11031 = vst [vmem:[#allocation20_spill] sm:$0xff] %v6993_v24  ;;  %v1176_v25 = vmul.f32 %v6920_v36, %v6935_v53  ;;  %v1177_v30 = vmul.f32 %v6920_v36, %v6938_v54  ;;  %v1178_v31 = vmul.f32 %v6920_v36, %v6941_v59  ;;  %vm5659_vm5 = vcmask 519169  }
  0x2f   : > { %v1179_v32 = vmul.f32 %v6920_v36, %v6944_v60  ;;  %v1180_v33 = vmul.f32 %v6920_v36, %v6947_v61  ;;  %v1181_v34 = vmul.f32 %v6920_v36, %v6950_v17  ;;  %v1182_v35 = vmul.f32 %v6920_v36, %v6953_v4 }
  0x30   : > { %v1183_v37 = vmul.f32 %v6920_v36, %v6956_v6  ;;  %v1184_v43 = vmul.f32 %v6920_v36, %v6959_v8  ;;  %v7015_v2 = vmul.f32 %v6920_v36, %v6962_v19  ;;  %v7019_v5 = vmul.f32 %v6920_v36, %v6965_v20 }
  0x31   : > { %v7023_v21 = vmul.f32 %v6920_v36, %v6971_v12  ;;  %v7030_v14 = vmul.f32 %v6920_v36, %v6974_v22  ;;  %v7034_v13 = vmul.f32 %v6920_v36, %v6977_v26  ;;  %v1281_v45 = vadd.f32 %v1169_v9, %v929_v40 }
  0x32   : > { %11032 = vst [vmem:[#allocation21_spill] sm:$0xff] %v7015_v2  ;;  %11033 = vst [vmem:[#allocation22_spill] sm:$0xff] %v7019_v5  ;;  %v7038_v2 = vmul.f32 %v6920_v36, %v6987_v18  ;;  %v7042_v5 = vmul.f32 %v6920_v36, %v6990_v23  ;;  %v1282_v44 = vadd.f32 %v1170_v10, %v930_v41  ;;  %vm5660_vm6 = vsmask.f32 7942 }
  0x33   : > { %11034 = vst [vmem:[#allocation23_spill] sm:$0xff] %v7023_v21  ;;  %11035 = vst [vmem:[#allocation24_spill] sm:$0xff] %v7030_v14  ;;  %v7046_v21 = vmul.f32 %v6920_v36, %v6993_v24  ;;  %v1283_v39 = vadd.f32 %v1171_v11, %v931_v42  ;;  %v1284_v14 = vadd.f32 %v1172_v16, %v932_v48 }
  0x34   : > { %11036 = vst [vmem:[#allocation25_spill] sm:$0xff] %v7034_v13  ;;  %11037 = vst [vmem:[#allocation26_spill] sm:$0xff] %v7038_v2  ;;  %v1285_v3 = vadd.f32 %v1173_v27, %v933_v49  ;;  %v1286_v38 = vadd.f32 %v1174_v28, %v934_v50  ;;  %v1287_v13 = vadd.f32 %v1175_v29, %v935_v51  ;;  %v7051_v2 = vld [vmem:[%s10901_s1 + $0x4] ss:$0 sm:$0xff]  ;;  %v7088_v28 = vld [vmem:[%s10901_s1 + $0x7] ss:$0 sm:$0xff] }
  0x35   : > { %11038 = vst [vmem:[#allocation27_spill] sm:$0xff] %v7042_v5  ;;  %11039 = vst [vmem:[#allocation28_spill] sm:$0xff] %v7046_v21  ;;  %v1288_v18 = vadd.f32 %v1176_v25, %v936_v55  ;;  %v1289_v23 = vadd.f32 %v1177_v30, %v937_v56  ;;  %v1290_v5 = vadd.f32 %v1178_v31, %v938_v57 }
  0x36   : > { %v1291_v26 = vadd.f32 %v1179_v32, %v939_v58  ;;  %v1292_v22 = vadd.f32 %v1180_v33, %v940_v62  ;;  %v1293_v36 = vadd.f32 %v1181_v34, %v941_v63  ;;  %v1294_v21 = vadd.f32 %v1182_v35, %v942_v0  ;;  %v11040_v63 = vld [vmem:[#allocation16_spill] sm:$0xff] }
  0x37   : > { %v1295_v40 = vadd.f32 %v1183_v37, %v943_v1  ;;  %v1296_v41 = vadd.f32 %v1184_v43, %v944_v7  ;;  %v1401_v15 = vmul.f32 %v7051_v2, %v6926_v46  ;;  %v1402_v42 = vmul.f32 %v7051_v2, %v6929_v47  ;;  %11041 = vst [vmem:[#allocation16_spill] sm:$0xff] %v7088_v28 }
  0x38   : > { %v1403_v48 = vmul.f32 %v7051_v2, %v6932_v52  ;;  %v1404_v49 = vmul.f32 %v7051_v2, %v6935_v53  ;;  %v1405_v50 = vmul.f32 %v7051_v2, %v6938_v54  ;;  %v1406_v51 = vmul.f32 %v7051_v2, %v6941_v59 }
  0x39   : > { %v1407_v55 = vmul.f32 %v7051_v2, %v6944_v60  ;;  %v1408_v46 = vmul.f32 %v7051_v2, %v6947_v61  ;;  %v1409_v47 = vmul.f32 %v7051_v2, %v6950_v17  ;;  %v1410_v52 = vmul.f32 %v7051_v2, %v6953_v4 }
  0x3a   : > { %v1411_v53 = vmul.f32 %v7051_v2, %v6956_v6  ;;  %v1412_v56 = vmul.f32 %v7051_v2, %v6959_v8  ;;  %v1413_v57 = vmul.f32 %v7051_v2, %v6962_v19  ;;  %v1414_v58 = vmul.f32 %v7051_v2, %v6965_v20 }
  0x3b   : > { %v1415_v62 = vmul.f32 %v7051_v2, %v6971_v12  ;;  %v1416_v0 = vmul.f32 %v7051_v2, %v11040_v63  ;;  %v1513_v1 = vadd.f32 %v1401_v15, %v1281_v45  ;;  %v1514_v7 = vadd.f32 %v1402_v42, %v1282_v44 }
  0x3c   : > { %v1515_v9 = vadd.f32 %v1403_v48, %v1283_v39  ;;  %v1516_v10 = vadd.f32 %v1404_v49, %v1284_v14  ;;  %v1517_v11 = vadd.f32 %v1405_v50, %v1285_v3  ;;  %v1518_v16 = vadd.f32 %v1406_v51, %v1286_v38  ;;  %v1862_v50 = vld [vmem:[%s6801_s6 + $0x2a] sm:$0xff]  ;;  %v1863_v51 = vld [vmem:[%s6801_s6 + $0x32] sm:$0xff] }
  0x3d   : > { %v1519_v27 = vadd.f32 %v1407_v55, %v1287_v13  ;;  %v1520_v29 = vadd.f32 %v1408_v46, %v1288_v18  ;;  %v1521_v25 = vadd.f32 %v1409_v47, %v1289_v23  ;;  %v1522_v30 = vadd.f32 %v1410_v52, %v1290_v5  ;;  %v1864_v55 = vld [vmem:[%s6801_s6 + $0x3a] sm:$0xff] }
  0x3e   : > { %v1523_v31 = vadd.f32 %v1411_v53, %v1291_v26  ;;  %v1524_v32 = vadd.f32 %v1412_v56, %v1292_v22  ;;  %v1525_v33 = vadd.f32 %v1413_v57, %v1293_v36  ;;  %v1526_v34 = vadd.f32 %v1414_v58, %v1294_v21  ;;  %v11044_v22 = vld [vmem:[#allocation19_spill] sm:$0xff]  ;;  %v1859_v36 = vld [vmem:[%s6801_s6 + $0x12] sm:$0xff]  ;;  %v7139_v57 = vld [vmem:[%s6801_s6 + $0x4a] sm:$0xff] }
  0x3f   : > { %v1527_v35 = vadd.f32 %v1415_v62, %v1295_v40  ;;  %v1528_v45 = vadd.f32 %v1416_v0, %v1296_v41  ;;  %v1633_v3 = vmul.f32 %v7088_v28, %v6938_v54  ;;  %v1634_v38 = vmul.f32 %v7088_v28, %v6941_v59  ;;  %v1857_v26 = vld [vmem:[%s6801_s6 + $0x2] sm:$0xff]  ;;  %v1860_v40 = vld [vmem:[%s6801_s6 + $0x1a] sm:$0xff]  ;;  %v7142_v58 = vld [vmem:[%s6801_s6 + $0x52] sm:$0xff] }
  0x40   : > { %v1635_v39 = vmul.f32 %v7088_v28, %v6944_v60  ;;  %v1636_v5 = vmul.f32 %v7088_v28, %v6947_v61  ;;  %v1637_v44 = vmul.f32 %v7088_v28, %v6950_v17  ;;  %v1638_v13 = vmul.f32 %v7088_v28, %v6953_v4  ;;  %v11042_v17 = vld [vmem:[#allocation17_spill] sm:$0xff]  ;;  %v1861_v41 = vld [vmem:[%s6801_s6 + $0x22] sm:$0xff] }
  0x41   : > { %v1639_v14 = vmul.f32 %v7088_v28, %v6956_v6  ;;  %v1640_v21 = vmul.f32 %v7088_v28, %v6959_v8  ;;  %v1641_v54 = vmul.f32 %v7088_v28, %v6962_v19  ;;  %v1642_v59 = vmul.f32 %v7088_v28, %v6965_v20  ;;  %v11043_v6 = vld [vmem:[#allocation18_spill] sm:$0xff]  ;;  %v1858_v20 = vld [vmem:[%s6801_s6 + $0xa] sm:$0xff]  ;;  %v7136_v56 = vld [vmem:[%s6801_s6 + $0x42] sm:$0xff] }
  0x42   : > { %v1643_v60 = vmul.f32 %v7088_v28, %v6971_v12  ;;  %v1644_v61 = vmul.f32 %v7088_v28, %v11040_v63  ;;  %v1645_v4 = vmul.f32 %v7088_v28, %v11042_v17  ;;  %v1646_v8 = vmul.f32 %v7088_v28, %v11043_v6  ;;  %v7125_v12 = vld [vmem:[%s10901_s1 + $0x2] ss:$0 sm:$0xff] }
  0x43   : > { %v1647_v19 = vmul.f32 %v7088_v28, %v11044_v22  ;;  %v1648_v18 = vmul.f32 %v7088_v28, %v6993_v24  ;;  %v1745_v23 = vadd.f32 %v1633_v3, %v1513_v1  ;;  %v1746_v37 = vadd.f32 %v1634_v38, %v1514_v7  ;;  %v7145_v7 = vld [vmem:[%s6801_s6 + $0x5a] sm:$0xff] }
  0x44   : > { %v1747_v43 = vadd.f32 %v1635_v39, %v1515_v9  ;;  %v1748_v15 = vadd.f32 %v1636_v5, %v1516_v10  ;;  %v1749_v42 = vadd.f32 %v1637_v44, %v1517_v11  ;;  %v1750_v48 = vadd.f32 %v1638_v13, %v1518_v16  ;;  %v7148_v10 = vld [vmem:[%s6801_s6 + $0x62] sm:$0xff]  ;;  %v7151_v11 = vld [vmem:[%s6801_s6 + $0x6a] sm:$0xff]  ;;  %v7154_v16 = vld [vmem:[%s6801_s6 + $0x72] sm:$0xff] }
  0x45   : > { %v1751_v49 = vadd.f32 %v1639_v14, %v1519_v27  ;;  %v1752_v46 = vadd.f32 %v1640_v21, %v1520_v29  ;;  %v1753_v47 = vadd.f32 %v1641_v54, %v1521_v25  ;;  %v1754_v52 = vadd.f32 %v1642_v59, %v1522_v30  ;;  %v1872_v30 = vld [vmem:[%s6801_s6 + $0x7a] sm:$0xff]  ;;  %v7182_v14 = vld [vmem:[%s10901_s1 + $0x5] ss:$0 sm:$0xff] }
  0x46   : > { %v1755_v53 = vadd.f32 %v1643_v60, %v1523_v31  ;;  %v1756_v62 = vadd.f32 %v1644_v61, %v1524_v32  ;;  %v1757_v63 = vadd.f32 %v1645_v4, %v1525_v33  ;;  %v1758_v0 = vadd.f32 %v1646_v8, %v1526_v34 }
  0x47   : > { %v1759_v1 = vadd.f32 %v1647_v19, %v1527_v35  ;;  %v1760_v9 = vadd.f32 %v1648_v18, %v1528_v45  ;;  %v1985_v27 = vmul.f32 %v7125_v12, %v1857_v26  ;;  %v1986_v29 = vmul.f32 %v7125_v12, %v1858_v20 }
  0x48   : > { %v1987_v25 = vmul.f32 %v7125_v12, %v1859_v36  ;;  %v1988_v31 = vmul.f32 %v7125_v12, %v1860_v40  ;;  %v1989_v32 = vmul.f32 %v7125_v12, %v1861_v41  ;;  %v1990_v33 = vmul.f32 %v7125_v12, %v1862_v50 }
  0x49   : > { %v1991_v34 = vmul.f32 %v7125_v12, %v1863_v51  ;;  %v1992_v35 = vmul.f32 %v7125_v12, %v1864_v55  ;;  %v1993_v45 = vmul.f32 %v7125_v12, %v7136_v56  ;;  %v1994_v3 = vmul.f32 %v7125_v12, %v7139_v57 }
  0x4a   : > { %v1995_v38 = vmul.f32 %v7125_v12, %v7142_v58  ;;  %v1996_v39 = vmul.f32 %v7125_v12, %v7145_v7  ;;  %v1997_v5 = vmul.f32 %v7125_v12, %v7148_v10  ;;  %v1998_v44 = vmul.f32 %v7125_v12, %v7151_v11 }
  0x4b   : > { %v1999_v13 = vmul.f32 %v7125_v12, %v7154_v16  ;;  %v2000_v21 = vmul.f32 %v7125_v12, %v1872_v30  ;;  %v2097_v54 = vadd.f32 %v1985_v27, %v1745_v23  ;;  %v2098_v59 = vadd.f32 %v1986_v29, %v1746_v37 }
  0x4c   : > { %v2099_v60 = vadd.f32 %v1987_v25, %v1747_v43  ;;  %v2100_v61 = vadd.f32 %v1988_v31, %v1748_v15  ;;  %v2101_v4 = vadd.f32 %v1989_v32, %v1749_v42  ;;  %v2102_v8 = vadd.f32 %v1990_v33, %v1750_v48 }
  0x4d   : > { %v2103_v19 = vadd.f32 %v1991_v34, %v1751_v49  ;;  %v2104_v26 = vadd.f32 %v1992_v35, %v1752_v46  ;;  %v7185_v20 = vadd.f32 %v1993_v45, %v1753_v47  ;;  %v7187_v18 = vadd.f32 %v1994_v3, %v1754_v52 }
  0x4e   : > { %v7189_v36 = vadd.f32 %v1995_v38, %v1755_v53  ;;  %v7191_v40 = vadd.f32 %v1996_v39, %v1756_v62  ;;  %v7193_v28 = vadd.f32 %v1997_v5, %v1757_v63  ;;  %v7195_v24 = vadd.f32 %v1998_v44, %v1758_v0 }
  0x4f   : > { %v7197_v23 = vadd.f32 %v1999_v13, %v1759_v1  ;;  %v7199_v37 = vadd.f32 %v2000_v21, %v1760_v9  ;;  %v2217_v43 = vmul.f32 %v7182_v14, %v1861_v41  ;;  %v2218_v15 = vmul.f32 %v7182_v14, %v1862_v50  ;;  %v7236_v1 = vld [vmem:[%s10903_s3] sm:$0xff]  }
  0x50   : > { %v2219_v42 = vmul.f32 %v7182_v14, %v1863_v51  ;;  %v2220_v48 = vmul.f32 %v7182_v14, %v1864_v55  ;;  %v2221_v49 = vmul.f32 %v7182_v14, %v7136_v56  ;;  %v2222_v46 = vmul.f32 %v7182_v14, %v7139_v57  ;;  %v7228_v55 = vld [vmem:[%s10901_s1 + $0x8] ss:$0 sm:$0xff]  ;;  %6141 = vmatprep.subr.bf16.mxu1 %v7236_v1 }
  0x51   : > { %v2223_v47 = vmul.f32 %v7182_v14, %v7142_v58  ;;  %v2224_v52 = vmul.f32 %v7182_v14, %v7145_v7  ;;  %v7215_v41 = vmul.f32 %v7182_v14, %v7148_v10  ;;  %v7219_v50 = vmul.f32 %v7182_v14, %v7151_v11 }
  0x52   : > { %v7223_v51 = vmul.f32 %v7182_v14, %v7154_v16  ;;  %v7231_v53 = vmul.f32 %v7182_v14, %v1872_v30  ;;  %v2329_v62 = vadd.f32 %v2217_v43, %v2097_v54  ;;  %v2330_v63 = vadd.f32 %v2218_v15, %v2098_v59 }
  0x53   : > { %v2331_v0 = vadd.f32 %v2219_v42, %v2099_v60  ;;  %v2332_v9 = vadd.f32 %v2220_v48, %v2100_v61  ;;  %v2333_v27 = vadd.f32 %v2221_v49, %v2101_v4  ;;  %v2334_v29 = vadd.f32 %v2222_v46, %v2102_v8  ;;  %v7267_v4 = vld [vmem:[%s6801_s6 + $0x82] sm:$0xff]  ;;  %v7270_v8 = vld [vmem:[%s6801_s6 + $0x8a] sm:$0xff]  ;;  %v7277_v48 = vld [vmem:[%s6801_s6 + $0x9a] sm:$0xff] }
  0x54   : > { %v2335_v25 = vadd.f32 %v2223_v47, %v2103_v19  ;;  %v2336_v31 = vadd.f32 %v2224_v52, %v2104_v26  ;;  %v2449_v32 = vmul.f32 %v7228_v55, %v7136_v56  ;;  %v2450_v33 = vmul.f32 %v7228_v55, %v7139_v57  ;;  %v7256_v57 = vld [vmem:[%s10902_s2] ss:$0 sm:$0xff]  ;;  %v7273_v19 = vld [vmem:[%s6801_s6 + $0x92] sm:$0xff] }
  0x55   : > { %v2451_v34 = vmul.f32 %v7228_v55, %v7142_v58  ;;  %v2452_v35 = vmul.f32 %v7228_v55, %v7145_v7  ;;  %v2453_v45 = vmul.f32 %v7228_v55, %v7148_v10  ;;  %v2454_v3 = vmul.f32 %v7228_v55, %v7151_v11 }
  0x56   : > { %v2455_v56 = vmul.f32 %v7228_v55, %v7154_v16  ;;  %v2456_v58 = vmul.f32 %v7228_v55, %v1872_v30  ;;  %v2561_v38 = vadd.f32 %v2449_v32, %v2329_v62  ;;  %v2562_v7 = vadd.f32 %v2450_v33, %v2330_v63 }
  0x57   : > { %v2563_v39 = vadd.f32 %v2451_v34, %v2331_v0  ;;  %v2564_v10 = vadd.f32 %v2452_v35, %v2332_v9  ;;  %v2565_v5 = vadd.f32 %v2453_v45, %v2333_v27  ;;  %v2566_v44 = vadd.f32 %v2454_v3, %v2334_v29  ;;  %v7307_v45 = vld [vmem:[%s6801_s6 + $0xa2] sm:$0xff] }
  0x58   : > { %v2567_v11 = vadd.f32 %v2455_v56, %v2335_v25  ;;  %v2568_v13 = vadd.f32 %v2456_v58, %v2336_v31  ;;  %v2680_v16 = vadd.f32 %v7256_v57, %v2561_v38  ;;  %v2681_v21 = vadd.f32 %v7256_v57, %v2562_v7 }
  0x59   : > { %v2682_v54 = vadd.f32 %v7256_v57, %v2563_v39  ;;  %v2683_v30 = vadd.f32 %v7256_v57, %v2564_v10  ;;  %v2684_v59 = vadd.f32 %v7256_v57, %v2565_v5  ;;  %v2685_v60 = vadd.f32 %v7256_v57, %v2566_v44 }
  0x5a   : > { %v2686_v61 = vadd.f32 %v7256_v57, %v2567_v11  ;;  %v2687_v26 = vadd.f32 %v7256_v57, %v2568_v13  ;;  %v2792_v43 = vmax.f32 %v2680_v16, 0.0  ;;  %v2793_v15 = vmax.f32 %v2681_v21, 0.0 }
  0x5b   : > { %v2794_v42 = vmax.f32 %v2682_v54, 0.0  ;;  %v2795_v49 = vmax.f32 %v2683_v30, 0.0  ;;  %v2796_v46 = vmax.f32 %v2684_v59, 0.0  ;;  %v2797_v47 = vmax.f32 %v2685_v60, 0.0 }
  0x5c   : > { %v2798_v52 = vmax.f32 %v2686_v61, 0.0  ;;  %v2799_v62 = vmax.f32 %v2687_v26, 0.0  ;;  %2905 = vst.msk [vmem:[#allocation2] sm:$0xff] %vm2904_vm0, %v2792_v43  ;;  %2906 = vst.msk [vmem:[#allocation2 + $0x8] sm:$0xff] %vm2904_vm0, %v2793_v15  ;;  %v2229_v63 = vmul.f32 %v7182_v14, %v7267_v4  ;;  %v2230_v0 = vmul.f32 %v7182_v14, %v7270_v8 }
  0x5d   : > { %2907 = vst.msk [vmem:[#allocation2 + $0x10] sm:$0xff] %vm2904_vm0, %v2794_v42  ;;  %v2231_v9 = vmul.f32 %v7182_v14, %v7273_v19  ;;  %2908 = vst.msk [vmem:[#allocation2 + $0x18] sm:$0xff] %vm2904_vm0, %v2795_v49  ;;  %v2232_v27 = vmul.f32 %v7182_v14, %v7277_v48  ;;  %v2337_v29 = vadd.f32 %v7215_v41, %v7185_v20  ;;  %v7310_v20 = vld [vmem:[%s6801_s6 + $0xaa] sm:$0xff]  ;;  %v7313_v41 = vld [vmem:[%s6801_s6 + $0xb2] sm:$0xff] }
  0x5e   : > { %2909 = vst.msk [vmem:[#allocation2 + $0x20] sm:$0xff] %vm2904_vm0, %v2796_v46  ;;  %2910 = vst.msk [vmem:[#allocation2 + $0x28] sm:$0xff] %vm2904_vm0, %v2797_v47  ;;  %v2338_v25 = vadd.f32 %v7219_v50, %v7187_v18  ;;  %v2339_v31 = vadd.f32 %v7223_v51, %v7189_v36  ;;  %v2340_v32 = vadd.f32 %v7231_v53, %v7191_v40 }
  0x5f   : > { %2911 = vst.msk [vmem:[#allocation2 + $0x30] sm:$0xff] %vm2904_vm0, %v2798_v52  ;;  %2912 = vst.msk [vmem:[#allocation2 + $0x38] sm:$0xff] %vm2904_vm0, %v2799_v62  ;;  %v2341_v33 = vadd.f32 %v2229_v63, %v7193_v28  ;;  %v2342_v34 = vadd.f32 %v2230_v0, %v7195_v24  ;;  %v2343_v35 = vadd.f32 %v2231_v9, %v7197_v23  ;;  %v7323_v24 = vld [vmem:[%s6801_s6 + $0xba] sm:$0xff]  ;;  %v11046_v9 = vld [vmem:[#allocation5_spill] sm:$0xff] }
  0x60   : > { %v2344_v18 = vadd.f32 %v2232_v27, %v7199_v37  ;;  %v2457_v36 = vmul.f32 %v7228_v55, %v7267_v4  ;;  %v2458_v40 = vmul.f32 %v7228_v55, %v7270_v8  ;;  %v2459_v28 = vmul.f32 %v7228_v55, %v7273_v19  ;;  %v11045_v0 = vld [vmem:[#allocation7_spill] sm:$0xff] }
  0x61   : > { %v2460_v23 = vmul.f32 %v7228_v55, %v7277_v48  ;;  %v2461_v50 = vmul.f32 %v7228_v55, %v7307_v45  ;;  %v2462_v37 = vmul.f32 %v7228_v55, %v7310_v20  ;;  %v2463_v51 = vmul.f32 %v7228_v55, %v7313_v41 }
  0x62   : > { %v2464_v53 = vmul.f32 %v7228_v55, %v7323_v24  ;;  %v2569_v3 = vadd.f32 %v2457_v36, %v2337_v29  ;;  %v2570_v56 = vadd.f32 %v2458_v40, %v2338_v25  ;;  %v2571_v58 = vadd.f32 %v2459_v28, %v2339_v31  ;;  %v11047_v29 = vld [vmem:[#allocation8_spill] sm:$0xff]  ;;  %v11048_v31 = vld [vmem:[#allocation9_spill] sm:$0xff] }
  0x63   : > { %v2572_v38 = vadd.f32 %v2460_v23, %v2340_v32  ;;  %v2573_v7 = vadd.f32 %v2461_v50, %v2341_v33  ;;  %v2574_v39 = vadd.f32 %v2462_v37, %v2342_v34  ;;  %v2575_v10 = vadd.f32 %v2463_v51, %v2343_v35  ;;  %v3051_v5 = vld [vmem:[#allocation2] ss:$2 sm:$0xff]  ;;  %v3055_v44 = vld [vmem:[#allocation2 + $0x1] ss:$2 sm:$0xff] }
  0x64   : > { %v2576_v11 = vadd.f32 %v2464_v53, %v2344_v18  ;;  %v2688_v13 = vadd.f32 %v7256_v57, %v2569_v3  ;;  %v2689_v16 = vadd.f32 %v7256_v57, %v2570_v56  ;;  %v2690_v21 = vadd.f32 %v7256_v57, %v2571_v58  ;;  %v3053_v54 = vld [vmem:[#allocation2 + $0x10] ss:$2 sm:$0x3f]  ;;  %v3057_v30 = vld [vmem:[#allocation2 + $0x11] ss:$2 sm:$0x3f] }
  0x65   : > { %v3066_v59 = vmax.f32 %v3051_v5, %v3055_v44  ;;  %v2691_v60 = vadd.f32 %v7256_v57, %v2572_v38  ;;  %v2692_v61 = vadd.f32 %v7256_v57, %v2573_v7  ;;  %v2693_v26 = vadd.f32 %v7256_v57, %v2574_v39  ;;  %v3059_v43 = vld [vmem:[#allocation2 + $0x20] ss:$2 sm:$0xff]  ;;  %v3063_v52 = vld [vmem:[#allocation2 + $0x21] ss:$2 sm:$0xff]  ;;  %v7360_v3 = vld [vmem:[%s6801_s6 + $0xd0] sm:$0xff] }
  0x66   : > { %v3061_v15 = vld [vmem:[#allocation2 + $0x30] ss:$2 sm:$0x3f]  ;;  %v3067_v42 = vmax.f32 %v3053_v54, %v3057_v30  ;;  %v2694_v49 = vadd.f32 %v7256_v57, %v2575_v10  ;;  %v2695_v46 = vadd.f32 %v7256_v57, %v2576_v11  ;;  %v2800_v47 = vmax.f32 %v2688_v13, 0.0  ;;  %v7352_v50 = vld [vmem:[%s6801_s6 + $0xc0] sm:$0xff]  ;;  %v7357_v53 = vld [vmem:[%s6801_s6 + $0xc8] sm:$0xff] }
  0x67   : > { %v3065_v62 = vld [vmem:[#allocation2 + $0x31] ss:$2 sm:$0x3f]  ;;  %v2801_v63 = vmax.f32 %v2689_v16, 0.0  ;;  %v369_v27 = vmul.f32 %v11046_v9, %v11045_v0  ;;  %v370_v25 = vmul.f32 %v11046_v9, %v11047_v29  ;;  %v371_v32 = vmul.f32 %v11046_v9, %v11048_v31  ;;  %v11050_v7 = vld [vmem:[#allocation12_spill] sm:$0xff]  ;;  %v11053_v13 = vld [vmem:[#allocation15_spill] sm:$0xff] }
  0x68   : > { %v3068_v33 = vmax.f32 %v3059_v43, %v3063_v52  ;;  %v3069_v34 = vmax.f32 %v3061_v15, %v3065_v62  ;;  %v2802_v35 = vmax.f32 %v2690_v21, 0.0  ;;  %v2803_v18 = vmax.f32 %v2691_v60, 0.0  ;;  %2913 = vst.msk [vmem:[#allocation2 + $0x40] sm:$0xff] %vm2904_vm0, %v2800_v47  ;;  %v7363_v56 = vld [vmem:[%s6801_s6 + $0xd8] sm:$0xff]  ;;  %v11051_v10 = vld [vmem:[#allocation13_spill] sm:$0xff] }
  0x69   : > { %v2804_v36 = vmax.f32 %v2692_v61, 0.0  ;;  %v2805_v40 = vmax.f32 %v2693_v26, 0.0  ;;  %v2806_v28 = vmax.f32 %v2694_v49, 0.0  ;;  %v2807_v23 = vmax.f32 %v2695_v46, 0.0  ;;  %2914 = vst.msk [vmem:[#allocation2 + $0x48] sm:$0xff] %vm2904_vm0, %v2801_v63  ;;  %v11049_v58 = vld [vmem:[#allocation10_spill] sm:$0xff] }
  0x6a   : > { %v3070_v37 = vmax.f32 %v3066_v59, %v3068_v33  ;;  %v3071_v51 = vmax.f32 %v3067_v42, %v3069_v34  ;;  %2915 = vst.msk [vmem:[#allocation2 + $0x50] sm:$0xff] %vm2904_vm0, %v2802_v35  ;;  %2916 = vst.msk [vmem:[#allocation2 + $0x58] sm:$0xff] %vm2904_vm0, %v2803_v18  ;;  %v372_v38 = vmul.f32 %v11046_v9, %v11049_v58  ;;  %v11052_v44 = vld [vmem:[#allocation14_spill] sm:$0xff]  ;;  %v7392_v26 = vld [vmem:[%s6801_s6 + $0xe0] sm:$0xff] }
  0x6b   : > { %v373_v39 = vmul.f32 %v11046_v9, %v11050_v7  ;;  %2917 = vst.msk [vmem:[#allocation2 + $0x60] sm:$0xff] %vm2904_vm0, %v2804_v36  ;;  %2918 = vst.msk [vmem:[#allocation2 + $0x68] sm:$0xff] %vm2904_vm0, %v2805_v40  ;;  %v374_v5 = vmul.f32 %v11046_v9, %v11051_v10  ;;  %v375_v11 = vmul.f32 %v11046_v9, %v11052_v44  ;;  %v11054_v21 = vld [vmem:[#allocation6_spill] sm:$0xff]  ;;  %v7401_v46 = vld [vmem:[%s6801_s6 + $0xe8] sm:$0xff] }
  0x6c   : > { %2919 = vst.msk [vmem:[#allocation2 + $0x70] sm:$0xff] %vm2904_vm0, %v2806_v28  ;;  %2920 = vst.msk [vmem:[#allocation2 + $0x78] sm:$0xff] %vm2904_vm0, %v2807_v23  ;;  %v376_v16 = vmul.f32 %v11046_v9, %v11053_v13  ;;  %v601_v54 = vmul.f32 %v11054_v21, %v11050_v7  ;;  %v602_v30 = vmul.f32 %v11054_v21, %v11051_v10  ;;  %v7404_v47 = vld [vmem:[%s6801_s6 + $0xf0] sm:$0xff]  ;;  %v7407_v52 = vld [vmem:[%s6801_s6 + $0xf8] sm:$0xff] }
  0x6d   : > { %3072 = vst.msk [vmem:[#allocation3 + $0x11] sm:$0xff] %vm2904_vm0, %v3070_v37  ;;  %v603_v59 = vmul.f32 %v11054_v21, %v11052_v44  ;;  %v604_v60 = vmul.f32 %v11054_v21, %v11053_v13  ;;  %v605_v61 = vmul.f32 %v11054_v21, %v7352_v50  ;;  %v606_v43 = vmul.f32 %v11054_v21, %v7357_v53  ;;  %v11055_v34 = vld [vmem:[#allocation11_spill] sm:$0xff] }
  0x6e   : > { %3074 = vst.msk [vmem:[#allocation3 + $0x19] sm:$0x3f] %vm3073_vm1, %v3071_v51  ;;  %v607_v15 = vmul.f32 %v11054_v21, %v7360_v3  ;;  %v608_v42 = vmul.f32 %v11054_v21, %v7363_v56  ;;  %v713_v49 = vadd.f32 %v601_v54, %v369_v27  ;;  %v714_v62 = vadd.f32 %v602_v30, %v370_v25 }
  0x6f   : > { %v715_v63 = vadd.f32 %v603_v59, %v371_v32  ;;  %v716_v0 = vadd.f32 %v604_v60, %v372_v38  ;;  %v717_v9 = vadd.f32 %v605_v61, %v373_v39  ;;  %v718_v29 = vadd.f32 %v606_v43, %v374_v5 }
  0x70   : > { %v719_v31 = vadd.f32 %v607_v15, %v375_v11  ;;  %v720_v33 = vadd.f32 %v608_v42, %v376_v16  ;;  %v833_v35 = vmul.f32 %v11055_v34, %v7352_v50  ;;  %v3076_v18 = vld [vmem:[#allocation2 + $0x40] ss:$2 sm:$0xff]  ;;  %v3080_v36 = vld [vmem:[#allocation2 + $0x41] ss:$2 sm:$0xff]  ;;  %v834_v27 = vmul.f32 %v11055_v34, %v7357_v53 }
  0x71   : > { %v835_v40 = vmul.f32 %v11055_v34, %v7360_v3  ;;  %v836_v25 = vmul.f32 %v11055_v34, %v7363_v56  ;;  %v837_v32 = vmul.f32 %v11055_v34, %v7392_v26  ;;  %v3078_v28 = vld [vmem:[#allocation2 + $0x50] ss:$2 sm:$0x3f]  ;;  %v3082_v23 = vld [vmem:[#allocation2 + $0x51] ss:$2 sm:$0x3f]  ;;  %v3091_v37 = vmax.f32 %v3076_v18, %v3080_v36 }
  0x72   : > { %v838_v51 = vmul.f32 %v11055_v34, %v7401_v46  ;;  %v839_v58 = vmul.f32 %v11055_v34, %v7404_v47  ;;  %v840_v38 = vmul.f32 %v11055_v34, %v7407_v52  ;;  %v3084_v7 = vld [vmem:[#allocation2 + $0x60] ss:$2 sm:$0xff]  ;;  %v3092_v10 = vmax.f32 %v3078_v28, %v3082_v23  ;;  %v3088_v21 = vld [vmem:[#allocation2 + $0x61] ss:$2 sm:$0xff]  ;;  %v11057_v34 = vld [vmem:[#allocation21_spill] sm:$0xff] }
  0x73   : > { %v3086_v39 = vld [vmem:[#allocation2 + $0x70] ss:$2 sm:$0x3f]  ;;  %v945_v5 = vadd.f32 %v833_v35, %v713_v49  ;;  %v946_v44 = vadd.f32 %v834_v27, %v714_v62  ;;  %v947_v11 = vadd.f32 %v835_v40, %v715_v63  ;;  %v948_v54 = vadd.f32 %v836_v25, %v716_v0  ;;  %v3090_v43 = vld [vmem:[#allocation2 + $0x71] ss:$2 sm:$0x3f] }
  0x74   : > { %v3389_v13 = vld [vmem:[#allocation3 + $0x10] sm:$0xff]  ;;  %v949_v30 = vadd.f32 %v837_v32, %v717_v9  ;;  %v950_v59 = vadd.f32 %v838_v51, %v718_v29  ;;  %v951_v60 = vadd.f32 %v839_v58, %v719_v31  ;;  %v3093_v15 = vmax.f32 %v3084_v7, %v3088_v21  ;;  %v11058_v63 = vld [vmem:[#allocation22_spill] sm:$0xff]  ;;  %v11059_v18 = vld [vmem:[#allocation23_spill] sm:$0xff] }
  0x75   : > { %v3390_v16 = vld [vmem:[#allocation3 + $0x18] sm:$0xff]  ;;  %v952_v42 = vadd.f32 %v840_v38, %v720_v33  ;;  %v1297_v49 = vadd.f32 %v11057_v34, %v945_v5  ;;  %v3094_v62 = vmax.f32 %v3086_v39, %v3090_v43  ;;  %v1298_v35 = vadd.f32 %v11058_v63, %v946_v44  ;;  %v11060_v0 = vld [vmem:[#allocation24_spill] sm:$0xff]  ;;  %v11061_v32 = vld [vmem:[#allocation25_spill] sm:$0xff] }
  0x76   : > { %v7425_v61 = vpack.c.bf16 %v3390_v16, %v3389_v13  ;;  %v1299_v36 = vadd.f32 %v11059_v18, %v947_v11  ;;  %v1300_v9 = vadd.f32 %v11060_v0, %v948_v54  ;;  %v3095_v29 = vmax.f32 %v3091_v37, %v3093_v15  ;;  %v7436_v40 = vld [vmem:[%s6801_s6 + $0xc1] sm:$0xff]  ;;  %v7439_v33 = vld [vmem:[%s6801_s6 + $0xc9] sm:$0xff]  ;;  %v7442_v25 = vld [vmem:[%s6801_s6 + $0xd1] sm:$0xff] }
  0x77   : > { %v1301_v28 = vadd.f32 %v11061_v32, %v949_v30  ;;  %v3096_v23 = vmax.f32 %v3092_v10, %v3094_v62  ;;  %v7446_v51 = vld [vmem:[%s6801_s6 + $0xd9] sm:$0xff]  ;;  %v11064_v39 = vld [vmem:[#allocation28_spill] sm:$0xff]  ;;  %v1417_v11 = vmul.f32 %v7051_v2, %v11042_v17  ;;  %v1418_v10 = vmul.f32 %v7051_v2, %v11043_v6 }
  0x78   : > { %11056 = vst [vmem:[#allocation17_spill] sm:$0xff] %v7425_v61  ;;  %6113 = vmatprep.mubr.msk.bf16.mxu1 %vm2904_vm0, %v7425_v61  ;;  %v4010_v31 = vshll.u32 %v7425_v61, 16  ;;  %v4014_v27 = vshrl.u32 %v7425_v61, 16  ;;  %v11062_v58 = vld [vmem:[#allocation26_spill] sm:$0xff]  ;;  %v11063_v37 = vld [vmem:[#allocation27_spill] sm:$0xff]  ;;  %v1304_v5 = vadd.f32 %v11064_v39, %v952_v42  ;;  %3097 = vst.msk [vmem:[#allocation3 + $0x21] sm:$0xff] %vm2904_vm0, %v3095_v29  ;;  %v1419_v13 = vmul.f32 %v7051_v2, %v11044_v22 }
  0x79   : > { %v1302_v38 = vadd.f32 %v11062_v58, %v950_v59  ;;  %v1303_v7 = vadd.f32 %v11063_v37, %v951_v60  ;;  %3098 = vst.msk [vmem:[#allocation3 + $0x29] sm:$0x3f] %vm3073_vm1, %v3096_v23  ;;  %v11066_v16 = vld [vmem:[#allocation20_spill] sm:$0xff]  ;;  %v1421_v54 = vmul.f32 %v7051_v2, %v7436_v40  ;;  %v1422_v30 = vmul.f32 %v7051_v2, %v7439_v33  ;;  %v7481_v42 = vld [vmem:[%s6801_s6 + $0xf1] sm:$0xff]  ;;  %v7484_v34 = vld [vmem:[%s6801_s6 + $0xf9] sm:$0xff] }
  0x7a   : > { %v7452_v44 = vrot.slane %v4010_v31, 1  ;;  %v1420_v21 = vmul.f32 %v7051_v2, %v11066_v16  ;;  %v1423_v17 = vmul.f32 %v7051_v2, %v7442_v25  ;;  %v7473_v6 = vld [vmem:[%s6801_s6 + $0xe1] sm:$0xff]  ;;  %v7476_v22 = vld [vmem:[%s6801_s6 + $0xe9] sm:$0xff]  ;;  %v1424_v60 = vmul.f32 %v7051_v2, %v7446_v51 }
  0x7b   : > { %v1529_v43 = vadd.f32 %v1417_v11, %v1297_v49  ;;  %v1530_v15 = vadd.f32 %v1418_v10, %v1298_v35  ;;  %v1531_v62 = vadd.f32 %v1419_v13, %v1299_v36  ;;  %v1533_v18 = vadd.f32 %v1421_v54, %v1301_v28 }
  0x7c   : > { %11065 = vst [vmem:[#allocation18_spill] sm:$0xff] %v7452_v44  ;;  %v7470_v59 = vor.u32 %v4014_v27, %v7452_v44  ;;  %v1532_v63 = vadd.f32 %v1420_v21, %v1300_v9  ;;  %v1534_v0 = vadd.f32 %v1422_v30, %v1302_v38  ;;  %v1535_v29 = vadd.f32 %v1423_v17, %v1303_v7  ;;  %v11067_v27 = vld [vmem:[#allocation16_spill] sm:$0xff] }
  0x7d   : > { %v1536_v31 = vadd.f32 %v1424_v60, %v1304_v5  ;;  %v1649_v32 = vmul.f32 %v11067_v27, %v7436_v40  ;;  %v1650_v23 = vmul.f32 %v11067_v27, %v7439_v33  ;;  %v1651_v2 = vmul.f32 %v11067_v27, %v7442_v25 }
  0x7e   : > { %v1652_v49 = vmul.f32 %v11067_v27, %v7446_v51  ;;  %v1653_v35 = vmul.f32 %v11067_v27, %v7473_v6  ;;  %v1654_v36 = vmul.f32 %v11067_v27, %v7476_v22  ;;  %v1655_v9 = vmul.f32 %v11067_v27, %v7481_v42 }
  0x7f   : > { %v1656_v28 = vmul.f32 %v11067_v27, %v7484_v34  ;;  %v1761_v58 = vadd.f32 %v1649_v32, %v1529_v43  ;;  %v1762_v38 = vadd.f32 %v1650_v23, %v1530_v15  ;;  %v3391_v37 = vld [vmem:[#allocation3 + $0x20] sm:$0xff]  ;;  %v1763_v7 = vadd.f32 %v1651_v2, %v1531_v62 }
  0x80   : > { %v1764_v39 = vadd.f32 %v1652_v49, %v1532_v63  ;;  %v1765_v5 = vadd.f32 %v1653_v35, %v1533_v18  ;;  %v1766_v11 = vadd.f32 %v1654_v36, %v1534_v0  ;;  %v3392_v10 = vld [vmem:[#allocation3 + $0x28] sm:$0xff]  ;;  %v1767_v13 = vadd.f32 %v1655_v9, %v1535_v29  ;;  %v7534_v27 = vld [vmem:[%s6801_s6 + $0xda] sm:$0xff] }
  0x81   : > { %v1768_v16 = vadd.f32 %v1656_v28, %v1536_v31  ;;  %v2001_v21 = vmul.f32 %v7125_v12, %v7267_v4  ;;  %v2002_v54 = vmul.f32 %v7125_v12, %v7270_v8  ;;  %v7506_v30 = vpack.c.bf16 %v3392_v10, %v3391_v37  ;;  %v7525_v63 = vld [vmem:[%s6801_s6 + $0xc2] sm:$0xff]  ;;  %v7528_v18 = vld [vmem:[%s6801_s6 + $0xca] sm:$0xff]  ;;  %v7531_v31 = vld [vmem:[%s6801_s6 + $0xd2] sm:$0xff] }
  0x82   : > { %v2003_v17 = vmul.f32 %v7125_v12, %v7273_v19  ;;  %v2004_v60 = vmul.f32 %v7125_v12, %v7277_v48  ;;  %v2005_v43 = vmul.f32 %v7125_v12, %v7307_v45  ;;  %v2006_v15 = vmul.f32 %v7125_v12, %v7310_v20 }
  0x83   : > { %11068 = vst [vmem:[#allocation19_spill] sm:$0xff] %v7506_v30  ;;  %v2007_v4 = vmul.f32 %v7125_v12, %v7313_v41  ;;  %v2008_v8 = vmul.f32 %v7125_v12, %v7323_v24  ;;  %v2113_v62 = vadd.f32 %v2001_v21, %v1761_v58  ;;  %6114 = vmatmul.mubr.msk.bf16.vlgmr.msra.gmra.mrb[0].mxu1 %vm2904_vm0, %v7506_v30  ;;  %v4017_v19 = vshll.u32 %v7506_v30, 16 }
  0x84   : > { %v4021_v48 = vshrl.u32 %v7506_v30, 16  ;;  %v2114_v0 = vadd.f32 %v2002_v54, %v1762_v38  ;;  %v2115_v29 = vadd.f32 %v2003_v17, %v1763_v7  ;;  %v2116_v12 = vadd.f32 %v2004_v60, %v1764_v39  ;;  %6142 = vmatpush3.bf16.msra.mxu1 %v7236_v1  ;;  %v7556_v7 = vld [vmem:[%s6801_s6 + $0xe2] sm:$0xff]  ;;  %v7568_v39 = vld [vmem:[%s6801_s6 + $0xf2] sm:$0xff] }
  0x85   : > { %v2117_v32 = vadd.f32 %v2005_v43, %v1765_v5  ;;  %v2118_v23 = vadd.f32 %v2006_v15, %v1766_v11  ;;  %v2119_v2 = vadd.f32 %v2007_v4, %v1767_v13  ;;  %v4019_v49 = vrot.slane %v4017_v19, 1  ;;  %v7571_v5 = vld [vmem:[%s6801_s6 + $0xfa] sm:$0xff] }
  0x86   : > { %v2120_v35 = vadd.f32 %v2008_v8, %v1768_v16  ;;  %v2233_v36 = vmul.f32 %v7182_v14, %v7307_v45  ;;  %v2234_v9 = vmul.f32 %v7182_v14, %v7310_v20  ;;  %v2235_v28 = vmul.f32 %v7182_v14, %v7313_v41 }
  0x87   : > { %v2236_v58 = vmul.f32 %v7182_v14, %v7323_v24  ;;  %v2237_v38 = vmul.f32 %v7182_v14, %v7525_v63  ;;  %v2238_v1 = vmul.f32 %v7182_v14, %v7528_v18  ;;  %v7551_v37 = vsel %vm4003_vm2, %v7470_v59, %v4019_v49  ;;  %v7565_v24 = vld [vmem:[%s6801_s6 + $0xea] sm:$0xff] }
  0x88   : > { %11069 = vst [vmem:[#allocation7_spill] sm:$0xff] %v7551_v37  ;;  %v7553_v45 = vor.u32 %v4021_v48, %v4019_v49  ;;  %v2239_v20 = vmul.f32 %v7182_v14, %v7531_v31  ;;  %v2240_v41 = vmul.f32 %v7182_v14, %v7534_v27  ;;  %6241 = vmatprep.mubr.msk.bf16.mxu0 %vm2904_vm0, %v7551_v37 }
  0x89   : > { %v2345_v59 = vadd.f32 %v2233_v36, %v2113_v62  ;;  %v2346_v11 = vadd.f32 %v2234_v9, %v2114_v0  ;;  %v2347_v10 = vadd.f32 %v2235_v28, %v2115_v29  ;;  %v2348_v13 = vadd.f32 %v2236_v58, %v2116_v12 }
  0x8a   : > { %v2349_v16 = vadd.f32 %v2237_v38, %v2117_v32  ;;  %v2350_v21 = vadd.f32 %v2238_v1, %v2118_v23  ;;  %v2351_v54 = vadd.f32 %v2239_v20, %v2119_v2  ;;  %v2352_v17 = vadd.f32 %v2240_v41, %v2120_v35 }
  0x8b   : > { %v2465_v14 = vmul.f32 %v7228_v55, %v7525_v63  ;;  %v2466_v60 = vmul.f32 %v7228_v55, %v7528_v18  ;;  %v2467_v43 = vmul.f32 %v7228_v55, %v7531_v31  ;;  %v2468_v15 = vmul.f32 %v7228_v55, %v7534_v27 }
  0x8c   : > { %v2469_v4 = vmul.f32 %v7228_v55, %v7556_v7  ;;  %v2470_v8 = vmul.f32 %v7228_v55, %v7565_v24  ;;  %v2471_v62 = vmul.f32 %v7228_v55, %v7568_v39  ;;  %v2472_v19 = vmul.f32 %v7228_v55, %v7571_v5 }
  0x8d   : > { %v2577_v48 = vadd.f32 %v2465_v14, %v2345_v59  ;;  %v2578_v0 = vadd.f32 %v2466_v60, %v2346_v11  ;;  %v2579_v29 = vadd.f32 %v2467_v43, %v2347_v10  ;;  %v2580_v12 = vadd.f32 %v2468_v15, %v2348_v13  ;;  %v7605_v14 = vld [vmem:[%s6801_s6 + $0x108] sm:$0xff]  ;;  %v7608_v60 = vld [vmem:[%s6801_s6 + $0x110] sm:$0xff]  ;;  %v7611_v43 = vld [vmem:[%s6801_s6 + $0x118] sm:$0xff] }
  0x8e   : > { %v2581_v32 = vadd.f32 %v2469_v4, %v2349_v16  ;;  %v2582_v23 = vadd.f32 %v2470_v8, %v2350_v21  ;;  %v2583_v2 = vadd.f32 %v2471_v62, %v2351_v54  ;;  %v2584_v49 = vadd.f32 %v2472_v19, %v2352_v17  ;;  %v7598_v17 = vld [vmem:[%s6801_s6 + $0x100] sm:$0xff] }
  0x8f   : > { %v2696_v35 = vadd.f32 %v7256_v57, %v2577_v48  ;;  %v2697_v36 = vadd.f32 %v7256_v57, %v2578_v0  ;;  %v2698_v9 = vadd.f32 %v7256_v57, %v2579_v29  ;;  %v2699_v28 = vadd.f32 %v7256_v57, %v2580_v12  ;;  %v7616_v15 = vld [vmem:[%s10901_s1] ss:$0 sm:$0xff]  ;;  %v7641_v48 = vld [vmem:[%s10901_s1 + $0x3] ss:$0 sm:$0xff] }
  0x90   : > { %v2700_v58 = vadd.f32 %v7256_v57, %v2581_v32  ;;  %v2701_v38 = vadd.f32 %v7256_v57, %v2582_v23  ;;  %v2702_v1 = vadd.f32 %v7256_v57, %v2583_v2  ;;  %v2703_v20 = vadd.f32 %v7256_v57, %v2584_v49  ;;  %11070 = vst [vmem:[#allocation5_spill] sm:$0xff] %v7641_v48  ;;  %v7652_v23 = vld [vmem:[%s6801_s6 + $0x120] sm:$0xff] }
  0x91   : > { %v2808_v41 = vmax.f32 %v2696_v35, 0.0  ;;  %v2809_v59 = vmax.f32 %v2697_v36, 0.0  ;;  %v2810_v11 = vmax.f32 %v2698_v9, 0.0  ;;  %v2811_v10 = vmax.f32 %v2699_v28, 0.0  ;;  %v7663_v35 = vld [vmem:[%s6801_s6 + $0x128] sm:$0xff]  ;;  %v7669_v36 = vld [vmem:[%s6801_s6 + $0x138] sm:$0xff] }
  0x92   : > { %v2812_v13 = vmax.f32 %v2700_v58, 0.0  ;;  %v2813_v16 = vmax.f32 %v2701_v38, 0.0  ;;  %v2814_v21 = vmax.f32 %v2702_v1, 0.0  ;;  %v2815_v54 = vmax.f32 %v2703_v20, 0.0 }
  0x93   : > { %2921 = vst.msk [vmem:[#allocation2 + $0x80] sm:$0xff] %vm2904_vm0, %v2808_v41  ;;  %2922 = vst.msk [vmem:[#allocation2 + $0x88] sm:$0xff] %vm2904_vm0, %v2809_v59  ;;  %v377_v4 = vmul.f32 %v7616_v15, %v7352_v50  ;;  %v378_v8 = vmul.f32 %v7616_v15, %v7357_v53  ;;  %v379_v62 = vmul.f32 %v7616_v15, %v7360_v3  ;;  %v7674_v59 = vld [vmem:[%s10901_s1 + $0x6] ss:$0 sm:$0xff] }
  0x94   : > { %2923 = vst.msk [vmem:[#allocation2 + $0x90] sm:$0xff] %vm2904_vm0, %v2810_v11  ;;  %2924 = vst.msk [vmem:[#allocation2 + $0x98] sm:$0xff] %vm2904_vm0, %v2811_v10  ;;  %v380_v19 = vmul.f32 %v7616_v15, %v7363_v56  ;;  %v381_v50 = vmul.f32 %v7616_v15, %v7392_v26  ;;  %v382_v53 = vmul.f32 %v7616_v15, %v7401_v46 }
  0x95   : > { %2925 = vst.msk [vmem:[#allocation2 + $0xa0] sm:$0xff] %vm2904_vm0, %v2812_v13  ;;  %2926 = vst.msk [vmem:[#allocation2 + $0xa8] sm:$0xff] %vm2904_vm0, %v2813_v16  ;;  %v383_v3 = vmul.f32 %v7616_v15, %v7404_v47  ;;  %v384_v56 = vmul.f32 %v7616_v15, %v7407_v52  ;;  %v609_v0 = vmul.f32 %v7641_v48, %v7392_v26 }
  0x96   : > { %2927 = vst.msk [vmem:[#allocation2 + $0xb0] sm:$0xff] %vm2904_vm0, %v2814_v21  ;;  %2928 = vst.msk [vmem:[#allocation2 + $0xb8] sm:$0xff] %vm2904_vm0, %v2815_v54  ;;  %v610_v29 = vmul.f32 %v7641_v48, %v7401_v46  ;;  %v611_v12 = vmul.f32 %v7641_v48, %v7404_v47  ;;  %v612_v32 = vmul.f32 %v7641_v48, %v7407_v52  ;;  %v7666_v47 = vld [vmem:[%s6801_s6 + $0x130] sm:$0xff] }
  0x97   : > { %v613_v2 = vmul.f32 %v7641_v48, %v7598_v17  ;;  %v614_v49 = vmul.f32 %v7641_v48, %v7605_v14  ;;  %v615_v26 = vmul.f32 %v7641_v48, %v7608_v60  ;;  %v616_v46 = vmul.f32 %v7641_v48, %v7611_v43  ;;  %11071 = vst [vmem:[#allocation8_spill] sm:$0xff] %v7674_v59 }
  0x98   : > { %v721_v52 = vadd.f32 %v609_v0, %v377_v4  ;;  %v722_v9 = vadd.f32 %v610_v29, %v378_v8  ;;  %v723_v28 = vadd.f32 %v611_v12, %v379_v62  ;;  %v724_v58 = vadd.f32 %v612_v32, %v380_v19 }
  0x99   : > { %v725_v38 = vadd.f32 %v613_v2, %v381_v50  ;;  %v726_v1 = vadd.f32 %v614_v49, %v382_v53  ;;  %v727_v20 = vadd.f32 %v615_v26, %v383_v3  ;;  %v728_v41 = vadd.f32 %v616_v46, %v384_v56 }
  0x9a   : > { %v841_v11 = vmul.f32 %v7674_v59, %v7598_v17  ;;  %v842_v10 = vmul.f32 %v7674_v59, %v7605_v14  ;;  %v843_v13 = vmul.f32 %v7674_v59, %v7608_v60  ;;  %v844_v16 = vmul.f32 %v7674_v59, %v7611_v43  ;;  %v3100_v21 = vld [vmem:[#allocation2 + $0x80] ss:$2 sm:$0xff]  ;;  %v3104_v50 = vld [vmem:[#allocation2 + $0x81] ss:$2 sm:$0xff] }
  0x9b   : > { %v3102_v54 = vld [vmem:[#allocation2 + $0x90] ss:$2 sm:$0x3f]  ;;  %v845_v4 = vmul.f32 %v7674_v59, %v7652_v23  ;;  %v846_v8 = vmul.f32 %v7674_v59, %v7663_v35  ;;  %v847_v62 = vmul.f32 %v7674_v59, %v7666_v47  ;;  %v848_v19 = vmul.f32 %v7674_v59, %v7669_v36  ;;  %v3106_v53 = vld [vmem:[#allocation2 + $0x91] ss:$2 sm:$0x3f] }
  0x9c   : > { %v953_v3 = vadd.f32 %v841_v11, %v721_v52  ;;  %v954_v56 = vadd.f32 %v842_v10, %v722_v9  ;;  %v955_v0 = vadd.f32 %v843_v13, %v723_v28  ;;  %v956_v29 = vadd.f32 %v844_v16, %v724_v58  ;;  %v3108_v12 = vld [vmem:[#allocation2 + $0xa0] ss:$2 sm:$0xff]  ;;  %v3112_v37 = vld [vmem:[#allocation2 + $0xa1] ss:$2 sm:$0xff]  ;;  %v7720_v13 = vld [vmem:[%s6801_s6 + $0x111] sm:$0xff] }
  0x9d   : > { %v3110_v32 = vld [vmem:[#allocation2 + $0xb0] ss:$2 sm:$0x3f]  ;;  %v3115_v2 = vmax.f32 %v3100_v21, %v3104_v50  ;;  %v3116_v49 = vmax.f32 %v3102_v54, %v3106_v53  ;;  %v957_v26 = vadd.f32 %v845_v4, %v725_v38  ;;  %v958_v46 = vadd.f32 %v846_v8, %v726_v1  ;;  %v3114_v44 = vld [vmem:[#allocation2 + $0xb1] ss:$2 sm:$0x3f] }
  0x9e   : > { %v959_v30 = vadd.f32 %v847_v62, %v727_v20  ;;  %v960_v61 = vadd.f32 %v848_v19, %v728_v41  ;;  %v7695_v59 = vld [vmem:[%s10901_s1 + $0x1] ss:$0 sm:$0xff]  ;;  %v3117_v28 = vmax.f32 %v3108_v12, %v3112_v37  ;;  %v3118_v58 = vmax.f32 %v3110_v32, %v3114_v44  ;;  %v7723_v16 = vld [vmem:[%s6801_s6 + $0x119] sm:$0xff]  ;;  %v7730_v50 = vld [vmem:[%s10901_s1 + $0x4] ss:$0 sm:$0xff] }
  0x9f   : > { %v1193_v52 = vmul.f32 %v7695_v59, %v7436_v40  ;;  %v1194_v9 = vmul.f32 %v7695_v59, %v7439_v33  ;;  %v1195_v38 = vmul.f32 %v7695_v59, %v7442_v25  ;;  %v1196_v1 = vmul.f32 %v7695_v59, %v7446_v51  ;;  %v7714_v11 = vld [vmem:[%s6801_s6 + $0x101] sm:$0xff]  ;;  %v7717_v25 = vld [vmem:[%s6801_s6 + $0x109] sm:$0xff] }
  0xa0   : > { %v1197_v20 = vmul.f32 %v7695_v59, %v7473_v6  ;;  %v1198_v41 = vmul.f32 %v7695_v59, %v7476_v22  ;;  %v1199_v40 = vmul.f32 %v7695_v59, %v7481_v42  ;;  %v1200_v33 = vmul.f32 %v7695_v59, %v7484_v34 }
  0xa1   : > { %v3119_v37 = vmax.f32 %v3115_v2, %v3117_v28  ;;  %v3120_v44 = vmax.f32 %v3116_v49, %v3118_v58  ;;  %v1305_v10 = vadd.f32 %v1193_v52, %v953_v3  ;;  %v1306_v51 = vadd.f32 %v1194_v9, %v954_v56  ;;  %v7749_v49 = vld [vmem:[%s6801_s6 + $0x121] sm:$0xff] }
  0xa2   : > { %v1307_v21 = vadd.f32 %v1195_v38, %v955_v0  ;;  %v1308_v54 = vadd.f32 %v1196_v1, %v956_v29  ;;  %v1309_v4 = vadd.f32 %v1197_v20, %v957_v26  ;;  %v1310_v8 = vadd.f32 %v1198_v41, %v958_v46  ;;  %v7752_v26 = vld [vmem:[%s6801_s6 + $0x129] sm:$0xff]  ;;  %v7757_v9 = vld [vmem:[%s10901_s1 + $0x7] ss:$0 sm:$0xff]  ;;  %v7764_v38 = vld [vmem:[%s6801_s6 + $0x131] sm:$0xff] }
  0xa3   : > { %3121 = vst.msk [vmem:[#allocation3 + $0x31] sm:$0xff] %vm2904_vm0, %v3119_v37  ;;  %v1311_v62 = vadd.f32 %v1199_v40, %v959_v30  ;;  %v1312_v19 = vadd.f32 %v1200_v33, %v960_v61  ;;  %v1425_v53 = vmul.f32 %v7730_v50, %v7473_v6  ;;  %v1426_v3 = vmul.f32 %v7730_v50, %v7476_v22  ;;  %v7767_v1 = vld [vmem:[%s6801_s6 + $0x139] sm:$0xff] }
  0xa4   : > { %3122 = vst.msk [vmem:[#allocation3 + $0x39] sm:$0x3f] %vm3073_vm1, %v3120_v44  ;;  %v1427_v56 = vmul.f32 %v7730_v50, %v7481_v42  ;;  %v1428_v30 = vmul.f32 %v7730_v50, %v7484_v34  ;;  %v1429_v61 = vmul.f32 %v7730_v50, %v7714_v11  ;;  %v1430_v0 = vmul.f32 %v7730_v50, %v7717_v25 }
  0xa5   : > { %v1431_v29 = vmul.f32 %v7730_v50, %v7720_v13  ;;  %v1432_v6 = vmul.f32 %v7730_v50, %v7723_v16  ;;  %v1537_v22 = vadd.f32 %v1425_v53, %v1305_v10  ;;  %v1538_v12 = vadd.f32 %v1426_v3, %v1306_v51 }
  0xa6   : > { %v1539_v42 = vadd.f32 %v1427_v56, %v1307_v21  ;;  %v1540_v32 = vadd.f32 %v1428_v30, %v1308_v54  ;;  %v1541_v2 = vadd.f32 %v1429_v61, %v1309_v4  ;;  %v1542_v34 = vadd.f32 %v1430_v0, %v1310_v8  ;;  %v7786_v30 = vld [vmem:[%s10901_s1 + $0x2] ss:$0 sm:$0xff] }
  0xa7   : > { %v1543_v46 = vadd.f32 %v1431_v29, %v1311_v62  ;;  %v1544_v52 = vadd.f32 %v1432_v6, %v1312_v19  ;;  %v1657_v28 = vmul.f32 %v7757_v9, %v7714_v11  ;;  %v1658_v58 = vmul.f32 %v7757_v9, %v7717_v25 }
  0xa8   : > { %v1659_v20 = vmul.f32 %v7757_v9, %v7720_v13  ;;  %v1660_v41 = vmul.f32 %v7757_v9, %v7723_v16  ;;  %v1661_v40 = vmul.f32 %v7757_v9, %v7749_v49  ;;  %v1662_v33 = vmul.f32 %v7757_v9, %v7752_v26 }
  0xa9   : > { %v1663_v37 = vmul.f32 %v7757_v9, %v7764_v38  ;;  %v1664_v44 = vmul.f32 %v7757_v9, %v7767_v1  ;;  %v1769_v10 = vadd.f32 %v1657_v28, %v1537_v22  ;;  %v1770_v51 = vadd.f32 %v1658_v58, %v1538_v12  ;;  %v7816_v28 = vld [vmem:[%s6801_s6 + $0x112] sm:$0xff]  ;;  %v7819_v58 = vld [vmem:[%s6801_s6 + $0x11a] sm:$0xff] }
  0xaa   : > { %v3393_v21 = vld [vmem:[#allocation3 + $0x30] sm:$0xff]  ;;  %v1771_v4 = vadd.f32 %v1659_v20, %v1539_v42  ;;  %v1772_v8 = vadd.f32 %v1660_v41, %v1540_v32  ;;  %v1773_v62 = vadd.f32 %v1661_v40, %v1541_v2  ;;  %v1774_v19 = vadd.f32 %v1662_v33, %v1542_v34  ;;  %v7808_v42 = vld [vmem:[%s6801_s6 + $0x102] sm:$0xff] }
  0xab   : > { %v3394_v54 = vld [vmem:[#allocation3 + $0x38] sm:$0xff]  ;;  %v1775_v3 = vadd.f32 %v1663_v37, %v1543_v46  ;;  %v1776_v56 = vadd.f32 %v1664_v44, %v1544_v52  ;;  %v2009_v61 = vmul.f32 %v7786_v30, %v7525_v63  ;;  %v2010_v0 = vmul.f32 %v7786_v30, %v7528_v18  ;;  %v7824_v37 = vld [vmem:[%s10901_s1 + $0x5] ss:$0 sm:$0xff] }
  0xac   : > { %v7781_v53 = vpack.c.bf16 %v3394_v54, %v3393_v21  ;;  %v2011_v29 = vmul.f32 %v7786_v30, %v7531_v31  ;;  %v2012_v6 = vmul.f32 %v7786_v30, %v7534_v27  ;;  %v2013_v22 = vmul.f32 %v7786_v30, %v7556_v7  ;;  %v7811_v27 = vld [vmem:[%s6801_s6 + $0x10a] sm:$0xff]  ;;  %v6642_v21 = vld [vmem:[%s10903_s3 + $0x78] sm:$0xff]  }
  0xad   : > { %v2014_v63 = vmul.f32 %v7786_v30, %v7565_v24  ;;  %v2015_v18 = vmul.f32 %v7786_v30, %v7568_v39  ;;  %v2016_v31 = vmul.f32 %v7786_v30, %v7571_v5  ;;  %v2121_v32 = vadd.f32 %v2009_v61, %v1769_v10 }
  0xae   : > { %11072 = vst [vmem:[#allocation9_spill] sm:$0xff] %v7781_v53  ;;  %6117 = vmatprep.mubr.msk.bf16.mxu1 %vm2904_vm0, %v7781_v53  ;;  %v4024_v12 = vshll.u32 %v7781_v53, 16  ;;  %v2122_v2 = vadd.f32 %v2010_v0, %v1770_v51  ;;  %v2123_v34 = vadd.f32 %v2011_v29, %v1771_v4  ;;  %v2124_v46 = vadd.f32 %v2012_v6, %v1772_v8  ;;  %v7856_v0 = vld [vmem:[%s6801_s6 + $0x122] sm:$0xff]  ;;  %v7859_v29 = vld [vmem:[%s6801_s6 + $0x12a] sm:$0xff] }
  0xaf   : > { %v2125_v20 = vadd.f32 %v2013_v22, %v1773_v62  ;;  %v2126_v41 = vadd.f32 %v2014_v63, %v1774_v19  ;;  %v2127_v40 = vadd.f32 %v2015_v18, %v1775_v3  ;;  %v2128_v33 = vadd.f32 %v2016_v31, %v1776_v56  ;;  %v7866_v18 = vld [vmem:[%s6801_s6 + $0x132] sm:$0xff]  ;;  %v7869_v31 = vld [vmem:[%s6801_s6 + $0x13a] sm:$0xff] }
  0xb0   : > { %v7813_v52 = vrot.slane %v4024_v12, 1  ;;  %v2241_v44 = vmul.f32 %v7824_v37, %v7556_v7  ;;  %v2242_v10 = vmul.f32 %v7824_v37, %v7565_v24  ;;  %v2243_v51 = vmul.f32 %v7824_v37, %v7568_v39 }
  0xb1   : > { %v2244_v7 = vmul.f32 %v7824_v37, %v7571_v5  ;;  %v2245_v24 = vmul.f32 %v7824_v37, %v7808_v42  ;;  %v2246_v39 = vmul.f32 %v7824_v37, %v7811_v27  ;;  %v2247_v4 = vmul.f32 %v7824_v37, %v7816_v28  ;;  %v6662_v5 = vld [vmem:[%s10903_s3 + $0x70] sm:$0xff]  }
  0xb2   : > { %v7838_v54 = vsel %vm4003_vm2, %v7553_v45, %v7813_v52  ;;  %v2248_v45 = vmul.f32 %v7824_v37, %v7819_v58  ;;  %v2353_v8 = vadd.f32 %v2241_v44, %v2121_v32  ;;  %v2354_v62 = vadd.f32 %v2242_v10, %v2122_v2  ;;  %v7874_v32 = vld [vmem:[%s10901_s1 + $0x8] ss:$0 sm:$0xff] }
  0xb3   : > { %11073 = vst [vmem:[#allocation10_spill] sm:$0xff] %v7838_v54  ;;  %6242 = vmatmul.mubr.msk.bf16.vlgmr.msra.gmra.mrb[0].mxu0 %vm2904_vm0, %v7838_v54  ;;  %v2355_v19 = vadd.f32 %v2243_v51, %v2123_v34  ;;  %v2356_v3 = vadd.f32 %v2244_v7, %v2124_v46  ;;  %v2357_v56 = vadd.f32 %v2245_v24, %v2125_v20 }
  0xb4   : > { %6270 = vmatpush3.bf16.msra.mxu0 %v6662_v5  ;;  %v2358_v61 = vadd.f32 %v2246_v39, %v2126_v41  ;;  %v2359_v6 = vadd.f32 %v2247_v4, %v2127_v40  ;;  %v2360_v22 = vadd.f32 %v2248_v45, %v2128_v33  ;;  %v2473_v12 = vmul.f32 %v7228_v55, %v7808_v42  ;;  %v7892_v45 = vld [vmem:[%s10902_s2] ss:$0 sm:$0xff] }
  0xb5   : > { %v2474_v63 = vmul.f32 %v7228_v55, %v7811_v27  ;;  %6271 = vmatprep.subr.bf16.mxu0 %v6642_v21  ;;  %v2475_v2 = vmul.f32 %v7874_v32, %v7816_v28  ;;  %v2476_v34 = vmul.f32 %v7874_v32, %v7819_v58  ;;  %v2477_v46 = vmul.f32 %v7874_v32, %v7856_v0 }
  0xb6   : > { %v2478_v55 = vmul.f32 %v7874_v32, %v7859_v29  ;;  %v2479_v20 = vmul.f32 %v7874_v32, %v7866_v18  ;;  %v2480_v41 = vmul.f32 %v7874_v32, %v7869_v31  ;;  %v2585_v40 = vadd.f32 %v2473_v12, %v2353_v8 }
  0xb7   : > { %v2586_v33 = vadd.f32 %v2474_v63, %v2354_v62  ;;  %v2587_v44 = vadd.f32 %v2475_v2, %v2355_v19  ;;  %v2588_v10 = vadd.f32 %v2476_v34, %v2356_v3  ;;  %v2589_v51 = vadd.f32 %v2477_v46, %v2357_v56  ;;  %v7905_v46 = vld [vmem:[%s6801_s6 + $0x140] sm:$0xff] }
  0xb8   : > { %v2590_v7 = vadd.f32 %v2478_v55, %v2358_v61  ;;  %6272 = vmatpush3.bf16.msra.mxu0 %v6642_v21  ;;  %v2591_v24 = vadd.f32 %v2479_v20, %v2359_v6  ;;  %v2592_v39 = vadd.f32 %v2480_v41, %v2360_v22  ;;  %v2704_v4 = vadd.f32 %v7256_v57, %v2585_v40  ;;  %v7917_v20 = vld [vmem:[%s6801_s6 + $0x150] sm:$0xff]  ;;  %v7920_v41 = vld [vmem:[%s6801_s6 + $0x158] sm:$0xff] }
  0xb9   : > { %v2705_v5 = vadd.f32 %v7892_v45, %v2586_v33  ;;  %v2706_v54 = vadd.f32 %v7892_v45, %v2587_v44  ;;  %v2707_v8 = vadd.f32 %v7892_v45, %v2588_v10  ;;  %v2708_v62 = vadd.f32 %v7892_v45, %v2589_v51  ;;  %11074 = vst [vmem:[#allocation12_spill] sm:$0xff] %v7920_v41 }
  0xba   : > { %v2709_v21 = vadd.f32 %v7892_v45, %v2590_v7  ;;  %v2710_v19 = vadd.f32 %v7892_v45, %v2591_v24  ;;  %v2711_v57 = vadd.f32 %v7892_v45, %v2592_v39  ;;  %v2816_v3 = vmax.f32 %v2704_v4, 0.0 }
  0xbb   : > { %v2817_v56 = vmax.f32 %v2705_v5, 0.0  ;;  %v2818_v61 = vmax.f32 %v2706_v54, 0.0  ;;  %v2819_v6 = vmax.f32 %v2707_v8, 0.0  ;;  %v2820_v22 = vmax.f32 %v2708_v62, 0.0  ;;  %v7914_v54 = vld [vmem:[%s6801_s6 + $0x148] sm:$0xff]  ;;  %v7958_v8 = vld [vmem:[%s6801_s6 + $0x160] sm:$0xff] }
  0xbc   : > { %v2821_v12 = vmax.f32 %v2709_v21, 0.0  ;;  %v2822_v63 = vmax.f32 %v2710_v19, 0.0  ;;  %v2823_v2 = vmax.f32 %v2711_v57, 0.0  ;;  %2929 = vst.msk [vmem:[#allocation2 + $0xc0] sm:$0xff] %vm2904_vm0, %v2816_v3  ;;  %v4028_v34 = vshrl.u32 %v7781_v53, 16  ;;  %11075 = vst [vmem:[#allocation13_spill] sm:$0xff] %v7958_v8 }
  0xbd   : > { %2930 = vst.msk [vmem:[#allocation2 + $0xc8] sm:$0xff] %vm2904_vm0, %v2817_v56  ;;  %v385_v55 = vmul.f32 %v7616_v15, %v7598_v17  ;;  %2931 = vst.msk [vmem:[#allocation2 + $0xd0] sm:$0xff] %vm2904_vm0, %v2818_v61  ;;  %v386_v40 = vmul.f32 %v7616_v15, %v7605_v14  ;;  %v387_v17 = vmul.f32 %v7616_v15, %v7608_v60  ;;  %v7967_v57 = vld [vmem:[%s6801_s6 + $0x178] sm:$0xff] }
  0xbe   : > { %2932 = vst.msk [vmem:[#allocation2 + $0xd8] sm:$0xff] %vm2904_vm0, %v2819_v6  ;;  %2933 = vst.msk [vmem:[#allocation2 + $0xe0] sm:$0xff] %vm2904_vm0, %v2820_v22  ;;  %v388_v33 = vmul.f32 %v7616_v15, %v7611_v43  ;;  %v389_v44 = vmul.f32 %v7616_v15, %v7652_v23  ;;  %v7933_v10 = vor.u32 %v4028_v34, %v7813_v52 }
  0xbf   : > { %2934 = vst.msk [vmem:[#allocation2 + $0xe8] sm:$0xff] %vm2904_vm0, %v2821_v12  ;;  %2935 = vst.msk [vmem:[#allocation2 + $0xf0] sm:$0xff] %vm2904_vm0, %v2822_v63  ;;  %v390_v14 = vmul.f32 %v7616_v15, %v7663_v35  ;;  %v391_v60 = vmul.f32 %v7616_v15, %v7666_v47  ;;  %v392_v43 = vmul.f32 %v7616_v15, %v7669_v36  ;;  %v11078_v63 = vld [vmem:[#allocation8_spill] sm:$0xff] }
  0xc0   : > { %2936 = vst.msk [vmem:[#allocation2 + $0xf8] sm:$0xff] %vm2904_vm0, %v2823_v2  ;;  %v617_v51 = vmul.f32 %v7641_v48, %v7652_v23  ;;  %v618_v7 = vmul.f32 %v7641_v48, %v7663_v35  ;;  %v619_v52 = vmul.f32 %v7641_v48, %v7666_v47  ;;  %v620_v24 = vmul.f32 %v7641_v48, %v7669_v36  ;;  %v7961_v35 = vld [vmem:[%s6801_s6 + $0x168] sm:$0xff]  ;;  %v7964_v47 = vld [vmem:[%s6801_s6 + $0x170] sm:$0xff] }
  0xc1   : > { %v621_v39 = vmul.f32 %v7641_v48, %v7905_v46  ;;  %v622_v4 = vmul.f32 %v7641_v48, %v7914_v54  ;;  %v623_v5 = vmul.f32 %v7641_v48, %v7917_v20  ;;  %v624_v23 = vmul.f32 %v7641_v48, %v7920_v41  ;;  %11076 = vst [vmem:[#allocation14_spill] sm:$0xff] %v7961_v35 }
  0xc2   : > { %11077 = vst [vmem:[#allocation15_spill] sm:$0xff] %v7964_v47  ;;  %v729_v62 = vadd.f32 %v617_v51, %v385_v55  ;;  %v730_v36 = vadd.f32 %v618_v7, %v386_v40  ;;  %v731_v21 = vadd.f32 %v619_v52, %v387_v17  ;;  %v732_v19 = vadd.f32 %v620_v24, %v388_v33 }
  0xc3   : > { %v733_v3 = vadd.f32 %v621_v39, %v389_v44  ;;  %v734_v56 = vadd.f32 %v622_v4, %v390_v14  ;;  %v735_v61 = vadd.f32 %v623_v5, %v391_v60  ;;  %v736_v6 = vadd.f32 %v624_v23, %v392_v43 }
  0xc4   : > { %v3124_v22 = vld [vmem:[#allocation2 + $0xc0] ss:$2 sm:$0xff]  ;;  %v3128_v12 = vld [vmem:[#allocation2 + $0xc1] ss:$2 sm:$0xff]  ;;  %v849_v2 = vmul.f32 %v11078_v63, %v7905_v46  ;;  %v850_v34 = vmul.f32 %v11078_v63, %v7914_v54  ;;  %v851_v55 = vmul.f32 %v11078_v63, %v7917_v20  ;;  %v852_v40 = vmul.f32 %v11078_v63, %v7920_v41 }
  0xc5   : > { %v3126_v17 = vld [vmem:[#allocation2 + $0xd0] ss:$2 sm:$0x3f]  ;;  %v3130_v33 = vld [vmem:[#allocation2 + $0xd1] ss:$2 sm:$0x3f]  ;;  %v3139_v44 = vmax.f32 %v3124_v22, %v3128_v12  ;;  %v853_v14 = vmul.f32 %v11078_v63, %v7958_v8  ;;  %v854_v60 = vmul.f32 %v11078_v63, %v7961_v35  ;;  %v855_v43 = vmul.f32 %v11078_v63, %v7964_v47 }
  0xc6   : > { %v3132_v51 = vld [vmem:[#allocation2 + $0xe0] ss:$2 sm:$0xff]  ;;  %v3140_v52 = vmax.f32 %v3126_v17, %v3130_v33  ;;  %v856_v24 = vmul.f32 %v11078_v63, %v7967_v57  ;;  %v961_v39 = vadd.f32 %v849_v2, %v729_v62  ;;  %v962_v4 = vadd.f32 %v850_v34, %v730_v36  ;;  %v3136_v5 = vld [vmem:[#allocation2 + $0xe1] ss:$2 sm:$0xff] }
  0xc7   : > { %v3134_v7 = vld [vmem:[#allocation2 + $0xf0] ss:$2 sm:$0x3f]  ;;  %v3138_v23 = vld [vmem:[#allocation2 + $0xf1] ss:$2 sm:$0x3f]  ;;  %v963_v22 = vadd.f32 %v851_v55, %v731_v21  ;;  %v964_v12 = vadd.f32 %v852_v40, %v732_v19  ;;  %v965_v53 = vadd.f32 %v853_v14, %v733_v3  ;;  %v966_v48 = vadd.f32 %v854_v60, %v734_v56 }
  0xc8   : > { %v3141_v35 = vmax.f32 %v3132_v51, %v3136_v5  ;;  %v3142_v8 = vmax.f32 %v3134_v7, %v3138_v23  ;;  %v967_v41 = vadd.f32 %v855_v43, %v735_v61  ;;  %v968_v47 = vadd.f32 %v856_v24, %v736_v6  ;;  %v8001_v6 = vld [vmem:[%s6801_s6 + $0x149] sm:$0xff]  ;;  %v8038_v24 = vld [vmem:[%s6801_s6 + $0x171] sm:$0xff] }
  0xc9   : > { %v1201_v17 = vmul.f32 %v7695_v59, %v7714_v11  ;;  %v1202_v62 = vmul.f32 %v7695_v59, %v7717_v25  ;;  %v1203_v36 = vmul.f32 %v7695_v59, %v7720_v13  ;;  %v1204_v21 = vmul.f32 %v7695_v59, %v7723_v16  ;;  %v7998_v11 = vld [vmem:[%s6801_s6 + $0x141] sm:$0xff] }
  0xca   : > { %v3143_v19 = vmax.f32 %v3139_v44, %v3141_v35  ;;  %v3144_v3 = vmax.f32 %v3140_v52, %v3142_v8  ;;  %v1205_v56 = vmul.f32 %v7695_v59, %v7749_v49  ;;  %v1206_v61 = vmul.f32 %v7695_v59, %v7752_v26  ;;  %v8010_v8 = vld [vmem:[%s6801_s6 + $0x151] sm:$0xff]  ;;  %v8013_v35 = vld [vmem:[%s6801_s6 + $0x159] sm:$0xff] }
  0xcb   : > { %v1207_v25 = vmul.f32 %v7695_v59, %v7764_v38  ;;  %v1208_v13 = vmul.f32 %v7695_v59, %v7767_v1  ;;  %v1313_v2 = vadd.f32 %v1201_v17, %v961_v39  ;;  %v1314_v16 = vadd.f32 %v1202_v62, %v962_v4 }
  0xcc   : > { %3145 = vst.msk [vmem:[#allocation3 + $0x41] sm:$0xff] %vm2904_vm0, %v3143_v19  ;;  %v1315_v34 = vadd.f32 %v1203_v36, %v963_v22  ;;  %v1316_v55 = vadd.f32 %v1204_v21, %v964_v12  ;;  %v1317_v40 = vadd.f32 %v1205_v56, %v965_v53  ;;  %v1318_v33 = vadd.f32 %v1206_v61, %v966_v48 }
  0xcd   : > { %3146 = vst.msk [vmem:[#allocation3 + $0x49] sm:$0x3f] %vm3073_vm1, %v3144_v3  ;;  %v1319_v44 = vadd.f32 %v1207_v25, %v967_v41  ;;  %v1320_v14 = vadd.f32 %v1208_v13, %v968_v47  ;;  %v1433_v60 = vmul.f32 %v7730_v50, %v7749_v49  ;;  %v1434_v43 = vmul.f32 %v7730_v50, %v7752_v26  ;;  %v8028_v41 = vld [vmem:[%s6801_s6 + $0x161] sm:$0xff]  ;;  %v8031_v47 = vld [vmem:[%s6801_s6 + $0x169] sm:$0xff] }
  0xce   : > { %v1435_v51 = vmul.f32 %v7730_v50, %v7764_v38  ;;  %v1436_v7 = vmul.f32 %v7730_v50, %v7767_v1  ;;  %v1437_v53 = vmul.f32 %v7730_v50, %v7998_v11  ;;  %v1438_v48 = vmul.f32 %v7730_v50, %v8001_v6  ;;  %v8041_v1 = vld [vmem:[%s6801_s6 + $0x179] sm:$0xff] }
  0xcf   : > { %v1439_v49 = vmul.f32 %v7730_v50, %v8010_v8  ;;  %v1440_v26 = vmul.f32 %v7730_v50, %v8013_v35  ;;  %v1545_v38 = vadd.f32 %v1433_v60, %v1313_v2  ;;  %v1546_v52 = vadd.f32 %v1434_v43, %v1314_v16 }
  0xd0   : > { %v1547_v39 = vadd.f32 %v1435_v51, %v1315_v34  ;;  %v1548_v4 = vadd.f32 %v1436_v7, %v1316_v55  ;;  %v1549_v5 = vadd.f32 %v1437_v53, %v1317_v40  ;;  %v1550_v23 = vadd.f32 %v1438_v48, %v1318_v33 }
  0xd1   : > { %v1551_v22 = vadd.f32 %v1439_v49, %v1319_v44  ;;  %v1552_v12 = vadd.f32 %v1440_v26, %v1320_v14  ;;  %v1665_v17 = vmul.f32 %v7757_v9, %v7998_v11  ;;  %v1666_v62 = vmul.f32 %v7757_v9, %v8001_v6 }
  0xd2   : > { %v1667_v36 = vmul.f32 %v7757_v9, %v8010_v8  ;;  %v1668_v21 = vmul.f32 %v7757_v9, %v8013_v35  ;;  %v1669_v19 = vmul.f32 %v7757_v9, %v8028_v41  ;;  %v1670_v3 = vmul.f32 %v7757_v9, %v8031_v47 }
  0xd3   : > { %v3395_v56 = vld [vmem:[#allocation3 + $0x40] sm:$0xff]  ;;  %v1671_v25 = vmul.f32 %v7757_v9, %v8038_v24  ;;  %v1672_v13 = vmul.f32 %v7757_v9, %v8041_v1  ;;  %v1777_v2 = vadd.f32 %v1665_v17, %v1545_v38  ;;  %v1778_v16 = vadd.f32 %v1666_v62, %v1546_v52 }
  0xd4   : > { %v3396_v61 = vld [vmem:[#allocation3 + $0x48] sm:$0xff]  ;;  %v1779_v55 = vadd.f32 %v1667_v36, %v1547_v39  ;;  %v1780_v40 = vadd.f32 %v1668_v21, %v1548_v4  ;;  %v1781_v33 = vadd.f32 %v1669_v19, %v1549_v5  ;;  %v1782_v44 = vadd.f32 %v1670_v3, %v1550_v23  ;;  %v8089_v5 = vld [vmem:[%s6801_s6 + $0x152] sm:$0xff]  ;;  %v8092_v23 = vld [vmem:[%s6801_s6 + $0x15a] sm:$0xff] }
  0xd5   : > { %v8059_v34 = vpack.c.bf16 %v3396_v61, %v3395_v56  ;;  %v1783_v14 = vadd.f32 %v1671_v25, %v1551_v22  ;;  %v1784_v60 = vadd.f32 %v1672_v13, %v1552_v12  ;;  %v2017_v43 = vmul.f32 %v7786_v30, %v7808_v42  ;;  %v8114_v13 = vld [vmem:[%s6801_s6 + $0x162] sm:$0xff] }
  0xd6   : > { %v2018_v7 = vmul.f32 %v7786_v30, %v7811_v27  ;;  %v2019_v53 = vmul.f32 %v7786_v30, %v7816_v28  ;;  %v2020_v48 = vmul.f32 %v7786_v30, %v7819_v58  ;;  %v2021_v49 = vmul.f32 %v7786_v30, %v7856_v0  ;;  %v8083_v27 = vld [vmem:[%s6801_s6 + $0x142] sm:$0xff]  ;;  %v8086_v28 = vld [vmem:[%s6801_s6 + $0x14a] sm:$0xff] }
  0xd7   : > { %11079 = vst [vmem:[#allocation6_spill] sm:$0xff] %v8059_v34  ;;  %6118 = vmatmul.mubr.msk.bf16.gmra.mrb[4].mxu1 %vm2904_vm0, %v8059_v34  ;;  %v4031_v51 = vshll.u32 %v8059_v34, 16  ;;  %v2022_v42 = vmul.f32 %v7786_v30, %v7859_v29  ;;  %v2023_v26 = vmul.f32 %v7786_v30, %v7866_v18  ;;  %v2024_v38 = vmul.f32 %v7786_v30, %v7869_v31 }
  0xd8   : > { %v2129_v39 = vadd.f32 %v2017_v43, %v1777_v2  ;;  %v2130_v58 = vadd.f32 %v2018_v7, %v1778_v16  ;;  %v2131_v4 = vadd.f32 %v2019_v53, %v1779_v55  ;;  %v2132_v22 = vadd.f32 %v2020_v48, %v1780_v40  ;;  %v8124_v55 = vld [vmem:[%s6801_s6 + $0x172] sm:$0xff] }
  0xd9   : > { %v8080_v52 = vrot.slane %v4031_v51, 1  ;;  %v2133_v12 = vadd.f32 %v2021_v49, %v1781_v33  ;;  %v2134_v17 = vadd.f32 %v2022_v42, %v1782_v44  ;;  %v2135_v62 = vadd.f32 %v2023_v26, %v1783_v14 }
  0xda   : > { %v2136_v21 = vadd.f32 %v2024_v38, %v1784_v60  ;;  %v2249_v19 = vmul.f32 %v7824_v37, %v7856_v0  ;;  %v2250_v3 = vmul.f32 %v7824_v37, %v7859_v29  ;;  %v2251_v56 = vmul.f32 %v7824_v37, %v7866_v18  ;;  %v8117_v0 = vld [vmem:[%s6801_s6 + $0x16a] sm:$0xff] }
  0xdb   : > { %v8097_v36 = vsel %vm4003_vm2, %v7933_v10, %v8080_v52  ;;  %v2252_v61 = vmul.f32 %v7824_v37, %v7869_v31  ;;  %v2253_v10 = vmul.f32 %v7824_v37, %v8083_v27  ;;  %v2254_v25 = vmul.f32 %v7824_v37, %v8086_v28  ;;  %v8127_v31 = vld [vmem:[%s6801_s6 + $0x17a] sm:$0xff] }
  0xdc   : > { %11080 = vst [vmem:[#allocation11_spill] sm:$0xff] %v8097_v36  ;;  %6245 = vmatprep.mubr.msk.bf16.mxu0 %vm2904_vm0, %v8097_v36  ;;  %v2255_v29 = vmul.f32 %v7824_v37, %v8089_v5  ;;  %v2256_v2 = vmul.f32 %v7824_v37, %v8092_v23  ;;  %v2361_v18 = vadd.f32 %v2249_v19, %v2129_v39 }
  0xdd   : > { %v2362_v16 = vadd.f32 %v2250_v3, %v2130_v58  ;;  %v2363_v40 = vadd.f32 %v2251_v56, %v2131_v4  ;;  %v2364_v33 = vadd.f32 %v2252_v61, %v2132_v22  ;;  %v2365_v44 = vadd.f32 %v2253_v10, %v2133_v12 }
  0xde   : > { %v2366_v14 = vadd.f32 %v2254_v25, %v2134_v17  ;;  %v2367_v60 = vadd.f32 %v2255_v29, %v2135_v62  ;;  %v2368_v43 = vadd.f32 %v2256_v2, %v2136_v21  ;;  %v2481_v51 = vmul.f32 %v7874_v32, %v8083_v27 }
  0xdf   : > { %v2482_v7 = vmul.f32 %v7874_v32, %v8086_v28  ;;  %v2483_v53 = vmul.f32 %v7874_v32, %v8089_v5  ;;  %v2484_v48 = vmul.f32 %v7874_v32, %v8092_v23  ;;  %v2485_v49 = vmul.f32 %v7874_v32, %v8114_v13 }
  0xe0   : > { %v2486_v42 = vmul.f32 %v7874_v32, %v8117_v0  ;;  %v2487_v26 = vmul.f32 %v7874_v32, %v8124_v55  ;;  %v2488_v38 = vmul.f32 %v7874_v32, %v8127_v31  ;;  %v2593_v39 = vadd.f32 %v2481_v51, %v2361_v18 }
  0xe1   : > { %v2594_v58 = vadd.f32 %v2482_v7, %v2362_v16  ;;  %v2595_v4 = vadd.f32 %v2483_v53, %v2363_v40  ;;  %v2596_v22 = vadd.f32 %v2484_v48, %v2364_v33  ;;  %v2597_v12 = vadd.f32 %v2485_v49, %v2365_v44  ;;  %v8157_v7 = vld [vmem:[%s6801_s6 + $0x180] sm:$0xff]  ;;  %v8166_v48 = vld [vmem:[%s6801_s6 + $0x188] sm:$0xff]  ;;  %v8169_v49 = vld [vmem:[%s6801_s6 + $0x190] sm:$0xff] }
  0xe2   : > { %v2598_v17 = vadd.f32 %v2486_v42, %v2366_v14  ;;  %v2599_v62 = vadd.f32 %v2487_v26, %v2367_v60  ;;  %v2600_v21 = vadd.f32 %v2488_v38, %v2368_v43  ;;  %v2712_v19 = vadd.f32 %v7892_v45, %v2593_v39  ;;  %v8172_v42 = vld [vmem:[%s6801_s6 + $0x198] sm:$0xff]  ;;  %v11081_v38 = vld [vmem:[#allocation12_spill] sm:$0xff] }
  0xe3   : > { %v2713_v3 = vadd.f32 %v7892_v45, %v2594_v58  ;;  %v2714_v56 = vadd.f32 %v7892_v45, %v2595_v4  ;;  %v2715_v61 = vadd.f32 %v7892_v45, %v2596_v22  ;;  %v2716_v10 = vadd.f32 %v7892_v45, %v2597_v12  ;;  %v11082_v58 = vld [vmem:[#allocation13_spill] sm:$0xff] }
  0xe4   : > { %v2717_v25 = vadd.f32 %v7892_v45, %v2598_v17  ;;  %v2718_v29 = vadd.f32 %v7892_v45, %v2599_v62  ;;  %v2719_v2 = vadd.f32 %v7892_v45, %v2600_v21  ;;  %v2824_v18 = vmax.f32 %v2712_v19, 0.0  ;;  %v11085_v21 = vld [vmem:[#allocation5_spill] sm:$0xff] }
  0xe5   : > { %v2825_v16 = vmax.f32 %v2713_v3, 0.0  ;;  %v2826_v40 = vmax.f32 %v2714_v56, 0.0  ;;  %v2827_v33 = vmax.f32 %v2715_v61, 0.0  ;;  %v2828_v44 = vmax.f32 %v2716_v10, 0.0 }
  0xe6   : > { %v2829_v14 = vmax.f32 %v2717_v25, 0.0  ;;  %v2830_v60 = vmax.f32 %v2718_v29, 0.0  ;;  %v2831_v43 = vmax.f32 %v2719_v2, 0.0  ;;  %2937 = vst.msk [vmem:[#allocation2 + $0x100] sm:$0xff] %vm2904_vm0, %v2824_v18  ;;  %v4035_v51 = vshrl.u32 %v8059_v34, 16  ;;  %v8210_v29 = vld [vmem:[%s6801_s6 + $0x1a0] sm:$0xff] }
  0xe7   : > { %2938 = vst.msk [vmem:[#allocation2 + $0x108] sm:$0xff] %vm2904_vm0, %v2825_v16  ;;  %v393_v53 = vmul.f32 %v7616_v15, %v7905_v46  ;;  %2939 = vst.msk [vmem:[#allocation2 + $0x110] sm:$0xff] %vm2904_vm0, %v2826_v40  ;;  %v394_v26 = vmul.f32 %v7616_v15, %v7914_v54  ;;  %v395_v46 = vmul.f32 %v7616_v15, %v7917_v20  ;;  %v11083_v54 = vld [vmem:[#allocation14_spill] sm:$0xff]  ;;  %v11084_v20 = vld [vmem:[#allocation15_spill] sm:$0xff] }
  0xe8   : > { %2940 = vst.msk [vmem:[#allocation2 + $0x118] sm:$0xff] %vm2904_vm0, %v2827_v33  ;;  %2941 = vst.msk [vmem:[#allocation2 + $0x120] sm:$0xff] %vm2904_vm0, %v2828_v44  ;;  %v396_v39 = vmul.f32 %v7616_v15, %v11081_v38  ;;  %v397_v4 = vmul.f32 %v7616_v15, %v11082_v58  ;;  %v8185_v22 = vor.u32 %v4035_v51, %v8080_v52  ;;  %v8213_v2 = vld [vmem:[%s6801_s6 + $0x1a8] sm:$0xff]  ;;  %v8216_v18 = vld [vmem:[%s6801_s6 + $0x1b0] sm:$0xff] }
  0xe9   : > { %2942 = vst.msk [vmem:[#allocation2 + $0x128] sm:$0xff] %vm2904_vm0, %v2829_v14  ;;  %2943 = vst.msk [vmem:[#allocation2 + $0x130] sm:$0xff] %vm2904_vm0, %v2830_v60  ;;  %v398_v12 = vmul.f32 %v7616_v15, %v11083_v54  ;;  %v399_v17 = vmul.f32 %v7616_v15, %v11084_v20  ;;  %v400_v62 = vmul.f32 %v7616_v15, %v7967_v57  ;;  %v8219_v44 = vld [vmem:[%s6801_s6 + $0x1b8] sm:$0xff] }
  0xea   : > { %2944 = vst.msk [vmem:[#allocation2 + $0x138] sm:$0xff] %vm2904_vm0, %v2831_v43  ;;  %v625_v19 = vmul.f32 %v11085_v21, %v11082_v58  ;;  %v626_v3 = vmul.f32 %v11085_v21, %v11083_v54  ;;  %v627_v52 = vmul.f32 %v11085_v21, %v11084_v20  ;;  %v628_v56 = vmul.f32 %v11085_v21, %v7967_v57 }
  0xeb   : > { %v629_v61 = vmul.f32 %v11085_v21, %v8157_v7  ;;  %v630_v10 = vmul.f32 %v11085_v21, %v8166_v48  ;;  %v631_v15 = vmul.f32 %v11085_v21, %v8169_v49  ;;  %v632_v25 = vmul.f32 %v11085_v21, %v8172_v42  ;;  %11086 = vst [vmem:[#allocation21_spill] sm:$0xff] %v8210_v29 }
  0xec   : > { %11087 = vst [vmem:[#allocation22_spill] sm:$0xff] %v8213_v2  ;;  %11088 = vst [vmem:[#allocation23_spill] sm:$0xff] %v8216_v18  ;;  %v737_v16 = vadd.f32 %v625_v19, %v393_v53  ;;  %v738_v57 = vadd.f32 %v626_v3, %v394_v26  ;;  %v739_v40 = vadd.f32 %v627_v52, %v395_v46 }
  0xed   : > { %v740_v33 = vadd.f32 %v628_v56, %v396_v39  ;;  %v741_v14 = vadd.f32 %v629_v61, %v397_v4  ;;  %v742_v60 = vadd.f32 %v630_v10, %v398_v12  ;;  %v743_v43 = vadd.f32 %v631_v15, %v399_v17 }
  0xee   : > { %v744_v51 = vadd.f32 %v632_v25, %v400_v62  ;;  %v3148_v38 = vld [vmem:[#allocation2 + $0x100] ss:$2 sm:$0xff]  ;;  %v3152_v58 = vld [vmem:[#allocation2 + $0x101] ss:$2 sm:$0xff]  ;;  %v857_v54 = vmul.f32 %v11078_v63, %v8157_v7  ;;  %v858_v20 = vmul.f32 %v11078_v63, %v8166_v48  ;;  %v859_v53 = vmul.f32 %v11078_v63, %v8169_v49 }
  0xef   : > { %v860_v26 = vmul.f32 %v11078_v63, %v8172_v42  ;;  %v3150_v46 = vld [vmem:[#allocation2 + $0x110] ss:$2 sm:$0x3f]  ;;  %v3154_v39 = vld [vmem:[#allocation2 + $0x111] ss:$2 sm:$0x3f]  ;;  %v3163_v4 = vmax.f32 %v3148_v38, %v3152_v58  ;;  %v861_v12 = vmul.f32 %v11078_v63, %v8210_v29  ;;  %v862_v17 = vmul.f32 %v11078_v63, %v8213_v2 }
  0xf0   : > { %v863_v62 = vmul.f32 %v11078_v63, %v8216_v18  ;;  %v3156_v21 = vld [vmem:[#allocation2 + $0x120] ss:$2 sm:$0xff]  ;;  %v3164_v3 = vmax.f32 %v3150_v46, %v3154_v39  ;;  %v864_v52 = vmul.f32 %v11078_v63, %v8219_v44  ;;  %v969_v56 = vadd.f32 %v857_v54, %v737_v16  ;;  %v3160_v10 = vld [vmem:[#allocation2 + $0x121] ss:$2 sm:$0xff] }
  0xf1   : > { %v3158_v19 = vld [vmem:[#allocation2 + $0x130] ss:$2 sm:$0x3f]  ;;  %v970_v61 = vadd.f32 %v858_v20, %v738_v57  ;;  %v3162_v15 = vld [vmem:[#allocation2 + $0x131] ss:$2 sm:$0x3f]  ;;  %v971_v25 = vadd.f32 %v859_v53, %v739_v40  ;;  %v972_v38 = vadd.f32 %v860_v26, %v740_v33  ;;  %v973_v58 = vadd.f32 %v861_v12, %v741_v14 }
  0xf2   : > { %v974_v34 = vadd.f32 %v862_v17, %v742_v60  ;;  %v3165_v36 = vmax.f32 %v3156_v21, %v3160_v10  ;;  %v3166_v2 = vmax.f32 %v3158_v19, %v3162_v15  ;;  %v975_v29 = vadd.f32 %v863_v62, %v743_v43  ;;  %v8253_v43 = vld [vmem:[%s6801_s6 + $0x189] sm:$0xff] }
  0xf3   : > { %v976_v18 = vadd.f32 %v864_v52, %v744_v51  ;;  %v1209_v46 = vmul.f32 %v7695_v59, %v7998_v11  ;;  %v1210_v63 = vmul.f32 %v7695_v59, %v8001_v6  ;;  %v1211_v16 = vmul.f32 %v7695_v59, %v8010_v8  ;;  %v8250_v11 = vld [vmem:[%s6801_s6 + $0x181] sm:$0xff] }
  0xf4   : > { %v1212_v57 = vmul.f32 %v7695_v59, %v8013_v35  ;;  %v3167_v40 = vmax.f32 %v3163_v4, %v3165_v36  ;;  %v3168_v33 = vmax.f32 %v3164_v3, %v3166_v2  ;;  %v1213_v14 = vmul.f32 %v7695_v59, %v8028_v41  ;;  %v8262_v36 = vld [vmem:[%s6801_s6 + $0x191] sm:$0xff]  ;;  %v8265_v2 = vld [vmem:[%s6801_s6 + $0x199] sm:$0xff]  ;;  %v8284_v52 = vld [vmem:[%s6801_s6 + $0x1a1] sm:$0xff] }
  0xf5   : > { %v1214_v60 = vmul.f32 %v7695_v59, %v8031_v47  ;;  %v1215_v6 = vmul.f32 %v7695_v59, %v8038_v24  ;;  %v1216_v8 = vmul.f32 %v7695_v59, %v8041_v1  ;;  %v1321_v51 = vadd.f32 %v1209_v46, %v969_v56  ;;  %v8287_v56 = vld [vmem:[%s6801_s6 + $0x1a9] sm:$0xff] }
  0xf6   : > { %v1322_v35 = vadd.f32 %v1210_v63, %v970_v61  ;;  %3169 = vst.msk [vmem:[#allocation3 + $0x51] sm:$0xff] %vm2904_vm0, %v3167_v40  ;;  %v1323_v54 = vadd.f32 %v1211_v16, %v971_v25  ;;  %v1324_v20 = vadd.f32 %v1212_v57, %v972_v38  ;;  %v1325_v53 = vadd.f32 %v1213_v14, %v973_v58  ;;  %v8294_v38 = vld [vmem:[%s6801_s6 + $0x1b1] sm:$0xff] }
  0xf7   : > { %3170 = vst.msk [vmem:[#allocation3 + $0x59] sm:$0x3f] %vm3073_vm1, %v3168_v33  ;;  %v1326_v26 = vadd.f32 %v1214_v60, %v974_v34  ;;  %v1327_v39 = vadd.f32 %v1215_v6, %v975_v29  ;;  %v1328_v4 = vadd.f32 %v1216_v8, %v976_v18  ;;  %v1441_v59 = vmul.f32 %v7730_v50, %v8028_v41 }
  0xf8   : > { %v1442_v12 = vmul.f32 %v7730_v50, %v8031_v47  ;;  %v1443_v17 = vmul.f32 %v7730_v50, %v8038_v24  ;;  %v1444_v62 = vmul.f32 %v7730_v50, %v8041_v1  ;;  %v1445_v21 = vmul.f32 %v7730_v50, %v8250_v11 }
  0xf9   : > { %v1446_v34 = vmul.f32 %v7730_v50, %v8253_v43  ;;  %v1447_v41 = vmul.f32 %v7730_v50, %v8262_v36  ;;  %v1448_v47 = vmul.f32 %v7730_v50, %v8265_v2  ;;  %v1553_v29 = vadd.f32 %v1441_v59, %v1321_v51  ;;  %v8297_v50 = vld [vmem:[%s6801_s6 + $0x1b9] sm:$0xff] }
  0xfa   : > { %v1554_v18 = vadd.f32 %v1442_v12, %v1322_v35  ;;  %v1555_v24 = vadd.f32 %v1443_v17, %v1323_v54  ;;  %v1556_v19 = vadd.f32 %v1444_v62, %v1324_v20  ;;  %v1557_v3 = vadd.f32 %v1445_v21, %v1325_v53 }
  0xfb   : > { %v1558_v1 = vadd.f32 %v1446_v34, %v1326_v26  ;;  %v1559_v61 = vadd.f32 %v1447_v41, %v1327_v39  ;;  %v1560_v10 = vadd.f32 %v1448_v47, %v1328_v4  ;;  %v1673_v15 = vmul.f32 %v7757_v9, %v8250_v11 }
  0xfc   : > { %v1674_v25 = vmul.f32 %v7757_v9, %v8253_v43  ;;  %v1675_v58 = vmul.f32 %v7757_v9, %v8262_v36  ;;  %v1676_v46 = vmul.f32 %v7757_v9, %v8265_v2  ;;  %v1677_v63 = vmul.f32 %v7757_v9, %v8284_v52 }
  0xfd   : > { %v1678_v16 = vmul.f32 %v7757_v9, %v8287_v56  ;;  %v3397_v57 = vld [vmem:[#allocation3 + $0x50] sm:$0xff]  ;;  %v1679_v33 = vmul.f32 %v7757_v9, %v8294_v38  ;;  %v1680_v14 = vmul.f32 %v7757_v9, %v8297_v50  ;;  %v1785_v60 = vadd.f32 %v1673_v15, %v1553_v29 }
  0xfe   : > { %v3398_v40 = vld [vmem:[#allocation3 + $0x58] sm:$0xff]  ;;  %v1786_v6 = vadd.f32 %v1674_v25, %v1554_v18  ;;  %v1787_v51 = vadd.f32 %v1675_v58, %v1555_v24  ;;  %v1788_v35 = vadd.f32 %v1676_v46, %v1556_v19  ;;  %v1789_v54 = vadd.f32 %v1677_v63, %v1557_v3 }
  0xff   : > { %v8311_v8 = vpack.c.bf16 %v3398_v40, %v3397_v57  ;;  %v1790_v20 = vadd.f32 %v1678_v16, %v1558_v1  ;;  %v1791_v53 = vadd.f32 %v1679_v33, %v1559_v61  ;;  %v1792_v26 = vadd.f32 %v1680_v14, %v1560_v10  ;;  %v8341_v29 = vld [vmem:[%s6801_s6 + $0x192] sm:$0xff]  ;;  %v8344_v18 = vld [vmem:[%s6801_s6 + $0x19a] sm:$0xff]  ;;  %v8370_v33 = vld [vmem:[%s6801_s6 + $0x1a2] sm:$0xff] }
 0x100   : > { %v2025_v39 = vmul.f32 %v7786_v30, %v8083_v27  ;;  %v2026_v4 = vmul.f32 %v7786_v30, %v8086_v28  ;;  %v2027_v59 = vmul.f32 %v7786_v30, %v8089_v5  ;;  %v2028_v12 = vmul.f32 %v7786_v30, %v8092_v23  ;;  %v8335_v28 = vld [vmem:[%s6801_s6 + $0x182] sm:$0xff]  ;;  %v8338_v5 = vld [vmem:[%s6801_s6 + $0x18a] sm:$0xff] }
 0x101   : > { %11089 = vst [vmem:[#allocation24_spill] sm:$0xff] %v8311_v8  ;;  %6121 = vmatprep.mubr.msk.bf16.mxu1 %vm2904_vm0, %v8311_v8  ;;  %v4038_v9 = vshll.u32 %v8311_v8, 16  ;;  %v2029_v17 = vmul.f32 %v7786_v30, %v8114_v13  ;;  %v2030_v27 = vmul.f32 %v7786_v30, %v8117_v0  ;;  %v2031_v62 = vmul.f32 %v7786_v30, %v8124_v55  ;;  %v8373_v14 = vld [vmem:[%s6801_s6 + $0x1aa] sm:$0xff] }
 0x102   : > { %v2032_v21 = vmul.f32 %v7786_v30, %v8127_v31  ;;  %v2137_v41 = vadd.f32 %v2025_v39, %v1785_v60  ;;  %v2138_v23 = vadd.f32 %v2026_v4, %v1786_v6  ;;  %v2139_v47 = vadd.f32 %v2027_v59, %v1787_v51 }
 0x103   : > { %v8332_v34 = vrot.slane %v4038_v9, 1  ;;  %v2140_v24 = vadd.f32 %v2028_v12, %v1788_v35  ;;  %v2141_v19 = vadd.f32 %v2029_v17, %v1789_v54  ;;  %v2142_v3 = vadd.f32 %v2030_v27, %v1790_v20  ;;  %v8380_v54 = vld [vmem:[%s6801_s6 + $0x1b2] sm:$0xff] }
 0x104   : > { %v2143_v1 = vadd.f32 %v2031_v62, %v1791_v53  ;;  %v2144_v61 = vadd.f32 %v2032_v21, %v1792_v26  ;;  %v2257_v10 = vmul.f32 %v7824_v37, %v8114_v13  ;;  %v2258_v15 = vmul.f32 %v7824_v37, %v8117_v0 }
 0x105   : > { %v8349_v30 = vsel %vm4003_vm2, %v8185_v22, %v8332_v34  ;;  %v2259_v25 = vmul.f32 %v7824_v37, %v8124_v55  ;;  %v2260_v58 = vmul.f32 %v7824_v37, %v8127_v31  ;;  %v2261_v22 = vmul.f32 %v7824_v37, %v8335_v28 }
 0x106   : > { %11090 = vst [vmem:[#allocation25_spill] sm:$0xff] %v8349_v30  ;;  %6246 = vmatmul.mubr.msk.bf16.gmra.mrb[4].mxu0 %vm2904_vm0, %v8349_v30  ;;  %v2262_v13 = vmul.f32 %v7824_v37, %v8338_v5  ;;  %v2263_v0 = vmul.f32 %v7824_v37, %v8341_v29  ;;  %v2264_v46 = vmul.f32 %v7824_v37, %v8344_v18  ;;  %v8383_v37 = vld [vmem:[%s6801_s6 + $0x1ba] sm:$0xff] }
 0x107   : > { %v2369_v63 = vadd.f32 %v2257_v10, %v2137_v41  ;;  %v2370_v16 = vadd.f32 %v2258_v15, %v2138_v23  ;;  %v2371_v55 = vadd.f32 %v2259_v25, %v2139_v47  ;;  %v2372_v57 = vadd.f32 %v2260_v58, %v2140_v24 }
 0x108   : > { %v2373_v40 = vadd.f32 %v2261_v22, %v2141_v19  ;;  %v2374_v31 = vadd.f32 %v2262_v13, %v2142_v3  ;;  %v2375_v60 = vadd.f32 %v2263_v0, %v2143_v1  ;;  %v2376_v6 = vadd.f32 %v2264_v46, %v2144_v61 }
 0x109   : > { %v2489_v51 = vmul.f32 %v7874_v32, %v8335_v28  ;;  %v2490_v35 = vmul.f32 %v7874_v32, %v8338_v5  ;;  %v2491_v20 = vmul.f32 %v7874_v32, %v8341_v29  ;;  %v2492_v53 = vmul.f32 %v7874_v32, %v8344_v18 }
 0x10a   : > { %v2493_v26 = vmul.f32 %v7874_v32, %v8370_v33  ;;  %v2494_v39 = vmul.f32 %v7874_v32, %v8373_v14  ;;  %v2495_v9 = vmul.f32 %v7874_v32, %v8380_v54  ;;  %v2496_v4 = vmul.f32 %v7874_v32, %v8383_v37 }
 0x10b   : > { %v2601_v59 = vadd.f32 %v2489_v51, %v2369_v63  ;;  %v2602_v12 = vadd.f32 %v2490_v35, %v2370_v16  ;;  %v2603_v17 = vadd.f32 %v2491_v20, %v2371_v55  ;;  %v2604_v27 = vadd.f32 %v2492_v53, %v2372_v57  ;;  %v8409_v55 = vld [vmem:[%s6801_s6 + $0x1c0] sm:$0xff]  ;;  %v11091_v35 = vld [vmem:[#allocation21_spill] sm:$0xff] }
 0x10c   : > { %v2605_v62 = vadd.f32 %v2493_v26, %v2373_v40  ;;  %v2606_v21 = vadd.f32 %v2494_v39, %v2374_v31  ;;  %v2607_v41 = vadd.f32 %v2495_v9, %v2375_v60  ;;  %v2608_v23 = vadd.f32 %v2496_v4, %v2376_v6  ;;  %v8423_v40 = vld [vmem:[%s6801_s6 + $0x1c8] sm:$0xff]  ;;  %v8426_v31 = vld [vmem:[%s6801_s6 + $0x1d0] sm:$0xff]  ;;  %v8429_v60 = vld [vmem:[%s6801_s6 + $0x1d8] sm:$0xff] }
 0x10d   : > { %v2720_v47 = vadd.f32 %v7892_v45, %v2601_v59  ;;  %v2721_v24 = vadd.f32 %v7892_v45, %v2602_v12  ;;  %v2722_v19 = vadd.f32 %v7892_v45, %v2603_v17  ;;  %v2723_v3 = vadd.f32 %v7892_v45, %v2604_v27  ;;  %v8453_v9 = vld [vmem:[%s10901_s1 + $0x3] ss:$0 sm:$0xff] }
 0x10e   : > { %v2724_v1 = vadd.f32 %v7892_v45, %v2605_v62  ;;  %v2725_v32 = vadd.f32 %v7892_v45, %v2606_v21  ;;  %v2726_v61 = vadd.f32 %v7892_v45, %v2607_v41  ;;  %v2727_v10 = vadd.f32 %v7892_v45, %v2608_v23  ;;  %v8414_v45 = vld [vmem:[%s10901_s1] ss:$0 sm:$0xff]  ;;  %11094 = vst [vmem:[#allocation26_spill] sm:$0xff] %v8453_v9  ;;  %v8475_v23 = vld [vmem:[%s6801_s6 + $0x1e8] sm:$0xff] }
 0x10f   : > { %v2832_v15 = vmax.f32 %v2720_v47, 0.0  ;;  %v2833_v25 = vmax.f32 %v2721_v24, 0.0  ;;  %v2834_v58 = vmax.f32 %v2722_v19, 0.0  ;;  %v2835_v22 = vmax.f32 %v2723_v3, 0.0  ;;  %v8472_v41 = vld [vmem:[%s6801_s6 + $0x1e0] sm:$0xff]  ;;  %v8478_v47 = vld [vmem:[%s6801_s6 + $0x1f0] sm:$0xff] }
 0x110   : > { %v2836_v13 = vmax.f32 %v2724_v1, 0.0  ;;  %v2837_v0 = vmax.f32 %v2725_v32, 0.0  ;;  %v2838_v46 = vmax.f32 %v2726_v61, 0.0  ;;  %v2839_v63 = vmax.f32 %v2727_v10, 0.0  ;;  %v8481_v1 = vld [vmem:[%s6801_s6 + $0x1f8] sm:$0xff] }
 0x111   : > { %2945 = vst.msk [vmem:[#allocation2 + $0x140] sm:$0xff] %vm2904_vm0, %v2832_v15  ;;  %2946 = vst.msk [vmem:[#allocation2 + $0x148] sm:$0xff] %vm2904_vm0, %v2833_v25  ;;  %v4042_v16 = vshrl.u32 %v8311_v8, 16  ;;  %v401_v57 = vmul.f32 %v8414_v45, %v8157_v7  ;;  %v402_v6 = vmul.f32 %v8414_v45, %v8166_v48  ;;  %v403_v7 = vmul.f32 %v8414_v45, %v8169_v49  ;;  %v11092_v48 = vld [vmem:[#allocation22_spill] sm:$0xff]  ;;  %v11093_v49 = vld [vmem:[#allocation23_spill] sm:$0xff] }
 0x112   : > { %2947 = vst.msk [vmem:[#allocation2 + $0x150] sm:$0xff] %vm2904_vm0, %v2834_v58  ;;  %2948 = vst.msk [vmem:[#allocation2 + $0x158] sm:$0xff] %vm2904_vm0, %v2835_v22  ;;  %v404_v51 = vmul.f32 %v8414_v45, %v8172_v42  ;;  %v405_v20 = vmul.f32 %v8414_v45, %v11091_v35  ;;  %v406_v26 = vmul.f32 %v8414_v45, %v11092_v48  ;;  %v8486_v22 = vld [vmem:[%s10901_s1 + $0x6] ss:$0 sm:$0xff] }
 0x113   : > { %2949 = vst.msk [vmem:[#allocation2 + $0x160] sm:$0xff] %vm2904_vm0, %v2836_v13  ;;  %2950 = vst.msk [vmem:[#allocation2 + $0x168] sm:$0xff] %vm2904_vm0, %v2837_v0  ;;  %v8442_v53 = vor.u32 %v4042_v16, %v8332_v34  ;;  %v407_v39 = vmul.f32 %v8414_v45, %v11093_v49  ;;  %v408_v42 = vmul.f32 %v8414_v45, %v8219_v44 }
 0x114   : > { %2951 = vst.msk [vmem:[#allocation2 + $0x170] sm:$0xff] %vm2904_vm0, %v2838_v46  ;;  %2952 = vst.msk [vmem:[#allocation2 + $0x178] sm:$0xff] %vm2904_vm0, %v2839_v63  ;;  %v633_v4 = vmul.f32 %v8453_v9, %v11091_v35  ;;  %v634_v34 = vmul.f32 %v8453_v9, %v11092_v48  ;;  %v635_v59 = vmul.f32 %v8453_v9, %v11093_v49 }
 0x115   : > { %v636_v12 = vmul.f32 %v8453_v9, %v8219_v44  ;;  %v637_v17 = vmul.f32 %v8453_v9, %v8409_v55  ;;  %v638_v27 = vmul.f32 %v8453_v9, %v8423_v40  ;;  %v639_v62 = vmul.f32 %v8453_v9, %v8426_v31 }
 0x116   : > { %v640_v21 = vmul.f32 %v8453_v9, %v8429_v60  ;;  %v745_v24 = vadd.f32 %v633_v4, %v401_v57  ;;  %v746_v44 = vadd.f32 %v634_v34, %v402_v6  ;;  %v747_v19 = vadd.f32 %v635_v59, %v403_v7 }
 0x117   : > { %v748_v3 = vadd.f32 %v636_v12, %v404_v51  ;;  %v749_v32 = vadd.f32 %v637_v17, %v405_v20  ;;  %v750_v61 = vadd.f32 %v638_v27, %v406_v26  ;;  %v751_v10 = vadd.f32 %v639_v62, %v407_v39 }
 0x118   : > { %v752_v15 = vadd.f32 %v640_v21, %v408_v42  ;;  %v3172_v25 = vld [vmem:[#allocation2 + $0x140] ss:$2 sm:$0xff]  ;;  %v3176_v58 = vld [vmem:[#allocation2 + $0x141] ss:$2 sm:$0xff]  ;;  %v865_v13 = vmul.f32 %v8486_v22, %v8409_v55  ;;  %v866_v0 = vmul.f32 %v8486_v22, %v8423_v40  ;;  %v867_v46 = vmul.f32 %v8486_v22, %v8426_v31 }
 0x119   : > { %v868_v63 = vmul.f32 %v8486_v22, %v8429_v60  ;;  %v3174_v16 = vld [vmem:[#allocation2 + $0x150] ss:$2 sm:$0x3f]  ;;  %v3178_v57 = vld [vmem:[#allocation2 + $0x151] ss:$2 sm:$0x3f]  ;;  %v3187_v6 = vmax.f32 %v3172_v25, %v3176_v58  ;;  %v869_v7 = vmul.f32 %v8486_v22, %v8472_v41  ;;  %v870_v51 = vmul.f32 %v8486_v22, %v8475_v23 }
 0x11a   : > { %v871_v35 = vmul.f32 %v8486_v22, %v8478_v47  ;;  %v3180_v20 = vld [vmem:[#allocation2 + $0x160] ss:$2 sm:$0xff]  ;;  %v3188_v26 = vmax.f32 %v3174_v16, %v3178_v57  ;;  %v872_v49 = vmul.f32 %v8486_v22, %v8481_v1  ;;  %v977_v39 = vadd.f32 %v865_v13, %v745_v24  ;;  %v3184_v4 = vld [vmem:[#allocation2 + $0x161] ss:$2 sm:$0xff] }
 0x11b   : > { %v3182_v48 = vld [vmem:[#allocation2 + $0x170] ss:$2 sm:$0x3f]  ;;  %v978_v42 = vadd.f32 %v866_v0, %v746_v44  ;;  %v3186_v34 = vld [vmem:[#allocation2 + $0x171] ss:$2 sm:$0x3f]  ;;  %v979_v59 = vadd.f32 %v867_v46, %v747_v19  ;;  %v980_v12 = vadd.f32 %v868_v63, %v748_v3  ;;  %v981_v17 = vadd.f32 %v869_v7, %v749_v32 }
 0x11c   : > { %v982_v27 = vadd.f32 %v870_v51, %v750_v61  ;;  %v3189_v62 = vmax.f32 %v3180_v20, %v3184_v4  ;;  %v3190_v21 = vmax.f32 %v3182_v48, %v3186_v34  ;;  %v983_v25 = vadd.f32 %v871_v35, %v751_v10  ;;  %v8507_v16 = vld [vmem:[%s10901_s1 + $0x1] ss:$0 sm:$0xff]  ;;  %v8525_v13 = vld [vmem:[%s6801_s6 + $0x1c9] sm:$0xff]  ;;  %v8534_v46 = vld [vmem:[%s6801_s6 + $0x1d1] sm:$0xff] }
 0x11d   : > { %v984_v58 = vadd.f32 %v872_v49, %v752_v15  ;;  %v1217_v24 = vmul.f32 %v8507_v16, %v8250_v11  ;;  %v1218_v44 = vmul.f32 %v8507_v16, %v8253_v43  ;;  %v1219_v19 = vmul.f32 %v8507_v16, %v8262_v36  ;;  %v8522_v11 = vld [vmem:[%s6801_s6 + $0x1c1] sm:$0xff]  ;;  %v8537_v63 = vld [vmem:[%s6801_s6 + $0x1d9] sm:$0xff] }
 0x11e   : > { %v1220_v3 = vmul.f32 %v8507_v16, %v8265_v2  ;;  %v3191_v32 = vmax.f32 %v3187_v6, %v3189_v62  ;;  %v3192_v61 = vmax.f32 %v3188_v26, %v3190_v21  ;;  %v1221_v10 = vmul.f32 %v8507_v16, %v8284_v52  ;;  %v8542_v48 = vld [vmem:[%s10901_s1 + $0x4] ss:$0 sm:$0xff] }
 0x11f   : > { %v1222_v15 = vmul.f32 %v8507_v16, %v8287_v56  ;;  %v1223_v43 = vmul.f32 %v8507_v16, %v8294_v38  ;;  %v1224_v36 = vmul.f32 %v8507_v16, %v8297_v50  ;;  %v1329_v0 = vadd.f32 %v1217_v24, %v977_v39 }
 0x120   : > { %v1330_v2 = vadd.f32 %v1218_v44, %v978_v42  ;;  %3193 = vst.msk [vmem:[#allocation3 + $0x61] sm:$0xff] %vm2904_vm0, %v3191_v32  ;;  %v1331_v57 = vadd.f32 %v1219_v19, %v979_v59  ;;  %v1332_v6 = vadd.f32 %v1220_v3, %v980_v12  ;;  %v1333_v7 = vadd.f32 %v1221_v10, %v981_v17  ;;  %v8557_v59 = vld [vmem:[%s6801_s6 + $0x1e1] sm:$0xff]  ;;  %v8560_v12 = vld [vmem:[%s6801_s6 + $0x1e9] sm:$0xff] }
 0x121   : > { %3194 = vst.msk [vmem:[#allocation3 + $0x69] sm:$0x3f] %vm3073_vm1, %v3192_v61  ;;  %v1334_v51 = vadd.f32 %v1222_v15, %v982_v27  ;;  %v1335_v35 = vadd.f32 %v1223_v43, %v983_v25  ;;  %v1336_v20 = vadd.f32 %v1224_v36, %v984_v58  ;;  %v1449_v26 = vmul.f32 %v8542_v48, %v8284_v52  ;;  %v8567_v27 = vld [vmem:[%s6801_s6 + $0x1f1] sm:$0xff]  ;;  %v8575_v19 = vld [vmem:[%s10901_s1 + $0x7] ss:$0 sm:$0xff] }
 0x122   : > { %v1450_v49 = vmul.f32 %v8542_v48, %v8287_v56  ;;  %v1451_v39 = vmul.f32 %v8542_v48, %v8294_v38  ;;  %v1452_v42 = vmul.f32 %v8542_v48, %v8297_v50  ;;  %v1453_v4 = vmul.f32 %v8542_v48, %v8522_v11  ;;  %v8570_v50 = vld [vmem:[%s6801_s6 + $0x1f9] sm:$0xff] }
 0x123   : > { %v1454_v34 = vmul.f32 %v8542_v48, %v8525_v13  ;;  %v1455_v52 = vmul.f32 %v8542_v48, %v8534_v46  ;;  %v1456_v56 = vmul.f32 %v8542_v48, %v8537_v63  ;;  %v1561_v38 = vadd.f32 %v1449_v26, %v1329_v0 }
 0x124   : > { %v1562_v17 = vadd.f32 %v1450_v49, %v1330_v2  ;;  %v1563_v62 = vadd.f32 %v1451_v39, %v1331_v57  ;;  %v1564_v21 = vadd.f32 %v1452_v42, %v1332_v6  ;;  %v1565_v25 = vadd.f32 %v1453_v4, %v1333_v7  ;;  %v8598_v4 = vld [vmem:[%s10901_s1 + $0x2] ss:$0 sm:$0xff] }
 0x125   : > { %v1566_v58 = vadd.f32 %v1454_v34, %v1334_v51  ;;  %v1567_v24 = vadd.f32 %v1455_v52, %v1335_v35  ;;  %v1568_v44 = vadd.f32 %v1456_v56, %v1336_v20  ;;  %v1681_v3 = vmul.f32 %v8575_v19, %v8522_v11 }
 0x126   : > { %v1682_v32 = vmul.f32 %v8575_v19, %v8525_v13  ;;  %v1683_v61 = vmul.f32 %v8575_v19, %v8534_v46  ;;  %v1684_v10 = vmul.f32 %v8575_v19, %v8537_v63  ;;  %v1685_v15 = vmul.f32 %v8575_v19, %v8557_v59 }
 0x127   : > { %v1686_v43 = vmul.f32 %v8575_v19, %v8560_v12  ;;  %v3399_v36 = vld [vmem:[#allocation3 + $0x60] sm:$0xff]  ;;  %v1687_v2 = vmul.f32 %v8575_v19, %v8567_v27  ;;  %v1688_v57 = vmul.f32 %v8575_v19, %v8570_v50  ;;  %v1793_v6 = vadd.f32 %v1681_v3, %v1561_v38  ;;  %v8628_v3 = vld [vmem:[%s6801_s6 + $0x1d2] sm:$0xff] }
 0x128   : > { %v3400_v0 = vld [vmem:[#allocation3 + $0x68] sm:$0xff]  ;;  %v1794_v7 = vadd.f32 %v1682_v32, %v1562_v17  ;;  %v1795_v35 = vadd.f32 %v1683_v61, %v1563_v62  ;;  %v1796_v20 = vadd.f32 %v1684_v10, %v1564_v21  ;;  %v1797_v26 = vadd.f32 %v1685_v15, %v1565_v25  ;;  %v8631_v32 = vld [vmem:[%s6801_s6 + $0x1da] sm:$0xff] }
 0x129   : > { %v8593_v51 = vpack.c.bf16 %v3400_v0, %v3399_v36  ;;  %v1798_v49 = vadd.f32 %v1686_v43, %v1566_v58  ;;  %v1799_v39 = vadd.f32 %v1687_v2, %v1567_v24  ;;  %v1800_v42 = vadd.f32 %v1688_v57, %v1568_v44  ;;  %v8641_v2 = vld [vmem:[%s10901_s1 + $0x5] ss:$0 sm:$0xff] }
 0x12a   : > { %v2033_v34 = vmul.f32 %v8598_v4, %v8335_v28  ;;  %v2034_v56 = vmul.f32 %v8598_v4, %v8338_v5  ;;  %v2035_v38 = vmul.f32 %v8598_v4, %v8341_v29  ;;  %v2036_v17 = vmul.f32 %v8598_v4, %v8344_v18  ;;  %v8622_v5 = vld [vmem:[%s6801_s6 + $0x1c2] sm:$0xff]  ;;  %v8625_v29 = vld [vmem:[%s6801_s6 + $0x1ca] sm:$0xff] }
 0x12b   : > { %11095 = vst [vmem:[#allocation27_spill] sm:$0xff] %v8593_v51  ;;  %6122 = vmatmul.mubr.msk.bf16.gmra.mrb[8].mxu1 %vm2904_vm0, %v8593_v51  ;;  %v4045_v52 = vshll.u32 %v8593_v51, 16  ;;  %v2037_v62 = vmul.f32 %v8598_v4, %v8370_v33  ;;  %v2038_v28 = vmul.f32 %v8598_v4, %v8373_v14  ;;  %v2039_v21 = vmul.f32 %v8598_v4, %v8380_v54 }
 0x12c   : > { %v2040_v25 = vmul.f32 %v8598_v4, %v8383_v37  ;;  %v2145_v24 = vadd.f32 %v2033_v34, %v1793_v6  ;;  %v2146_v18 = vadd.f32 %v2034_v56, %v1794_v7  ;;  %v2147_v44 = vadd.f32 %v2035_v38, %v1795_v35 }
 0x12d   : > { %v8619_v58 = vrot.slane %v4045_v52, 1  ;;  %v2148_v61 = vadd.f32 %v2036_v17, %v1796_v20  ;;  %v2149_v10 = vadd.f32 %v2037_v62, %v1797_v26  ;;  %v2150_v15 = vadd.f32 %v2038_v28, %v1798_v49  ;;  %v8658_v26 = vld [vmem:[%s6801_s6 + $0x1e2] sm:$0xff] }
 0x12e   : > { %v2151_v43 = vadd.f32 %v2039_v21, %v1799_v39  ;;  %v2152_v0 = vadd.f32 %v2040_v25, %v1800_v42  ;;  %v2265_v57 = vmul.f32 %v8641_v2, %v8370_v33  ;;  %v2266_v6 = vmul.f32 %v8641_v2, %v8373_v14  ;;  %v8661_v33 = vld [vmem:[%s6801_s6 + $0x1ea] sm:$0xff]  ;;  %v8668_v42 = vld [vmem:[%s6801_s6 + $0x1f2] sm:$0xff]  ;;  %v8676_v28 = vld [vmem:[%s10901_s1 + $0x8] ss:$0 sm:$0xff] }
 0x12f   : > { %v8636_v36 = vsel %vm4003_vm2, %v8442_v53, %v8619_v58  ;;  %v2267_v53 = vmul.f32 %v8641_v2, %v8380_v54  ;;  %v2268_v7 = vmul.f32 %v8641_v2, %v8383_v37  ;;  %v2269_v35 = vmul.f32 %v8641_v2, %v8622_v5  ;;  %v8671_v37 = vld [vmem:[%s6801_s6 + $0x1fa] sm:$0xff] }
 0x130   : > { %11096 = vst [vmem:[#allocation28_spill] sm:$0xff] %v8636_v36  ;;  %6249 = vmatprep.mubr.msk.bf16.mxu0 %vm2904_vm0, %v8636_v36  ;;  %v2270_v20 = vmul.f32 %v8641_v2, %v8625_v29  ;;  %v2271_v14 = vmul.f32 %v8641_v2, %v8628_v3  ;;  %v2272_v49 = vmul.f32 %v8641_v2, %v8631_v32 }
 0x131   : > { %v2377_v54 = vadd.f32 %v2265_v57, %v2145_v24  ;;  %v2378_v39 = vadd.f32 %v2266_v6, %v2146_v18  ;;  %v2379_v34 = vadd.f32 %v2267_v53, %v2147_v44  ;;  %v2380_v52 = vadd.f32 %v2268_v7, %v2148_v61 }
 0x132   : > { %v2381_v56 = vadd.f32 %v2269_v35, %v2149_v10  ;;  %v2382_v38 = vadd.f32 %v2270_v20, %v2150_v15  ;;  %v2383_v17 = vadd.f32 %v2271_v14, %v2151_v43  ;;  %v2384_v62 = vadd.f32 %v2272_v49, %v2152_v0  ;;  %v8697_v14 = vld [vmem:[%s10902_s2] ss:$0 sm:$0xff] }
 0x133   : > { %v2497_v21 = vmul.f32 %v8676_v28, %v8622_v5  ;;  %v2498_v25 = vmul.f32 %v8676_v28, %v8625_v29  ;;  %v2499_v24 = vmul.f32 %v8676_v28, %v8628_v3  ;;  %v2500_v18 = vmul.f32 %v8676_v28, %v8631_v32 }
 0x134   : > { %v2501_v44 = vmul.f32 %v8676_v28, %v8658_v26  ;;  %v2502_v61 = vmul.f32 %v8676_v28, %v8661_v33  ;;  %v2503_v10 = vmul.f32 %v8676_v28, %v8668_v42  ;;  %v2504_v15 = vmul.f32 %v8676_v28, %v8671_v37 }
 0x135   : > { %v2609_v43 = vadd.f32 %v2497_v21, %v2377_v54  ;;  %v2610_v0 = vadd.f32 %v2498_v25, %v2378_v39  ;;  %v2611_v57 = vadd.f32 %v2499_v24, %v2379_v34  ;;  %v2612_v6 = vadd.f32 %v2500_v18, %v2380_v52 }
 0x136   : > { %v2613_v53 = vadd.f32 %v2501_v44, %v2381_v56  ;;  %v2614_v7 = vadd.f32 %v2502_v61, %v2382_v38  ;;  %v2615_v35 = vadd.f32 %v2503_v10, %v2383_v17  ;;  %v2616_v20 = vadd.f32 %v2504_v15, %v2384_v62  ;;  %v8711_v10 = vld [vmem:[%s6801_s6 + $0x200] sm:$0xff]  ;;  %v8723_v15 = vld [vmem:[%s6801_s6 + $0x210] sm:$0xff] }
 0x137   : > { %v2728_v49 = vadd.f32 %v8697_v14, %v2609_v43  ;;  %v2729_v8 = vadd.f32 %v8697_v14, %v2610_v0  ;;  %v2730_v36 = vadd.f32 %v8697_v14, %v2611_v57  ;;  %v2731_v54 = vadd.f32 %v8697_v14, %v2612_v6  ;;  %v8726_v43 = vld [vmem:[%s6801_s6 + $0x218] sm:$0xff] }
 0x138   : > { %v2732_v39 = vadd.f32 %v8697_v14, %v2613_v53  ;;  %v2733_v34 = vadd.f32 %v8697_v14, %v2614_v7  ;;  %v2734_v52 = vadd.f32 %v8697_v14, %v2615_v35  ;;  %v2735_v56 = vadd.f32 %v8697_v14, %v2616_v20  ;;  %11097 = vst [vmem:[#allocation20_spill] sm:$0xff] %v8726_v43 }
 0x139   : > { %v2840_v38 = vmax.f32 %v2728_v49, 0.0  ;;  %v2841_v17 = vmax.f32 %v2729_v8, 0.0  ;;  %v2842_v62 = vmax.f32 %v2730_v36, 0.0  ;;  %v2843_v21 = vmax.f32 %v2731_v54, 0.0  ;;  %v8720_v36 = vld [vmem:[%s6801_s6 + $0x208] sm:$0xff] }
 0x13a   : > { %v2844_v25 = vmax.f32 %v2732_v39, 0.0  ;;  %v2845_v24 = vmax.f32 %v2733_v34, 0.0  ;;  %v2846_v18 = vmax.f32 %v2734_v52, 0.0  ;;  %v2847_v44 = vmax.f32 %v2735_v56, 0.0  ;;  %v8764_v34 = vld [vmem:[%s6801_s6 + $0x220] sm:$0xff] }
 0x13b   : > { %2953 = vst.msk [vmem:[#allocation2 + $0x180] sm:$0xff] %vm2904_vm0, %v2840_v38  ;;  %2954 = vst.msk [vmem:[#allocation2 + $0x188] sm:$0xff] %vm2904_vm0, %v2841_v17  ;;  %v4049_v61 = vshrl.u32 %v8593_v51, 16  ;;  %v409_v8 = vmul.f32 %v8414_v45, %v8409_v55  ;;  %v410_v0 = vmul.f32 %v8414_v45, %v8423_v40  ;;  %v411_v55 = vmul.f32 %v8414_v45, %v8426_v31  ;;  %v8773_v17 = vld [vmem:[%s6801_s6 + $0x238] sm:$0xff] }
 0x13c   : > { %2955 = vst.msk [vmem:[#allocation2 + $0x190] sm:$0xff] %vm2904_vm0, %v2842_v62  ;;  %2956 = vst.msk [vmem:[#allocation2 + $0x198] sm:$0xff] %vm2904_vm0, %v2843_v21  ;;  %v412_v57 = vmul.f32 %v8414_v45, %v8429_v60  ;;  %v413_v6 = vmul.f32 %v8414_v45, %v8472_v41  ;;  %v414_v40 = vmul.f32 %v8414_v45, %v8475_v23 }
 0x13d   : > { %2957 = vst.msk [vmem:[#allocation2 + $0x1a0] sm:$0xff] %vm2904_vm0, %v2844_v25  ;;  %2958 = vst.msk [vmem:[#allocation2 + $0x1a8] sm:$0xff] %vm2904_vm0, %v2845_v24  ;;  %v8739_v53 = vor.u32 %v4049_v61, %v8619_v58  ;;  %v415_v31 = vmul.f32 %v8414_v45, %v8478_v47  ;;  %v416_v60 = vmul.f32 %v8414_v45, %v8481_v1 }
 0x13e   : > { %2959 = vst.msk [vmem:[#allocation2 + $0x1b0] sm:$0xff] %vm2904_vm0, %v2846_v18  ;;  %2960 = vst.msk [vmem:[#allocation2 + $0x1b8] sm:$0xff] %vm2904_vm0, %v2847_v44  ;;  %v641_v7 = vmul.f32 %v8453_v9, %v8472_v41  ;;  %v642_v35 = vmul.f32 %v8453_v9, %v8475_v23  ;;  %v643_v58 = vmul.f32 %v8453_v9, %v8478_v47  ;;  %v8767_v23 = vld [vmem:[%s6801_s6 + $0x228] sm:$0xff]  ;;  %v8770_v47 = vld [vmem:[%s6801_s6 + $0x230] sm:$0xff] }
 0x13f   : > { %v644_v20 = vmul.f32 %v8453_v9, %v8481_v1  ;;  %v645_v49 = vmul.f32 %v8453_v9, %v8711_v10  ;;  %v646_v54 = vmul.f32 %v8453_v9, %v8720_v36  ;;  %v647_v39 = vmul.f32 %v8453_v9, %v8723_v15  ;;  %11098 = vst [vmem:[#allocation16_spill] sm:$0xff] %v8764_v34 }
 0x140   : > { %v648_v41 = vmul.f32 %v8453_v9, %v8726_v43  ;;  %11099 = vst [vmem:[#allocation8_spill] sm:$0xff] %v8767_v23  ;;  %11100 = vst [vmem:[#allocation12_spill] sm:$0xff] %v8770_v47  ;;  %v753_v52 = vadd.f32 %v641_v7, %v409_v8  ;;  %v754_v1 = vadd.f32 %v642_v35, %v410_v0 }
 0x141   : > { %v755_v56 = vadd.f32 %v643_v58, %v411_v55  ;;  %v756_v38 = vadd.f32 %v644_v20, %v412_v57  ;;  %v757_v62 = vadd.f32 %v645_v49, %v413_v6  ;;  %v758_v21 = vadd.f32 %v646_v54, %v414_v40 }
 0x142   : > { %v759_v25 = vadd.f32 %v647_v39, %v415_v31  ;;  %v760_v24 = vadd.f32 %v648_v41, %v416_v60  ;;  %v3196_v18 = vld [vmem:[#allocation2 + $0x180] ss:$2 sm:$0xff]  ;;  %v3200_v44 = vld [vmem:[#allocation2 + $0x181] ss:$2 sm:$0xff]  ;;  %v873_v61 = vmul.f32 %v8486_v22, %v8711_v10  ;;  %v874_v51 = vmul.f32 %v8486_v22, %v8720_v36 }
 0x143   : > { %v875_v8 = vmul.f32 %v8486_v22, %v8723_v15  ;;  %v876_v0 = vmul.f32 %v8486_v22, %v8726_v43  ;;  %v3198_v55 = vld [vmem:[#allocation2 + $0x190] ss:$2 sm:$0x3f]  ;;  %v3202_v57 = vld [vmem:[#allocation2 + $0x191] ss:$2 sm:$0x3f]  ;;  %v3211_v6 = vmax.f32 %v3196_v18, %v3200_v44  ;;  %v877_v40 = vmul.f32 %v8486_v22, %v8764_v34 }
 0x144   : > { %v878_v31 = vmul.f32 %v8486_v22, %v8767_v23  ;;  %v879_v60 = vmul.f32 %v8486_v22, %v8770_v47  ;;  %v3204_v7 = vld [vmem:[#allocation2 + $0x1a0] ss:$2 sm:$0xff]  ;;  %v3212_v58 = vmax.f32 %v3198_v55, %v3202_v57  ;;  %v880_v20 = vmul.f32 %v8486_v22, %v8773_v17  ;;  %v3208_v39 = vld [vmem:[#allocation2 + $0x1a1] ss:$2 sm:$0xff] }
 0x145   : > { %v3206_v35 = vld [vmem:[#allocation2 + $0x1b0] ss:$2 sm:$0x3f]  ;;  %v985_v49 = vadd.f32 %v873_v61, %v753_v52  ;;  %v986_v54 = vadd.f32 %v874_v51, %v754_v1  ;;  %v3210_v41 = vld [vmem:[#allocation2 + $0x1b1] ss:$2 sm:$0x3f]  ;;  %v987_v18 = vadd.f32 %v875_v8, %v755_v56  ;;  %v988_v44 = vadd.f32 %v876_v0, %v756_v38 }
 0x146   : > { %v989_v30 = vadd.f32 %v877_v40, %v757_v62  ;;  %v990_v9 = vadd.f32 %v878_v31, %v758_v21  ;;  %v3213_v23 = vmax.f32 %v3204_v7, %v3208_v39  ;;  %v3214_v34 = vmax.f32 %v3206_v35, %v3210_v41 }
 0x147   : > { %v991_v43 = vadd.f32 %v879_v60, %v759_v25  ;;  %v992_v47 = vadd.f32 %v880_v20, %v760_v24  ;;  %v1225_v55 = vmul.f32 %v8507_v16, %v8522_v11  ;;  %v1226_v52 = vmul.f32 %v8507_v16, %v8525_v13  ;;  %v8804_v11 = vld [vmem:[%s6801_s6 + $0x201] sm:$0xff]  ;;  %v8807_v25 = vld [vmem:[%s6801_s6 + $0x209] sm:$0xff] }
 0x148   : > { %v1227_v51 = vmul.f32 %v8507_v16, %v8534_v46  ;;  %v1228_v1 = vmul.f32 %v8507_v16, %v8537_v63  ;;  %v3215_v56 = vmax.f32 %v3211_v6, %v3213_v23  ;;  %v3216_v38 = vmax.f32 %v3212_v58, %v3214_v34  ;;  %v8816_v34 = vld [vmem:[%s6801_s6 + $0x211] sm:$0xff]  ;;  %v8819_v23 = vld [vmem:[%s6801_s6 + $0x219] sm:$0xff] }
 0x149   : > { %v1229_v62 = vmul.f32 %v8507_v16, %v8557_v59  ;;  %v1230_v21 = vmul.f32 %v8507_v16, %v8560_v12  ;;  %v1231_v13 = vmul.f32 %v8507_v16, %v8567_v27  ;;  %v1232_v46 = vmul.f32 %v8507_v16, %v8570_v50 }
 0x14a   : > { %v1337_v24 = vadd.f32 %v1225_v55, %v985_v49  ;;  %v1338_v63 = vadd.f32 %v1226_v52, %v986_v54  ;;  %3217 = vst.msk [vmem:[#allocation3 + $0x71] sm:$0xff] %vm2904_vm0, %v3215_v56  ;;  %v1339_v61 = vadd.f32 %v1227_v51, %v987_v18  ;;  %v1340_v8 = vadd.f32 %v1228_v1, %v988_v44  ;;  %v8838_v49 = vld [vmem:[%s6801_s6 + $0x221] sm:$0xff]  ;;  %v8841_v54 = vld [vmem:[%s6801_s6 + $0x229] sm:$0xff]  ;;  %v8851_v52 = vld [vmem:[%s6801_s6 + $0x231] sm:$0xff] }
 0x14b   : > { %3218 = vst.msk [vmem:[#allocation3 + $0x79] sm:$0x3f] %vm3073_vm1, %v3216_v38  ;;  %v1341_v0 = vadd.f32 %v1229_v62, %v989_v30  ;;  %v1342_v57 = vadd.f32 %v1230_v21, %v990_v9  ;;  %v1343_v6 = vadd.f32 %v1231_v13, %v991_v43  ;;  %v1344_v40 = vadd.f32 %v1232_v46, %v992_v47  ;;  %v6643_v55 = vld [vmem:[%s10903_s3 + $0x20] sm:$0xff]  }
 0x14c   : > { %v1457_v31 = vmul.f32 %v8542_v48, %v8557_v59  ;;  %v1458_v60 = vmul.f32 %v8542_v48, %v8560_v12  ;;  %v1459_v7 = vmul.f32 %v8542_v48, %v8567_v27  ;;  %v1460_v35 = vmul.f32 %v8542_v48, %v8570_v50  ;;  %v8854_v51 = vld [vmem:[%s6801_s6 + $0x239] sm:$0xff]  ;;  %6301 = vmatprep.subr.bf16.mxu0 %v6643_v55 }
 0x14d   : > { %v1461_v30 = vmul.f32 %v8542_v48, %v8804_v11  ;;  %v1462_v9 = vmul.f32 %v8542_v48, %v8807_v25  ;;  %v1463_v43 = vmul.f32 %v8542_v48, %v8816_v34  ;;  %v1464_v59 = vmul.f32 %v8542_v48, %v8819_v23 }
 0x14e   : > { %v1569_v12 = vadd.f32 %v1457_v31, %v1337_v24  ;;  %v1570_v47 = vadd.f32 %v1458_v60, %v1338_v63  ;;  %v1571_v27 = vadd.f32 %v1459_v7, %v1339_v61  ;;  %v1572_v58 = vadd.f32 %v1460_v35, %v1340_v8 }
 0x14f   : > { %v1573_v20 = vadd.f32 %v1461_v30, %v1341_v0  ;;  %v1574_v50 = vadd.f32 %v1462_v9, %v1342_v57  ;;  %v1575_v39 = vadd.f32 %v1463_v43, %v1343_v6  ;;  %v1576_v41 = vadd.f32 %v1464_v59, %v1344_v40 }
 0x150   : > { %v1689_v18 = vmul.f32 %v8575_v19, %v8804_v11  ;;  %v1690_v44 = vmul.f32 %v8575_v19, %v8807_v25  ;;  %v1691_v1 = vmul.f32 %v8575_v19, %v8816_v34  ;;  %v1692_v56 = vmul.f32 %v8575_v19, %v8819_v23 }
 0x151   : > { %v1693_v38 = vmul.f32 %v8575_v19, %v8838_v49  ;;  %v1694_v62 = vmul.f32 %v8575_v19, %v8841_v54  ;;  %v3401_v21 = vld [vmem:[#allocation3 + $0x70] sm:$0xff]  ;;  %v1695_v46 = vmul.f32 %v8575_v19, %v8851_v52  ;;  %v1696_v24 = vmul.f32 %v8575_v19, %v8854_v51 }
 0x152   : > { %v3402_v13 = vld [vmem:[#allocation3 + $0x78] sm:$0xff]  ;;  %v1801_v63 = vadd.f32 %v1689_v18, %v1569_v12  ;;  %v1802_v61 = vadd.f32 %v1690_v44, %v1570_v47  ;;  %v1803_v0 = vadd.f32 %v1691_v1, %v1571_v27  ;;  %v1804_v57 = vadd.f32 %v1692_v56, %v1572_v58 }
 0x153   : > { %v8868_v8 = vpack.c.bf16 %v3402_v13, %v3401_v21  ;;  %v1805_v6 = vadd.f32 %v1693_v38, %v1573_v20  ;;  %v1806_v40 = vadd.f32 %v1694_v62, %v1574_v50  ;;  %v1807_v31 = vadd.f32 %v1695_v46, %v1575_v39  ;;  %v8898_v50 = vld [vmem:[%s6801_s6 + $0x212] sm:$0xff]  ;;  %v8901_v39 = vld [vmem:[%s6801_s6 + $0x21a] sm:$0xff] }
 0x154   : > { %v1808_v60 = vadd.f32 %v1696_v24, %v1576_v41  ;;  %v2041_v7 = vmul.f32 %v8598_v4, %v8622_v5  ;;  %v2042_v30 = vmul.f32 %v8598_v4, %v8625_v29  ;;  %v2043_v9 = vmul.f32 %v8598_v4, %v8628_v3  ;;  %v8892_v29 = vld [vmem:[%s6801_s6 + $0x202] sm:$0xff]  ;;  %v8895_v3 = vld [vmem:[%s6801_s6 + $0x20a] sm:$0xff] }
 0x155   : > { %11101 = vst [vmem:[#allocation13_spill] sm:$0xff] %v8868_v8  ;;  %6125 = vmatprep.mubr.msk.bf16.mxu1 %vm2904_vm0, %v8868_v8  ;;  %v4052_v35 = vshll.u32 %v8868_v8, 16  ;;  %v2044_v43 = vmul.f32 %v8598_v4, %v8631_v32  ;;  %v2045_v59 = vmul.f32 %v8598_v4, %v8658_v26  ;;  %v2046_v5 = vmul.f32 %v8598_v4, %v8661_v33 }
 0x156   : > { %v2047_v12 = vmul.f32 %v8598_v4, %v8668_v42  ;;  %v2048_v47 = vmul.f32 %v8598_v4, %v8671_v37  ;;  %v2153_v58 = vadd.f32 %v2041_v7, %v1801_v63  ;;  %v2154_v32 = vadd.f32 %v2042_v30, %v1802_v61  ;;  %v8940_v30 = vld [vmem:[%s6801_s6 + $0x23a] sm:$0xff] }
 0x157   : > { %v8889_v27 = vrot.slane %v4052_v35, 1  ;;  %v2155_v20 = vadd.f32 %v2043_v9, %v1803_v0  ;;  %v2156_v41 = vadd.f32 %v2044_v43, %v1804_v57  ;;  %v2157_v18 = vadd.f32 %v2045_v59, %v1805_v6  ;;  %v8927_v57 = vld [vmem:[%s6801_s6 + $0x222] sm:$0xff]  ;;  %v8930_v6 = vld [vmem:[%s6801_s6 + $0x22a] sm:$0xff]  ;;  %v8937_v35 = vld [vmem:[%s6801_s6 + $0x232] sm:$0xff] }
 0x158   : > { %v2158_v44 = vadd.f32 %v2046_v5, %v1806_v40  ;;  %v2159_v55 = vadd.f32 %v2047_v12, %v1807_v31  ;;  %v2160_v56 = vadd.f32 %v2048_v47, %v1808_v60  ;;  %v2273_v38 = vmul.f32 %v8641_v2, %v8658_v26 }
 0x159   : > { %v8906_v1 = vsel %vm4003_vm2, %v8739_v53, %v8889_v27  ;;  %v2274_v62 = vmul.f32 %v8641_v2, %v8661_v33  ;;  %v2275_v21 = vmul.f32 %v8641_v2, %v8668_v42  ;;  %v2276_v13 = vmul.f32 %v8641_v2, %v8671_v37 }
 0x15a   : > { %11102 = vst [vmem:[#allocation14_spill] sm:$0xff] %v8906_v1  ;;  %6250 = vmatmul.mubr.msk.bf16.gmra.mrb[8].mxu0 %vm2904_vm0, %v8906_v1  ;;  %v2277_v53 = vmul.f32 %v8641_v2, %v8892_v29  ;;  %v2278_v26 = vmul.f32 %v8641_v2, %v8895_v3  ;;  %v2279_v33 = vmul.f32 %v8641_v2, %v8898_v50 }
 0x15b   : > { %v2280_v46 = vmul.f32 %v8641_v2, %v8901_v39  ;;  %v2385_v24 = vadd.f32 %v2273_v38, %v2153_v58  ;;  %v2386_v63 = vadd.f32 %v2274_v62, %v2154_v32  ;;  %v2387_v42 = vadd.f32 %v2275_v21, %v2155_v20 }
 0x15c   : > { %v2388_v61 = vadd.f32 %v2276_v13, %v2156_v41  ;;  %v2389_v0 = vadd.f32 %v2277_v53, %v2157_v18  ;;  %v2390_v37 = vadd.f32 %v2278_v26, %v2158_v44  ;;  %v2391_v40 = vadd.f32 %v2279_v33, %v2159_v55 }
 0x15d   : > { %v2392_v31 = vadd.f32 %v2280_v46, %v2160_v56  ;;  %v2505_v60 = vmul.f32 %v8676_v28, %v8892_v29  ;;  %v2506_v7 = vmul.f32 %v8676_v28, %v8895_v3  ;;  %v2507_v9 = vmul.f32 %v8676_v28, %v8898_v50 }
 0x15e   : > { %v2508_v43 = vmul.f32 %v8676_v28, %v8901_v39  ;;  %v2509_v59 = vmul.f32 %v8676_v28, %v8927_v57  ;;  %v2510_v5 = vmul.f32 %v8676_v28, %v8930_v6  ;;  %v2511_v12 = vmul.f32 %v8676_v28, %v8937_v35 }
 0x15f   : > { %v2512_v47 = vmul.f32 %v8676_v28, %v8940_v30  ;;  %v2617_v58 = vadd.f32 %v2505_v60, %v2385_v24  ;;  %v2618_v32 = vadd.f32 %v2506_v7, %v2386_v63  ;;  %v2619_v20 = vadd.f32 %v2507_v9, %v2387_v42  ;;  %v8966_v7 = vld [vmem:[%s6801_s6 + $0x240] sm:$0xff] }
 0x160   : > { %v2620_v41 = vadd.f32 %v2508_v43, %v2388_v61  ;;  %v2621_v18 = vadd.f32 %v2509_v59, %v2389_v0  ;;  %v2622_v44 = vadd.f32 %v2510_v5, %v2390_v37  ;;  %v2623_v55 = vadd.f32 %v2511_v12, %v2391_v40  ;;  %v8975_v43 = vld [vmem:[%s6801_s6 + $0x248] sm:$0xff]  ;;  %v8978_v59 = vld [vmem:[%s6801_s6 + $0x250] sm:$0xff]  ;;  %v8981_v5 = vld [vmem:[%s6801_s6 + $0x258] sm:$0xff] }
 0x161   : > { %v2624_v56 = vadd.f32 %v2512_v47, %v2392_v31  ;;  %v2736_v38 = vadd.f32 %v8697_v14, %v2617_v58  ;;  %v2737_v62 = vadd.f32 %v8697_v14, %v2618_v32  ;;  %v2738_v21 = vadd.f32 %v8697_v14, %v2619_v20  ;;  %v11103_v47 = vld [vmem:[#allocation20_spill] sm:$0xff] }
 0x162   : > { %v2739_v13 = vadd.f32 %v8697_v14, %v2620_v41  ;;  %v2740_v53 = vadd.f32 %v8697_v14, %v2621_v18  ;;  %v2741_v26 = vadd.f32 %v8697_v14, %v2622_v44  ;;  %v2742_v33 = vadd.f32 %v8697_v14, %v2623_v55  ;;  %v11104_v32 = vld [vmem:[#allocation16_spill] sm:$0xff] }
 0x163   : > { %v2743_v46 = vadd.f32 %v8697_v14, %v2624_v56  ;;  %v2848_v24 = vmax.f32 %v2736_v38, 0.0  ;;  %v2849_v63 = vmax.f32 %v2737_v62, 0.0  ;;  %v2850_v42 = vmax.f32 %v2738_v21, 0.0  ;;  %v11107_v56 = vld [vmem:[#allocation26_spill] sm:$0xff] }
 0x164   : > { %v2851_v61 = vmax.f32 %v2739_v13, 0.0  ;;  %v2852_v0 = vmax.f32 %v2740_v53, 0.0  ;;  %v2853_v37 = vmax.f32 %v2741_v26, 0.0  ;;  %v2854_v40 = vmax.f32 %v2742_v33, 0.0  ;;  %v9019_v33 = vld [vmem:[%s6801_s6 + $0x260] sm:$0xff] }
 0x165   : > { %v2855_v31 = vmax.f32 %v2743_v46, 0.0  ;;  %2961 = vst.msk [vmem:[#allocation2 + $0x1c0] sm:$0xff] %vm2904_vm0, %v2848_v24  ;;  %2962 = vst.msk [vmem:[#allocation2 + $0x1c8] sm:$0xff] %vm2904_vm0, %v2849_v63  ;;  %v4056_v60 = vshrl.u32 %v8868_v8, 16  ;;  %v417_v9 = vmul.f32 %v8414_v45, %v8711_v10  ;;  %v418_v12 = vmul.f32 %v8414_v45, %v8720_v36  ;;  %v11105_v36 = vld [vmem:[#allocation8_spill] sm:$0xff]  ;;  %v9025_v24 = vld [vmem:[%s6801_s6 + $0x270] sm:$0xff] }
 0x166   : > { %2963 = vst.msk [vmem:[#allocation2 + $0x1d0] sm:$0xff] %vm2904_vm0, %v2850_v42  ;;  %2964 = vst.msk [vmem:[#allocation2 + $0x1d8] sm:$0xff] %vm2904_vm0, %v2851_v61  ;;  %v419_v10 = vmul.f32 %v8414_v45, %v8723_v15  ;;  %v420_v58 = vmul.f32 %v8414_v45, %v11103_v47  ;;  %v421_v20 = vmul.f32 %v8414_v45, %v11104_v32  ;;  %v11106_v15 = vld [vmem:[#allocation12_spill] sm:$0xff] }
 0x167   : > { %2965 = vst.msk [vmem:[#allocation2 + $0x1e0] sm:$0xff] %vm2904_vm0, %v2852_v0  ;;  %2966 = vst.msk [vmem:[#allocation2 + $0x1e8] sm:$0xff] %vm2904_vm0, %v2853_v37  ;;  %v8994_v41 = vor.u32 %v4056_v60, %v8889_v27  ;;  %v422_v18 = vmul.f32 %v8414_v45, %v11105_v36  ;;  %v423_v44 = vmul.f32 %v8414_v45, %v11106_v15  ;;  %v9022_v46 = vld [vmem:[%s6801_s6 + $0x268] sm:$0xff]  ;;  %v9028_v0 = vld [vmem:[%s6801_s6 + $0x278] sm:$0xff] }
 0x168   : > { %2967 = vst.msk [vmem:[#allocation2 + $0x1f0] sm:$0xff] %vm2904_vm0, %v2854_v40  ;;  %2968 = vst.msk [vmem:[#allocation2 + $0x1f8] sm:$0xff] %vm2904_vm0, %v2855_v31  ;;  %v424_v55 = vmul.f32 %v8414_v45, %v8773_v17  ;;  %v649_v38 = vmul.f32 %v11107_v56, %v11104_v32  ;;  %v650_v62 = vmul.f32 %v11107_v56, %v11105_v36 }
 0x169   : > { %v651_v27 = vmul.f32 %v11107_v56, %v11106_v15  ;;  %v652_v21 = vmul.f32 %v11107_v56, %v8773_v17  ;;  %v653_v13 = vmul.f32 %v11107_v56, %v8966_v7  ;;  %v654_v53 = vmul.f32 %v11107_v56, %v8975_v43  ;;  %11108 = vst [vmem:[#allocation15_spill] sm:$0xff] %v9019_v33 }
 0x16a   : > { %v655_v45 = vmul.f32 %v11107_v56, %v8978_v59  ;;  %v656_v26 = vmul.f32 %v11107_v56, %v8981_v5  ;;  %11109 = vst [vmem:[#allocation5_spill] sm:$0xff] %v9022_v46  ;;  %11110 = vst [vmem:[#allocation21_spill] sm:$0xff] %v9025_v24  ;;  %v761_v63 = vadd.f32 %v649_v38, %v417_v9 }
 0x16b   : > { %v762_v17 = vadd.f32 %v650_v62, %v418_v12  ;;  %v763_v42 = vadd.f32 %v651_v27, %v419_v10  ;;  %v764_v61 = vadd.f32 %v652_v21, %v420_v58  ;;  %v765_v37 = vadd.f32 %v653_v13, %v421_v20 }
 0x16c   : > { %v766_v40 = vadd.f32 %v654_v53, %v422_v18  ;;  %v767_v31 = vadd.f32 %v655_v45, %v423_v44  ;;  %v768_v60 = vadd.f32 %v656_v26, %v424_v55  ;;  %v3220_v47 = vld [vmem:[#allocation2 + $0x1c0] ss:$2 sm:$0xff]  ;;  %v3224_v32 = vld [vmem:[#allocation2 + $0x1c1] ss:$2 sm:$0xff]  ;;  %v881_v36 = vmul.f32 %v8486_v22, %v8966_v7 }
 0x16d   : > { %v882_v15 = vmul.f32 %v8486_v22, %v8975_v43  ;;  %v883_v9 = vmul.f32 %v8486_v22, %v8978_v59  ;;  %v884_v12 = vmul.f32 %v8486_v22, %v8981_v5  ;;  %v3222_v10 = vld [vmem:[#allocation2 + $0x1d0] ss:$2 sm:$0x3f]  ;;  %v3226_v58 = vld [vmem:[#allocation2 + $0x1d1] ss:$2 sm:$0x3f]  ;;  %v3235_v20 = vmax.f32 %v3220_v47, %v3224_v32 }
 0x16e   : > { %v885_v18 = vmul.f32 %v8486_v22, %v9019_v33  ;;  %v886_v44 = vmul.f32 %v8486_v22, %v9022_v46  ;;  %v887_v55 = vmul.f32 %v8486_v22, %v9025_v24  ;;  %v3228_v56 = vld [vmem:[#allocation2 + $0x1e0] ss:$2 sm:$0xff]  ;;  %v3236_v62 = vmax.f32 %v3222_v10, %v3226_v58  ;;  %v3232_v53 = vld [vmem:[#allocation2 + $0x1e1] ss:$2 sm:$0xff] }
 0x16f   : > { %v3230_v38 = vld [vmem:[#allocation2 + $0x1f0] ss:$2 sm:$0x3f]  ;;  %v888_v27 = vmul.f32 %v8486_v22, %v9028_v0  ;;  %v993_v21 = vadd.f32 %v881_v36, %v761_v63  ;;  %v994_v13 = vadd.f32 %v882_v15, %v762_v17  ;;  %v3234_v45 = vld [vmem:[#allocation2 + $0x1f1] ss:$2 sm:$0x3f]  ;;  %v995_v26 = vadd.f32 %v883_v9, %v763_v42 }
 0x170   : > { %v996_v47 = vadd.f32 %v884_v12, %v764_v61  ;;  %v997_v32 = vadd.f32 %v885_v18, %v765_v37  ;;  %v998_v8 = vadd.f32 %v886_v44, %v766_v40  ;;  %v3237_v1 = vmax.f32 %v3228_v56, %v3232_v53 }
 0x171   : > { %v3238_v46 = vmax.f32 %v3230_v38, %v3234_v45  ;;  %v999_v33 = vadd.f32 %v887_v55, %v767_v31  ;;  %v1000_v24 = vadd.f32 %v888_v27, %v768_v60  ;;  %v1233_v10 = vmul.f32 %v8507_v16, %v8804_v11  ;;  %v9059_v11 = vld [vmem:[%s6801_s6 + $0x241] sm:$0xff]  ;;  %v9062_v31 = vld [vmem:[%s6801_s6 + $0x249] sm:$0xff] }
 0x172   : > { %v1234_v22 = vmul.f32 %v8507_v16, %v8807_v25  ;;  %v1235_v63 = vmul.f32 %v8507_v16, %v8816_v34  ;;  %v1236_v17 = vmul.f32 %v8507_v16, %v8819_v23  ;;  %v3239_v42 = vmax.f32 %v3235_v20, %v3237_v1  ;;  %v9071_v1 = vld [vmem:[%s6801_s6 + $0x251] sm:$0xff] }
 0x173   : > { %v3240_v61 = vmax.f32 %v3236_v62, %v3238_v46  ;;  %v1237_v37 = vmul.f32 %v8507_v16, %v8838_v49  ;;  %v1238_v40 = vmul.f32 %v8507_v16, %v8841_v54  ;;  %v1239_v25 = vmul.f32 %v8507_v16, %v8851_v52  ;;  %v9074_v46 = vld [vmem:[%s6801_s6 + $0x259] sm:$0xff]  ;;  %v9099_v62 = vld [vmem:[%s6801_s6 + $0x271] sm:$0xff] }
 0x174   : > { %v1240_v34 = vmul.f32 %v8507_v16, %v8854_v51  ;;  %v1345_v60 = vadd.f32 %v1233_v10, %v993_v21  ;;  %v1346_v23 = vadd.f32 %v1234_v22, %v994_v13  ;;  %3241 = vst.msk [vmem:[#allocation3 + $0x81] sm:$0xff] %vm2904_vm0, %v3239_v42  ;;  %v1347_v36 = vadd.f32 %v1235_v63, %v995_v26 }
 0x175   : > { %3242 = vst.msk [vmem:[#allocation3 + $0x89] sm:$0x3f] %vm3073_vm1, %v3240_v61  ;;  %v1348_v15 = vadd.f32 %v1236_v17, %v996_v47  ;;  %v1349_v9 = vadd.f32 %v1237_v37, %v997_v32  ;;  %v1350_v12 = vadd.f32 %v1238_v40, %v998_v8  ;;  %v1351_v58 = vadd.f32 %v1239_v25, %v999_v33  ;;  %v9089_v33 = vld [vmem:[%s6801_s6 + $0x261] sm:$0xff] }
 0x176   : > { %v1352_v16 = vadd.f32 %v1240_v34, %v1000_v24  ;;  %v1465_v20 = vmul.f32 %v8542_v48, %v8838_v49  ;;  %v1466_v18 = vmul.f32 %v8542_v48, %v8841_v54  ;;  %v1467_v44 = vmul.f32 %v8542_v48, %v8851_v52  ;;  %v9092_v24 = vld [vmem:[%s6801_s6 + $0x269] sm:$0xff] }
 0x177   : > { %v1468_v55 = vmul.f32 %v8542_v48, %v8854_v51  ;;  %v1469_v56 = vmul.f32 %v8542_v48, %v9059_v11  ;;  %v1470_v8 = vmul.f32 %v8542_v48, %v9062_v31  ;;  %v1471_v49 = vmul.f32 %v8542_v48, %v9071_v1  ;;  %v9102_v51 = vld [vmem:[%s6801_s6 + $0x279] sm:$0xff] }
 0x178   : > { %v1472_v54 = vmul.f32 %v8542_v48, %v9074_v46  ;;  %v1577_v52 = vadd.f32 %v1465_v20, %v1345_v60  ;;  %v1578_v38 = vadd.f32 %v1466_v18, %v1346_v23  ;;  %v1579_v27 = vadd.f32 %v1467_v44, %v1347_v36 }
 0x179   : > { %v1580_v21 = vadd.f32 %v1468_v55, %v1348_v15  ;;  %v1581_v13 = vadd.f32 %v1469_v56, %v1349_v9  ;;  %v1582_v53 = vadd.f32 %v1470_v8, %v1350_v12  ;;  %v1583_v45 = vadd.f32 %v1471_v49, %v1351_v58 }
 0x17a   : > { %v1584_v26 = vadd.f32 %v1472_v54, %v1352_v16  ;;  %v1697_v47 = vmul.f32 %v8575_v19, %v9059_v11  ;;  %v1698_v32 = vmul.f32 %v8575_v19, %v9062_v31  ;;  %v1699_v48 = vmul.f32 %v8575_v19, %v9071_v1 }
 0x17b   : > { %v1700_v10 = vmul.f32 %v8575_v19, %v9074_v46  ;;  %v1701_v22 = vmul.f32 %v8575_v19, %v9089_v33  ;;  %v1702_v63 = vmul.f32 %v8575_v19, %v9092_v24  ;;  %v3403_v17 = vld [vmem:[#allocation3 + $0x80] sm:$0xff]  ;;  %v1703_v61 = vmul.f32 %v8575_v19, %v9099_v62 }
 0x17c   : > { %v3404_v42 = vld [vmem:[#allocation3 + $0x88] sm:$0xff]  ;;  %v1704_v37 = vmul.f32 %v8575_v19, %v9102_v51  ;;  %v1809_v40 = vadd.f32 %v1697_v47, %v1577_v52  ;;  %v1810_v25 = vadd.f32 %v1698_v32, %v1578_v38  ;;  %v1811_v60 = vadd.f32 %v1699_v48, %v1579_v27  ;;  %v9150_v52 = vld [vmem:[%s6801_s6 + $0x252] sm:$0xff]  ;;  %v9153_v38 = vld [vmem:[%s6801_s6 + $0x25a] sm:$0xff] }
 0x17d   : > { %v9120_v34 = vpack.c.bf16 %v3404_v42, %v3403_v17  ;;  %v1812_v23 = vadd.f32 %v1700_v10, %v1580_v21  ;;  %v1813_v36 = vadd.f32 %v1701_v22, %v1581_v13  ;;  %v1814_v15 = vadd.f32 %v1702_v63, %v1582_v53  ;;  %v9175_v22 = vld [vmem:[%s6801_s6 + $0x262] sm:$0xff]  ;;  %v9185_v42 = vld [vmem:[%s6801_s6 + $0x272] sm:$0xff] }
 0x17e   : > { %v1815_v9 = vadd.f32 %v1703_v61, %v1583_v45  ;;  %v1816_v12 = vadd.f32 %v1704_v37, %v1584_v26  ;;  %v2049_v58 = vmul.f32 %v8598_v4, %v8892_v29  ;;  %v2050_v16 = vmul.f32 %v8598_v4, %v8895_v3  ;;  %v9144_v3 = vld [vmem:[%s6801_s6 + $0x242] sm:$0xff] }
 0x17f   : > { %11111 = vst [vmem:[#allocation22_spill] sm:$0xff] %v9120_v34  ;;  %6126 = vmatmul.mubr.msk.bf16.gmra.mrb[12].mxu1 %vm2904_vm0, %v9120_v34  ;;  %v4059_v19 = vshll.u32 %v9120_v34, 16  ;;  %v2051_v20 = vmul.f32 %v8598_v4, %v8898_v50  ;;  %v2052_v18 = vmul.f32 %v8598_v4, %v8901_v39  ;;  %v2053_v44 = vmul.f32 %v8598_v4, %v8927_v57  ;;  %v9147_v50 = vld [vmem:[%s6801_s6 + $0x24a] sm:$0xff] }
 0x180   : > { %v2054_v29 = vmul.f32 %v8598_v4, %v8930_v6  ;;  %v2055_v55 = vmul.f32 %v8598_v4, %v8937_v35  ;;  %v2056_v56 = vmul.f32 %v8598_v4, %v8940_v30  ;;  %v2161_v49 = vadd.f32 %v2049_v58, %v1809_v40 }
 0x181   : > { %v9141_v8 = vrot.slane %v4059_v19, 1  ;;  %v2162_v39 = vadd.f32 %v2050_v16, %v1810_v25  ;;  %v2163_v54 = vadd.f32 %v2051_v20, %v1811_v60  ;;  %v2164_v27 = vadd.f32 %v2052_v18, %v1812_v23 }
 0x182   : > { %v2165_v21 = vadd.f32 %v2053_v44, %v1813_v36  ;;  %v2166_v13 = vadd.f32 %v2054_v29, %v1814_v15  ;;  %v2167_v53 = vadd.f32 %v2055_v55, %v1815_v9  ;;  %v2168_v45 = vadd.f32 %v2056_v56, %v1816_v12 }
 0x183   : > { %v9158_v4 = vsel %vm4003_vm2, %v8994_v41, %v9141_v8  ;;  %v2281_v26 = vmul.f32 %v8641_v2, %v8927_v57  ;;  %v2282_v47 = vmul.f32 %v8641_v2, %v8930_v6  ;;  %v2283_v32 = vmul.f32 %v8641_v2, %v8937_v35  ;;  %v9178_v57 = vld [vmem:[%s6801_s6 + $0x26a] sm:$0xff] }
 0x184   : > { %11112 = vst [vmem:[#allocation23_spill] sm:$0xff] %v9158_v4  ;;  %6253 = vmatprep.mubr.msk.bf16.mxu0 %vm2904_vm0, %v9158_v4  ;;  %v2284_v48 = vmul.f32 %v8641_v2, %v8940_v30  ;;  %v2285_v41 = vmul.f32 %v8641_v2, %v9144_v3  ;;  %v2286_v10 = vmul.f32 %v8641_v2, %v9147_v50  ;;  %v9188_v30 = vld [vmem:[%s6801_s6 + $0x27a] sm:$0xff] }
 0x185   : > { %v2287_v6 = vmul.f32 %v8641_v2, %v9150_v52  ;;  %v2288_v63 = vmul.f32 %v8641_v2, %v9153_v38  ;;  %v2393_v35 = vadd.f32 %v2281_v26, %v2161_v49  ;;  %v2394_v17 = vadd.f32 %v2282_v47, %v2162_v39 }
 0x186   : > { %v2395_v61 = vadd.f32 %v2283_v32, %v2163_v54  ;;  %v2396_v37 = vadd.f32 %v2284_v48, %v2164_v27  ;;  %v2397_v40 = vadd.f32 %v2285_v41, %v2165_v21  ;;  %v2398_v25 = vadd.f32 %v2286_v10, %v2166_v13 }
 0x187   : > { %v2399_v60 = vadd.f32 %v2287_v6, %v2167_v53  ;;  %v2400_v23 = vadd.f32 %v2288_v63, %v2168_v45  ;;  %v2513_v36 = vmul.f32 %v8676_v28, %v9144_v3  ;;  %v2514_v15 = vmul.f32 %v8676_v28, %v9147_v50 }
 0x188   : > { %v2515_v2 = vmul.f32 %v8676_v28, %v9150_v52  ;;  %v2516_v9 = vmul.f32 %v8676_v28, %v9153_v38  ;;  %v2517_v12 = vmul.f32 %v8676_v28, %v9175_v22  ;;  %v2518_v58 = vmul.f32 %v8676_v28, %v9178_v57 }
 0x189   : > { %v2519_v19 = vmul.f32 %v8676_v28, %v9185_v42  ;;  %v2520_v16 = vmul.f32 %v8676_v28, %v9188_v30  ;;  %v2625_v20 = vadd.f32 %v2513_v36, %v2393_v35  ;;  %v2626_v18 = vadd.f32 %v2514_v15, %v2394_v17  ;;  %v11113_v15 = vld [vmem:[#allocation15_spill] sm:$0xff] }
 0x18a   : > { %v2627_v44 = vadd.f32 %v2515_v2, %v2395_v61  ;;  %v2628_v29 = vadd.f32 %v2516_v9, %v2396_v37  ;;  %v2629_v55 = vadd.f32 %v2517_v12, %v2397_v40  ;;  %v2630_v56 = vadd.f32 %v2518_v58, %v2398_v25  ;;  %v9218_v61 = vld [vmem:[%s6801_s6 + $0x280] sm:$0xff]  ;;  %v9232_v40 = vld [vmem:[%s6801_s6 + $0x288] sm:$0xff]  ;;  %v9235_v25 = vld [vmem:[%s6801_s6 + $0x290] sm:$0xff] }
 0x18b   : > { %v2631_v49 = vadd.f32 %v2519_v19, %v2399_v60  ;;  %v2632_v39 = vadd.f32 %v2520_v16, %v2400_v23  ;;  %v2744_v54 = vadd.f32 %v8697_v14, %v2625_v20  ;;  %v2745_v27 = vadd.f32 %v8697_v14, %v2626_v18  ;;  %v9238_v60 = vld [vmem:[%s6801_s6 + $0x298] sm:$0xff]  ;;  %v9262_v19 = vld [vmem:[%s10901_s1 + $0x3] ss:$0 sm:$0xff] }
 0x18c   : > { %v2746_v21 = vadd.f32 %v8697_v14, %v2627_v44  ;;  %v2747_v13 = vadd.f32 %v8697_v14, %v2628_v29  ;;  %v2748_v53 = vadd.f32 %v8697_v14, %v2629_v55  ;;  %v2749_v28 = vadd.f32 %v8697_v14, %v2630_v56  ;;  %11116 = vst [vmem:[#allocation20_spill] sm:$0xff] %v9262_v19 }
 0x18d   : > { %v2750_v45 = vadd.f32 %v8697_v14, %v2631_v49  ;;  %v2751_v26 = vadd.f32 %v8697_v14, %v2632_v39  ;;  %v2856_v47 = vmax.f32 %v2744_v54, 0.0  ;;  %v2857_v32 = vmax.f32 %v2745_v27, 0.0  ;;  %v9223_v14 = vld [vmem:[%s10901_s1] ss:$0 sm:$0xff]  ;;  %v9284_v39 = vld [vmem:[%s6801_s6 + $0x2a8] sm:$0xff]  ;;  %v9287_v54 = vld [vmem:[%s6801_s6 + $0x2b0] sm:$0xff] }
 0x18e   : > { %v2858_v48 = vmax.f32 %v2746_v21, 0.0  ;;  %v2859_v41 = vmax.f32 %v2747_v13, 0.0  ;;  %v2860_v10 = vmax.f32 %v2748_v53, 0.0  ;;  %v2861_v6 = vmax.f32 %v2749_v28, 0.0  ;;  %v9281_v49 = vld [vmem:[%s6801_s6 + $0x2a0] sm:$0xff]  ;;  %v9290_v53 = vld [vmem:[%s6801_s6 + $0x2b8] sm:$0xff] }
 0x18f   : > { %v2862_v63 = vmax.f32 %v2750_v45, 0.0  ;;  %v2863_v35 = vmax.f32 %v2751_v26, 0.0  ;;  %2969 = vst.msk [vmem:[#allocation2 + $0x200] sm:$0xff] %vm2904_vm0, %v2856_v47  ;;  %2970 = vst.msk [vmem:[#allocation2 + $0x208] sm:$0xff] %vm2904_vm0, %v2857_v32  ;;  %v4063_v17 = vshrl.u32 %v9120_v34, 16  ;;  %v425_v37 = vmul.f32 %v9223_v14, %v8966_v7 }
 0x190   : > { %2971 = vst.msk [vmem:[#allocation2 + $0x210] sm:$0xff] %vm2904_vm0, %v2858_v48  ;;  %2972 = vst.msk [vmem:[#allocation2 + $0x218] sm:$0xff] %vm2904_vm0, %v2859_v41  ;;  %v426_v23 = vmul.f32 %v9223_v14, %v8975_v43  ;;  %v427_v7 = vmul.f32 %v9223_v14, %v8978_v59  ;;  %v428_v36 = vmul.f32 %v9223_v14, %v8981_v5  ;;  %v11114_v43 = vld [vmem:[#allocation5_spill] sm:$0xff]  ;;  %v9295_v41 = vld [vmem:[%s10901_s1 + $0x6] ss:$0 sm:$0xff] }
 0x191   : > { %2973 = vst.msk [vmem:[#allocation2 + $0x220] sm:$0xff] %vm2904_vm0, %v2860_v10  ;;  %2974 = vst.msk [vmem:[#allocation2 + $0x228] sm:$0xff] %vm2904_vm0, %v2861_v6  ;;  %v429_v2 = vmul.f32 %v9223_v14, %v11113_v15  ;;  %v9251_v9 = vor.u32 %v4063_v17, %v9141_v8  ;;  %v430_v12 = vmul.f32 %v9223_v14, %v11114_v43  ;;  %v11115_v59 = vld [vmem:[#allocation21_spill] sm:$0xff] }
 0x192   : > { %2975 = vst.msk [vmem:[#allocation2 + $0x230] sm:$0xff] %vm2904_vm0, %v2862_v63  ;;  %2976 = vst.msk [vmem:[#allocation2 + $0x238] sm:$0xff] %vm2904_vm0, %v2863_v35  ;;  %v431_v58 = vmul.f32 %v9223_v14, %v11115_v59  ;;  %v432_v5 = vmul.f32 %v9223_v14, %v9028_v0  ;;  %v657_v16 = vmul.f32 %v9262_v19, %v11113_v15 }
 0x193   : > { %v658_v8 = vmul.f32 %v9262_v19, %v11114_v43  ;;  %v659_v20 = vmul.f32 %v9262_v19, %v11115_v59  ;;  %v660_v18 = vmul.f32 %v9262_v19, %v9028_v0  ;;  %v661_v44 = vmul.f32 %v9262_v19, %v9218_v61 }
 0x194   : > { %v662_v29 = vmul.f32 %v9262_v19, %v9232_v40  ;;  %v663_v55 = vmul.f32 %v9262_v19, %v9235_v25  ;;  %v664_v56 = vmul.f32 %v9262_v19, %v9238_v60  ;;  %v769_v27 = vadd.f32 %v657_v16, %v425_v37 }
 0x195   : > { %v770_v0 = vadd.f32 %v658_v8, %v426_v23  ;;  %v771_v21 = vadd.f32 %v659_v20, %v427_v7  ;;  %v772_v13 = vadd.f32 %v660_v18, %v428_v36  ;;  %v773_v28 = vadd.f32 %v661_v44, %v429_v2 }
 0x196   : > { %v774_v45 = vadd.f32 %v662_v29, %v430_v12  ;;  %v775_v26 = vadd.f32 %v663_v55, %v431_v58  ;;  %v776_v47 = vadd.f32 %v664_v56, %v432_v5  ;;  %v3244_v32 = vld [vmem:[#allocation2 + $0x200] ss:$2 sm:$0xff]  ;;  %v3248_v48 = vld [vmem:[#allocation2 + $0x201] ss:$2 sm:$0xff]  ;;  %v889_v10 = vmul.f32 %v9295_v41, %v9218_v61 }
 0x197   : > { %v890_v6 = vmul.f32 %v9295_v41, %v9232_v40  ;;  %v891_v63 = vmul.f32 %v9295_v41, %v9235_v25  ;;  %v892_v35 = vmul.f32 %v9295_v41, %v9238_v60  ;;  %v3246_v17 = vld [vmem:[#allocation2 + $0x210] ss:$2 sm:$0x3f]  ;;  %v3250_v37 = vld [vmem:[#allocation2 + $0x211] ss:$2 sm:$0x3f]  ;;  %v3259_v23 = vmax.f32 %v3244_v32, %v3248_v48 }
 0x198   : > { %v893_v7 = vmul.f32 %v9295_v41, %v9281_v49  ;;  %v894_v36 = vmul.f32 %v9295_v41, %v9284_v39  ;;  %v895_v15 = vmul.f32 %v9295_v41, %v9287_v54  ;;  %v3252_v2 = vld [vmem:[#allocation2 + $0x220] ss:$2 sm:$0xff]  ;;  %v3260_v12 = vmax.f32 %v3246_v17, %v3250_v37  ;;  %v3256_v16 = vld [vmem:[#allocation2 + $0x221] ss:$2 sm:$0xff] }
 0x199   : > { %v3254_v43 = vld [vmem:[#allocation2 + $0x230] ss:$2 sm:$0x3f]  ;;  %v896_v59 = vmul.f32 %v9295_v41, %v9290_v53  ;;  %v1001_v58 = vadd.f32 %v889_v10, %v769_v27  ;;  %v1002_v5 = vadd.f32 %v890_v6, %v770_v0  ;;  %v3258_v8 = vld [vmem:[#allocation2 + $0x231] ss:$2 sm:$0x3f]  ;;  %v1003_v20 = vadd.f32 %v891_v63, %v771_v21 }
 0x19a   : > { %v1004_v18 = vadd.f32 %v892_v35, %v772_v13  ;;  %v1005_v44 = vadd.f32 %v893_v7, %v773_v28  ;;  %v1006_v29 = vadd.f32 %v894_v36, %v774_v45  ;;  %v3261_v55 = vmax.f32 %v3252_v2, %v3256_v16  ;;  %v9316_v17 = vld [vmem:[%s10901_s1 + $0x1] ss:$0 sm:$0xff]  ;;  %v9334_v10 = vld [vmem:[%s6801_s6 + $0x289] sm:$0xff]  ;;  %v9343_v63 = vld [vmem:[%s6801_s6 + $0x291] sm:$0xff] }
 0x19b   : > { %v3262_v56 = vmax.f32 %v3254_v43, %v3258_v8  ;;  %v1007_v32 = vadd.f32 %v895_v15, %v775_v26  ;;  %v1008_v48 = vadd.f32 %v896_v59, %v776_v47  ;;  %v1241_v27 = vmul.f32 %v9316_v17, %v9059_v11  ;;  %v9331_v11 = vld [vmem:[%s6801_s6 + $0x281] sm:$0xff]  ;;  %v9346_v35 = vld [vmem:[%s6801_s6 + $0x299] sm:$0xff] }
 0x19c   : > { %v1242_v0 = vmul.f32 %v9316_v17, %v9062_v31  ;;  %v1243_v21 = vmul.f32 %v9316_v17, %v9071_v1  ;;  %v1244_v13 = vmul.f32 %v9316_v17, %v9074_v46  ;;  %v3263_v28 = vmax.f32 %v3259_v23, %v3261_v55  ;;  %v9351_v43 = vld [vmem:[%s10901_s1 + $0x4] ss:$0 sm:$0xff]  ;;  %v9382_v55 = vld [vmem:[%s6801_s6 + $0x2b9] sm:$0xff] }
 0x19d   : > { %v3264_v45 = vmax.f32 %v3260_v12, %v3262_v56  ;;  %v1245_v26 = vmul.f32 %v9316_v17, %v9089_v33  ;;  %v1246_v47 = vmul.f32 %v9316_v17, %v9092_v24  ;;  %v1247_v31 = vmul.f32 %v9316_v17, %v9099_v62 }
 0x19e   : > { %v1248_v1 = vmul.f32 %v9316_v17, %v9102_v51  ;;  %v1353_v6 = vadd.f32 %v1241_v27, %v1001_v58  ;;  %v1354_v46 = vadd.f32 %v1242_v0, %v1002_v5  ;;  %3265 = vst.msk [vmem:[#allocation3 + $0x91] sm:$0xff] %vm2904_vm0, %v3263_v28  ;;  %v1355_v37 = vadd.f32 %v1243_v21, %v1003_v20  ;;  %v9366_v20 = vld [vmem:[%s6801_s6 + $0x2a1] sm:$0xff] }
 0x19f   : > { %3266 = vst.msk [vmem:[#allocation3 + $0x99] sm:$0x3f] %vm3073_vm1, %v3264_v45  ;;  %v1356_v23 = vadd.f32 %v1244_v13, %v1004_v18  ;;  %v1357_v7 = vadd.f32 %v1245_v26, %v1005_v44  ;;  %v1358_v36 = vadd.f32 %v1246_v47, %v1006_v29  ;;  %v1359_v15 = vadd.f32 %v1247_v31, %v1007_v32  ;;  %v9369_v18 = vld [vmem:[%s6801_s6 + $0x2a9] sm:$0xff]  ;;  %v9379_v29 = vld [vmem:[%s6801_s6 + $0x2b1] sm:$0xff]  ;;  %v9387_v13 = vld [vmem:[%s10901_s1 + $0x7] ss:$0 sm:$0xff] }
 0x1a0   : > { %v1360_v2 = vadd.f32 %v1248_v1, %v1008_v48  ;;  %v1473_v12 = vmul.f32 %v9351_v43, %v9089_v33  ;;  %v1474_v59 = vmul.f32 %v9351_v43, %v9092_v24  ;;  %v1475_v58 = vmul.f32 %v9351_v43, %v9099_v62 }
 0x1a1   : > { %v1476_v5 = vmul.f32 %v9351_v43, %v9102_v51  ;;  %v1477_v16 = vmul.f32 %v9351_v43, %v9331_v11  ;;  %v1478_v8 = vmul.f32 %v9351_v43, %v9334_v10  ;;  %v1479_v33 = vmul.f32 %v9351_v43, %v9343_v63  ;;  %v6644_v51 = vld [vmem:[%s10903_s3 + $0x8] sm:$0xff]  }
 0x1a2   : > { %v1480_v24 = vmul.f32 %v9351_v43, %v9346_v35  ;;  %v1585_v62 = vadd.f32 %v1473_v12, %v1353_v6  ;;  %v1586_v44 = vadd.f32 %v1474_v59, %v1354_v46  ;;  %v1587_v56 = vadd.f32 %v1475_v58, %v1355_v37  ;;  %6143 = vmatprep.subr.bf16.mxu1 %v6644_v51 }
 0x1a3   : > { %v1588_v32 = vadd.f32 %v1476_v5, %v1356_v23  ;;  %v1589_v48 = vadd.f32 %v1477_v16, %v1357_v7  ;;  %v1590_v27 = vadd.f32 %v1478_v8, %v1358_v36  ;;  %v1591_v0 = vadd.f32 %v1479_v33, %v1359_v15  ;;  %6144 = vmatpush3.bf16.msra.mxu1 %v6644_v51  ;;  %v9410_v8 = vld [vmem:[%s10901_s1 + $0x2] ss:$0 sm:$0xff] }
 0x1a4   : > { %v1592_v21 = vadd.f32 %v1480_v24, %v1360_v2  ;;  %v1705_v28 = vmul.f32 %v9387_v13, %v9331_v11  ;;  %v1706_v45 = vmul.f32 %v9387_v13, %v9334_v10  ;;  %v1707_v26 = vmul.f32 %v9387_v13, %v9343_v63 }
 0x1a5   : > { %v1708_v47 = vmul.f32 %v9387_v13, %v9346_v35  ;;  %v1709_v31 = vmul.f32 %v9387_v13, %v9366_v20  ;;  %v1710_v1 = vmul.f32 %v9387_v13, %v9369_v18  ;;  %v3405_v6 = vld [vmem:[#allocation3 + $0x90] sm:$0xff]  ;;  %v1711_v37 = vmul.f32 %v9387_v13, %v9379_v29 }
 0x1a6   : > { %v3406_v46 = vld [vmem:[#allocation3 + $0x98] sm:$0xff]  ;;  %v1712_v23 = vmul.f32 %v9387_v13, %v9382_v55  ;;  %v1817_v7 = vadd.f32 %v1705_v28, %v1585_v62  ;;  %v1818_v36 = vadd.f32 %v1706_v45, %v1586_v44  ;;  %v1819_v2 = vadd.f32 %v1707_v26, %v1587_v56 }
 0x1a7   : > { %v9405_v15 = vpack.c.bf16 %v3406_v46, %v3405_v6  ;;  %v1820_v12 = vadd.f32 %v1708_v47, %v1588_v32  ;;  %v1821_v59 = vadd.f32 %v1709_v31, %v1589_v48  ;;  %v1822_v58 = vadd.f32 %v1710_v1, %v1590_v27  ;;  %v9440_v28 = vld [vmem:[%s6801_s6 + $0x292] sm:$0xff]  ;;  %v9443_v45 = vld [vmem:[%s6801_s6 + $0x29a] sm:$0xff] }
 0x1a8   : > { %v1823_v5 = vadd.f32 %v1711_v37, %v1591_v0  ;;  %v1824_v16 = vadd.f32 %v1712_v23, %v1592_v21  ;;  %v2057_v33 = vmul.f32 %v9410_v8, %v9144_v3  ;;  %v2058_v62 = vmul.f32 %v9410_v8, %v9147_v50  ;;  %v9434_v50 = vld [vmem:[%s6801_s6 + $0x282] sm:$0xff] }
 0x1a9   : > { %11117 = vst [vmem:[#allocation16_spill] sm:$0xff] %v9405_v15  ;;  %6129 = vmatprep.mubr.msk.bf16.mxu1 %vm2904_vm0, %v9405_v15  ;;  %v4066_v24 = vshll.u32 %v9405_v15, 16  ;;  %v2059_v44 = vmul.f32 %v9410_v8, %v9150_v52  ;;  %v2060_v51 = vmul.f32 %v9410_v8, %v9153_v38  ;;  %v2061_v56 = vmul.f32 %v9410_v8, %v9175_v22  ;;  %v9437_v52 = vld [vmem:[%s6801_s6 + $0x28a] sm:$0xff]  ;;  %v9453_v37 = vld [vmem:[%s10901_s1 + $0x5] ss:$0 sm:$0xff] }
 0x1aa   : > { %v2062_v3 = vmul.f32 %v9410_v8, %v9178_v57  ;;  %v2063_v32 = vmul.f32 %v9410_v8, %v9185_v42  ;;  %v2064_v48 = vmul.f32 %v9410_v8, %v9188_v30  ;;  %v2169_v0 = vadd.f32 %v2057_v33, %v1817_v7  ;;  %v9485_v33 = vld [vmem:[%s6801_s6 + $0x2ba] sm:$0xff] }
 0x1ab   : > { %v9431_v27 = vrot.slane %v4066_v24, 1  ;;  %v2170_v38 = vadd.f32 %v2058_v62, %v1818_v36  ;;  %v2171_v21 = vadd.f32 %v2059_v44, %v1819_v2  ;;  %v2172_v26 = vadd.f32 %v2060_v51, %v1820_v12 }
 0x1ac   : > { %v2173_v47 = vadd.f32 %v2061_v56, %v1821_v59  ;;  %v2174_v31 = vadd.f32 %v2062_v3, %v1822_v58  ;;  %v2175_v1 = vadd.f32 %v2063_v32, %v1823_v5  ;;  %v2176_v46 = vadd.f32 %v2064_v48, %v1824_v16  ;;  %v9470_v59 = vld [vmem:[%s6801_s6 + $0x2a2] sm:$0xff]  ;;  %v11120_v16 = vld [vmem:[#allocation10_spill] sm:$0xff] }
 0x1ad   : > { %11118 = vst [vmem:[#allocation8_spill] sm:$0xff] %v9431_v27  ;;  %v9448_v6 = vsel %vm4003_vm2, %v9251_v9, %v9431_v27  ;;  %v2289_v23 = vmul.f32 %v9453_v37, %v9175_v22  ;;  %v2290_v7 = vmul.f32 %v9453_v37, %v9178_v57  ;;  %v2291_v9 = vmul.f32 %v9453_v37, %v9185_v42  ;;  %v9473_v22 = vld [vmem:[%s6801_s6 + $0x2aa] sm:$0xff]  ;;  %v9490_v32 = vld [vmem:[%s10901_s1 + $0x8] ss:$0 sm:$0xff] }
 0x1ae   : > { %11119 = vst [vmem:[#allocation12_spill] sm:$0xff] %v9448_v6  ;;  %6254 = vmatmul.mubr.msk.bf16.gmra.mrb[12].mxu0 %vm2904_vm0, %v9448_v6  ;;  %v2292_v36 = vmul.f32 %v9453_v37, %v9188_v30  ;;  %v2293_v2 = vmul.f32 %v9453_v37, %v9434_v50  ;;  %v2294_v12 = vmul.f32 %v9453_v37, %v9437_v52  ;;  %v9482_v30 = vld [vmem:[%s6801_s6 + $0x2b2] sm:$0xff] }
 0x1af   : > { %v2295_v57 = vmul.f32 %v9453_v37, %v9440_v28  ;;  %v2296_v58 = vmul.f32 %v9453_v37, %v9443_v45  ;;  %v2401_v42 = vadd.f32 %v2289_v23, %v2169_v0  ;;  %v2402_v5 = vadd.f32 %v2290_v7, %v2170_v38  ;;  %6273 = vmatprep.mubr.msk.bf16.mxu0 %vm2904_vm0, %v11120_v16 }
 0x1b0   : > { %v2403_v24 = vadd.f32 %v2291_v9, %v2171_v21  ;;  %v2404_v62 = vadd.f32 %v2292_v36, %v2172_v26  ;;  %v2405_v44 = vadd.f32 %v2293_v2, %v2173_v47  ;;  %v2406_v51 = vadd.f32 %v2294_v12, %v2174_v31 }
 0x1b1   : > { %v2407_v56 = vadd.f32 %v2295_v57, %v2175_v1  ;;  %v2408_v3 = vadd.f32 %v2296_v58, %v2176_v46  ;;  %v2521_v48 = vmul.f32 %v9490_v32, %v9434_v50  ;;  %v2522_v0 = vmul.f32 %v9490_v32, %v9437_v52  ;;  %v9511_v58 = vld [vmem:[%s10902_s2] ss:$0 sm:$0xff] }
 0x1b2   : > { %v2523_v38 = vmul.f32 %v9490_v32, %v9440_v28  ;;  %v2524_v21 = vmul.f32 %v9490_v32, %v9443_v45  ;;  %v2525_v26 = vmul.f32 %v9490_v32, %v9470_v59  ;;  %v2526_v47 = vmul.f32 %v9490_v32, %v9473_v22 }
 0x1b3   : > { %v2527_v31 = vmul.f32 %v9490_v32, %v9482_v30  ;;  %v2528_v1 = vmul.f32 %v9490_v32, %v9485_v33  ;;  %v2633_v46 = vadd.f32 %v2521_v48, %v2401_v42  ;;  %v2634_v23 = vadd.f32 %v2522_v0, %v2402_v5  ;;  %v6685_v48 = vld [vmem:[%s10903_s3 + $0x20] sm:$0xff]   ;;  %v11122_v0 = vld [vmem:[#allocation25_spill] sm:$0xff] }
 0x1b4   : > { %v2635_v7 = vadd.f32 %v2523_v38, %v2403_v24  ;;  %v2636_v9 = vadd.f32 %v2524_v21, %v2404_v62  ;;  %v2637_v36 = vadd.f32 %v2525_v26, %v2405_v44  ;;  %v2638_v2 = vadd.f32 %v2526_v47, %v2406_v51  ;;  %v11121_v62 = vld [vmem:[#allocation11_spill] sm:$0xff] }
 0x1b5   : > { %v2639_v12 = vadd.f32 %v2527_v31, %v2407_v56  ;;  %v2640_v57 = vadd.f32 %v2528_v1, %v2408_v3  ;;  %v2752_v16 = vadd.f32 %v9511_v58, %v2633_v46  ;;  %v2753_v34 = vadd.f32 %v9511_v58, %v2634_v23  ;;  %v9545_v23 = vld [vmem:[%s6801_s6 + $0x2d0] sm:$0xff] }
 0x1b6   : > { %v2754_v27 = vadd.f32 %v9511_v58, %v2635_v7  ;;  %v2755_v42 = vadd.f32 %v9511_v58, %v2636_v9  ;;  %v2756_v5 = vadd.f32 %v9511_v58, %v2637_v36  ;;  %v2757_v24 = vadd.f32 %v9511_v58, %v2638_v2  ;;  %6274 = vmatmul.mubr.msk.bf16.vlgmr.msra.gmra.mrb[0].mxu0 %vm2904_vm0, %v11121_v62  ;;  %v9548_v7 = vld [vmem:[%s6801_s6 + $0x2d8] sm:$0xff] }
 0x1b7   : > { %v2758_v44 = vadd.f32 %v9511_v58, %v2639_v12  ;;  %v2759_v51 = vadd.f32 %v9511_v58, %v2640_v57  ;;  %v2864_v56 = vmax.f32 %v2752_v16, 0.0  ;;  %v2865_v3 = vmax.f32 %v2753_v34, 0.0  ;;  %6302 = vmatpush3.bf16.msra.mxu0 %v6685_v48  ;;  %6277 = vmatprep.mubr.msk.bf16.mxu0 %vm2904_vm0, %v11122_v0  ;;  %v9531_v34 = vld [vmem:[%s6801_s6 + $0x2c0] sm:$0xff]  ;;  %v9534_v16 = vld [vmem:[%s6801_s6 + $0x2c8] sm:$0xff]  ;;  %11123 = vst [vmem:[#allocation26_spill] sm:$0xff] %v9545_v23 }
 0x1b8   : > { %v2866_v38 = vmax.f32 %v2754_v27, 0.0  ;;  %v2867_v21 = vmax.f32 %v2755_v42, 0.0  ;;  %v2868_v26 = vmax.f32 %v2756_v5, 0.0  ;;  %v2869_v47 = vmax.f32 %v2757_v24, 0.0  ;;  %11124 = vst [vmem:[#allocation15_spill] sm:$0xff] %v9548_v7 }
 0x1b9   : > { %v2870_v31 = vmax.f32 %v2758_v44, 0.0  ;;  %v2871_v1 = vmax.f32 %v2759_v51, 0.0  ;;  %2977 = vst.msk [vmem:[#allocation2 + $0x240] sm:$0xff] %vm2904_vm0, %v2864_v56  ;;  %2978 = vst.msk [vmem:[#allocation2 + $0x248] sm:$0xff] %vm2904_vm0, %v2865_v3  ;;  %v433_v46 = vmul.f32 %v9223_v14, %v9218_v61  ;;  %v434_v27 = vmul.f32 %v9223_v14, %v9232_v40  ;;  %v9577_v44 = vld [vmem:[%s6801_s6 + $0x2e0] sm:$0xff]  ;;  %v9580_v51 = vld [vmem:[%s6801_s6 + $0x2e8] sm:$0xff] }
 0x1ba   : > { %2979 = vst.msk [vmem:[#allocation2 + $0x250] sm:$0xff] %vm2904_vm0, %v2866_v38  ;;  %2980 = vst.msk [vmem:[#allocation2 + $0x258] sm:$0xff] %vm2904_vm0, %v2867_v21  ;;  %v435_v61 = vmul.f32 %v9223_v14, %v9235_v25  ;;  %v436_v40 = vmul.f32 %v9223_v14, %v9238_v60  ;;  %v437_v9 = vmul.f32 %v9223_v14, %v9281_v49  ;;  %v9587_v3 = vld [vmem:[%s6801_s6 + $0x2f0] sm:$0xff] }
 0x1bb   : > { %2981 = vst.msk [vmem:[#allocation2 + $0x260] sm:$0xff] %vm2904_vm0, %v2868_v26  ;;  %2982 = vst.msk [vmem:[#allocation2 + $0x268] sm:$0xff] %vm2904_vm0, %v2869_v47  ;;  %v438_v36 = vmul.f32 %v9223_v14, %v9284_v39  ;;  %v439_v2 = vmul.f32 %v9223_v14, %v9287_v54  ;;  %v440_v25 = vmul.f32 %v9223_v14, %v9290_v53  ;;  %v11128_v47 = vld [vmem:[#allocation28_spill] sm:$0xff] }
 0x1bc   : > { %2983 = vst.msk [vmem:[#allocation2 + $0x270] sm:$0xff] %vm2904_vm0, %v2870_v31  ;;  %2984 = vst.msk [vmem:[#allocation2 + $0x278] sm:$0xff] %vm2904_vm0, %v2871_v1  ;;  %v665_v60 = vmul.f32 %v9262_v19, %v9281_v49  ;;  %v666_v12 = vmul.f32 %v9262_v19, %v9284_v39  ;;  %v667_v57 = vmul.f32 %v9262_v19, %v9287_v54 }
 0x1bd   : > { %v668_v42 = vmul.f32 %v9262_v19, %v9290_v53  ;;  %v669_v5 = vmul.f32 %v9262_v19, %v9531_v34  ;;  %v670_v24 = vmul.f32 %v9262_v19, %v9534_v16  ;;  %11125 = vst [vmem:[#allocation5_spill] sm:$0xff] %v9577_v44  ;;  %11126 = vst [vmem:[#allocation21_spill] sm:$0xff] %v9580_v51  ;;  %v9590_v53 = vld [vmem:[%s6801_s6 + $0x2f8] sm:$0xff] }
 0x1be   : > { %v671_v49 = vmul.f32 %v9262_v19, %v9545_v23  ;;  %v672_v39 = vmul.f32 %v9262_v19, %v9548_v7  ;;  %v777_v54 = vadd.f32 %v665_v60, %v433_v46  ;;  %v778_v56 = vadd.f32 %v666_v12, %v434_v27  ;;  %11127 = vst [vmem:[#allocation29_spill] sm:$0xff] %v9587_v3  ;;  %v11129_v27 = vld [vmem:[#allocation14_spill] sm:$0xff] }
 0x1bf   : > { %v779_v48 = vadd.f32 %v667_v57, %v435_v61  ;;  %v780_v38 = vadd.f32 %v668_v42, %v436_v40  ;;  %v781_v21 = vadd.f32 %v669_v5, %v437_v9  ;;  %v782_v26 = vadd.f32 %v670_v24, %v438_v36  ;;  %6278 = vmatmul.mubr.msk.bf16.gmra.mrb[4].mxu0 %vm2904_vm0, %v11128_v47 }
 0x1c0   : > { %v783_v31 = vadd.f32 %v671_v49, %v439_v2  ;;  %v784_v1 = vadd.f32 %v672_v39, %v440_v25  ;;  %v897_v0 = vmul.f32 %v9295_v41, %v9531_v34  ;;  %v898_v46 = vmul.f32 %v9295_v41, %v9534_v16  ;;  %6281 = vmatprep.mubr.msk.bf16.mxu0 %vm2904_vm0, %v11129_v27  ;;  %v3268_v60 = vld [vmem:[#allocation2 + $0x240] ss:$2 sm:$0xff]  ;;  %v3272_v12 = vld [vmem:[#allocation2 + $0x241] ss:$2 sm:$0xff] }
 0x1c1   : > { %v899_v61 = vmul.f32 %v9295_v41, %v9545_v23  ;;  %v900_v40 = vmul.f32 %v9295_v41, %v9548_v7  ;;  %v901_v9 = vmul.f32 %v9295_v41, %v9577_v44  ;;  %v902_v36 = vmul.f32 %v9295_v41, %v9580_v51  ;;  %v3270_v2 = vld [vmem:[#allocation2 + $0x250] ss:$2 sm:$0x3f]  ;;  %v3274_v25 = vld [vmem:[#allocation2 + $0x251] ss:$2 sm:$0x3f] }
 0x1c2   : > { %v3283_v57 = vmax.f32 %v3268_v60, %v3272_v12  ;;  %v903_v42 = vmul.f32 %v9295_v41, %v9587_v3  ;;  %v904_v5 = vmul.f32 %v9295_v41, %v9590_v53  ;;  %v1009_v24 = vadd.f32 %v897_v0, %v777_v54  ;;  %v3276_v49 = vld [vmem:[#allocation2 + $0x260] ss:$2 sm:$0xff]  ;;  %v3280_v19 = vld [vmem:[#allocation2 + $0x261] ss:$2 sm:$0xff] }
 0x1c3   : > { %v3278_v39 = vld [vmem:[#allocation2 + $0x270] ss:$2 sm:$0x3f]  ;;  %v3284_v27 = vmax.f32 %v3270_v2, %v3274_v25  ;;  %v1010_v47 = vadd.f32 %v898_v46, %v778_v56  ;;  %v1011_v62 = vadd.f32 %v899_v61, %v779_v48  ;;  %v1012_v15 = vadd.f32 %v900_v40, %v780_v38  ;;  %v3282_v44 = vld [vmem:[#allocation2 + $0x271] ss:$2 sm:$0x3f] }
 0x1c4   : > { %v1013_v51 = vadd.f32 %v901_v9, %v781_v21  ;;  %v1014_v7 = vadd.f32 %v902_v36, %v782_v26  ;;  %v1015_v23 = vadd.f32 %v903_v42, %v783_v31  ;;  %v1016_v60 = vadd.f32 %v904_v5, %v784_v1  ;;  %v9625_v26 = vld [vmem:[%s6801_s6 + $0x2c1] sm:$0xff]  ;;  %v9640_v31 = vld [vmem:[%s6801_s6 + $0x2d9] sm:$0xff] }
 0x1c5   : > { %v3285_v12 = vmax.f32 %v3276_v49, %v3280_v19  ;;  %v3286_v3 = vmax.f32 %v3278_v39, %v3282_v44  ;;  %v1249_v0 = vmul.f32 %v9316_v17, %v9331_v11  ;;  %v1250_v54 = vmul.f32 %v9316_v17, %v9334_v10  ;;  %v9663_v42 = vld [vmem:[%s6801_s6 + $0x2e1] sm:$0xff]  ;;  %v9666_v39 = vld [vmem:[%s6801_s6 + $0x2e9] sm:$0xff] }
 0x1c6   : > { %v1251_v56 = vmul.f32 %v9316_v17, %v9343_v63  ;;  %v1252_v48 = vmul.f32 %v9316_v17, %v9346_v35  ;;  %v1253_v38 = vmul.f32 %v9316_v17, %v9366_v20  ;;  %v1254_v19 = vmul.f32 %v9316_v17, %v9369_v18  ;;  %v9634_v63 = vld [vmem:[%s6801_s6 + $0x2c9] sm:$0xff]  ;;  %v9637_v35 = vld [vmem:[%s6801_s6 + $0x2d1] sm:$0xff] }
 0x1c7   : > { %v3287_v21 = vmax.f32 %v3283_v57, %v3285_v12  ;;  %v3288_v44 = vmax.f32 %v3284_v27, %v3286_v3  ;;  %v1255_v11 = vmul.f32 %v9316_v17, %v9379_v29  ;;  %v1256_v10 = vmul.f32 %v9316_v17, %v9382_v55  ;;  %6282 = vmatmul.mubr.msk.bf16.gmra.mrb[8].mxu0 %vm2904_vm0, %v9158_v4  ;;  %v9672_v12 = vld [vmem:[%s6801_s6 + $0x2f9] sm:$0xff] }
 0x1c8   : > { %v1361_v1 = vadd.f32 %v1249_v0, %v1009_v24  ;;  %v1362_v46 = vadd.f32 %v1250_v54, %v1010_v47  ;;  %v1363_v3 = vadd.f32 %v1251_v56, %v1011_v62  ;;  %v1364_v27 = vadd.f32 %v1252_v48, %v1012_v15  ;;  %6285 = vmatprep.mubr.msk.bf16.mxu0 %vm2904_vm0, %v9448_v6 }
 0x1c9   : > { %3289 = vst.msk [vmem:[#allocation3 + $0xa1] sm:$0xff] %vm2904_vm0, %v3287_v21  ;;  %v1365_v61 = vadd.f32 %v1253_v38, %v1013_v51  ;;  %v1366_v40 = vadd.f32 %v1254_v19, %v1014_v7  ;;  %v1367_v9 = vadd.f32 %v1255_v11, %v1015_v23  ;;  %v1368_v36 = vadd.f32 %v1256_v10, %v1016_v60  ;;  %v9669_v60 = vld [vmem:[%s6801_s6 + $0x2f1] sm:$0xff] }
 0x1ca   : > { %3290 = vst.msk [vmem:[#allocation3 + $0xa9] sm:$0x3f] %vm3073_vm1, %v3288_v44  ;;  %v1481_v2 = vmul.f32 %v9351_v43, %v9366_v20  ;;  %v1482_v47 = vmul.f32 %v9351_v43, %v9369_v18  ;;  %v1483_v15 = vmul.f32 %v9351_v43, %v9379_v29  ;;  %v1484_v62 = vmul.f32 %v9351_v43, %v9382_v55 }
 0x1cb   : > { %v1485_v7 = vmul.f32 %v9351_v43, %v9625_v26  ;;  %v1486_v23 = vmul.f32 %v9351_v43, %v9634_v63  ;;  %v1487_v20 = vmul.f32 %v9351_v43, %v9637_v35  ;;  %v1488_v18 = vmul.f32 %v9351_v43, %v9640_v31 }
 0x1cc   : > { %v1593_v51 = vadd.f32 %v1481_v2, %v1361_v1  ;;  %v1594_v25 = vadd.f32 %v1482_v47, %v1362_v46  ;;  %v1595_v29 = vadd.f32 %v1483_v15, %v1363_v3  ;;  %v1596_v57 = vadd.f32 %v1484_v62, %v1364_v27 }
 0x1cd   : > { %v1597_v55 = vadd.f32 %v1485_v7, %v1365_v61  ;;  %v1598_v5 = vadd.f32 %v1486_v23, %v1366_v40  ;;  %v1599_v24 = vadd.f32 %v1487_v20, %v1367_v9  ;;  %v1600_v49 = vadd.f32 %v1488_v18, %v1368_v36  ;;  %v9709_v18 = vld [vmem:[%s6801_s6 + $0x2c2] sm:$0xff] }
 0x1ce   : > { %v1713_v0 = vmul.f32 %v9387_v13, %v9625_v26  ;;  %v1714_v54 = vmul.f32 %v9387_v13, %v9634_v63  ;;  %v1715_v56 = vmul.f32 %v9387_v13, %v9637_v35  ;;  %v1716_v48 = vmul.f32 %v9387_v13, %v9640_v31 }
 0x1cf   : > { %v1717_v38 = vmul.f32 %v9387_v13, %v9663_v42  ;;  %v1718_v19 = vmul.f32 %v9387_v13, %v9666_v39  ;;  %v1719_v21 = vmul.f32 %v9387_v13, %v9669_v60  ;;  %v1720_v44 = vmul.f32 %v9387_v13, %v9672_v12 }
 0x1d0   : > { %v3407_v11 = vld [vmem:[#allocation3 + $0xa0] sm:$0xff]  ;;  %v1825_v1 = vadd.f32 %v1713_v0, %v1593_v51  ;;  %v1826_v46 = vadd.f32 %v1714_v54, %v1594_v25  ;;  %v1827_v3 = vadd.f32 %v1715_v56, %v1595_v29  ;;  %v1828_v27 = vadd.f32 %v1716_v48, %v1596_v57 }
 0x1d1   : > { %v3408_v10 = vld [vmem:[#allocation3 + $0xa8] sm:$0xff]  ;;  %v1829_v40 = vadd.f32 %v1717_v38, %v1597_v55  ;;  %v1830_v9 = vadd.f32 %v1718_v19, %v1598_v5  ;;  %v1831_v36 = vadd.f32 %v1719_v21, %v1599_v24  ;;  %v1832_v2 = vadd.f32 %v1720_v44, %v1600_v49  ;;  %v9720_v57 = vld [vmem:[%s6801_s6 + $0x2da] sm:$0xff] }
 0x1d2   : > { %v9690_v61 = vpack.c.bf16 %v3408_v10, %v3407_v11  ;;  %v2065_v47 = vmul.f32 %v9410_v8, %v9434_v50  ;;  %v2066_v15 = vmul.f32 %v9410_v8, %v9437_v52  ;;  %v2067_v62 = vmul.f32 %v9410_v8, %v9440_v28  ;;  %v9712_v52 = vld [vmem:[%s6801_s6 + $0x2ca] sm:$0xff]  ;;  %v9715_v28 = vld [vmem:[%s6801_s6 + $0x2d2] sm:$0xff] }
 0x1d3   : > { %v2068_v7 = vmul.f32 %v9410_v8, %v9443_v45  ;;  %v2069_v23 = vmul.f32 %v9410_v8, %v9470_v59  ;;  %v2070_v20 = vmul.f32 %v9410_v8, %v9473_v22  ;;  %v2071_v50 = vmul.f32 %v9410_v8, %v9482_v30 }
 0x1d4   : > { %11130 = vst [vmem:[#allocation30_spill] sm:$0xff] %v9690_v61  ;;  %6130 = vmatmul.mubr.msk.bf16.gmra.mrb[16].mxu1 %vm2904_vm0, %v9690_v61  ;;  %v2072_v51 = vmul.f32 %v9410_v8, %v9485_v33  ;;  %v2177_v25 = vadd.f32 %v2065_v47, %v1825_v1  ;;  %v2178_v45 = vadd.f32 %v2066_v15, %v1826_v46  ;;  %v9754_v15 = vld [vmem:[%s6801_s6 + $0x2fa] sm:$0xff] }
 0x1d5   : > { %v2179_v29 = vadd.f32 %v2067_v62, %v1827_v3  ;;  %v2180_v55 = vadd.f32 %v2068_v7, %v1828_v27  ;;  %v2181_v5 = vadd.f32 %v2069_v23, %v1829_v40  ;;  %v2182_v24 = vadd.f32 %v2070_v20, %v1830_v9  ;;  %v9739_v3 = vld [vmem:[%s6801_s6 + $0x2e2] sm:$0xff]  ;;  %v9742_v27 = vld [vmem:[%s6801_s6 + $0x2ea] sm:$0xff]  ;;  %v9745_v40 = vld [vmem:[%s6801_s6 + $0x2f2] sm:$0xff] }
 0x1d6   : > { %v2183_v49 = vadd.f32 %v2071_v50, %v1831_v36  ;;  %v2184_v0 = vadd.f32 %v2072_v51, %v1832_v2  ;;  %v2297_v54 = vmul.f32 %v9453_v37, %v9470_v59  ;;  %v2298_v56 = vmul.f32 %v9453_v37, %v9473_v22 }
 0x1d7   : > { %v2299_v48 = vmul.f32 %v9453_v37, %v9482_v30  ;;  %v2300_v38 = vmul.f32 %v9453_v37, %v9485_v33  ;;  %v2301_v19 = vmul.f32 %v9453_v37, %v9709_v18  ;;  %v2302_v21 = vmul.f32 %v9453_v37, %v9712_v52 }
 0x1d8   : > { %v2303_v59 = vmul.f32 %v9453_v37, %v9715_v28  ;;  %v2304_v22 = vmul.f32 %v9453_v37, %v9720_v57  ;;  %v2409_v44 = vadd.f32 %v2297_v54, %v2177_v25  ;;  %v2410_v11 = vadd.f32 %v2298_v56, %v2178_v45 }
 0x1d9   : > { %v2411_v10 = vadd.f32 %v2299_v48, %v2179_v29  ;;  %v2412_v30 = vadd.f32 %v2300_v38, %v2180_v55  ;;  %v2413_v1 = vadd.f32 %v2301_v19, %v2181_v5  ;;  %v2414_v46 = vadd.f32 %v2302_v21, %v2182_v24 }
 0x1da   : > { %v2415_v33 = vadd.f32 %v2303_v59, %v2183_v49  ;;  %v2416_v9 = vadd.f32 %v2304_v22, %v2184_v0  ;;  %v2529_v36 = vmul.f32 %v9490_v32, %v9709_v18  ;;  %v2530_v2 = vmul.f32 %v9490_v32, %v9712_v52 }
 0x1db   : > { %v2531_v47 = vmul.f32 %v9490_v32, %v9715_v28  ;;  %v2532_v62 = vmul.f32 %v9490_v32, %v9720_v57  ;;  %v2533_v7 = vmul.f32 %v9490_v32, %v9739_v3  ;;  %v2534_v23 = vmul.f32 %v9490_v32, %v9742_v27 }
 0x1dc   : > { %v2535_v20 = vmul.f32 %v9490_v32, %v9745_v40  ;;  %v2536_v50 = vmul.f32 %v9490_v32, %v9754_v15  ;;  %v2641_v51 = vadd.f32 %v2529_v36, %v2409_v44  ;;  %v2642_v25 = vadd.f32 %v2530_v2, %v2410_v11  ;;  %v9781_v36 = vld [vmem:[%s6801_s6 + $0x308] sm:$0xff]  ;;  %v9784_v2 = vld [vmem:[%s6801_s6 + $0x310] sm:$0xff] }
 0x1dd   : > { %v2643_v45 = vadd.f32 %v2531_v47, %v2411_v10  ;;  %v2644_v29 = vadd.f32 %v2532_v62, %v2412_v30  ;;  %v2645_v55 = vadd.f32 %v2533_v7, %v2413_v1  ;;  %v2646_v5 = vadd.f32 %v2534_v23, %v2414_v46  ;;  %v11131_v7 = vld [vmem:[#allocation26_spill] sm:$0xff] }
 0x1de   : > { %v2647_v24 = vadd.f32 %v2535_v20, %v2415_v33  ;;  %v2648_v49 = vadd.f32 %v2536_v50, %v2416_v9  ;;  %v2760_v0 = vadd.f32 %v9511_v58, %v2641_v51  ;;  %v2761_v54 = vadd.f32 %v9511_v58, %v2642_v25  ;;  %v9778_v9 = vld [vmem:[%s6801_s6 + $0x300] sm:$0xff]  ;;  %v9797_v20 = vld [vmem:[%s6801_s6 + $0x318] sm:$0xff]  ;;  %v11134_v25 = vld [vmem:[#allocation21_spill] sm:$0xff] }
 0x1df   : > { %v2762_v56 = vadd.f32 %v9511_v58, %v2643_v45  ;;  %v2763_v48 = vadd.f32 %v9511_v58, %v2644_v29  ;;  %v2764_v38 = vadd.f32 %v9511_v58, %v2645_v55  ;;  %v2765_v19 = vadd.f32 %v9511_v58, %v2646_v5  ;;  %v11132_v50 = vld [vmem:[#allocation15_spill] sm:$0xff]  ;;  %v11135_v29 = vld [vmem:[#allocation29_spill] sm:$0xff] }
 0x1e0   : > { %v2766_v21 = vadd.f32 %v9511_v58, %v2647_v24  ;;  %v2767_v59 = vadd.f32 %v9511_v58, %v2648_v49  ;;  %v2872_v22 = vmax.f32 %v2760_v0, 0.0  ;;  %v2873_v44 = vmax.f32 %v2761_v54, 0.0  ;;  %v11136_v24 = vld [vmem:[#allocation20_spill] sm:$0xff] }
 0x1e1   : > { %v2874_v11 = vmax.f32 %v2762_v56, 0.0  ;;  %v2875_v10 = vmax.f32 %v2763_v48, 0.0  ;;  %v2876_v30 = vmax.f32 %v2764_v38, 0.0  ;;  %v2877_v1 = vmax.f32 %v2765_v19, 0.0  ;;  %v9825_v19 = vld [vmem:[%s6801_s6 + $0x320] sm:$0xff] }
 0x1e2   : > { %v2878_v46 = vmax.f32 %v2766_v21, 0.0  ;;  %v2879_v33 = vmax.f32 %v2767_v59, 0.0  ;;  %2985 = vst.msk [vmem:[#allocation2 + $0x280] sm:$0xff] %vm2904_vm0, %v2872_v22  ;;  %2986 = vst.msk [vmem:[#allocation2 + $0x288] sm:$0xff] %vm2904_vm0, %v2873_v44  ;;  %v441_v47 = vmul.f32 %v9223_v14, %v9531_v34  ;;  %v442_v62 = vmul.f32 %v9223_v14, %v9534_v16  ;;  %v11133_v16 = vld [vmem:[#allocation5_spill] sm:$0xff]  ;;  %v9828_v21 = vld [vmem:[%s6801_s6 + $0x328] sm:$0xff] }
 0x1e3   : > { %2987 = vst.msk [vmem:[#allocation2 + $0x290] sm:$0xff] %vm2904_vm0, %v2874_v11  ;;  %v443_v23 = vmul.f32 %v9223_v14, %v11131_v7  ;;  %2988 = vst.msk [vmem:[#allocation2 + $0x298] sm:$0xff] %vm2904_vm0, %v2875_v10  ;;  %v444_v34 = vmul.f32 %v9223_v14, %v11132_v50  ;;  %v445_v51 = vmul.f32 %v9223_v14, %v11133_v16  ;;  %v9831_v59 = vld [vmem:[%s6801_s6 + $0x330] sm:$0xff]  ;;  %v9836_v10 = vld [vmem:[%s6801_s6 + $0x338] sm:$0xff] }
 0x1e4   : > { %2989 = vst.msk [vmem:[#allocation2 + $0x2a0] sm:$0xff] %vm2904_vm0, %v2876_v30  ;;  %2990 = vst.msk [vmem:[#allocation2 + $0x2a8] sm:$0xff] %vm2904_vm0, %v2877_v1  ;;  %v446_v45 = vmul.f32 %v9223_v14, %v11134_v25  ;;  %v447_v55 = vmul.f32 %v9223_v14, %v11135_v29  ;;  %v448_v5 = vmul.f32 %v9223_v14, %v9590_v53 }
 0x1e5   : > { %2991 = vst.msk [vmem:[#allocation2 + $0x2b0] sm:$0xff] %vm2904_vm0, %v2878_v46  ;;  %2992 = vst.msk [vmem:[#allocation2 + $0x2b8] sm:$0xff] %vm2904_vm0, %v2879_v33  ;;  %v673_v49 = vmul.f32 %v11136_v24, %v11133_v16  ;;  %v674_v0 = vmul.f32 %v11136_v24, %v11134_v25  ;;  %v675_v54 = vmul.f32 %v11136_v24, %v11135_v29 }
 0x1e6   : > { %v676_v56 = vmul.f32 %v11136_v24, %v9590_v53  ;;  %v677_v48 = vmul.f32 %v11136_v24, %v9778_v9  ;;  %v678_v38 = vmul.f32 %v11136_v24, %v9781_v36  ;;  %v679_v14 = vmul.f32 %v11136_v24, %v9784_v2  ;;  %11137 = vst [vmem:[#allocation26_spill] sm:$0xff] %v9828_v21 }
 0x1e7   : > { %11138 = vst [vmem:[#allocation15_spill] sm:$0xff] %v9831_v59  ;;  %v680_v22 = vmul.f32 %v11136_v24, %v9797_v20  ;;  %v785_v44 = vadd.f32 %v673_v49, %v441_v47  ;;  %v786_v53 = vadd.f32 %v674_v0, %v442_v62  ;;  %v787_v11 = vadd.f32 %v675_v54, %v443_v23 }
 0x1e8   : > { %v788_v30 = vadd.f32 %v676_v56, %v444_v34  ;;  %v789_v1 = vadd.f32 %v677_v48, %v445_v51  ;;  %v790_v46 = vadd.f32 %v678_v38, %v446_v45  ;;  %v791_v33 = vadd.f32 %v679_v14, %v447_v55 }
 0x1e9   : > { %v792_v7 = vadd.f32 %v680_v22, %v448_v5  ;;  %v905_v50 = vmul.f32 %v9295_v41, %v9778_v9  ;;  %v906_v16 = vmul.f32 %v9295_v41, %v9781_v36  ;;  %v907_v25 = vmul.f32 %v9295_v41, %v9784_v2  ;;  %v3292_v29 = vld [vmem:[#allocation2 + $0x280] ss:$2 sm:$0xff]  ;;  %v3296_v47 = vld [vmem:[#allocation2 + $0x281] ss:$2 sm:$0xff] }
 0x1ea   : > { %v908_v62 = vmul.f32 %v9295_v41, %v9797_v20  ;;  %v909_v23 = vmul.f32 %v9295_v41, %v9825_v19  ;;  %v910_v34 = vmul.f32 %v9295_v41, %v9828_v21  ;;  %v911_v51 = vmul.f32 %v9295_v41, %v9831_v59  ;;  %v3294_v45 = vld [vmem:[#allocation2 + $0x290] ss:$2 sm:$0x3f]  ;;  %v3298_v55 = vld [vmem:[#allocation2 + $0x291] ss:$2 sm:$0x3f] }
 0x1eb   : > { %v3307_v5 = vmax.f32 %v3292_v29, %v3296_v47  ;;  %v912_v24 = vmul.f32 %v9295_v41, %v9836_v10  ;;  %v1017_v49 = vadd.f32 %v905_v50, %v785_v44  ;;  %v1018_v0 = vadd.f32 %v906_v16, %v786_v53  ;;  %v3300_v54 = vld [vmem:[#allocation2 + $0x2a0] ss:$2 sm:$0xff]  ;;  %v3304_v6 = vld [vmem:[#allocation2 + $0x2a1] ss:$2 sm:$0xff] }
 0x1ec   : > { %v3302_v56 = vld [vmem:[#allocation2 + $0x2b0] ss:$2 sm:$0x3f]  ;;  %v3308_v48 = vmax.f32 %v3294_v45, %v3298_v55  ;;  %v1019_v38 = vadd.f32 %v907_v25, %v787_v11  ;;  %v1020_v14 = vadd.f32 %v908_v62, %v788_v30  ;;  %v1021_v22 = vadd.f32 %v909_v23, %v789_v1  ;;  %v3306_v4 = vld [vmem:[#allocation2 + $0x2b1] ss:$2 sm:$0x3f] }
 0x1ed   : > { %v1022_v61 = vadd.f32 %v910_v34, %v790_v46  ;;  %v1023_v21 = vadd.f32 %v911_v51, %v791_v33  ;;  %v1024_v59 = vadd.f32 %v912_v24, %v792_v7  ;;  %v1257_v29 = vmul.f32 %v9316_v17, %v9625_v26  ;;  %v9869_v33 = vld [vmem:[%s6801_s6 + $0x301] sm:$0xff]  ;;  %v9874_v7 = vld [vmem:[%s6801_s6 + $0x309] sm:$0xff]  ;;  %v9880_v50 = vld [vmem:[%s6801_s6 + $0x319] sm:$0xff] }
 0x1ee   : > { %v3309_v41 = vmax.f32 %v3300_v54, %v3304_v6  ;;  %v3310_v44 = vmax.f32 %v3302_v56, %v3306_v4  ;;  %v1258_v53 = vmul.f32 %v9316_v17, %v9634_v63  ;;  %v1259_v11 = vmul.f32 %v9316_v17, %v9637_v35 }
 0x1ef   : > { %v1260_v30 = vmul.f32 %v9316_v17, %v9640_v31  ;;  %v1261_v1 = vmul.f32 %v9316_v17, %v9663_v42  ;;  %v1262_v46 = vmul.f32 %v9316_v17, %v9666_v39  ;;  %v1263_v26 = vmul.f32 %v9316_v17, %v9669_v60  ;;  %v9877_v31 = vld [vmem:[%s6801_s6 + $0x311] sm:$0xff] }
 0x1f0   : > { %v3311_v6 = vmax.f32 %v3307_v5, %v3309_v41  ;;  %v3312_v4 = vmax.f32 %v3308_v48, %v3310_v44  ;;  %v1264_v63 = vmul.f32 %v9316_v17, %v9672_v12  ;;  %v1369_v35 = vadd.f32 %v1257_v29, %v1017_v49  ;;  %v9895_v49 = vld [vmem:[%s6801_s6 + $0x321] sm:$0xff] }
 0x1f1   : > { %v1370_v16 = vadd.f32 %v1258_v53, %v1018_v0  ;;  %v1371_v25 = vadd.f32 %v1259_v11, %v1019_v38  ;;  %v1372_v47 = vadd.f32 %v1260_v30, %v1020_v14  ;;  %v1373_v62 = vadd.f32 %v1261_v1, %v1021_v22 }
 0x1f2   : > { %3313 = vst.msk [vmem:[#allocation3 + $0xb1] sm:$0xff] %vm2904_vm0, %v3311_v6  ;;  %v1374_v17 = vadd.f32 %v1262_v46, %v1022_v61  ;;  %v1375_v23 = vadd.f32 %v1263_v26, %v1023_v21  ;;  %v1376_v34 = vadd.f32 %v1264_v63, %v1024_v59  ;;  %v1489_v51 = vmul.f32 %v9351_v43, %v9663_v42  ;;  %v9904_v59 = vld [vmem:[%s6801_s6 + $0x329] sm:$0xff] }
 0x1f3   : > { %3314 = vst.msk [vmem:[#allocation3 + $0xb9] sm:$0x3f] %vm3073_vm1, %v3312_v4  ;;  %v1490_v45 = vmul.f32 %v9351_v43, %v9666_v39  ;;  %v1491_v55 = vmul.f32 %v9351_v43, %v9669_v60  ;;  %v1492_v5 = vmul.f32 %v9351_v43, %v9672_v12  ;;  %v1493_v24 = vmul.f32 %v9351_v43, %v9869_v33  ;;  %v9907_v60 = vld [vmem:[%s6801_s6 + $0x331] sm:$0xff]  ;;  %v9910_v12 = vld [vmem:[%s6801_s6 + $0x339] sm:$0xff] }
 0x1f4   : > { %v1494_v61 = vmul.f32 %v9351_v43, %v9874_v7  ;;  %v1495_v42 = vmul.f32 %v9351_v43, %v9877_v31  ;;  %v1496_v39 = vmul.f32 %v9351_v43, %v9880_v50  ;;  %v1601_v21 = vadd.f32 %v1489_v51, %v1369_v35 }
 0x1f5   : > { %v1602_v0 = vadd.f32 %v1490_v45, %v1370_v16  ;;  %v1603_v54 = vadd.f32 %v1491_v55, %v1371_v25  ;;  %v1604_v56 = vadd.f32 %v1492_v5, %v1372_v47  ;;  %v1605_v48 = vadd.f32 %v1493_v24, %v1373_v62  ;;  %v9941_v45 = vld [vmem:[%s6801_s6 + $0x302] sm:$0xff]  ;;  %v9952_v5 = vld [vmem:[%s6801_s6 + $0x30a] sm:$0xff]  ;;  %v9958_v24 = vld [vmem:[%s6801_s6 + $0x31a] sm:$0xff] }
 0x1f6   : > { %v1606_v38 = vadd.f32 %v1494_v61, %v1374_v17  ;;  %v1607_v14 = vadd.f32 %v1495_v42, %v1375_v23  ;;  %v1608_v22 = vadd.f32 %v1496_v39, %v1376_v34  ;;  %v1721_v29 = vmul.f32 %v9387_v13, %v9869_v33 }
 0x1f7   : > { %v1722_v43 = vmul.f32 %v9387_v13, %v9874_v7  ;;  %v1723_v41 = vmul.f32 %v9387_v13, %v9877_v31  ;;  %v1724_v44 = vmul.f32 %v9387_v13, %v9880_v50  ;;  %v1725_v53 = vmul.f32 %v9387_v13, %v9895_v49 }
 0x1f8   : > { %v1726_v11 = vmul.f32 %v9387_v13, %v9904_v59  ;;  %v1727_v30 = vmul.f32 %v9387_v13, %v9907_v60  ;;  %v1728_v1 = vmul.f32 %v9387_v13, %v9910_v12  ;;  %v1833_v46 = vadd.f32 %v1721_v29, %v1601_v21  ;;  %v9969_v29 = vld [vmem:[%s6801_s6 + $0x322] sm:$0xff] }
 0x1f9   : > { %v3409_v26 = vld [vmem:[#allocation3 + $0xb0] sm:$0xff]  ;;  %v1834_v4 = vadd.f32 %v1722_v43, %v1602_v0  ;;  %v1835_v63 = vadd.f32 %v1723_v41, %v1603_v54  ;;  %v1836_v35 = vadd.f32 %v1724_v44, %v1604_v56  ;;  %v1837_v16 = vadd.f32 %v1725_v53, %v1605_v48  ;;  %v9986_v53 = vld [vmem:[%s6801_s6 + $0x33a] sm:$0xff] }
 0x1fa   : > { %v3410_v6 = vld [vmem:[#allocation3 + $0xb8] sm:$0xff]  ;;  %v1838_v47 = vadd.f32 %v1726_v11, %v1606_v38  ;;  %v1839_v62 = vadd.f32 %v1727_v30, %v1607_v14  ;;  %v1840_v17 = vadd.f32 %v1728_v1, %v1608_v22  ;;  %v2073_v23 = vmul.f32 %v9410_v8, %v9709_v18  ;;  %v9980_v44 = vld [vmem:[%s6801_s6 + $0x32a] sm:$0xff] }
 0x1fb   : > { %v9928_v25 = vpack.c.bf16 %v3410_v6, %v3409_v26  ;;  %v2074_v13 = vmul.f32 %v9410_v8, %v9712_v52  ;;  %v2075_v34 = vmul.f32 %v9410_v8, %v9715_v28  ;;  %v2076_v51 = vmul.f32 %v9410_v8, %v9720_v57  ;;  %v9955_v57 = vld [vmem:[%s6801_s6 + $0x312] sm:$0xff] }
 0x1fc   : > { %v2077_v55 = vmul.f32 %v9410_v8, %v9739_v3  ;;  %v2078_v18 = vmul.f32 %v9410_v8, %v9742_v27  ;;  %v2079_v52 = vmul.f32 %v9410_v8, %v9745_v40  ;;  %v2080_v28 = vmul.f32 %v9410_v8, %v9754_v15 }
 0x1fd   : > { %6133 = vmatprep.mubr.msk.bf16.mxu1 %vm2904_vm0, %v9928_v25  ;;  %v2185_v61 = vadd.f32 %v2073_v23, %v1833_v46  ;;  %v2186_v42 = vadd.f32 %v2074_v13, %v1834_v4  ;;  %v2187_v39 = vadd.f32 %v2075_v34, %v1835_v63  ;;  %v2188_v21 = vadd.f32 %v2076_v51, %v1836_v35 }
 0x1fe   : > { %v2189_v0 = vadd.f32 %v2077_v55, %v1837_v16  ;;  %v2190_v54 = vadd.f32 %v2078_v18, %v1838_v47  ;;  %v2191_v56 = vadd.f32 %v2079_v52, %v1839_v62  ;;  %v2192_v48 = vadd.f32 %v2080_v28, %v1840_v17  ;;  %v6645_v47 = vld [vmem:[%s10903_s3 + $0x28] sm:$0xff]   ;;  %v6646_v62 = vld [vmem:[%s10903_s3 + $0x60] sm:$0xff]  }
 0x1ff   : > { %v2305_v8 = vmul.f32 %v9453_v37, %v9739_v3  ;;  %v2306_v38 = vmul.f32 %v9453_v37, %v9742_v27  ;;  %v2307_v14 = vmul.f32 %v9453_v37, %v9745_v40  ;;  %v2308_v22 = vmul.f32 %v9453_v37, %v9754_v15  ;;  %v9983_v40 = vld [vmem:[%s6801_s6 + $0x332] sm:$0xff]  ;;  %6303 = vmatprep.subr.bf16.mxu0 %v6645_v47 }
 0x200   : > { %v2309_v43 = vmul.f32 %v9453_v37, %v9941_v45  ;;  %v2310_v41 = vmul.f32 %v9453_v37, %v9952_v5  ;;  %v2311_v3 = vmul.f32 %v9453_v37, %v9955_v57  ;;  %v2312_v27 = vmul.f32 %v9453_v37, %v9958_v24  ;;  %6304 = vmatpush3.bf16.msra.mxu0 %v6645_v47  ;;  %v10062_v47 = vld [vmem:[%s10901_s1 + $0x3] ss:$0 sm:$0xff] }
 0x201   : > { %v2417_v15 = vadd.f32 %v2305_v8, %v2185_v61  ;;  %v2418_v11 = vadd.f32 %v2306_v38, %v2186_v42  ;;  %v2419_v30 = vadd.f32 %v2307_v14, %v2187_v39  ;;  %v2420_v1 = vadd.f32 %v2308_v22, %v2188_v21  ;;  %6173 = vmatprep.subr.bf16.mxu1 %v6646_v62 }
 0x202   : > { %v2421_v46 = vadd.f32 %v2309_v43, %v2189_v0  ;;  %v2422_v26 = vadd.f32 %v2310_v41, %v2190_v54  ;;  %v2423_v6 = vadd.f32 %v2311_v3, %v2191_v56  ;;  %v2424_v4 = vadd.f32 %v2312_v27, %v2192_v48 }
 0x203   : > { %v2537_v63 = vmul.f32 %v9490_v32, %v9941_v45  ;;  %v2538_v37 = vmul.f32 %v9490_v32, %v9952_v5  ;;  %v2539_v35 = vmul.f32 %v9490_v32, %v9955_v57  ;;  %v2540_v16 = vmul.f32 %v9490_v32, %v9958_v24 }
 0x204   : > { %v2541_v17 = vmul.f32 %v9490_v32, %v9969_v29  ;;  %v2542_v23 = vmul.f32 %v9490_v32, %v9980_v44  ;;  %v2543_v13 = vmul.f32 %v9490_v32, %v9983_v40  ;;  %v2544_v34 = vmul.f32 %v9490_v32, %v9986_v53 }
 0x205   : > { %v2649_v51 = vadd.f32 %v2537_v63, %v2417_v15  ;;  %v2650_v55 = vadd.f32 %v2538_v37, %v2418_v11  ;;  %v2651_v18 = vadd.f32 %v2539_v35, %v2419_v30  ;;  %v2652_v52 = vadd.f32 %v2540_v16, %v2420_v1  ;;  %v10019_v30 = vld [vmem:[%s6801_s6 + $0x340] sm:$0xff]  ;;  %v10029_v1 = vld [vmem:[%s6801_s6 + $0x350] sm:$0xff] }
 0x206   : > { %v2653_v28 = vadd.f32 %v2541_v17, %v2421_v46  ;;  %v2654_v61 = vadd.f32 %v2542_v23, %v2422_v26  ;;  %v2655_v42 = vadd.f32 %v2543_v13, %v2423_v6  ;;  %v2656_v39 = vadd.f32 %v2544_v34, %v2424_v4  ;;  %v10032_v46 = vld [vmem:[%s6801_s6 + $0x358] sm:$0xff]  ;;  %v10037_v26 = vld [vmem:[%s10901_s1] ss:$0 sm:$0xff] }
 0x207   : > { %v2768_v21 = vadd.f32 %v9511_v58, %v2649_v51  ;;  %v2769_v0 = vadd.f32 %v9511_v58, %v2650_v55  ;;  %v2770_v54 = vadd.f32 %v9511_v58, %v2651_v18  ;;  %v2771_v56 = vadd.f32 %v9511_v58, %v2652_v52  ;;  %v11140_v35 = vld [vmem:[#allocation15_spill] sm:$0xff]  ;;  %v10084_v52 = vld [vmem:[%s6801_s6 + $0x368] sm:$0xff] }
 0x208   : > { %v2772_v32 = vadd.f32 %v9511_v58, %v2653_v28  ;;  %v2773_v48 = vadd.f32 %v9511_v58, %v2654_v61  ;;  %v2774_v8 = vadd.f32 %v9511_v58, %v2655_v42  ;;  %v2775_v38 = vadd.f32 %v9511_v58, %v2656_v39  ;;  %v10026_v58 = vld [vmem:[%s6801_s6 + $0x348] sm:$0xff]  ;;  %v10073_v34 = vld [vmem:[%s6801_s6 + $0x360] sm:$0xff]  ;;  %v10087_v28 = vld [vmem:[%s6801_s6 + $0x370] sm:$0xff] }
 0x209   : > { %v2880_v14 = vmax.f32 %v2768_v21, 0.0  ;;  %v2881_v22 = vmax.f32 %v2769_v0, 0.0  ;;  %v2882_v43 = vmax.f32 %v2770_v54, 0.0  ;;  %v2883_v41 = vmax.f32 %v2771_v56, 0.0  ;;  %v10090_v61 = vld [vmem:[%s6801_s6 + $0x378] sm:$0xff] }
 0x20a   : > { %v2884_v3 = vmax.f32 %v2772_v32, 0.0  ;;  %v2885_v27 = vmax.f32 %v2773_v48, 0.0  ;;  %v2886_v15 = vmax.f32 %v2774_v8, 0.0  ;;  %v2887_v11 = vmax.f32 %v2775_v38, 0.0  ;;  %v10095_v48 = vld [vmem:[%s10901_s1 + $0x6] ss:$0 sm:$0xff] }
 0x20b   : > { %2993 = vst.msk [vmem:[#allocation2 + $0x2c0] sm:$0xff] %vm2904_vm0, %v2880_v14  ;;  %2994 = vst.msk [vmem:[#allocation2 + $0x2c8] sm:$0xff] %vm2904_vm0, %v2881_v22  ;;  %v449_v6 = vmul.f32 %v10037_v26, %v9778_v9  ;;  %v450_v4 = vmul.f32 %v10037_v26, %v9781_v36  ;;  %v451_v63 = vmul.f32 %v10037_v26, %v9784_v2  ;;  %v11139_v36 = vld [vmem:[#allocation26_spill] sm:$0xff] }
 0x20c   : > { %2995 = vst.msk [vmem:[#allocation2 + $0x2d0] sm:$0xff] %vm2904_vm0, %v2882_v43  ;;  %2996 = vst.msk [vmem:[#allocation2 + $0x2d8] sm:$0xff] %vm2904_vm0, %v2883_v41  ;;  %v452_v37 = vmul.f32 %v10037_v26, %v9797_v20  ;;  %v453_v9 = vmul.f32 %v10037_v26, %v9825_v19  ;;  %v454_v2 = vmul.f32 %v10037_v26, %v11139_v36 }
 0x20d   : > { %2997 = vst.msk [vmem:[#allocation2 + $0x2e0] sm:$0xff] %vm2904_vm0, %v2884_v3  ;;  %2998 = vst.msk [vmem:[#allocation2 + $0x2e8] sm:$0xff] %vm2904_vm0, %v2885_v27  ;;  %v455_v20 = vmul.f32 %v10037_v26, %v11140_v35  ;;  %v456_v16 = vmul.f32 %v10037_v26, %v9836_v10  ;;  %v681_v62 = vmul.f32 %v10062_v47, %v9825_v19 }
 0x20e   : > { %2999 = vst.msk [vmem:[#allocation2 + $0x2f0] sm:$0xff] %vm2904_vm0, %v2886_v15  ;;  %3000 = vst.msk [vmem:[#allocation2 + $0x2f8] sm:$0xff] %vm2904_vm0, %v2887_v11  ;;  %v682_v17 = vmul.f32 %v10062_v47, %v11139_v36  ;;  %v683_v23 = vmul.f32 %v10062_v47, %v11140_v35  ;;  %v684_v13 = vmul.f32 %v10062_v47, %v9836_v10 }
 0x20f   : > { %v685_v51 = vmul.f32 %v10062_v47, %v10019_v30  ;;  %v686_v55 = vmul.f32 %v10062_v47, %v10026_v58  ;;  %v687_v19 = vmul.f32 %v10062_v47, %v10029_v1  ;;  %v688_v18 = vmul.f32 %v10062_v47, %v10032_v46 }
 0x210   : > { %v793_v10 = vadd.f32 %v681_v62, %v449_v6  ;;  %v794_v42 = vadd.f32 %v682_v17, %v450_v4  ;;  %v795_v39 = vadd.f32 %v683_v23, %v451_v63  ;;  %v796_v21 = vadd.f32 %v684_v13, %v452_v37 }
 0x211   : > { %v797_v0 = vadd.f32 %v685_v51, %v453_v9  ;;  %v798_v54 = vadd.f32 %v686_v55, %v454_v2  ;;  %v799_v56 = vadd.f32 %v687_v19, %v455_v20  ;;  %v800_v32 = vadd.f32 %v688_v18, %v456_v16  ;;  %v10116_v19 = vld [vmem:[%s10901_s1 + $0x1] ss:$0 sm:$0xff] }
 0x212   : > { %v913_v8 = vmul.f32 %v10095_v48, %v10019_v30  ;;  %v914_v38 = vmul.f32 %v10095_v48, %v10026_v58  ;;  %v915_v14 = vmul.f32 %v10095_v48, %v10029_v1  ;;  %v916_v22 = vmul.f32 %v10095_v48, %v10032_v46  ;;  %v3316_v43 = vld [vmem:[#allocation2 + $0x2c0] ss:$2 sm:$0xff]  ;;  %v3320_v6 = vld [vmem:[#allocation2 + $0x2c1] ss:$2 sm:$0xff] }
 0x213   : > { %v3318_v41 = vld [vmem:[#allocation2 + $0x2d0] ss:$2 sm:$0x3f]  ;;  %v917_v3 = vmul.f32 %v10095_v48, %v10073_v34  ;;  %v918_v27 = vmul.f32 %v10095_v48, %v10084_v52  ;;  %v919_v15 = vmul.f32 %v10095_v48, %v10087_v28  ;;  %v920_v11 = vmul.f32 %v10095_v48, %v10090_v61  ;;  %v3322_v4 = vld [vmem:[#allocation2 + $0x2d1] ss:$2 sm:$0x3f] }
 0x214   : > { %v1025_v63 = vadd.f32 %v913_v8, %v793_v10  ;;  %v1026_v37 = vadd.f32 %v914_v38, %v794_v42  ;;  %v1027_v9 = vadd.f32 %v915_v14, %v795_v39  ;;  %v1028_v36 = vadd.f32 %v916_v22, %v796_v21  ;;  %v3324_v2 = vld [vmem:[#allocation2 + $0x2e0] ss:$2 sm:$0xff]  ;;  %v3328_v23 = vld [vmem:[#allocation2 + $0x2e1] ss:$2 sm:$0xff]  ;;  %v10141_v22 = vld [vmem:[%s6801_s6 + $0x351] sm:$0xff] }
 0x215   : > { %v3326_v35 = vld [vmem:[#allocation2 + $0x2f0] ss:$2 sm:$0x3f]  ;;  %v3331_v20 = vmax.f32 %v3316_v43, %v3320_v6  ;;  %v3332_v16 = vmax.f32 %v3318_v41, %v3322_v4  ;;  %v1029_v62 = vadd.f32 %v917_v3, %v797_v0  ;;  %v1030_v17 = vadd.f32 %v918_v27, %v798_v54  ;;  %v3330_v13 = vld [vmem:[#allocation2 + $0x2f1] ss:$2 sm:$0x3f] }
 0x216   : > { %v1031_v51 = vadd.f32 %v919_v15, %v799_v56  ;;  %v1032_v55 = vadd.f32 %v920_v11, %v800_v32  ;;  %v1265_v18 = vmul.f32 %v10116_v19, %v9869_v33  ;;  %v1266_v10 = vmul.f32 %v10116_v19, %v9874_v7  ;;  %v10135_v38 = vld [vmem:[%s6801_s6 + $0x341] sm:$0xff]  ;;  %v10144_v43 = vld [vmem:[%s6801_s6 + $0x359] sm:$0xff] }
 0x217   : > { %v3333_v42 = vmax.f32 %v3324_v2, %v3328_v23  ;;  %v3334_v39 = vmax.f32 %v3326_v35, %v3330_v13  ;;  %v1267_v21 = vmul.f32 %v10116_v19, %v9877_v31  ;;  %v1268_v0 = vmul.f32 %v10116_v19, %v9880_v50  ;;  %v10138_v31 = vld [vmem:[%s6801_s6 + $0x349] sm:$0xff]  ;;  %v10151_v4 = vld [vmem:[%s10901_s1 + $0x4] ss:$0 sm:$0xff] }
 0x218   : > { %v1269_v54 = vmul.f32 %v10116_v19, %v9895_v49  ;;  %v1270_v56 = vmul.f32 %v10116_v19, %v9904_v59  ;;  %v1271_v33 = vmul.f32 %v10116_v19, %v9907_v60  ;;  %v1272_v7 = vmul.f32 %v10116_v19, %v9910_v12  ;;  %v10176_v13 = vld [vmem:[%s6801_s6 + $0x361] sm:$0xff] }
 0x219   : > { %v3335_v32 = vmax.f32 %v3331_v20, %v3333_v42  ;;  %v3336_v8 = vmax.f32 %v3332_v16, %v3334_v39  ;;  %v1377_v14 = vadd.f32 %v1265_v18, %v1025_v63  ;;  %v1378_v50 = vadd.f32 %v1266_v10, %v1026_v37  ;;  %v10184_v10 = vld [vmem:[%s10901_s1 + $0x7] ss:$0 sm:$0xff] }
 0x21a   : > { %v1379_v41 = vadd.f32 %v1267_v21, %v1027_v9  ;;  %v1380_v3 = vadd.f32 %v1268_v0, %v1028_v36  ;;  %v1381_v27 = vadd.f32 %v1269_v54, %v1029_v62  ;;  %v1382_v15 = vadd.f32 %v1270_v56, %v1030_v17  ;;  %v10191_v21 = vld [vmem:[%s6801_s6 + $0x371] sm:$0xff]  ;;  %v10194_v0 = vld [vmem:[%s6801_s6 + $0x379] sm:$0xff] }
 0x21b   : > { %3337 = vst.msk [vmem:[#allocation3 + $0xc1] sm:$0xff] %vm2904_vm0, %v3335_v32  ;;  %v1383_v11 = vadd.f32 %v1271_v33, %v1031_v51  ;;  %v1384_v6 = vadd.f32 %v1272_v7, %v1032_v55  ;;  %v1497_v63 = vmul.f32 %v10151_v4, %v9895_v49  ;;  %v1498_v37 = vmul.f32 %v10151_v4, %v9904_v59  ;;  %v10168_v49 = vld [vmem:[%s10903_s3 + $0x50] sm:$0xff]  }
 0x21c   : > { %3338 = vst.msk [vmem:[#allocation3 + $0xc9] sm:$0x3f] %vm3073_vm1, %v3336_v8  ;;  %v1499_v9 = vmul.f32 %v10151_v4, %v9907_v60  ;;  %v1500_v36 = vmul.f32 %v10151_v4, %v9910_v12  ;;  %v1501_v2 = vmul.f32 %v10151_v4, %v10135_v38  ;;  %v1502_v35 = vmul.f32 %v10151_v4, %v10138_v31  ;;  %v10179_v51 = vld [vmem:[%s6801_s6 + $0x369] sm:$0xff] }
 0x21d   : > { %v1503_v59 = vmul.f32 %v10151_v4, %v10141_v22  ;;  %v1504_v60 = vmul.f32 %v10151_v4, %v10144_v43  ;;  %v1609_v12 = vadd.f32 %v1497_v63, %v1377_v14  ;;  %v1610_v20 = vadd.f32 %v1498_v37, %v1378_v50  ;;  %6333 = vmatprep.subr.bf16.mxu0 %v10168_v49 }
 0x21e   : > { %v1611_v16 = vadd.f32 %v1499_v9, %v1379_v41  ;;  %v1612_v62 = vadd.f32 %v1500_v36, %v1380_v3  ;;  %v1613_v17 = vadd.f32 %v1501_v2, %v1381_v27  ;;  %v1614_v23 = vadd.f32 %v1502_v35, %v1382_v15  ;;  %v10213_v36 = vld [vmem:[%s10901_s1 + $0x2] ss:$0 sm:$0xff] }
 0x21f   : > { %v1615_v55 = vadd.f32 %v1503_v59, %v1383_v11  ;;  %v1616_v18 = vadd.f32 %v1504_v60, %v1384_v6  ;;  %v1729_v42 = vmul.f32 %v10184_v10, %v10135_v38  ;;  %v1730_v39 = vmul.f32 %v10184_v10, %v10138_v31 }
 0x220   : > { %v1731_v54 = vmul.f32 %v10184_v10, %v10141_v22  ;;  %v1732_v56 = vmul.f32 %v10184_v10, %v10144_v43  ;;  %v1733_v33 = vmul.f32 %v10184_v10, %v10176_v13  ;;  %v1734_v7 = vmul.f32 %v10184_v10, %v10179_v51 }
 0x221   : > { %v1735_v32 = vmul.f32 %v10184_v10, %v10191_v21  ;;  %v1736_v8 = vmul.f32 %v10184_v10, %v10194_v0  ;;  %v1841_v14 = vadd.f32 %v1729_v42, %v1609_v12  ;;  %v1842_v50 = vadd.f32 %v1730_v39, %v1610_v20  ;;  %v10228_v20 = vld [vmem:[%s6801_s6 + $0x342] sm:$0xff] }
 0x222   : > { %v3411_v41 = vld [vmem:[#allocation3 + $0xc0] sm:$0xff]  ;;  %v1843_v27 = vadd.f32 %v1731_v54, %v1611_v16  ;;  %v1844_v15 = vadd.f32 %v1732_v56, %v1612_v62  ;;  %v1845_v11 = vadd.f32 %v1733_v33, %v1613_v17  ;;  %v1846_v6 = vadd.f32 %v1734_v7, %v1614_v23  ;;  %v10237_v62 = vld [vmem:[%s6801_s6 + $0x34a] sm:$0xff] }
 0x223   : > { %v3412_v3 = vld [vmem:[#allocation3 + $0xc8] sm:$0xff]  ;;  %v1847_v37 = vadd.f32 %v1735_v32, %v1615_v55  ;;  %v1848_v9 = vadd.f32 %v1736_v8, %v1616_v18  ;;  %v2081_v2 = vmul.f32 %v10213_v36, %v9941_v45  ;;  %v2082_v35 = vmul.f32 %v10213_v36, %v9952_v5  ;;  %v10243_v17 = vld [vmem:[%s6801_s6 + $0x35a] sm:$0xff]  ;;  %v10248_v33 = vld [vmem:[%s10901_s1 + $0x5] ss:$0 sm:$0xff] }
 0x224   : > { %v10208_v63 = vpack.c.bf16 %v3412_v3, %v3411_v41  ;;  %v2083_v59 = vmul.f32 %v10213_v36, %v9955_v57  ;;  %v2084_v60 = vmul.f32 %v10213_v36, %v9958_v24  ;;  %v2085_v12 = vmul.f32 %v10213_v36, %v9969_v29  ;;  %v10240_v24 = vld [vmem:[%s6801_s6 + $0x352] sm:$0xff] }
 0x225   : > { %v2086_v45 = vmul.f32 %v10213_v36, %v9980_v44  ;;  %v2087_v5 = vmul.f32 %v10213_v36, %v9983_v40  ;;  %v2088_v57 = vmul.f32 %v10213_v36, %v9986_v53  ;;  %v2193_v16 = vadd.f32 %v2081_v2, %v1841_v14  ;;  %v10272_v2 = vld [vmem:[%s10901_s1 + $0x8] ss:$0 sm:$0xff] }
 0x226   : > { %6134 = vmatmul.mubr.msk.bf16.gmra.mrb[20].mxu1 %vm2904_vm0, %v10208_v63  ;;  %v2194_v23 = vadd.f32 %v2082_v35, %v1842_v50  ;;  %v2195_v55 = vadd.f32 %v2083_v59, %v1843_v27  ;;  %v2196_v18 = vadd.f32 %v2084_v60, %v1844_v15  ;;  %v2197_v42 = vadd.f32 %v2085_v12, %v1845_v11  ;;  %v10267_v11 = vld [vmem:[%s6801_s6 + $0x362] sm:$0xff]  ;;  %v10277_v59 = vld [vmem:[%s6801_s6 + $0x36a] sm:$0xff]  ;;  %v10280_v60 = vld [vmem:[%s6801_s6 + $0x372] sm:$0xff] }
 0x227   : > { %v2198_v39 = vadd.f32 %v2086_v45, %v1846_v6  ;;  %v2199_v54 = vadd.f32 %v2087_v5, %v1847_v37  ;;  %v2200_v56 = vadd.f32 %v2088_v57, %v1848_v9  ;;  %v2313_v7 = vmul.f32 %v10248_v33, %v9969_v29  ;;  %v10283_v12 = vld [vmem:[%s6801_s6 + $0x37a] sm:$0xff] }
 0x228   : > { %v2314_v32 = vmul.f32 %v10248_v33, %v9980_v44  ;;  %v2315_v8 = vmul.f32 %v10248_v33, %v9983_v40  ;;  %v2316_v14 = vmul.f32 %v10248_v33, %v9986_v53  ;;  %v2317_v50 = vmul.f32 %v10248_v33, %v10228_v20 }
 0x229   : > { %v2318_v41 = vmul.f32 %v10248_v33, %v10237_v62  ;;  %v2319_v29 = vmul.f32 %v10248_v33, %v10240_v24  ;;  %v2320_v44 = vmul.f32 %v10248_v33, %v10243_v17  ;;  %v2425_v3 = vadd.f32 %v2313_v7, %v2193_v16 }
 0x22a   : > { %v2426_v40 = vadd.f32 %v2314_v32, %v2194_v23  ;;  %v2427_v27 = vadd.f32 %v2315_v8, %v2195_v55  ;;  %v2428_v15 = vadd.f32 %v2316_v14, %v2196_v18  ;;  %v2429_v53 = vadd.f32 %v2317_v50, %v2197_v42  ;;  %v10302_v50 = vld [vmem:[%s10902_s2] ss:$0 sm:$0xff] }
 0x22b   : > { %v2430_v6 = vadd.f32 %v2318_v41, %v2198_v39  ;;  %v2431_v37 = vadd.f32 %v2319_v29, %v2199_v54  ;;  %v2432_v9 = vadd.f32 %v2320_v44, %v2200_v56  ;;  %v2545_v35 = vmul.f32 %v10272_v2, %v10228_v20 }
 0x22c   : > { %v2546_v45 = vmul.f32 %v10272_v2, %v10237_v62  ;;  %v2547_v5 = vmul.f32 %v10272_v2, %v10240_v24  ;;  %v2548_v57 = vmul.f32 %v10272_v2, %v10243_v17  ;;  %v2549_v16 = vmul.f32 %v10272_v2, %v10267_v11 }
 0x22d   : > { %v2550_v23 = vmul.f32 %v10272_v2, %v10277_v59  ;;  %v2551_v55 = vmul.f32 %v10272_v2, %v10280_v60  ;;  %v2552_v18 = vmul.f32 %v10272_v2, %v10283_v12  ;;  %v2657_v42 = vadd.f32 %v2545_v35, %v2425_v3 }
 0x22e   : > { %v2658_v39 = vadd.f32 %v2546_v45, %v2426_v40  ;;  %v2659_v54 = vadd.f32 %v2547_v5, %v2427_v27  ;;  %v2660_v56 = vadd.f32 %v2548_v57, %v2428_v15  ;;  %v2661_v7 = vadd.f32 %v2549_v16, %v2429_v53 }
 0x22f   : > { %v2662_v32 = vadd.f32 %v2550_v23, %v2430_v6  ;;  %v2663_v8 = vadd.f32 %v2551_v55, %v2431_v37  ;;  %v2664_v14 = vadd.f32 %v2552_v18, %v2432_v9  ;;  %v2776_v41 = vadd.f32 %v10302_v50, %v2657_v42  ;;  %v338_v23 = vld [vmem:[%s6801_s6 + $0x380] sm:$0xff]  ;;  %v339_v18 = vld [vmem:[%s6801_s6 + $0x388] sm:$0xff]  ;;  %v340_v42 = vld [vmem:[%s6801_s6 + $0x390] sm:$0xff] }
 0x230   : > { %v2777_v29 = vadd.f32 %v10302_v50, %v2658_v39  ;;  %v2778_v44 = vadd.f32 %v10302_v50, %v2659_v54  ;;  %v2779_v3 = vadd.f32 %v10302_v50, %v2660_v56  ;;  %v2780_v40 = vadd.f32 %v10302_v50, %v2661_v7  ;;  %v341_v39 = vld [vmem:[%s6801_s6 + $0x398] sm:$0xff] }
 0x231   : > { %v2781_v27 = vadd.f32 %v10302_v50, %v2662_v32  ;;  %v2782_v15 = vadd.f32 %v10302_v50, %v2663_v8  ;;  %v2783_v53 = vadd.f32 %v10302_v50, %v2664_v14  ;;  %v2888_v6 = vmax.f32 %v2776_v41, 0.0 }
 0x232   : > { %v2889_v37 = vmax.f32 %v2777_v29, 0.0  ;;  %v2890_v9 = vmax.f32 %v2778_v44, 0.0  ;;  %v2891_v35 = vmax.f32 %v2779_v3, 0.0  ;;  %v2892_v45 = vmax.f32 %v2780_v40, 0.0  ;;  %v342_v44 = vld [vmem:[%s6801_s6 + $0x3a0] sm:$0xff] }
 0x233   : > { %v2893_v5 = vmax.f32 %v2781_v27, 0.0  ;;  %v2894_v57 = vmax.f32 %v2782_v15, 0.0  ;;  %v2895_v16 = vmax.f32 %v2783_v53, 0.0  ;;  %3001 = vst.msk [vmem:[#allocation2 + $0x300] sm:$0xff] %vm2904_vm0, %v2888_v6  ;;  %v457_v55 = vmul.f32 %v10037_v26, %v10019_v30  ;;  %v344_v15 = vld [vmem:[%s6801_s6 + $0x3b0] sm:$0xff]  ;;  %v345_v53 = vld [vmem:[%s6801_s6 + $0x3b8] sm:$0xff] }
 0x234   : > { %3002 = vst.msk [vmem:[#allocation2 + $0x308] sm:$0xff] %vm2904_vm0, %v2889_v37  ;;  %3003 = vst.msk [vmem:[#allocation2 + $0x310] sm:$0xff] %vm2904_vm0, %v2890_v9  ;;  %v458_v54 = vmul.f32 %v10037_v26, %v10026_v58  ;;  %v459_v56 = vmul.f32 %v10037_v26, %v10029_v1  ;;  %v460_v30 = vmul.f32 %v10037_v26, %v10032_v46 }
 0x235   : > { %3004 = vst.msk [vmem:[#allocation2 + $0x318] sm:$0xff] %vm2904_vm0, %v2891_v35  ;;  %3005 = vst.msk [vmem:[#allocation2 + $0x320] sm:$0xff] %vm2904_vm0, %v2892_v45  ;;  %v461_v7 = vmul.f32 %v10037_v26, %v10073_v34  ;;  %v462_v58 = vmul.f32 %v10037_v26, %v10084_v52  ;;  %v463_v1 = vmul.f32 %v10037_v26, %v10087_v28 }
 0x236   : > { %3006 = vst.msk [vmem:[#allocation2 + $0x328] sm:$0xff] %vm2904_vm0, %v2893_v5  ;;  %3007 = vst.msk [vmem:[#allocation2 + $0x330] sm:$0xff] %vm2904_vm0, %v2894_v57  ;;  %v464_v46 = vmul.f32 %v10037_v26, %v10090_v61  ;;  %v689_v32 = vmul.f32 %v10062_v47, %v10073_v34  ;;  %v690_v8 = vmul.f32 %v10062_v47, %v10084_v52  ;;  %v343_v34 = vld [vmem:[%s6801_s6 + $0x3a8] sm:$0xff] }
 0x237   : > { %3008 = vst.msk [vmem:[#allocation2 + $0x338] sm:$0xff] %vm2904_vm0, %v2895_v16  ;;  %v691_v14 = vmul.f32 %v10062_v47, %v10087_v28  ;;  %v692_v41 = vmul.f32 %v10062_v47, %v10090_v61  ;;  %v693_v29 = vmul.f32 %v10062_v47, %v338_v23  ;;  %v694_v3 = vmul.f32 %v10062_v47, %v339_v18 }
 0x238   : > { %v695_v40 = vmul.f32 %v10062_v47, %v340_v42  ;;  %v696_v26 = vmul.f32 %v10062_v47, %v341_v39  ;;  %v801_v27 = vadd.f32 %v689_v32, %v457_v55  ;;  %v802_v52 = vadd.f32 %v690_v8, %v458_v54 }
 0x239   : > { %v803_v6 = vadd.f32 %v691_v14, %v459_v56  ;;  %v804_v37 = vadd.f32 %v692_v41, %v460_v30  ;;  %v805_v28 = vadd.f32 %v693_v29, %v461_v7  ;;  %v806_v9 = vadd.f32 %v694_v3, %v462_v58 }
 0x23a   : > { %v807_v35 = vadd.f32 %v695_v40, %v463_v1  ;;  %v808_v61 = vadd.f32 %v696_v26, %v464_v46  ;;  %v921_v45 = vmul.f32 %v10095_v48, %v338_v23  ;;  %v922_v5 = vmul.f32 %v10095_v48, %v339_v18 }
 0x23b   : > { %v923_v57 = vmul.f32 %v10095_v48, %v340_v42  ;;  %v924_v16 = vmul.f32 %v10095_v48, %v341_v39  ;;  %v925_v47 = vmul.f32 %v10095_v48, %v342_v44  ;;  %v3340_v55 = vld [vmem:[#allocation2 + $0x300] ss:$2 sm:$0xff]  ;;  %v926_v54 = vmul.f32 %v10095_v48, %v343_v34  ;;  %v3344_v58 = vld [vmem:[#allocation2 + $0x301] ss:$2 sm:$0xff] }
 0x23c   : > { %v3342_v32 = vld [vmem:[#allocation2 + $0x310] ss:$2 sm:$0x3f]  ;;  %v927_v56 = vmul.f32 %v10095_v48, %v344_v15  ;;  %v928_v30 = vmul.f32 %v10095_v48, %v345_v53  ;;  %v1033_v7 = vadd.f32 %v921_v45, %v801_v27  ;;  %v3346_v1 = vld [vmem:[#allocation2 + $0x311] ss:$2 sm:$0x3f]  ;;  %v1034_v23 = vadd.f32 %v922_v5, %v802_v52 }
 0x23d   : > { %v1035_v46 = vadd.f32 %v923_v57, %v803_v6  ;;  %v1036_v18 = vadd.f32 %v924_v16, %v804_v37  ;;  %v1037_v8 = vadd.f32 %v925_v47, %v805_v28  ;;  %v3348_v42 = vld [vmem:[#allocation2 + $0x320] ss:$2 sm:$0xff]  ;;  %v3355_v39 = vmax.f32 %v3340_v55, %v3344_v58  ;;  %v3352_v3 = vld [vmem:[#allocation2 + $0x321] ss:$2 sm:$0xff]  ;;  %v1155_v45 = vld [vmem:[%s6801_s6 + $0x391] sm:$0xff] }
 0x23e   : > { %v3350_v14 = vld [vmem:[#allocation2 + $0x330] ss:$2 sm:$0x3f]  ;;  %v3356_v41 = vmax.f32 %v3342_v32, %v3346_v1  ;;  %v1038_v29 = vadd.f32 %v926_v54, %v806_v9  ;;  %v1039_v44 = vadd.f32 %v927_v56, %v807_v35  ;;  %v3354_v40 = vld [vmem:[#allocation2 + $0x331] ss:$2 sm:$0x3f]  ;;  %v1040_v26 = vadd.f32 %v928_v30, %v808_v61 }
 0x23f   : > { %v1273_v48 = vmul.f32 %v10116_v19, %v10135_v38  ;;  %v1274_v27 = vmul.f32 %v10116_v19, %v10138_v31  ;;  %v1275_v34 = vmul.f32 %v10116_v19, %v10141_v22  ;;  %v3357_v15 = vmax.f32 %v3348_v42, %v3352_v3  ;;  %v1153_v35 = vld [vmem:[%s6801_s6 + $0x381] sm:$0xff]  ;;  %v1154_v61 = vld [vmem:[%s6801_s6 + $0x389] sm:$0xff]  ;;  %v1156_v57 = vld [vmem:[%s6801_s6 + $0x399] sm:$0xff] }
 0x240   : > { %v3358_v53 = vmax.f32 %v3350_v14, %v3354_v40  ;;  %v1276_v52 = vmul.f32 %v10116_v19, %v10144_v43  ;;  %v1277_v6 = vmul.f32 %v10116_v19, %v10176_v13  ;;  %v1278_v37 = vmul.f32 %v10116_v19, %v10179_v51 }
 0x241   : > { %v1279_v38 = vmul.f32 %v10116_v19, %v10191_v21  ;;  %v1280_v31 = vmul.f32 %v10116_v19, %v10194_v0  ;;  %v1385_v28 = vadd.f32 %v1273_v48, %v1033_v7  ;;  %v3359_v22 = vmax.f32 %v3355_v39, %v3357_v15  ;;  %v1160_v39 = vld [vmem:[%s6801_s6 + $0x3b9] sm:$0xff] }
 0x242   : > { %v3360_v9 = vmax.f32 %v3356_v41, %v3358_v53  ;;  %v1386_v5 = vadd.f32 %v1274_v27, %v1034_v23  ;;  %v1387_v43 = vadd.f32 %v1275_v34, %v1035_v46  ;;  %v1388_v16 = vadd.f32 %v1276_v52, %v1036_v18  ;;  %v1157_v46 = vld [vmem:[%s6801_s6 + $0x3a1] sm:$0xff]  ;;  %v1158_v18 = vld [vmem:[%s6801_s6 + $0x3a9] sm:$0xff] }
 0x243   : > { %v1389_v47 = vadd.f32 %v1277_v6, %v1037_v8  ;;  %v1390_v55 = vadd.f32 %v1278_v37, %v1038_v29  ;;  %v1391_v32 = vadd.f32 %v1279_v38, %v1039_v44  ;;  %3361 = vst.msk [vmem:[#allocation3 + $0xd1] sm:$0xff] %vm2904_vm0, %v3359_v22  ;;  %v1392_v19 = vadd.f32 %v1280_v31, %v1040_v26  ;;  %v1159_v8 = vld [vmem:[%s6801_s6 + $0x3b1] sm:$0xff] }
 0x244   : > { %3362 = vst.msk [vmem:[#allocation3 + $0xd9] sm:$0x3f] %vm3073_vm1, %v3360_v9  ;;  %v1505_v54 = vmul.f32 %v10151_v4, %v10176_v13  ;;  %v1506_v56 = vmul.f32 %v10151_v4, %v10179_v51  ;;  %v1507_v30 = vmul.f32 %v10151_v4, %v10191_v21  ;;  %v1508_v7 = vmul.f32 %v10151_v4, %v10194_v0 }
 0x245   : > { %v1509_v58 = vmul.f32 %v10151_v4, %v1153_v35  ;;  %v1510_v1 = vmul.f32 %v10151_v4, %v1154_v61  ;;  %v1511_v23 = vmul.f32 %v10151_v4, %v1155_v45  ;;  %v1512_v13 = vmul.f32 %v10151_v4, %v1156_v57 }
 0x246   : > { %v1617_v42 = vadd.f32 %v1505_v54, %v1385_v28  ;;  %v1618_v14 = vadd.f32 %v1506_v56, %v1386_v5  ;;  %v1619_v51 = vadd.f32 %v1507_v30, %v1387_v43  ;;  %v1620_v41 = vadd.f32 %v1508_v7, %v1388_v16 }
 0x247   : > { %v1621_v21 = vadd.f32 %v1509_v58, %v1389_v47  ;;  %v1622_v29 = vadd.f32 %v1510_v1, %v1390_v55  ;;  %v1623_v44 = vadd.f32 %v1511_v23, %v1391_v32  ;;  %v1624_v0 = vadd.f32 %v1512_v13, %v1392_v19  ;;  %v1969_v47 = vld [vmem:[%s6801_s6 + $0x382] sm:$0xff]  ;;  %v1971_v32 = vld [vmem:[%s6801_s6 + $0x392] sm:$0xff]  ;;  %v1972_v19 = vld [vmem:[%s6801_s6 + $0x39a] sm:$0xff] }
 0x248   : > { %v1737_v3 = vmul.f32 %v10184_v10, %v1153_v35  ;;  %v1738_v40 = vmul.f32 %v10184_v10, %v1154_v61  ;;  %v1739_v26 = vmul.f32 %v10184_v10, %v1155_v45  ;;  %v1740_v48 = vmul.f32 %v10184_v10, %v1156_v57 }
 0x249   : > { %v1741_v27 = vmul.f32 %v10184_v10, %v1157_v46  ;;  %v1742_v4 = vmul.f32 %v10184_v10, %v1158_v18  ;;  %v1743_v34 = vmul.f32 %v10184_v10, %v1159_v8  ;;  %v1744_v15 = vmul.f32 %v10184_v10, %v1160_v39 }
 0x24a   : > { %v1849_v53 = vadd.f32 %v1737_v3, %v1617_v42  ;;  %v1850_v52 = vadd.f32 %v1738_v40, %v1618_v14  ;;  %v1851_v6 = vadd.f32 %v1739_v26, %v1619_v51  ;;  %v3413_v37 = vld [vmem:[#allocation3 + $0xd0] sm:$0xff]  ;;  %v1852_v31 = vadd.f32 %v1740_v48, %v1620_v41  ;;  %v1973_v42 = vld [vmem:[%s6801_s6 + $0x3a2] sm:$0xff] }
 0x24b   : > { %v3414_v38 = vld [vmem:[#allocation3 + $0xd8] sm:$0xff]  ;;  %v1853_v28 = vadd.f32 %v1741_v27, %v1621_v21  ;;  %v1854_v22 = vadd.f32 %v1742_v4, %v1622_v29  ;;  %v1855_v9 = vadd.f32 %v1743_v34, %v1623_v44  ;;  %v1856_v61 = vadd.f32 %v1744_v15, %v1624_v0  ;;  %v1974_v14 = vld [vmem:[%s6801_s6 + $0x3aa] sm:$0xff] }
 0x24c   : > { %v10410_v35 = vpack.c.bf16 %v3414_v38, %v3413_v37  ;;  %v2089_v45 = vmul.f32 %v10213_v36, %v10228_v20  ;;  %v2090_v10 = vmul.f32 %v10213_v36, %v10237_v62  ;;  %v2091_v5 = vmul.f32 %v10213_v36, %v10240_v24  ;;  %v1970_v20 = vld [vmem:[%s6801_s6 + $0x38a] sm:$0xff]  ;;  %v1975_v21 = vld [vmem:[%s6801_s6 + $0x3b2] sm:$0xff] }
 0x24d   : > { %v2092_v43 = vmul.f32 %v10213_v36, %v10243_v17  ;;  %v2093_v57 = vmul.f32 %v10213_v36, %v10267_v11  ;;  %v2094_v16 = vmul.f32 %v10213_v36, %v10277_v59  ;;  %v2095_v62 = vmul.f32 %v10213_v36, %v10280_v60 }
 0x24e   : > { %6137 = vmatprep.mubr.msk.bf16.mxu1 %vm2904_vm0, %v10410_v35  ;;  %v2096_v24 = vmul.f32 %v10213_v36, %v10283_v12  ;;  %v2201_v55 = vadd.f32 %v2089_v45, %v1849_v53  ;;  %v2202_v17 = vadd.f32 %v2090_v10, %v1850_v52  ;;  %v2203_v54 = vadd.f32 %v2091_v5, %v1851_v6 }
 0x24f   : > { %v2204_v56 = vadd.f32 %v2092_v43, %v1852_v31  ;;  %v2205_v30 = vadd.f32 %v2093_v57, %v1853_v28  ;;  %v2206_v7 = vadd.f32 %v2094_v16, %v1854_v22  ;;  %v2207_v58 = vadd.f32 %v2095_v62, %v1855_v9 }
 0x250   : > { %v2208_v1 = vadd.f32 %v2096_v24, %v1856_v61  ;;  %v2321_v23 = vmul.f32 %v10248_v33, %v10267_v11  ;;  %v2322_v36 = vmul.f32 %v10248_v33, %v10277_v59  ;;  %v2323_v46 = vmul.f32 %v10248_v33, %v10280_v60  ;;  %v1976_v59 = vld [vmem:[%s6801_s6 + $0x3ba] sm:$0xff]  ;;  %s10823_s6 = scalar_lea.vmem %s10905_s5, %s6626_s14 }
 0x251   : > { %v2324_v18 = vmul.f32 %v10248_v33, %v10283_v12  ;;  %v2325_v8 = vmul.f32 %v10248_v33, %v1969_v47  ;;  %v2326_v13 = vmul.f32 %v10248_v33, %v1970_v20  ;;  %v2327_v51 = vmul.f32 %v10248_v33, %v1971_v32 }
 0x252   : > { %v2328_v39 = vmul.f32 %v10248_v33, %v1972_v19  ;;  %v2433_v11 = vadd.f32 %v2321_v23, %v2201_v55  ;;  %v2434_v41 = vadd.f32 %v2322_v36, %v2202_v17  ;;  %v2435_v29 = vadd.f32 %v2323_v46, %v2203_v54 }
 0x253   : > { %v2436_v44 = vadd.f32 %v2324_v18, %v2204_v56  ;;  %v2437_v60 = vadd.f32 %v2325_v8, %v2205_v30  ;;  %v2438_v0 = vadd.f32 %v2326_v13, %v2206_v7  ;;  %v2439_v3 = vadd.f32 %v2327_v51, %v2207_v58  ;;  %v11143_v58 = vld [vmem:[#allocation8_spill] sm:$0xff] }
 0x254   : > { %v2440_v12 = vadd.f32 %v2328_v39, %v2208_v1  ;;  %v2553_v40 = vmul.f32 %v10272_v2, %v1969_v47  ;;  %v2554_v26 = vmul.f32 %v10272_v2, %v1970_v20  ;;  %v2555_v48 = vmul.f32 %v10272_v2, %v1971_v32 }
 0x255   : > { %v2556_v27 = vmul.f32 %v10272_v2, %v1972_v19  ;;  %v2557_v33 = vmul.f32 %v10272_v2, %v1973_v42  ;;  %v2558_v4 = vmul.f32 %v10272_v2, %v1974_v14  ;;  %v2559_v34 = vmul.f32 %v10272_v2, %v1975_v21  ;;  %v11141_v19 = vld [vmem:[#allocation16_spill] sm:$0xff] }
 0x256   : > { %v2560_v15 = vmul.f32 %v10272_v2, %v1976_v59  ;;  %v2665_v53 = vadd.f32 %v2553_v40, %v2433_v11  ;;  %v2666_v52 = vadd.f32 %v2554_v26, %v2434_v41  ;;  %v2667_v6 = vadd.f32 %v2555_v48, %v2435_v29 }
 0x257   : > { %v2668_v37 = vadd.f32 %v2556_v27, %v2436_v44  ;;  %v2669_v38 = vadd.f32 %v2557_v33, %v2437_v60  ;;  %v2670_v31 = vadd.f32 %v2558_v4, %v2438_v0  ;;  %v2671_v28 = vadd.f32 %v2559_v34, %v2439_v3 }
 0x258   : > { %v2672_v22 = vadd.f32 %v2560_v15, %v2440_v12  ;;  %v2784_v9 = vadd.f32 %v10302_v50, %v2665_v53  ;;  %v2785_v61 = vadd.f32 %v10302_v50, %v2666_v52  ;;  %v2786_v45 = vadd.f32 %v10302_v50, %v2667_v6  ;;  %v3417_v52 = vld [vmem:[#allocation3 + $0xf0] sm:$0xff]  ;;  %v3418_v6 = vld [vmem:[#allocation3 + $0xf8] sm:$0xff] }
 0x259   : > { %v2787_v10 = vadd.f32 %v10302_v50, %v2668_v37  ;;  %v2788_v5 = vadd.f32 %v10302_v50, %v2669_v38  ;;  %v2789_v2 = vadd.f32 %v10302_v50, %v2670_v31  ;;  %v2790_v43 = vadd.f32 %v10302_v50, %v2671_v28  ;;  %v3387_v37 = vld [vmem:[#allocation3] sm:$0xff]  ;;  %v3388_v38 = vld [vmem:[#allocation3 + $0x8] sm:$0xff] }
 0x25a   : > { %v2791_v57 = vadd.f32 %v10302_v50, %v2672_v22  ;;  %v2896_v16 = vmax.f32 %v2784_v9, 0.0  ;;  %v2897_v47 = vmax.f32 %v2785_v61, 0.0  ;;  %v2898_v20 = vmax.f32 %v2786_v45, 0.0  ;;  %v11142_v50 = vld [vmem:[#allocation30_spill] sm:$0xff]  ;;  %v3419_v28 = vld [vmem:[#allocation3 + $0x100] sm:$0xff] }
 0x25b   : > { %v2899_v62 = vmax.f32 %v2787_v10, 0.0  ;;  %v2900_v24 = vmax.f32 %v2788_v5, 0.0  ;;  %v2901_v55 = vmax.f32 %v2789_v2, 0.0  ;;  %v2902_v17 = vmax.f32 %v2790_v43, 0.0 }
 0x25c   : > { %v2903_v32 = vmax.f32 %v2791_v57, 0.0  ;;  %3009 = vst.msk [vmem:[#allocation2 + $0x340] sm:$0xff] %vm2904_vm0, %v2896_v16  ;;  %3010 = vst.msk [vmem:[#allocation2 + $0x348] sm:$0xff] %vm2904_vm0, %v2897_v47  ;;  %v4070_v54 = vshrl.u32 %v11141_v19, 16  ;;  %v4073_v56 = vshll.u32 %v11142_v50, 16  ;;  %v4077_v30 = vshrl.u32 %v11142_v50, 16 }
 0x25d   : > { %3011 = vst.msk [vmem:[#allocation2 + $0x350] sm:$0xff] %vm2904_vm0, %v2898_v20  ;;  %3012 = vst.msk [vmem:[#allocation2 + $0x358] sm:$0xff] %vm2904_vm0, %v2899_v62  ;;  %v4080_v7 = vshll.u32 %v9928_v25, 16  ;;  %v4087_v23 = vshll.u32 %v10208_v63, 16  ;;  %v4084_v18 = vshrl.u32 %v9928_v25, 16  ;;  %v4094_v8 = vshll.u32 %v10410_v35, 16 }
 0x25e   : > { %3013 = vst.msk [vmem:[#allocation2 + $0x360] sm:$0xff] %vm2904_vm0, %v2900_v24  ;;  %3014 = vst.msk [vmem:[#allocation2 + $0x368] sm:$0xff] %vm2904_vm0, %v2901_v55  ;;  %v4072_v1 = vor.u32 %v4070_v54, %v11143_v58  ;;  %v4075_v36 = vrot.slane %v4073_v56, 1  ;;  %v4091_v13 = vshrl.u32 %v10208_v63, 16  ;;  %v10505_v31 = vpack.c.bf16 %v3418_v6, %v3417_v52  ;;  %v11144_v58 = vld [vmem:[#allocation17_spill] sm:$0xff] }
 0x25f   : > { %3015 = vst.msk [vmem:[#allocation2 + $0x370] sm:$0xff] %vm2904_vm0, %v2902_v17  ;;  %3016 = vst.msk [vmem:[#allocation2 + $0x378] sm:$0xff] %vm2904_vm0, %v2903_v32  ;;  %v4082_v46 = vrot.slane %v4080_v7, 1  ;;  %v4089_v51 = vrot.slane %v4087_v23, 1  ;;  %v4096_v59 = vrot.slane %v4094_v8, 1  ;;  %v4098_v22 = vshrl.u32 %v10410_v35, 16 }
 0x260   : > { %v10484_v42 = vsel %vm4003_vm2, %v4072_v1, %v4075_v36  ;;  %v4079_v14 = vor.u32 %v4077_v30, %v4075_v36  ;;  %v10508_v45 = vpack.c.bf16 %v3388_v38, %v3387_v37  ;;  %v4340_v5 = vshll.u32 %v10505_v31, 16  ;;  %v6648_v30 = vld [vmem:[%s10903_s3 + $0x68] sm:$0xff]   ;;  %v11145_v23 = vld [vmem:[#allocation19_spill] sm:$0xff] }
 0x261   : > { %6286 = vmatmul.mubr.msk.bf16.gmra.mrb[12].mxu0 %vm2904_vm0, %v10484_v42  ;;  %v4086_v21 = vor.u32 %v4084_v18, %v4082_v46  ;;  %v4093_v60 = vor.u32 %v4091_v13, %v4089_v51  ;;  %v10513_v2 = vpack.c.bf16 %v3419_v28, %v3419_v28  ;;  %v4100_v43 = vor.u32 %v4098_v22, %v4096_v59  ;;  %v6696_v36 = vld [vmem:[%s10903_s3 + $0x60] sm:$0xff]   ;;  %v10549_v18 = vld [vmem:[%s10903_s3 + $0x10] sm:$0xff]  }
 0x262   : > { %v10489_v41 = vsel %vm4003_vm2, %v4079_v14, %v4082_v46  ;;  %v4342_v20 = vrot.slane %v4340_v5, 1  ;;  %v4537_v62 = vshrl.u32 %v10505_v31, 16  ;;  %v4754_v7 = vrot.slane %v10508_v45, 1  ;;  %v11146_v14 = vld [vmem:[#allocation9_spill] sm:$0xff] }
 0x263   : > { %v3364_v39 = vld [vmem:[#allocation2 + $0x340] ss:$2 sm:$0xff]  ;;  %v3368_v11 = vld [vmem:[#allocation2 + $0x341] ss:$2 sm:$0xff]  ;;  %6289 = vmatprep.mubr.msk.bf16.mxu0 %vm2904_vm0, %v10489_v41  ;;  %v10494_v4 = vsel %vm4003_vm2, %v4086_v21, %v4089_v51  ;;  %v10497_v34 = vsel %vm4003_vm2, %v4093_v60, %v4096_v59  ;;  %v4541_v24 = vshll.u32 %v10513_v2, 16  ;;  %v4755_v1 = vrot.slane %v11144_v58, 1 }
 0x264   : > { %v3366_v29 = vld [vmem:[#allocation2 + $0x350] ss:$2 sm:$0x3f]  ;;  %v3370_v44 = vld [vmem:[#allocation2 + $0x351] ss:$2 sm:$0x3f]  ;;  %v3379_v12 = vmax.f32 %v3364_v39, %v3368_v11  ;;  %v4539_v54 = vor.u32 %v4537_v62, %v4342_v20 }
 0x265   : > { %v3372_v0 = vld [vmem:[#allocation2 + $0x360] ss:$2 sm:$0xff]  ;;  %v3380_v40 = vmax.f32 %v3366_v29, %v3370_v44  ;;  %v3376_v26 = vld [vmem:[#allocation2 + $0x361] ss:$2 sm:$0xff]  ;;  %v4543_v56 = vrot.slane %v4541_v24, 1  ;;  %v4756_v8 = vsel %vm4753_vm3, %v4754_v7, %v4755_v1  ;;  %v4757_v13 = vrot.slane %v11145_v23, 1 }
 0x266   : > { %v3374_v3 = vld [vmem:[#allocation2 + $0x370] ss:$2 sm:$0x3f]  ;;  %v3378_v48 = vld [vmem:[#allocation2 + $0x371] ss:$2 sm:$0x3f]  ;;  %v3381_v27 = vmax.f32 %v3372_v0, %v3376_v26 }
 0x267   : > { %v3382_v33 = vmax.f32 %v3374_v3, %v3378_v48  ;;  %v4544_v46 = vsel %vm4003_vm2, %v4539_v54, %v4543_v56  ;;  %v4759_v51 = vrot.slane %v11146_v14, 1  ;;  %v11147_v39 = vld [vmem:[#allocation6_spill] sm:$0xff]  ;;  %v4758_v11 = vsel %vm4753_vm3, %v4755_v1, %v4757_v13  ;;  %v11148_v44 = vld [vmem:[#allocation24_spill] sm:$0xff]  ;;  %v6651_v0 = vld [vmem:[%s10903_s3 + $0x80] sm:$0xff]  }
 0x268   : > { %v3383_v15 = vmax.f32 %v3379_v12, %v3381_v27  ;;  %v6649_v59 = vld [vmem:[%s10903_s3 + $0x58] sm:$0xff]   ;;  %v4761_v29 = vrot.slane %v11147_v39, 1  ;;  %v4763_v60 = vrot.slane %v11148_v44, 1  ;;  %v11149_v3 = vld [vmem:[#allocation27_spill] sm:$0xff]  ;;  %v11150_v26 = vld [vmem:[#allocation13_spill] sm:$0xff]  ;;  %v4771_v52 = vrot.slane %v11141_v19, 1 }
 0x269   : > { %v3384_v53 = vmax.f32 %v3380_v40, %v3382_v33  ;;  %6290 = vmatmul.mubr.msk.bf16.gmra.mrb[16].mxu0 %vm2904_vm0, %v10494_v4  ;;  %v10563_v21 = vsel %vm4753_vm3, %v4757_v13, %v4759_v51  ;;  %v4765_v40 = vrot.slane %v11149_v3, 1  ;;  %v4767_v48 = vrot.slane %v11150_v26, 1  ;;  %v11151_v27 = vld [vmem:[#allocation22_spill] sm:$0xff]  ;;  %v6697_v62 = vld [vmem:[%s10903_s3 + $0x40] sm:$0xff]   ;;  %v6653_v24 = vld [vmem:[%s10903_s3 + $0x88] sm:$0xff]  }
 0x26a   : > { %3385 = vst.msk [vmem:[#allocation3 + $0xe1] sm:$0xff] %vm2904_vm0, %v3383_v15  ;;  %6293 = vmatprep.mubr.msk.bf16.mxu0 %vm2904_vm0, %v10497_v34  ;;  %v10585_v12 = vsel %vm4753_vm3, %v4761_v29, %v4763_v60  ;;  %v4773_v38 = vrot.slane %v11142_v50, 1  ;;  %v4775_v28 = vrot.slane %v9928_v25, 1  ;;  %v4779_v5 = vrot.slane %v10410_v35, 1  ;;  %v11156_v7 = vld [vmem:[#allocation25_spill] sm:$0xff]  ;;  %v11158_v1 = vld [vmem:[#allocation14_spill] sm:$0xff] }
 0x26b   : > { %3386 = vst.msk [vmem:[#allocation3 + $0xe9] sm:$0x3f] %vm3073_vm1, %v3384_v53  ;;  %v10598_v33 = vsel %vm4753_vm3, %v4763_v60, %v4765_v40  ;;  %v10601_v15 = vsel %vm4753_vm3, %v4765_v40, %v4767_v48  ;;  %v4769_v53 = vrot.slane %v11151_v27, 1  ;;  %vm5604_vm1 = vcmask 517120  }
 0x26c   : > { %v10630_v22 = vsel %vm4753_vm3, %v4771_v52, %v4773_v38 }
 0x26d   : > { %v10614_v6 = vsel %vm4753_vm3, %v4767_v48, %v4769_v53  ;;  %v10617_v37 = vsel %vm4753_vm3, %v4769_v53, %v4771_v52 }
 0x271   : > { %v3415_v9 = vld [vmem:[#allocation3 + $0xe0] sm:$0xff] }
 0x272   : > { %v3416_v61 = vld [vmem:[#allocation3 + $0xe8] sm:$0xff] }
 0x273   : > { %v10510_v10 = vpack.c.bf16 %v3416_v61, %v3415_v9  ;;  %v10633_v9 = vsel %vm4753_vm3, %v4773_v38, %v4775_v28  ;;  %v4777_v61 = vrot.slane %v10208_v63, 1 }
 0x275   : > { %6138 = vmatmul.mubr.msk.bf16.gmra.mrb[24].mxu1 %vm2904_vm0, %v10510_v10  ;;  %v4101_v57 = vshll.u32 %v10510_v10, 16  ;;  %v4337_v16 = vshrl.u32 %v10510_v10, 16 }
 0x276   : > { %6145 = vmatprep.mubr.msk.bf16.mxu1 %vm2904_vm0, %v10508_v45 }
 0x277   : > { %v4103_v47 = vrot.slane %v4101_v57, 1  ;;  %v10649_v57 = vsel %vm4753_vm3, %v4777_v61, %v4779_v5 }
 0x279   : > { %v10524_v55 = vsel %vm4003_vm2, %v4100_v43, %v4103_v47  ;;  %v4339_v17 = vor.u32 %v4337_v16, %v4103_v47  ;;  %v10646_v43 = vsel %vm4753_vm3, %v4775_v28, %v4777_v61  ;;  %v4781_v16 = vrot.slane %v10510_v10, 1  ;;  %v6652_v47 = vld [vmem:[%s10903_s3 + $0x18] sm:$0xff]  }
 0x27a   : > { %6294 = vmatmul.mubr.msk.bf16.gmra.mrb[20].mxu0 %vm2904_vm0, %v10524_v55 }
 0x27b   : > { %v10529_v32 = vsel %vm4003_vm2, %v4339_v17, %v4342_v20  ;;  %v10665_v20 = vsel %vm4753_vm3, %v4779_v5, %v4781_v16  ;;  %v4006_v17 = vshll.u32 %v10508_v45, 16 }
 0x27c   : > { %6297 = vmatprep.mubr.msk.bf16.mxu0 %vm2904_vm0, %v10529_v32 }
 0x27d   : > { %6146 = vmatmul.mubr.msk.bf16.vlgmr.msra.gmra.mrb[0].mxu1 %vm2904_vm0, %v11144_v58  ;;  %v11157_v58 = vld [vmem:[#allocation28_spill] sm:$0xff] }
 0x27e   : > { %6149 = vmatprep.mubr.msk.bf16.mxu1 %vm2904_vm0, %v11145_v23  ;;  %6174 = vmatpush3.bf16.msra.mxu1 %v6696_v36  ;;  %v11160_v36 = vld [vmem:[#allocation12_spill] sm:$0xff] }
 0x27f   : > { %6175 = vmatprep.subr.bf16.mxu1 %v6648_v30 }
 0x282   : > { %6298 = vmatmul.mubr.msk.bf16.gmra.mrb[24].mxu0 %vm2904_vm0, %v4544_v46  ;;  %6176 = vmatpush3.bf16.msra.mxu1 %v6648_v30  ;;  %v6698_v30 = vld [vmem:[%s10903_s3 + $0x48] sm:$0xff]   ;;  %v5212_v46 = vrot.slane %v10513_v2, 1 }
 0x283   : > { %6305 = vmatprep.mubr.msk.bf16.mxu0 %vm2904_vm0, %v4756_v8  ;;  %6205 = vmatprep.subr.bf16.mxu1 %v10549_v18 }
 0x285   : > { %6150 = vmatmul.mubr.msk.bf16.gmra.mrb[4].mxu1 %vm2904_vm0, %v11146_v14 }
 0x286   : > { %6153 = vmatprep.mubr.msk.bf16.mxu1 %vm2904_vm0, %v11147_v39 }
 0x28a   : > { %6306 = vmatmul.mubr.msk.bf16.vlgmr.msra.gmra.mrb[0].mxu0 %vm2904_vm0, %v4758_v11 }
 0x28b   : > { %6334 = vmatpush3.bf16.msra.mxu0 %v10168_v49  ;;  %6309 = vmatprep.mubr.msk.bf16.mxu0 %vm2904_vm0, %v10563_v21  ;;  %v10582_v49 = vsel %vm4753_vm3, %v4759_v51, %v4761_v29 }
 0x28c   : > { %6335 = vmatprep.subr.bf16.mxu0 %v6649_v59 }
 0x28d   : > { %6154 = vmatmul.mubr.msk.bf16.gmra.mrb[8].mxu1 %vm2904_vm0, %v11148_v44 }
 0x28e   : > { %6157 = vmatprep.mubr.msk.bf16.mxu1 %vm2904_vm0, %v11149_v3 }
 0x28f   : > { %6336 = vmatpush3.bf16.msra.mxu0 %v6649_v59 }
 0x290   : > { %6365 = vmatprep.subr.bf16.mxu0 %v6651_v0 }
 0x292   : > { %6310 = vmatmul.mubr.msk.bf16.gmra.mrb[4].mxu0 %vm2904_vm0, %v10582_v49 }
 0x293   : > { %6313 = vmatprep.mubr.msk.bf16.mxu0 %vm2904_vm0, %v10585_v12 }
 0x295   : > { %6158 = vmatmul.mubr.msk.bf16.gmra.mrb[12].mxu1 %vm2904_vm0, %v11150_v26 }
 0x296   : > { %6161 = vmatprep.mubr.msk.bf16.mxu1 %vm2904_vm0, %v11151_v27 }
 0x29a   : > { %6314 = vmatmul.mubr.msk.bf16.gmra.mrb[8].mxu0 %vm2904_vm0, %v10598_v33 }
 0x29b   : > { %6317 = vmatprep.mubr.msk.bf16.mxu0 %vm2904_vm0, %v10601_v15 }
 0x29d   : > { %6162 = vmatmul.mubr.msk.bf16.gmra.mrb[16].mxu1 %vm2904_vm0, %v11141_v19 }
 0x29e   : > { %6165 = vmatprep.mubr.msk.bf16.mxu1 %vm2904_vm0, %v11142_v50 }
 0x2a2   : > { %6318 = vmatmul.mubr.msk.bf16.gmra.mrb[12].mxu0 %vm2904_vm0, %v10614_v6 }
 0x2a3   : > { %6321 = vmatprep.mubr.msk.bf16.mxu0 %vm2904_vm0, %v10617_v37 }
 0x2a5   : > { %6166 = vmatmul.mubr.msk.bf16.gmra.mrb[20].mxu1 %vm2904_vm0, %v9928_v25 }
 0x2a6   : > { %6169 = vmatprep.mubr.msk.bf16.mxu1 %vm2904_vm0, %v10208_v63 }
 0x2aa   : > { %6322 = vmatmul.mubr.msk.bf16.gmra.mrb[16].mxu0 %vm2904_vm0, %v10630_v22 }
 0x2ab   : > { %6325 = vmatprep.mubr.msk.bf16.mxu0 %vm2904_vm0, %v10633_v9 }
 0x2ad   : > { %6170 = vmatmul.mubr.msk.bf16.gmra.mrb[24].mxu1 %vm2904_vm0, %v10410_v35 }
 0x2ae   : > { %6177 = vmatprep.mubr.msk.bf16.mxu1 %vm2904_vm0, %v11145_v23  ;;  %v11159_v23 = vld [vmem:[#allocation23_spill] sm:$0xff] }
 0x2b2   : > { %6326 = vmatmul.mubr.msk.bf16.gmra.mrb[20].mxu0 %vm2904_vm0, %v10646_v43 }
 0x2b3   : > { %6329 = vmatprep.mubr.msk.bf16.mxu0 %vm2904_vm0, %v10649_v57 }
 0x2b5   : > { %6178 = vmatmul.mubr.msk.bf16.vlgmr.msra.gmra.mrb[0].mxu1 %vm2904_vm0, %v11146_v14 }
 0x2b6   : > { %6181 = vmatprep.mubr.msk.bf16.mxu1 %vm2904_vm0, %v11147_v39  ;;  %6206 = vmatpush3.bf16.msra.mxu1 %v10549_v18 }
 0x2b7   : > { %6207 = vmatprep.subr.bf16.mxu1 %v6652_v47 }
 0x2ba   : > { %6330 = vmatmul.mubr.msk.bf16.gmra.mrb[24].mxu0 %vm2904_vm0, %v10665_v20  ;;  %6208 = vmatpush3.bf16.msra.mxu1 %v6652_v47 }
 0x2bb   : > { %6337 = vmatprep.mubr.msk.bf16.mxu0 %vm2904_vm0, %v4758_v11  ;;  %6397 = vmatprep.subr.bf16.mxu1 %v6697_v62  ;;  %v10802_v11 = vld [vmem:[%s10904_s4] ss:$0 sm:$0xff] }
 0x2bd   : > { %6182 = vmatmul.mubr.msk.bf16.gmra.mrb[4].mxu1 %vm2904_vm0, %v11148_v44 }
 0x2be   : > { %6185 = vmatprep.mubr.msk.bf16.mxu1 %vm2904_vm0, %v11149_v3 }
 0x2c2   : > { %6338 = vmatmul.mubr.msk.bf16.vlgmr.msra.gmra.mrb[0].mxu0 %vm2904_vm0, %v10563_v21 }
 0x2c3   : > { %6366 = vmatpush3.bf16.msra.mxu0 %v6651_v0  ;;  %6341 = vmatprep.mubr.msk.bf16.mxu0 %vm2904_vm0, %v10582_v49 }
 0x2c4   : > { %6367 = vmatprep.subr.bf16.mxu0 %v6653_v24 }
 0x2c5   : > { %6186 = vmatmul.mubr.msk.bf16.gmra.mrb[8].mxu1 %vm2904_vm0, %v11150_v26 }
 0x2c6   : > { %6189 = vmatprep.mubr.msk.bf16.mxu1 %vm2904_vm0, %v11151_v27 }
 0x2c7   : > { %6368 = vmatpush3.bf16.msra.mxu0 %v6653_v24 }
 0x2ca   : > { %6342 = vmatmul.mubr.msk.bf16.gmra.mrb[4].mxu0 %vm2904_vm0, %v10585_v12 }
 0x2cb   : > { %6345 = vmatprep.mubr.msk.bf16.mxu0 %vm2904_vm0, %v10598_v33 }
 0x2cd   : > { %6190 = vmatmul.mubr.msk.bf16.gmra.mrb[12].mxu1 %vm2904_vm0, %v11141_v19  ;;  %v4004_v19 = vshrl.u32 %v10508_v45, 16  ;;  %v11153_v45 = vld [vmem:[#allocation7_spill] sm:$0xff] }
 0x2ce   : > { %6193 = vmatprep.mubr.msk.bf16.mxu1 %vm2904_vm0, %v11142_v50  ;;  %v4008_v50 = vrot.slane %v4006_v17, 1 }
 0x2d2   : > { %6346 = vmatmul.mubr.msk.bf16.gmra.mrb[8].mxu0 %vm2904_vm0, %v10601_v15 }
 0x2d3   : > { %6349 = vmatprep.mubr.msk.bf16.mxu0 %vm2904_vm0, %v10614_v6 }
 0x2d5   : > { %6194 = vmatmul.mubr.msk.bf16.gmra.mrb[16].mxu1 %vm2904_vm0, %v9928_v25  ;;  %v4009_v25 = vor.u32 %v4008_v50, %v4004_v19 }
 0x2d6   : > { %6197 = vmatprep.mubr.msk.bf16.mxu1 %vm2904_vm0, %v10208_v63  ;;  %v11152_v63 = vld [vmem:[#allocation18_spill] sm:$0xff] }
 0x2d7   : > { %v4013_v54 = vsel %vm4003_vm2, %v4009_v25, %v11152_v63  ;;  %vm5628_vm2 = vsmask.f32 1280 }
 0x2da   : > { %6350 = vmatmul.mubr.msk.bf16.gmra.mrb[12].mxu0 %vm2904_vm0, %v10617_v37 }
 0x2db   : > { %6353 = vmatprep.mubr.msk.bf16.mxu0 %vm2904_vm0, %v10630_v22 }
 0x2dd   : > { %6198 = vmatmul.mubr.msk.bf16.gmra.mrb[20].mxu1 %vm2904_vm0, %v10410_v35  ;;  %v5016_v35 = vrot.slane %v10505_v31, 1 }
 0x2de   : > { %6201 = vmatprep.mubr.msk.bf16.mxu1 %vm2904_vm0, %v10510_v10  ;;  %v11154_v10 = vld [vmem:[#allocation10_spill] sm:$0xff] }
 0x2df   : > { %v5017_v56 = vsel %vm4753_vm3, %v4781_v16, %v5016_v35  ;;  %v5213_v18 = vsel %vm4753_vm3, %v5016_v35, %v5212_v46  ;;  %vm5629_vm3 = vmand %vm5604_vm1, %vm5628_vm2 }
 0x2e2   : > { %6354 = vmatmul.mubr.msk.bf16.gmra.mrb[16].mxu0 %vm2904_vm0, %v10633_v9 }
 0x2e3   : > { %6357 = vmatprep.mubr.msk.bf16.mxu0 %vm2904_vm0, %v10646_v43 }
 0x2e5   : > { %6202 = vmatmul.mubr.msk.bf16.gmra.mrb[24].mxu1 %vm2904_vm0, %v10505_v31  ;;  %v11155_v31 = vld [vmem:[#allocation11_spill] sm:$0xff] }
 0x2e6   : > { %6209 = vmatprep.mubr.msk.bf16.mxu1 %vm2904_vm0, %v4013_v54 }
 0x2ea   : > { %6358 = vmatmul.mubr.msk.bf16.gmra.mrb[20].mxu0 %vm2904_vm0, %v10649_v57 }
 0x2eb   : > { %6361 = vmatprep.mubr.msk.bf16.mxu0 %vm2904_vm0, %v10665_v20 }
 0x2ed   : > { %6210 = vmatmul.mubr.msk.bf16.vlgmr.msra.gmra.mrb[0].mxu1 %vm2904_vm0, %v11153_v45 }
 0x2ee   : > { %6213 = vmatprep.mubr.msk.bf16.mxu1 %vm2904_vm0, %v11154_v10  ;;  %6399 = vmatpush3.bf16.msra.mxu1 %v6697_v62 }
 0x2ef   : > { %6398 = vmatprep.subr.bf16.mxu1 %v6698_v30 }
 0x2f2   : > { %6362 = vmatmul.mubr.msk.bf16.gmra.mrb[24].mxu0 %vm2904_vm0, %v5017_v56  ;;  %6400 = vmatpush3.bf16.msra.mxu1 %v6698_v30 }
 0x2f3   : > { %6369 = vmatprep.mubr.msk.bf16.mxu0 %vm2904_vm0, %v10563_v21 }
 0x2f5   : > { %6214 = vmatmul.mubr.msk.bf16.gmra.mrb[4].mxu1 %vm2904_vm0, %v11155_v31 }
 0x2f6   : > { %6217 = vmatprep.mubr.msk.bf16.mxu1 %vm2904_vm0, %v11156_v7 }
 0x2fa   : > { %6370 = vmatmul.mubr.msk.bf16.vlgmr.msra.gmra.mrb[0].mxu0 %vm2904_vm0, %v10582_v49 }
 0x2fb   : > { %6373 = vmatprep.mubr.msk.bf16.mxu0 %vm2904_vm0, %v10585_v12 }
 0x2fd   : > { %6218 = vmatmul.mubr.msk.bf16.gmra.mrb[8].mxu1 %vm2904_vm0, %v11157_v58 }
 0x2fe   : > { %6221 = vmatprep.mubr.msk.bf16.mxu1 %vm2904_vm0, %v11158_v1 }
 0x302   : > { %6374 = vmatmul.mubr.msk.bf16.gmra.mrb[4].mxu0 %vm2904_vm0, %v10598_v33 }
 0x303   : > { %6377 = vmatprep.mubr.msk.bf16.mxu0 %vm2904_vm0, %v10601_v15 }
 0x305   : > { %6222 = vmatmul.mubr.msk.bf16.gmra.mrb[12].mxu1 %vm2904_vm0, %v11159_v23 }
 0x306   : > { %6225 = vmatprep.mubr.msk.bf16.mxu1 %vm2904_vm0, %v11160_v36  ;;  %v5508_v36 = vld [vmem:[%s10823_s6] sm:$0xf] }
 0x30a   : > { %6378 = vmatmul.mubr.msk.bf16.gmra.mrb[8].mxu0 %vm2904_vm0, %v10614_v6 }
 0x30b   : > { %6381 = vmatprep.mubr.msk.bf16.mxu0 %vm2904_vm0, %v10617_v37 }
 0x30d   : > { %6226 = vmatmul.mubr.msk.bf16.gmra.mrb[16].mxu1 %vm2904_vm0, %v10484_v42 }
 0x30e   : > { %6229 = vmatprep.mubr.msk.bf16.mxu1 %vm2904_vm0, %v10489_v41 }
 0x312   : > { %6382 = vmatmul.mubr.msk.bf16.gmra.mrb[12].mxu0 %vm2904_vm0, %v10630_v22 }
 0x313   : > { %6385 = vmatprep.mubr.msk.bf16.mxu0 %vm2904_vm0, %v10633_v9 }
 0x315   : > { %6230 = vmatmul.mubr.msk.bf16.gmra.mrb[20].mxu1 %vm2904_vm0, %v10494_v4 }
 0x316   : > { %6233 = vmatprep.mubr.msk.bf16.mxu1 %vm2904_vm0, %v10497_v34 }
 0x31a   : > { %6386 = vmatmul.mubr.msk.bf16.gmra.mrb[16].mxu0 %vm2904_vm0, %v10646_v43 }
 0x31b   : > { %6389 = vmatprep.mubr.msk.bf16.mxu0 %vm2904_vm0, %v10649_v57 }
 0x31d   : > { %6234 = vmatmul.mubr.msk.bf16.gmra.mrb[24].mxu1 %vm2904_vm0, %v10524_v55 }
 0x31e   : > { %6257 = vmatprep.mubr.msk.bf16.mxu1 %vm2904_vm0, %v10484_v42 }
 0x322   : > { %6390 = vmatmul.mubr.msk.bf16.gmra.mrb[20].mxu0 %vm2904_vm0, %v10665_v20 }
 0x323   : > { %6393 = vmatprep.mubr.msk.bf16.mxu0 %vm2904_vm0, %v5017_v56 }
 0x325   : > { %6258 = vmatmul.mubr.msk.bf16.vlgmr.msra.gmra.mrb[16].mxu1 %vm2904_vm0, %v10489_v41 }
 0x326   : > { %6261 = vmatprep.mubr.msk.bf16.mxu1 %vm2904_vm0, %v10494_v4 }
 0x32a   : > { %6394 = vmatmul.mubr.msk.bf16.gmra.mrb[24].mxu0 %vm2904_vm0, %v5213_v18 }
 0x32d   : > { %6262 = vmatmul.mubr.msk.bf16.gmra.mrb[20].mxu1 %vm2904_vm0, %v10497_v34 }
 0x32e   : > { %6265 = vmatprep.mubr.msk.bf16.mxu1 %vm2904_vm0, %v10524_v55 }
 0x335   : > { %6266 = vmatmul.mubr.msk.bf16.gmra.mrb[24].mxu1 %vm2904_vm0, %v10529_v32  ;;  %vm5600_vm0 = vmand %vm5598_vm15, %vm5599_vm14 }
 0x3c0   : > { %v6211_v42 = vpop.f32.mrb[0].mxu1 }
 0x3c1   : > { %v4193_v2 = vpop.f32.mrb[1].mxu1 }
 0x3c2   : > { %v6212_v8 = vpop.f32.mrb[2].mxu1 }
 0x3c3   : > { %v4196_v41 = vpop.f32.mrb[3].mxu1 }
 0x3c8   : > { %v6215_v13 = vpop.f32.mrb[4].mxu1 }
 0x3c9   : > { %v4209_v14 = vpop.f32.mrb[5].mxu1 }
 0x3ca   : > { %v6216_v4 = vpop.f32.mrb[6].mxu1 }
 0x3cb   : > { %v4212_v51 = vpop.f32.mrb[7].mxu1 }
 0x3cd   : > { %v6371_v39 = vpop.f32.mrb[0].mxu0 }
 0x3ce   : > { %v6401_v34 = vadd.f32 %v6371_v39, %v6211_v42  ;;  %v5263_v21 = vpop.f32.mrb[1].mxu0 }
 0x3cf   : > { %v6402_v55 = vadd.f32 %v5263_v21, %v4193_v2  ;;  %v6372_v59 = vpop.f32.mrb[2].mxu0 }
 0x3d0   : > { %v6219_v29 = vpop.f32.mrb[8].mxu1  ;;  %v5411_v32 = vadd.f32 %v6401_v34, %v10802_v11  ;;  %v6403_v44 = vadd.f32 %v6372_v59, %v6212_v8  ;;  %v5266_v60 = vpop.f32.mrb[3].mxu0 }
 0x3d1   : > { %v4225_v0 = vpop.f32.mrb[9].mxu1  ;;  %v5409_v3 = vadd.f32 %v6402_v55, %v10802_v11  ;;  %v6404_v49 = vadd.f32 %v5266_v60, %v4196_v41 }
 0x3d2   : > { %v6220_v12 = vpop.f32.mrb[10].mxu1  ;;  %v5439_v40 = vmax.f32 %v5411_v32, 0.0  ;;  %v5412_v26 = vadd.f32 %v6403_v44, %v10802_v11 }
 0x3d3   : > { %v4228_v48 = vpop.f32.mrb[11].mxu1  ;;  %v5437_v27 = vmax.f32 %v5409_v3, 0.0  ;;  %v5410_v33 = vadd.f32 %v6404_v49, %v10802_v11 }
 0x3d4   : > { %5468 = vst.msk [vmem:[#allocation4 + $0x10] sm:$0xff] %vm5465_vm4, %v5439_v40  ;;  %v5440_v15 = vmax.f32 %v5412_v26, 0.0 }
 0x3d5   : > { %5466 = vst.msk [vmem:[#allocation4] sm:$0xff] %vm5465_vm4, %v5437_v27  ;;  %v5438_v53 = vmax.f32 %v5410_v33, 0.0  ;;  %v6375_v52 = vpop.f32.mrb[4].mxu0 }
 0x3d6   : > { %5469 = vst.msk [vmem:[#allocation4 + $0x18] sm:$0xff] %vm5465_vm4, %v5440_v15  ;;  %v6405_v6 = vadd.f32 %v6375_v52, %v6215_v13  ;;  %v5279_v37 = vpop.f32.mrb[5].mxu0 }
 0x3d7   : > { %5467 = vst.msk [vmem:[#allocation4 + $0x8] sm:$0xff] %vm5465_vm4, %v5438_v53  ;;  %v6406_v38 = vadd.f32 %v5279_v37, %v4209_v14  ;;  %v6376_v28 = vpop.f32.mrb[6].mxu0 }
 0x3d8   : > { %v6223_v22 = vpop.f32.mrb[12].mxu1  ;;  %v5415_v9 = vadd.f32 %v6405_v6, %v10802_v11  ;;  %v6407_v61 = vadd.f32 %v6376_v28, %v6216_v4  ;;  %v5282_v5 = vpop.f32.mrb[7].mxu0 }
 0x3d9   : > { %v4241_v43 = vpop.f32.mrb[13].mxu1  ;;  %v5413_v57 = vadd.f32 %v6406_v38, %v10802_v11  ;;  %v6408_v16 = vadd.f32 %v5282_v5, %v4212_v51 }
 0x3da   : > { %v6224_v47 = vpop.f32.mrb[14].mxu1  ;;  %v5443_v20 = vmax.f32 %v5415_v9, 0.0  ;;  %v5416_v62 = vadd.f32 %v6407_v61, %v10802_v11 }
 0x3db   : > { %v4244_v24 = vpop.f32.mrb[15].mxu1  ;;  %v5441_v17 = vmax.f32 %v5413_v57, 0.0  ;;  %v5414_v19 = vadd.f32 %v6408_v16, %v10802_v11 }
 0x3dc   : > { %5472 = vst.msk [vmem:[#allocation4 + $0x30] sm:$0xff] %vm5465_vm4, %v5443_v20  ;;  %v5444_v50 = vmax.f32 %v5416_v62, 0.0 }
 0x3dd   : > { %v5498_v25 = vld [vmem:[#allocation4 + $0x10] ss:$2 sm:$0x7f]  ;;  %v5500_v63 = vld [vmem:[#allocation4 + $0x11] ss:$2 sm:$0x7f] }
 0x3de   : > { %5470 = vst.msk [vmem:[#allocation4 + $0x20] sm:$0xff] %vm5465_vm4, %v5441_v17  ;;  %v5502_v54 = vmax.f32 %v5498_v25, %v5500_v63  ;;  %v5494_v35 = vld [vmem:[#allocation4] ss:$2 sm:$0x7f]  ;;  %5473 = vst.msk [vmem:[#allocation4 + $0x38] sm:$0xff] %vm5465_vm4, %v5444_v50  ;;  %v5442_v56 = vmax.f32 %v5414_v19, 0.0 }
 0x3df   : > { %v5496_v45 = vld [vmem:[#allocation4 + $0x1] ss:$2 sm:$0x7f]  ;;  %v6379_v30 = vpop.f32.mrb[8].mxu0 }
 0x3e0   : > { %v5501_v10 = vmax.f32 %v5494_v35, %v5496_v45  ;;  %v6409_v31 = vadd.f32 %v6379_v30, %v6219_v29  ;;  %v5295_v7 = vpop.f32.mrb[9].mxu0  ;;  %5471 = vst.msk [vmem:[#allocation4 + $0x28] sm:$0xff] %vm5465_vm4, %v5442_v56 }
 0x3e1   : > { %v6410_v1 = vadd.f32 %v5295_v7, %v4225_v0  ;;  %v6380_v23 = vpop.f32.mrb[10].mxu0 }
 0x3e2   : > { %v5503_v58 = vmax.f32 %v5501_v10, %v5502_v54  ;;  %v5419_v46 = vadd.f32 %v6409_v31, %v10802_v11  ;;  %v6411_v18 = vadd.f32 %v6380_v23, %v6220_v12  ;;  %v5298_v42 = vpop.f32.mrb[11].mxu0 }
 0x3e3   : > { %v5417_v8 = vadd.f32 %v6410_v1, %v10802_v11  ;;  %v6412_v41 = vadd.f32 %v5298_v42, %v4228_v48 }
 0x3e4   : > { %v5504_v2 = vpack.c.bf16 %v5503_v58, %v5503_v58  ;;  %v5447_v13 = vmax.f32 %v5419_v46, 0.0  ;;  %v5420_v14 = vadd.f32 %v6411_v18, %v10802_v11  ;;  %v5569_v58 = vld [vmem:[%s10823_s6 + $0x8] sm:$0x7] }
 0x3e5   : > { %v5516_v51 = vld [vmem:[#allocation4 + $0x30] ss:$2 sm:$0x7f]  ;;  %v5518_v39 = vld [vmem:[#allocation4 + $0x31] ss:$2 sm:$0x7f]  ;;  %v5418_v34 = vadd.f32 %v6412_v41, %v10802_v11 }
 0x3e6   : > { %v5509_v4 = vsel %vm5507_vm7, %v5504_v2, %v5508_v36  ;;  %5476 = vst.msk [vmem:[#allocation4 + $0x50] sm:$0xff] %vm5465_vm4, %v5447_v13  ;;  %v5445_v21 = vmax.f32 %v5417_v8, 0.0  ;;  %v5448_v55 = vmax.f32 %v5420_v14, 0.0  ;;  %v6383_v59 = vpop.f32.mrb[12].mxu0  ;;  %v5520_v29 = vmax.f32 %v5516_v51, %v5518_v39 }
 0x3e7   : > { %5510 = vst [vmem:[%s10823_s6] sm:$0xf] %v5509_v4  ;;  %v5446_v32 = vmax.f32 %v5418_v34, 0.0  ;;  %v6413_v44 = vadd.f32 %v6383_v59, %v6223_v22  ;;  %v5311_v60 = vpop.f32.mrb[13].mxu0  ;;  %v5512_v0 = vld [vmem:[#allocation4 + $0x20] ss:$2 sm:$0x7f] }
 0x3e8   : > { %v5514_v3 = vld [vmem:[#allocation4 + $0x21] ss:$2 sm:$0x7f]  ;;  %5474 = vst.msk [vmem:[#allocation4 + $0x40] sm:$0xff] %vm5465_vm4, %v5445_v21  ;;  %5477 = vst.msk [vmem:[#allocation4 + $0x58] sm:$0xff] %vm5465_vm4, %v5448_v55  ;;  %v6414_v49 = vadd.f32 %v5311_v60, %v4241_v43  ;;  %v6384_v26 = vpop.f32.mrb[14].mxu0 }
 0x3e9   : > { %v5519_v12 = vmax.f32 %v5512_v0, %v5514_v3  ;;  %5475 = vst.msk [vmem:[#allocation4 + $0x48] sm:$0xff] %vm5465_vm4, %v5446_v32  ;;  %v5423_v40 = vadd.f32 %v6413_v44, %v10802_v11  ;;  %v6415_v27 = vadd.f32 %v6384_v26, %v6224_v47  ;;  %v5314_v33 = vpop.f32.mrb[15].mxu0  ;;  %vm5665_vm7 = vcmask 516096  }
 0x3ea   : > { %v5421_v48 = vadd.f32 %v6414_v49, %v10802_v11  ;;  %v6416_v52 = vadd.f32 %v5314_v33, %v4244_v24 }
 0x3eb   : > { %v5521_v15 = vmax.f32 %v5519_v12, %v5520_v29  ;;  %v5451_v53 = vmax.f32 %v5423_v40, 0.0  ;;  %v5424_v37 = vadd.f32 %v6415_v27, %v10802_v11 }
 0x3ec   : > { %v5449_v6 = vmax.f32 %v5421_v48, 0.0  ;;  %v5422_v28 = vadd.f32 %v6416_v52, %v10802_v11 }
 0x3ed   : > { %v5959_v38 = vpack.c.bf16 %v5521_v15, %v5521_v15  ;;  %5480 = vst.msk [vmem:[#allocation4 + $0x70] sm:$0xff] %vm5465_vm4, %v5451_v53  ;;  %v6387_v22 = vpop.f32.mrb[16].mxu0  ;;  %v5452_v9 = vmax.f32 %v5424_v37, 0.0 }
 0x3ee   : > { %5478 = vst.msk [vmem:[#allocation4 + $0x60] sm:$0xff] %vm5465_vm4, %v5449_v6  ;;  %v5327_v61 = vpop.f32.mrb[17].mxu0  ;;  %v5450_v16 = vmax.f32 %v5422_v28, 0.0  ;;  %v5540_v25 = vld [vmem:[%s10823_s6] sm:$0x8] }
 0x3ef   : > { %v5527_v5 = vshll.u32 %v5959_v38, 16  ;;  %v5530_v43 = vshrl.u32 %v5959_v38, 16  ;;  %v5550_v57 = vld [vmem:[#allocation4 + $0x50] ss:$2 sm:$0x7f]  ;;  %5481 = vst.msk [vmem:[#allocation4 + $0x78] sm:$0xff] %vm5465_vm4, %v5452_v9 }
 0x3f0   : > { %v5552_v47 = vld [vmem:[#allocation4 + $0x51] ss:$2 sm:$0x7f]  ;;  %v5546_v20 = vld [vmem:[#allocation4 + $0x40] ss:$2 sm:$0x7f] }
 0x3f1   : > { %v5529_v62 = vrot.slane %v5527_v5, 5  ;;  %v5532_v24 = vrot.slane %v5530_v43, 4  ;;  %v5554_v17 = vmax.f32 %v5550_v57, %v5552_v47  ;;  %v5548_v19 = vld [vmem:[#allocation4 + $0x41] ss:$2 sm:$0x7f]  ;;  %5479 = vst.msk [vmem:[#allocation4 + $0x68] sm:$0xff] %vm5465_vm4, %v5450_v16 }
 0x3f2   : > { %v6388_v50 = vpop.f32.mrb[18].mxu0  ;;  %v5553_v63 = vmax.f32 %v5546_v20, %v5548_v19 }
 0x3f3   : > { %v5330_v54 = vpop.f32.mrb[19].mxu0  ;;  %v5533_v35 = vor.u32 %v5532_v24, %v5529_v62  ;;  %v5541_v45 = vsel %vm5539_vm10, %v5529_v62, %v5540_v25 }
 0x3f4   : > { %5542 = vst [vmem:[%s10823_s6] sm:$0x8] %v5541_v45  ;;  %v5555_v10 = vmax.f32 %v5553_v63, %v5554_v17 }
 0x3f5   : > { %v5534_v56 = vrot.slane %v5533_v35, 4  ;;  %v6391_v30 = vpop.f32.mrb[20].mxu0 }
 0x3f6   : > { %v5960_v31 = vpack.c.bf16 %v5555_v10, %v5555_v10  ;;  %v5343_v7 = vpop.f32.mrb[21].mxu0  ;;  %v5577_v1 = vld [vmem:[#allocation4 + $0x70] ss:$2 sm:$0x7f] }
 0x3f7   : > { %5544 = vst.msk [vmem:[%s10823_s6 + $0x4] sm:$0x7] %vm5543_vm11, %v5534_v56  ;;  %v5579_v23 = vld [vmem:[#allocation4 + $0x71] ss:$2 sm:$0x7f]  ;;  %v6392_v2 = vpop.f32.mrb[22].mxu0 }
 0x3f8   : > { %v6259_v36 = vpop.f32.mrb[16].mxu1  ;;  %v5560_v46 = vrot.slane %v5960_v31, 5  ;;  %v5581_v18 = vmax.f32 %v5577_v1, %v5579_v23  ;;  %v5573_v42 = vld [vmem:[#allocation4 + $0x60] ss:$2 sm:$0x7f]  ;;  %v5346_v14 = vpop.f32.mrb[23].mxu0 }
 0x3f9   : > { %v4457_v8 = vpop.f32.mrb[17].mxu1  ;;  %v5575_v41 = vld [vmem:[#allocation4 + $0x61] ss:$2 sm:$0x7f]  ;;  %v6417_v13 = vadd.f32 %v6387_v22, %v6259_v36 }
 0x3fa   : > { %v6260_v4 = vpop.f32.mrb[18].mxu1  ;;  %v5561_v51 = vrot.slane %v5560_v46, 4  ;;  %5565 = vst.msk [vmem:[%s10823_s6 + $0x4] sm:$0x8] %vm5537_vm8, %v5560_v46  ;;  %v5580_v39 = vmax.f32 %v5573_v42, %v5575_v41  ;;  %v6418_v34 = vadd.f32 %v5327_v61, %v4457_v8  ;;  %vm5689_vm8 = vsmask.f32 256 }
 0x3fb   : > { %v4460_v21 = vpop.f32.mrb[19].mxu1  ;;  %v5427_v55 = vadd.f32 %v6417_v13, %v10802_v11  ;;  %v6419_v59 = vadd.f32 %v6388_v50, %v6260_v4  ;;  %vm5690_vm9 = vmand %vm5665_vm7, %vm5689_vm8 }
 0x3fc   : > { %v5570_v29 = vsel %vm5568_vm13, %v5561_v51, %v5569_v58  ;;  %v5582_v32 = vmax.f32 %v5580_v39, %v5581_v18  ;;  %v5425_v44 = vadd.f32 %v6418_v34, %v10802_v11  ;;  %v6420_v60 = vadd.f32 %v5330_v54, %v4460_v21 }
 0x3fd   : > { %5571 = vst [vmem:[%s10823_s6 + $0x8] sm:$0x7] %v5570_v29  ;;  %v5455_v0 = vmax.f32 %v5427_v55, 0.0  ;;  %v5428_v3 = vadd.f32 %v6419_v59, %v10802_v11  ;;  %v6395_v49 = vpop.f32.mrb[24].mxu0 }
 0x3fe   : > { %v5961_v12 = vpack.c.bf16 %v5582_v32, %v5582_v32  ;;  %v5453_v40 = vmax.f32 %v5425_v44, 0.0  ;;  %v5426_v26 = vadd.f32 %v6420_v60, %v10802_v11  ;;  %v5359_v48 = vpop.f32.mrb[25].mxu0 }
 0x3ff   : > { %5484 = vst.msk [vmem:[#allocation4 + $0x90] sm:$0xff] %vm5465_vm4, %v5455_v0  ;;  %v5456_v27 = vmax.f32 %v5428_v3, 0.0  ;;  %v6396_v33 = vpop.f32.mrb[26].mxu0 }
 0x400   : > { %v6263_v15 = vpop.f32.mrb[20].mxu1  ;;  %v5588_v53 = vshrl.u32 %v5961_v12, 16  ;;  %v5591_v52 = vshll.u32 %v5961_v12, 16  ;;  %5482 = vst.msk [vmem:[#allocation4 + $0x80] sm:$0xff] %vm5465_vm4, %v5453_v40  ;;  %v5454_v6 = vmax.f32 %v5426_v26, 0.0  ;;  %v5362_v37 = vpop.f32.mrb[27].mxu0 }
 0x401   : > { %v4473_v38 = vpop.f32.mrb[21].mxu1  ;;  %5485 = vst.msk [vmem:[#allocation4 + $0x98] sm:$0xff] %vm5465_vm4, %v5456_v27  ;;  %v6421_v28 = vadd.f32 %v6391_v30, %v6263_v15 }
 0x402   : > { %v6264_v22 = vpop.f32.mrb[22].mxu1  ;;  %v5590_v9 = vrot.slane %v5588_v53, 5  ;;  %v5593_v61 = vrot.slane %v5591_v52, 6  ;;  %5483 = vst.msk [vmem:[#allocation4 + $0x88] sm:$0xff] %vm5465_vm4, %v5454_v6  ;;  %v6422_v5 = vadd.f32 %v5343_v7, %v4473_v38 }
 0x403   : > { %v4476_v43 = vpop.f32.mrb[23].mxu1  ;;  %v5431_v57 = vadd.f32 %v6421_v28, %v10802_v11  ;;  %v6423_v16 = vadd.f32 %v6392_v2, %v6264_v22 }
 0x404   : > { %v5594_v47 = vor.u32 %v5593_v61, %v5590_v9  ;;  %v5601_v20 = vld [vmem:[%s10823_s6 + $0x8] sm:$0xc]  ;;  %v5429_v62 = vadd.f32 %v6422_v5, %v10802_v11  ;;  %v6424_v24 = vadd.f32 %v5346_v14, %v4476_v43 }
 0x405   : > { %v5459_v17 = vmax.f32 %v5431_v57, 0.0  ;;  %v5432_v19 = vadd.f32 %v6423_v16, %v10802_v11 }
 0x406   : > { %v5595_v50 = vrot.slane %v5594_v47, 4  ;;  %v5602_v25 = vsel %vm5600_vm0, %v5594_v47, %v5601_v20  ;;  %v5457_v63 = vmax.f32 %v5429_v62, 0.0  ;;  %v5430_v54 = vadd.f32 %v6424_v24, %v10802_v11  ;;  %v5691_v20 = vld [vmem:[%s10823_s6 + $0x18] sm:$0x1] }
 0x407   : > { %5603 = vst [vmem:[%s10823_s6 + $0x8] sm:$0xc] %v5602_v25  ;;  %5488 = vst.msk [vmem:[#allocation4 + $0xb0] sm:$0xff] %vm5465_vm4, %v5459_v17  ;;  %v5460_v35 = vmax.f32 %v5432_v19, 0.0 }
 0x408   : > { %v6267_v45 = vpop.f32.mrb[24].mxu1  ;;  %v5611_v10 = vld [vmem:[#allocation4 + $0x90] ss:$2 sm:$0x7f]  ;;  %5605 = vst.msk [vmem:[%s10823_s6 + $0xc] sm:$0x3] %vm5604_vm1, %v5595_v50 }
 0x409   : > { %5486 = vst.msk [vmem:[#allocation4 + $0xa0] sm:$0xff] %vm5465_vm4, %v5457_v63  ;;  %v5458_v56 = vmax.f32 %v5430_v54, 0.0  ;;  %v4489_v30 = vpop.f32.mrb[25].mxu1  ;;  %v5613_v31 = vld [vmem:[#allocation4 + $0x91] ss:$2 sm:$0x7f]  ;;  %v6425_v7 = vadd.f32 %v6395_v49, %v6267_v45 }
 0x40a   : > { %5489 = vst.msk [vmem:[#allocation4 + $0xb8] sm:$0xff] %vm5465_vm4, %v5460_v35  ;;  %v5615_v58 = vmax.f32 %v5611_v10, %v5613_v31  ;;  %v6268_v1 = vpop.f32.mrb[26].mxu1  ;;  %v5607_v23 = vld [vmem:[#allocation4 + $0x80] ss:$2 sm:$0x7f]  ;;  %v6426_v36 = vadd.f32 %v5359_v48, %v4489_v30 }
 0x40b   : > { %5487 = vst.msk [vmem:[#allocation4 + $0xa8] sm:$0xff] %vm5465_vm4, %v5458_v56  ;;  %v5609_v46 = vld [vmem:[#allocation4 + $0x81] ss:$2 sm:$0x7f]  ;;  %v4492_v18 = vpop.f32.mrb[27].mxu1  ;;  %v5435_v42 = vadd.f32 %v6425_v7, %v10802_v11  ;;  %v6427_v2 = vadd.f32 %v6396_v33, %v6268_v1 }
 0x40c   : > { %v5614_v8 = vmax.f32 %v5607_v23, %v5609_v46  ;;  %v5433_v41 = vadd.f32 %v6426_v36, %v10802_v11  ;;  %v6428_v13 = vadd.f32 %v5362_v37, %v4492_v18  ;;  %v5630_v49 = vld [vmem:[%s10823_s6 + $0x10] sm:$0x3] }
 0x40d   : > { %v5463_v14 = vmax.f32 %v5435_v42, 0.0  ;;  %v5436_v4 = vadd.f32 %v6427_v2, %v10802_v11 }
 0x40e   : > { %v5616_v51 = vmax.f32 %v5614_v8, %v5615_v58  ;;  %v5461_v39 = vmax.f32 %v5433_v41, 0.0  ;;  %v5434_v34 = vadd.f32 %v6428_v13, %v10802_v11 }
 0x40f   : > { %5492 = vst.msk [vmem:[#allocation4 + $0xd0] sm:$0xff] %vm5465_vm4, %v5463_v14  ;;  %v5464_v21 = vmax.f32 %v5436_v4, 0.0 }
 0x410   : > { %v5962_v55 = vpack.c.bf16 %v5616_v51, %v5616_v51  ;;  %5490 = vst.msk [vmem:[#allocation4 + $0xc0] sm:$0xff] %vm5465_vm4, %v5461_v39  ;;  %v5462_v11 = vmax.f32 %v5434_v34, 0.0 }
 0x411   : > { %v5638_v59 = vld [vmem:[#allocation4 + $0xb0] ss:$2 sm:$0x7f]  ;;  %v5640_v29 = vld [vmem:[#allocation4 + $0xb1] ss:$2 sm:$0x7f] }
 0x412   : > { %v5642_v32 = vmax.f32 %v5638_v59, %v5640_v29  ;;  %v5634_v44 = vld [vmem:[#allocation4 + $0xa0] ss:$2 sm:$0x7f]  ;;  %v5636_v60 = vld [vmem:[#allocation4 + $0xa1] ss:$2 sm:$0x7f] }
 0x413   : > { %5493 = vst.msk [vmem:[#allocation4 + $0xd8] sm:$0xff] %vm5465_vm4, %v5464_v21  ;;  %v5621_v0 = vrot.slane %v5962_v55, 6  ;;  %v5641_v3 = vmax.f32 %v5634_v44, %v5636_v60  ;;  %5491 = vst.msk [vmem:[#allocation4 + $0xc8] sm:$0xff] %vm5465_vm4, %v5462_v11 }
 0x414   : > { %vm5661_vm4 = vmand %vm5659_vm5, %vm5660_vm6 }
 0x415   : > { %v5622_v12 = vrot.slane %v5621_v0, 4  ;;  %5626 = vst.msk [vmem:[%s10823_s6 + $0xc] sm:$0xc] %vm5598_vm15, %v5621_v0  ;;  %v5643_v40 = vmax.f32 %v5641_v3, %v5642_v32 }
 0x417   : > { %v5631_v26 = vsel %vm5629_vm3, %v5622_v12, %v5630_v49  ;;  %v5963_v48 = vpack.c.bf16 %v5643_v40, %v5643_v40 }
 0x418   : > { %5632 = vst [vmem:[%s10823_s6 + $0x10] sm:$0x3] %v5631_v26 }
 0x419   : > { %v5649_v27 = vshrl.u32 %v5963_v48, 16  ;;  %v5652_v33 = vshll.u32 %v5963_v48, 16 }
 0x41a   : > { %v5672_v15 = vld [vmem:[#allocation4 + $0xd0] ss:$2 sm:$0x7f]  ;;  %v5674_v53 = vld [vmem:[#allocation4 + $0xd1] ss:$2 sm:$0x7f] }
 0x41b   : > { %v5651_v52 = vrot.slane %v5649_v27, 6  ;;  %v5654_v6 = vrot.slane %v5652_v33, 7  ;;  %v5676_v37 = vmax.f32 %v5672_v15, %v5674_v53  ;;  %v5668_v38 = vld [vmem:[#allocation4 + $0xc0] ss:$2 sm:$0x7f] }
 0x41c   : > { %v5670_v28 = vld [vmem:[#allocation4 + $0xc1] ss:$2 sm:$0x7f] }
 0x41d   : > { %v5655_v22 = vor.u32 %v5654_v6, %v5651_v52  ;;  %v5675_v9 = vmax.f32 %v5668_v38, %v5670_v28 }
 0x41f   : > { %v5656_v61 = vrot.slane %v5655_v22, 4  ;;  %v5662_v5 = vld [vmem:[%s10823_s6 + $0x10] sm:$0xe]  ;;  %v5677_v43 = vmax.f32 %v5675_v9, %v5676_v37 }
 0x420   : > { %v5663_v57 = vsel %vm5661_vm4, %v5655_v22, %v5662_v5 }
 0x421   : > { %5664 = vst [vmem:[%s10823_s6 + $0x10] sm:$0xe] %v5663_v57  ;;  %5666 = vst.msk [vmem:[%s10823_s6 + $0x14] sm:$0x1] %vm5665_vm7, %v5656_v61  ;;  %v5964_v16 = vpack.c.bf16 %v5677_v43, %v5677_v43 }
 0x423   : > { %v5682_v47 = vrot.slane %v5964_v16, 7 }
 0x425   : > { %v5683_v62 = vrot.slane %v5682_v47, 4  ;;  %5687 = vst.msk [vmem:[%s10823_s6 + $0x14] sm:$0xe] %vm5659_vm5, %v5682_v47 }
 0x427   : > { %v5692_v24 = vsel %vm5690_vm9, %v5683_v62, %v5691_v20 }
 0x428   : > { %5693 = vst [vmem:[%s10823_s6 + $0x18] sm:$0x1] %v5692_v24 }
 0x429 PF: > { %s15_s18 = sadd.s32 1, %s6705_s18  }
 0x42a   : > { %p12_p4 = scmp.ge.s32.totalorder %s15_s18, 4  }
 0x42c   :  { %14 = sbr.rel (!%p12_p4) target bundleno = 1 (0x1), region = 224 }

</bundles_post_ra>
